<compile_context>
chip_gen: v7x
topology: tpu7x:2x2x1
jax: 0.10.0
libtpu: 0.0.40
codegen_flags: <defaults>
</compile_context>

<pallas_src>
import jax
import jax.numpy as jnp
from jax.experimental import pallas as pl
from jax.experimental.pallas import tpu as pltpu

FEAT = 1024
BN_EPS = 1e-5
NORM_EPS = 1e-12  # torch.nn.functional.normalize default eps


def _round_up(x, m):
    return (x + m - 1) // m * m


def _tpu_budget():
    """Generation-aware (vmem_limit_bytes, max_k_tile). Conservative fallback."""
    try:
        vmem_cap = pltpu.get_tpu_info().vmem_capacity_bytes
    except Exception:
        vmem_cap = 64 * 1024 * 1024  # assume the smallest (v7x: 64 MiB / TC)
    if vmem_cap >= 100 * 1024 * 1024:        # v5e / v6e: 128 MiB physical
        return 96 * 1024 * 1024, 2048
    return 48 * 1024 * 1024, 1024            # v7x-class: 64 MiB physical


def rank_swin_kernel(
    x_ref,        # [bm, tk]      bf16 flattened-image tile
    wenc_ref,     # [tk, 1024]    bf16 stand-in encoder weight tile
    w1_ref,       # [1024, 1024]  bf16 projector linear 1 (BN folded)
    b1_ref,       # [1, 1024]     f32  projector bias 1   (BN folded)
    w2_ref,       # [1024, 1024]  bf16 projector linear 2
    b2_ref,       # [1, 1024]     f32  projector bias 2
    out_ref,      # [bm, 1024]
    acc_ref,      # [bm, 1024]    f32 scratch accumulator
):
    k = pl.program_id(1)

    @pl.when(k == 0)
    def _():
        acc_ref[...] = jnp.zeros_like(acc_ref)

    # --- stand-in encoder: K-tiled matmul, f32 accumulation on the MXU -------
    acc_ref[...] += jnp.dot(
        x_ref[...], wenc_ref[...], preferred_element_type=jnp.float32
    )

    @pl.when(k == pl.num_programs(1) - 1)
    def _():
        feat = jnp.maximum(acc_ref[...], 0.0)  # encoder ReLU

        # --- projector: Linear (BN(eval) folded in) -> ReLU -> Linear --------
        z1 = jnp.dot(
            feat.astype(jnp.bfloat16), w1_ref[...],
            preferred_element_type=jnp.float32,
        ) + b1_ref[...]
        h = jnp.maximum(z1, 0.0)
        z2 = jnp.dot(
            h.astype(jnp.bfloat16), w2_ref[...],
            preferred_element_type=jnp.float32,
        ) + b2_ref[...]

        # --- L2 normalize along feature dim (F.normalize, dim=1) -------------
        sumsq = jnp.sum(z2 * z2, axis=1, keepdims=True)
        inv_norm = jax.lax.rsqrt(jnp.maximum(sumsq, NORM_EPS * NORM_EPS))
        out_ref[...] = (z2 * inv_norm).astype(out_ref.dtype)


def rank_swin_forward(image, params, *, bm_max=256, out_dtype=jnp.float32):
    B = image.shape[0]
    x = image.reshape(B, -1)               # glue: NCHW -> [B, C*H*W]
    din = x.shape[1]

    vmem_limit, tk_max = _tpu_budget()

    # --- fold BatchNorm1d (eval) into Linear-1 at trace time ------------------
    s = params["bn_gamma"] * jax.lax.rsqrt(params["bn_var"] + BN_EPS)   # [1, FEAT]
    w1_f = (params["w1"] * s).astype(jnp.bfloat16)                      # scale columns
    b1_f = ((params["b1"] - params["bn_mean"]) * s + params["bn_beta"]).astype(jnp.float32)

    wenc = params["w_enc"].astype(jnp.bfloat16)
    w2 = params["w2"].astype(jnp.bfloat16)
    b2 = params["b2"].astype(jnp.float32)

    # --- batch tiling: sublane aligned; keep >= 2 tiles when possible so both
    #     v7x TensorCores get work on the "parallel" axis ----------------------
    b_pad = _round_up(max(B, 8), 8)
    bm = min(bm_max, b_pad)
    if b_pad > 8 and bm == b_pad:
        bm = _round_up(b_pad // 2, 8)
    b_pad = _round_up(b_pad, bm)

    # --- K tiling: largest 128-multiple divisor of din_pad (<= tk_max).
    #     If din is already 128-aligned this needs NO Din padding of x / w_enc.
    din_pad = _round_up(din, 128)
    k_tile = 128
    t = 128
    while t <= min(tk_max, din_pad):
        if din_pad % t == 0:
            k_tile = t
        t += 128

    x_bf = x.astype(jnp.bfloat16)
    if b_pad != B or din_pad != din:
        x_bf = jnp.pad(x_bf, ((0, b_pad - B), (0, din_pad - din)))
    if din_pad != din:
        wenc = jnp.pad(wenc, ((0, din_pad - din), (0, 0)))

    grid = (b_pad // bm, din_pad // k_tile)
    n_steps = grid[0] * grid[1]
    stream_depth = min(3, max(2, n_steps))   # 3-deep prefetch on real grids

    flops = 2 * b_pad * (din_pad * FEAT + 2 * FEAT * FEAT)
    bytes_accessed = (
        x_bf.size * 2 + wenc.size * 2 + w1_f.size * 2 + w2.size * 2
        + (b1_f.size + b2.size) * 4
        + b_pad * FEAT * jnp.dtype(out_dtype).itemsize
    )
    cost = pl.CostEstimate(
        flops=flops, transcendentals=b_pad, bytes_accessed=bytes_accessed
    )

    out_pad = pl.pallas_call(
        rank_swin_kernel,
        out_shape=jax.ShapeDtypeStruct((b_pad, FEAT), out_dtype),
        grid_spec=pltpu.PrefetchScalarGridSpec(
            num_scalar_prefetch=0,
            grid=grid,
            in_specs=[
                # streamed inputs: deeper buffering so prefetch runs ahead of
                # the long fused epilogue on the last K step
                pl.BlockSpec((bm, k_tile), lambda i, k: (i, k),
                             pipeline_mode=pl.Buffered(stream_depth)),
                pl.BlockSpec((k_tile, FEAT), lambda i, k: (k, 0),
                             pipeline_mode=pl.Buffered(stream_depth)),
                # resident inputs (constant index_map): single-buffered
                pl.BlockSpec((FEAT, FEAT), lambda i, k: (0, 0),
                             pipeline_mode=pl.Buffered(1)),
                pl.BlockSpec((1, FEAT), lambda i, k: (0, 0),
                             pipeline_mode=pl.Buffered(1)),
                pl.BlockSpec((FEAT, FEAT), lambda i, k: (0, 0),
                             pipeline_mode=pl.Buffered(1)),
                pl.BlockSpec((1, FEAT), lambda i, k: (0, 0),
                             pipeline_mode=pl.Buffered(1)),
            ],
            out_specs=pl.BlockSpec((bm, FEAT), lambda i, k: (i, 0)),
            scratch_shapes=[pltpu.VMEM((bm, FEAT), jnp.float32)],
        ),
        compiler_params=pltpu.CompilerParams(
            dimension_semantics=("parallel", "arbitrary"),
            vmem_limit_bytes=vmem_limit,
        ),
        cost_estimate=cost,
    )(x_bf, wenc, w1_f, b1_f, w2, b2)

    return out_pad[:B]


def rank_swin_reference(image, params):
    """Pure-JAX reference using the same bf16 weight casts as the kernel."""
    B = image.shape[0]
    x = image.reshape(B, -1).astype(jnp.bfloat16)
    wenc = params["w_enc"].astype(jnp.bfloat16)
    s = params["bn_gamma"] * jax.lax.rsqrt(params["bn_var"] + BN_EPS)
    w1_f = (params["w1"] * s).astype(jnp.bfloat16)
    b1_f = (params["b1"] - params["bn_mean"]) * s + params["bn_beta"]
    w2 = params["w2"].astype(jnp.bfloat16)

    feat = jnp.maximum(jnp.dot(x, wenc, preferred_element_type=jnp.float32), 0.0)
    z1 = jnp.dot(feat.astype(jnp.bfloat16), w1_f,
                 preferred_element_type=jnp.float32) + b1_f
    h = jnp.maximum(z1, 0.0)
    z2 = jnp.dot(h.astype(jnp.bfloat16), w2,
                 preferred_element_type=jnp.float32) + params["b2"]
    norm = jnp.sqrt(jnp.sum(z2 * z2, axis=1, keepdims=True))
    return z2 / jnp.maximum(norm, NORM_EPS)


def init_params(key, d_in):
    ks = jax.random.split(key, 5)
    scale = 0.02
    return {
        "w_enc": scale * jax.random.normal(ks[0], (d_in, FEAT), jnp.float32),
        "w1":    scale * jax.random.normal(ks[1], (FEAT, FEAT), jnp.float32),
        "b1":    scale * jax.random.normal(ks[2], (1, FEAT), jnp.float32),
        "bn_gamma": jnp.ones((1, FEAT), jnp.float32),
        "bn_beta":  jnp.zeros((1, FEAT), jnp.float32),
        "bn_mean":  jnp.zeros((1, FEAT), jnp.float32),
        "bn_var":   jnp.ones((1, FEAT), jnp.float32),
        "w2":    scale * jax.random.normal(ks[3], (FEAT, FEAT), jnp.float32),
        "b2":    scale * jax.random.normal(ks[4], (1, FEAT), jnp.float32),
    }


if __name__ == "__main__":
    key = jax.random.PRNGKey(0)
    k_img, k_par = jax.random.split(key)

    # Small synthetic image, NCHW: batch=2, channels=4, spatial=16x16 (C*H*W = 1024)
    B, C, H, W = 2, 4, 16, 16
    image = jax.random.normal(k_img, (B, C, H, W), jnp.float32)
    params = init_params(k_par, C * H * W)

    out = rank_swin_forward(image, params)
    out = jax.block_until_ready(out)
    assert out.shape == (B, FEAT)

    # sanity: rows are unit-norm after F.normalize
    row_norms = jnp.linalg.norm(out.astype(jnp.float32), axis=1)
    assert bool(jnp.allclose(row_norms, 1.0, atol=1e-3))

    # match a same-precision (bf16-weight) pure-JAX reference
    ref = rank_swin_reference(image, params)
    assert bool(jnp.allclose(out.astype(jnp.float32), ref, atol=2e-2))

    print("KERNEL_OK")
</pallas_src>

<mosaic_0001>
module attributes {stable_mosaic.version = 11 : i64} {
  func.func @rank_swin_kernel(%arg0: i32, %arg1: i32, %arg2: memref<8x1024xbf16, #tpu.memory_space<vmem>>, %arg3: memref<1024x1024xbf16, #tpu.memory_space<vmem>>, %arg4: memref<1024x1024xbf16, #tpu.memory_space<vmem>>, %arg5: memref<1x1024xf32, #tpu.memory_space<vmem>>, %arg6: memref<1024x1024xbf16, #tpu.memory_space<vmem>>, %arg7: memref<1x1024xf32, #tpu.memory_space<vmem>>, %arg8: memref<8x1024xf32, #tpu.memory_space<vmem>>, %arg9: memref<8x1024xf32, #tpu.memory_space<vmem>>) attributes {dimension_semantics = [#tpu.dimension_semantics<parallel>, #tpu.dimension_semantics<arbitrary>], iteration_bounds = array<i64: 1, 1>, scalar_prefetch = 0 : i64, scratch_operands = 1 : i64, tpu.core_type = #tpu.core_type<tc>, window_params = [{pipeline_mode = #tpu.pipeline_mode<double_buffered>, transform_indices = @transform_0, window_bounds = array<i64: 8, 1024>}, {pipeline_mode = #tpu.pipeline_mode<double_buffered>, transform_indices = @transform_1, window_bounds = array<i64: 1024, 1024>}, {pipeline_mode = #tpu.pipeline_mode<synchronous>, transform_indices = @transform_2, window_bounds = array<i64: 1024, 1024>}, {pipeline_mode = #tpu.pipeline_mode<synchronous>, transform_indices = @transform_3, window_bounds = array<i64: 1, 1024>}, {pipeline_mode = #tpu.pipeline_mode<synchronous>, transform_indices = @transform_4, window_bounds = array<i64: 1024, 1024>}, {pipeline_mode = #tpu.pipeline_mode<synchronous>, transform_indices = @transform_5, window_bounds = array<i64: 1, 1024>}, {transform_indices = @transform_6, window_bounds = array<i64: 8, 1024>}]} {
    %c0_i32 = arith.constant 0 : i32
    %0 = arith.cmpi eq, %arg1, %c0_i32 : i32
    %1 = arith.extui %0 : i1 to i32
    %c0_i32_0 = arith.constant 0 : i32
    %2 = arith.cmpi ne, %1, %c0_i32_0 : i32
    scf.if %2 {
      %cst_10 = arith.constant 0.000000e+00 : f32
      %12 = vector.broadcast %cst_10 : f32 to vector<8x1024xf32>
      %c0_11 = arith.constant 0 : index
      %c0_12 = arith.constant 0 : index
      %13 = vector.load %arg9[%c0_11, %c0_12] : memref<8x1024xf32, #tpu.memory_space<vmem>>, vector<8x1024xf32>
      tpu.vector_store %arg9[%c0_11, %c0_12], %12 {strides = array<i32>} : memref<8x1024xf32, #tpu.memory_space<vmem>>, vector<8x1024xf32>,
    } else {
    }
    %c0 = arith.constant 0 : index
    %c0_1 = arith.constant 0 : index
    %3 = vector.load %arg9[%c0, %c0_1] : memref<8x1024xf32, #tpu.memory_space<vmem>>, vector<8x1024xf32>
    %c0_2 = arith.constant 0 : index
    %c0_3 = arith.constant 0 : index
    %4 = vector.load %arg2[%c0_2, %c0_3] : memref<8x1024xbf16, #tpu.memory_space<vmem>>, vector<8x1024xbf16>
    %c0_4 = arith.constant 0 : index
    %c0_5 = arith.constant 0 : index
    %5 = vector.load %arg3[%c0_4, %c0_5] : memref<1024x1024xbf16, #tpu.memory_space<vmem>>, vector<1024x1024xbf16>
    %cst = arith.constant dense<0.000000e+00> : vector<8x1024xf32>
    %6 = tpu.matmul %4, %5, %cst {dimension_numbers = #tpu.dot_dimension_numbers<[1], [0], [0], [1], [0, 0, 1, 1], [], []>} : vector<8x1024xbf16>, vector<1024x1024xbf16>, vector<8x1024xf32> -> vector<8x1024xf32>
    %7 = arith.addf %3, %6 : vector<8x1024xf32>
    %c0_6 = arith.constant 0 : index
    %c0_7 = arith.constant 0 : index
    %8 = vector.load %arg9[%c0_6, %c0_7] : memref<8x1024xf32, #tpu.memory_space<vmem>>, vector<8x1024xf32>
    tpu.vector_store %arg9[%c0_6, %c0_7], %7 {strides = array<i32>} : memref<8x1024xf32, #tpu.memory_space<vmem>>, vector<8x1024xf32>,
    %c0_i32_8 = arith.constant 0 : i32
    %9 = arith.cmpi eq, %arg1, %c0_i32_8 : i32
    %10 = arith.extui %9 : i1 to i32
    %c0_i32_9 = arith.constant 0 : i32
    %11 = arith.cmpi ne, %10, %c0_i32_9 : i32
    scf.if %11 {
      %c0_10 = arith.constant 0 : index
      %c0_11 = arith.constant 0 : index
      %12 = vector.load %arg9[%c0_10, %c0_11] : memref<8x1024xf32, #tpu.memory_space<vmem>>, vector<8x1024xf32>
      %cst_12 = arith.constant 0.000000e+00 : f32
      %13 = vector.broadcast %cst_12 : f32 to vector<8x1024xf32>
      %14 = arith.maximumf %12, %13 : vector<8x1024xf32>
      %15 = arith.truncf %14 : vector<8x1024xf32> to vector<8x1024xbf16>
      %c0_13 = arith.constant 0 : index
      %c0_14 = arith.constant 0 : index
      %16 = vector.load %arg4[%c0_13, %c0_14] : memref<1024x1024xbf16, #tpu.memory_space<vmem>>, vector<1024x1024xbf16>
      %cst_15 = arith.constant dense<0.000000e+00> : vector<8x1024xf32>
      %17 = tpu.matmul %15, %16, %cst_15 {dimension_numbers = #tpu.dot_dimension_numbers<[1], [0], [0], [1], [0, 0, 1, 1], [], []>} : vector<8x1024xbf16>, vector<1024x1024xbf16>, vector<8x1024xf32> -> vector<8x1024xf32>
      %c0_16 = arith.constant 0 : index
      %c0_17 = arith.constant 0 : index
      %18 = vector.load %arg5[%c0_16, %c0_17] : memref<1x1024xf32, #tpu.memory_space<vmem>>, vector<1x1024xf32>
      %19 = vector.broadcast %18 : vector<1x1024xf32> to vector<8x1024xf32>
      %20 = arith.addf %17, %19 : vector<8x1024xf32>
      %cst_18 = arith.constant 0.000000e+00 : f32
      %21 = vector.broadcast %cst_18 : f32 to vector<8x1024xf32>
      %22 = arith.maximumf %20, %21 : vector<8x1024xf32>
      %23 = arith.truncf %22 : vector<8x1024xf32> to vector<8x1024xbf16>
      %c0_19 = arith.constant 0 : index
      %c0_20 = arith.constant 0 : index
      %24 = vector.load %arg6[%c0_19, %c0_20] : memref<1024x1024xbf16, #tpu.memory_space<vmem>>, vector<1024x1024xbf16>
      %cst_21 = arith.constant dense<0.000000e+00> : vector<8x1024xf32>
      %25 = tpu.matmul %23, %24, %cst_21 {dimension_numbers = #tpu.dot_dimension_numbers<[1], [0], [0], [1], [0, 0, 1, 1], [], []>} : vector<8x1024xbf16>, vector<1024x1024xbf16>, vector<8x1024xf32> -> vector<8x1024xf32>
      %c0_22 = arith.constant 0 : index
      %c0_23 = arith.constant 0 : index
      %26 = vector.load %arg7[%c0_22, %c0_23] : memref<1x1024xf32, #tpu.memory_space<vmem>>, vector<1x1024xf32>
      %27 = vector.broadcast %26 : vector<1x1024xf32> to vector<8x1024xf32>
      %28 = arith.addf %25, %27 : vector<8x1024xf32>
      %29 = arith.mulf %28, %28 : vector<8x1024xf32>
      %cst_24 = arith.constant dense<0.000000e+00> : vector<8xf32>
      %30 = vector.multi_reduction <add>, %29, %cst_24 [1] : vector<8x1024xf32> to vector<8xf32>
      %31 = vector.shape_cast %30 : vector<8xf32> to vector<8x1xf32>
      %cst_25 = arith.constant 1.000000e-24 : f32
      %32 = vector.broadcast %cst_25 : f32 to vector<8x1xf32>
      %33 = arith.maximumf %31, %32 : vector<8x1xf32>
      %34 = math.rsqrt %33 : vector<8x1xf32>
      %35 = vector.broadcast %34 : vector<8x1xf32> to vector<8x1024xf32>
      %36 = arith.mulf %28, %35 : vector<8x1024xf32>
      %c0_26 = arith.constant 0 : index
      %c0_27 = arith.constant 0 : index
      %37 = vector.load %arg8[%c0_26, %c0_27] : memref<8x1024xf32, #tpu.memory_space<vmem>>, vector<8x1024xf32>
      tpu.vector_store %arg8[%c0_26, %c0_27], %36 {strides = array<i32>} : memref<8x1024xf32, #tpu.memory_space<vmem>>, vector<8x1024xf32>,
    } else {
    }
    return
  }
  func.func @transform_0(%arg0: i32, %arg1: i32) -> (i32, i32) {
    %c0_i32 = arith.constant 0 : i32
    return %arg0, %arg1 : i32, i32
  }
  func.func @transform_1(%arg0: i32, %arg1: i32) -> (i32, i32) {
    %c0_i32 = arith.constant 0 : i32
    %c0_i32_0 = arith.constant 0 : i32
    return %arg1, %c0_i32 : i32, i32
  }
  func.func @transform_2(%arg0: i32, %arg1: i32) -> (i32, i32) {
    %c0_i32 = arith.constant 0 : i32
    %c0_i32_0 = arith.constant 0 : i32
    %c0_i32_1 = arith.constant 0 : i32
    return %c0_i32, %c0_i32_0 : i32, i32
  }
  func.func @transform_3(%arg0: i32, %arg1: i32) -> (i32, i32) {
    %c0_i32 = arith.constant 0 : i32
    %c0_i32_0 = arith.constant 0 : i32
    %c0_i32_1 = arith.constant 0 : i32
    return %c0_i32, %c0_i32_0 : i32, i32
  }
  func.func @transform_4(%arg0: i32, %arg1: i32) -> (i32, i32) {
    %c0_i32 = arith.constant 0 : i32
    %c0_i32_0 = arith.constant 0 : i32
    %c0_i32_1 = arith.constant 0 : i32
    return %c0_i32, %c0_i32_0 : i32, i32
  }
  func.func @transform_5(%arg0: i32, %arg1: i32) -> (i32, i32) {
    %c0_i32 = arith.constant 0 : i32
    %c0_i32_0 = arith.constant 0 : i32
    %c0_i32_1 = arith.constant 0 : i32
    return %c0_i32, %c0_i32_0 : i32, i32
  }
  func.func @transform_6(%arg0: i32, %arg1: i32) -> (i32, i32) {
    %c0_i32 = arith.constant 0 : i32
    %c0_i32_0 = arith.constant 0 : i32
    return %arg0, %c0_i32 : i32, i32
  }
}

</mosaic_0001>

<bundles_post_ra>
// kernel: tpu_custom_call.1
= control target key start
LH: loop header
LB: loop body
LE: loop exit
PB: predicated region body
PF: predicated region fallthrough
CT: control target
= control target key end

     0   :  { %11 = vsyncpa [#allocation4], 0  ;;  %s13821_s0 = inlined_call_operand.hbm [shape: bf16[8,1024], index: 0, kind: input, shape index: {}]   ;;  %s13822_s1 = inlined_call_operand.hbm [shape: bf16[1024,1024], index: 1, kind: input, shape index: {}]   ;;  %s13823_s2 = inlined_call_operand.hbm [shape: bf16[1024,1024], index: 2, kind: input, shape index: {}]   ;;  %s13824_s3 = inlined_call_operand.hbm [shape: f32[1,1024], index: 3, kind: input, shape index: {}]   ;;  %s13825_s4 = inlined_call_operand.hbm [shape: bf16[1024,1024], index: 4, kind: input, shape index: {}]   ;;  %s13826_s5 = inlined_call_operand.hbm [shape: f32[1,1024], index: 5, kind: input, shape index: {}]   ;;  %s13827_s6 = inlined_call_operand.hbm [shape: f32[8,1024], index: 6, kind: output, shape index: {}]  }
   0x1   :  { %12 = vsyncpa [#allocation7], 0 }
   0x2   :  { %13 = vsyncpa [#allocation10], 0 }
   0x3   :  { %14 = vsyncpa [#allocation13], 0 }
   0x4   :  { %15 = vsyncpa [#allocation5], 0  ;;  %s13420_s21 = smov [#allocation6]   ;;  %s13256_s25 = scalar_lea.hbm %s13822_s1, 65536 }
   0x5   :  { %s31_s22 = sshll.u32 %s13420_s21, 4  ;;  %p13257_p0 = scmp.ne.s32.totalorder %s13822_s1, %s13256_s25  ;;  %s32_s22 = int_to_ptr.vmem [resolvable:$true] %s31_s22 }
   0x6   :  { %p13260_p1 = scmp.lt.u32.totalorder %s13256_s25, %s13822_s1 }
   0x8   :  { %p13262_p2 = pnand %p13260_p1, %p13257_p0 }
   0xa   :  { %13265 = shalt.err (!%p13262_p2)
}
   0xb   :  { %s13266_s30 = scalar_lea.vmem %s32_s22, 65536  ;;  %p13271_p4 = scmp.lt.s32.totalorder %s32_s22, %s32_s22 }
   0xc   :  { %p13267_p3 = scmp.ne.s32.totalorder %s32_s22, %s13266_s30  ;;  %p13272_p5 = scmp.lt.s32.totalorder %s13266_s30, %s13266_s30 }
   0xe   :  { %p13273_p6 = por %p13272_p5, %p13271_p4 }
  0x10   :  { %p13274_p7 = pnand %p13273_p6, %p13267_p3 }
  0x12   :  { %13277 = shalt.err (!%p13274_p7)
}
  0x13   :  { %s13421_s7 = smov 512   ;;  %s13422_s8 = smov 32  }
  0x14   :  { %37 = dma.hbm_to_vmem [thread:$0]  %s13822_s1, 65536, %s32_s22, [#allocation7], %s13421_s7, %s13421_s7, %s13422_s8  }
  0x15   :  { %s13423_s11 = smov [#allocation9]   ;;  %s13424_s13 = smov [#allocation3]  }
  0x16   :  { %s56_s12 = sshll.u32 %s13423_s11, 4  ;;  %s22_s14 = sshll.u32 %s13424_s13, 4  ;;  %s57_s12 = int_to_ptr.vmem [resolvable:$true] %s56_s12  ;;  %s23_s14 = int_to_ptr.vmem [resolvable:$true] %s22_s14 }
  0x17   :  { %s13278_s17 = scalar_lea.hbm %s13824_s3, 128 }
  0x18   :  { %p13279_p8 = scmp.ne.s32.totalorder %s13824_s3, %s13278_s17  ;;  %p13282_p9 = scmp.lt.u32.totalorder %s13278_s17, %s13824_s3 }
  0x1a   :  { %p13284_p10 = pnand %p13282_p9, %p13279_p8 }
  0x1c   :  { %13287 = shalt.err (!%p13284_p10)
}
  0x1d   :  { %s13288_s1 = scalar_lea.vmem %s57_s12, 128  ;;  %p13293_p12 = scmp.lt.s32.totalorder %s57_s12, %s57_s12 }
  0x1e   :  { %p13289_p11 = scmp.ne.s32.totalorder %s57_s12, %s13288_s1  ;;  %p13294_p13 = scmp.lt.s32.totalorder %s13288_s1, %s13288_s1 }
  0x20   :  { %p13295_p0 = por %p13294_p13, %p13293_p12 }
  0x22   :  { %p13296_p1 = pnand %p13295_p0, %p13289_p11 }
  0x24   :  { %13299 = shalt.err (!%p13296_p1)
}
  0x25   :  { %59 = dma.hbm_to_vmem [thread:$0]  %s13824_s3, 128, %s57_s12, [#allocation10]  }
  0x26   :  { %s13300_s26 = scalar_lea.hbm %s13821_s0, 512 }
  0x27   :  { %p13301_p2 = scmp.ne.s32.totalorder %s13821_s0, %s13300_s26  ;;  %p13304_p3 = scmp.lt.u32.totalorder %s13300_s26, %s13821_s0 }
  0x29   :  { %p13306_p4 = pnand %p13304_p3, %p13301_p2 }
  0x2b   :  { %13309 = shalt.err (!%p13306_p4)
}
  0x2c   :  { %s13310_s9 = scalar_lea.vmem %s23_s14, 512  ;;  %p13315_p6 = scmp.lt.s32.totalorder %s23_s14, %s23_s14 }
  0x2d   :  { %p13311_p5 = scmp.ne.s32.totalorder %s23_s14, %s13310_s9  ;;  %p13316_p7 = scmp.lt.s32.totalorder %s13310_s9, %s13310_s9 }
  0x2f   :  { %p13317_p8 = por %p13316_p7, %p13315_p6 }
  0x31   :  { %p13318_p9 = pnand %p13317_p8, %p13311_p5 }
  0x33   :  { %13321 = shalt.err (!%p13318_p9)
}
  0x34   :  { %25 = dma.hbm_to_vmem [thread:$0]  %s13821_s0, 512, %s23_s14, [#allocation4]  }
  0x35   :  { %s13425_s11 = smov [#allocation8]   ;;  %s13426_s13 = smov [#allocation11]  }
  0x36   :  { %s43_s12 = sshll.u32 %s13425_s11, 4  ;;  %s65_s15 = sshll.u32 %s13426_s13, 4  ;;  %s44_s12 = int_to_ptr.vmem [resolvable:$true] %s43_s12  ;;  %s66_s15 = int_to_ptr.vmem [resolvable:$true] %s65_s15 }
  0x37   :  { %s13322_s18 = scalar_lea.hbm %s13823_s2, 65536 }
  0x38   :  { %p13323_p10 = scmp.ne.s32.totalorder %s13823_s2, %s13322_s18  ;;  %p13326_p11 = scmp.lt.u32.totalorder %s13322_s18, %s13823_s2 }
  0x3a   :  { %p13328_p12 = pnand %p13326_p11, %p13323_p10 }
  0x3c   :  { %13331 = shalt.err (!%p13328_p12)
}
  0x3d   :  { %s13332_s0 = scalar_lea.vmem %s44_s12, 65536  ;;  %p13337_p0 = scmp.lt.s32.totalorder %s44_s12, %s44_s12 }
  0x3e   :  { %p13333_p13 = scmp.ne.s32.totalorder %s44_s12, %s13332_s0  ;;  %p13338_p1 = scmp.lt.s32.totalorder %s13332_s0, %s13332_s0 }
  0x40   :  { %p13339_p2 = por %p13338_p1, %p13337_p0 }
  0x42   :  { %p13340_p3 = pnand %p13339_p2, %p13333_p13 }
  0x44   :  { %13343 = shalt.err (!%p13340_p3)
}
  0x45   :  { %49 = dma.hbm_to_vmem [thread:$0]  %s13823_s2, 65536, %s44_s12, [#allocation7], %s13421_s7, %s13421_s7, %s13422_s8  }
  0x46   :  { %s13344_s25 = scalar_lea.hbm %s13825_s4, 65536 }
  0x47   :  { %p13345_p4 = scmp.ne.s32.totalorder %s13825_s4, %s13344_s25  ;;  %p13348_p5 = scmp.lt.u32.totalorder %s13344_s25, %s13825_s4 }
  0x49   :  { %p13350_p6 = pnand %p13348_p5, %p13345_p4 }
  0x4b   :  { %13353 = shalt.err (!%p13350_p6)
}
  0x4c   :  { %s13354_s30 = scalar_lea.vmem %s66_s15, 65536  ;;  %p13359_p8 = scmp.lt.s32.totalorder %s66_s15, %s66_s15 }
  0x4d   :  { %p13355_p7 = scmp.ne.s32.totalorder %s66_s15, %s13354_s30  ;;  %p13360_p9 = scmp.lt.s32.totalorder %s13354_s30, %s13354_s30 }
  0x4f   :  { %p13361_p10 = por %p13360_p9, %p13359_p8 }
  0x51   :  { %p13362_p11 = pnand %p13361_p10, %p13355_p7 }
  0x53   :  { %13365 = shalt.err (!%p13362_p11)
}
  0x54   :  { %71 = dma.hbm_to_vmem [thread:$0]  %s13825_s4, 65536, %s66_s15, [#allocation10], %s13421_s7, %s13421_s7, %s13422_s8  }
  0x55   :  { %s13427_s3 = smov [#allocation12]   ;;  %s13366_s13 = scalar_lea.hbm %s13826_s5, 128 }
  0x56   :  { %s78_s10 = sshll.u32 %s13427_s3, 4  ;;  %p13367_p12 = scmp.ne.s32.totalorder %s13826_s5, %s13366_s13  ;;  %s79_s10 = int_to_ptr.vmem [resolvable:$true] %s78_s10 }
  0x57   :  { %p13370_p13 = scmp.lt.u32.totalorder %s13366_s13, %s13826_s5 }
  0x59   :  { %p13372_p0 = pnand %p13370_p13, %p13367_p12 }
  0x5b   :  { %13375 = shalt.err (!%p13372_p0)
}
  0x5c   :  { %s13376_s20 = scalar_lea.vmem %s79_s10, 128  ;;  %p13381_p2 = scmp.lt.s32.totalorder %s79_s10, %s79_s10 }
  0x5d   :  { %p13377_p1 = scmp.ne.s32.totalorder %s79_s10, %s13376_s20  ;;  %p13382_p3 = scmp.lt.s32.totalorder %s13376_s20, %s13376_s20 }
  0x5f   :  { %p13383_p4 = por %p13382_p3, %p13381_p2 }
  0x61   :  { %p13384_p5 = pnand %p13383_p4, %p13377_p1 }
  0x63   :  { %13387 = shalt.err (!%p13384_p5)
}
  0x64   :  { %81 = dma.hbm_to_vmem [thread:$0]  %s13826_s5, 128, %s79_s10, [#allocation13]  }
  0x65   :  { %13410 = dma.done.wait [#allocation4], 512  }
  0x66   :  { %13411 = vsyncadd [#allocation4], 4294966784 }
  0x67   :  { %13412 = dma.done.wait [#allocation7], 131072  }
  0x68   :  { %13413 = vsyncadd [#allocation7], 4294836224 }
  0x69   :  { %13414 = dma.done.wait [#allocation10], 65664  }
  0x6a   :  { %13415 = vsyncadd [#allocation10], 4294901632 }
  0x6b   :  { %13416 = dma.done.wait [#allocation13], 128  }
  0x6c   :  { %13417 = vsyncadd [#allocation13], 4294967168  ;;  %v124_v0 = vld [vmem:[#allocation6] sm:$0xff]  ;;  %v125_v2 = vld [vmem:[#allocation6 + $0x8] sm:$0xff]  ;;  %s13428_s5 = smov [#allocation14]  }
  0x6d   :  { %v128_v1 = vld [vmem:[#allocation6 + $0x20] sm:$0xff]  ;;  %v129_v4 = vld [vmem:[#allocation6 + $0x28] sm:$0xff]  ;;  %s11520_s8 = sshll.u32 %s13428_s5, 4  ;;  %s11521_s8 = int_to_ptr.vmem [resolvable:$true] %s11520_s8 }
  0x6e   :  { %v11541_v3 = vcombine.high %v124_v0, %v128_v1  ;;  %v11540_v5 = vcombine.low %v124_v0, %v128_v1  ;;  %v132_v6 = vld [vmem:[#allocation6 + $0x40] sm:$0xff]  ;;  %v11543_v8 = vcombine.high %v125_v2, %v129_v4  ;;  %v11542_v9 = vcombine.low %v125_v2, %v129_v4  ;;  %v133_v11 = vld [vmem:[#allocation6 + $0x48] sm:$0xff]  ;;  %s13388_s15 = scalar_lea.vmem %s11521_s8, 1024  ;;  %p13393_p7 = scmp.lt.s32.totalorder %s11521_s8, %s11521_s8 }
  0x6f   :  { %v136_v7 = vld [vmem:[#allocation6 + $0x60] sm:$0xff]  ;;  %v137_v12 = vld [vmem:[#allocation6 + $0x68] sm:$0xff]  ;;  %p13389_p6 = scmp.ne.s32.totalorder %s11521_s8, %s13388_s15  ;;  %p13394_p8 = scmp.lt.s32.totalorder %s13388_s15, %s13388_s15 }
  0x70   :  { %v11549_v10 = vcombine.high %v132_v6, %v136_v7  ;;  %v140_v13 = vld [vmem:[#allocation6 + $0x80] sm:$0xff]  ;;  %3224 = vmatprep.subr.bf16.mxu0 %v11541_v3  ;;  %v11551_v14 = vcombine.high %v133_v11, %v137_v12  ;;  %v141_v16 = vld [vmem:[#allocation6 + $0x88] sm:$0xff]  ;;  %3388 = vmatprep.subr.bf16.mxu1 %v11543_v8  ;;  %v11548_v18 = vcombine.low %v132_v6, %v136_v7 }
  0x71   :  { %v144_v15 = vld [vmem:[#allocation6 + $0xa0] sm:$0xff]  ;;  %v145_v17 = vld [vmem:[#allocation6 + $0xa8] sm:$0xff]  ;;  %3225 = vmatpush1.bf16.msra.mxu0 %v11540_v5  ;;  %3389 = vmatpush1.bf16.msra.mxu1 %v11542_v9  ;;  %v11550_v19 = vcombine.low %v133_v11, %v137_v12  ;;  %p13395_p9 = por %p13394_p8, %p13393_p7 }
  0x72   :  { %3226 = vmatprep.subr.bf16.mxu0 %v11549_v10  ;;  %v11557_v20 = vcombine.high %v140_v13, %v144_v15  ;;  %3390 = vmatprep.subr.bf16.mxu1 %v11551_v14  ;;  %v11559_v21 = vcombine.high %v141_v16, %v145_v17  ;;  %v148_v22 = vld [vmem:[#allocation6 + $0xc0] sm:$0xff]  ;;  %v149_v24 = vld [vmem:[#allocation6 + $0xc8] sm:$0xff]  ;;  %v11556_v26 = vcombine.low %v140_v13, %v144_v15 }
  0x73   :  { %v152_v23 = vld [vmem:[#allocation6 + $0xe0] sm:$0xff]  ;;  %v153_v25 = vld [vmem:[#allocation6 + $0xe8] sm:$0xff]  ;;  %v11558_v27 = vcombine.low %v141_v16, %v145_v17  ;;  %p13396_p10 = pnand %p13395_p9, %p13389_p6 }
  0x74   :  { %v11565_v28 = vcombine.high %v148_v22, %v152_v23  ;;  %v11567_v29 = vcombine.high %v149_v24, %v153_v25  ;;  %v156_v30 = vld [vmem:[#allocation6 + $0x100] sm:$0xff]  ;;  %v157_v32 = vld [vmem:[#allocation6 + $0x108] sm:$0xff]  ;;  %v11564_v34 = vcombine.low %v148_v22, %v152_v23  ;;  %v11566_v35 = vcombine.low %v149_v24, %v153_v25 }
  0x75   :  { %3227 = vmatpush1.bf16.msra.mxu0 %v11548_v18  ;;  %3391 = vmatpush1.bf16.msra.mxu1 %v11550_v19  ;;  %v160_v31 = vld [vmem:[#allocation6 + $0x120] sm:$0xff]  ;;  %v161_v33 = vld [vmem:[#allocation6 + $0x128] sm:$0xff] }
  0x76   :  { %3228 = vmatprep.subr.bf16.mxu0 %v11557_v20  ;;  %3392 = vmatprep.subr.bf16.mxu1 %v11559_v21  ;;  %v11573_v36 = vcombine.high %v156_v30, %v160_v31  ;;  %v11575_v37 = vcombine.high %v157_v32, %v161_v33  ;;  %v164_v38 = vld [vmem:[#allocation6 + $0x140] sm:$0xff]  ;;  %v165_v40 = vld [vmem:[#allocation6 + $0x148] sm:$0xff]  ;;  %v11572_v42 = vcombine.low %v156_v30, %v160_v31 }
  0x77   :  { %v168_v39 = vld [vmem:[#allocation6 + $0x160] sm:$0xff]  ;;  %v169_v41 = vld [vmem:[#allocation6 + $0x168] sm:$0xff]  ;;  %v11574_v43 = vcombine.low %v157_v32, %v161_v33 }
  0x78   :  { %v11581_v44 = vcombine.high %v164_v38, %v168_v39  ;;  %v11583_v45 = vcombine.high %v165_v40, %v169_v41  ;;  %v172_v46 = vld [vmem:[#allocation6 + $0x180] sm:$0xff]  ;;  %v173_v48 = vld [vmem:[#allocation6 + $0x188] sm:$0xff]  ;;  %v11580_v50 = vcombine.low %v164_v38, %v168_v39  ;;  %v11582_v51 = vcombine.low %v165_v40, %v169_v41 }
  0x79   :  { %3229 = vmatpush1.bf16.msra.mxu0 %v11556_v26  ;;  %3393 = vmatpush1.bf16.msra.mxu1 %v11558_v27  ;;  %v176_v47 = vld [vmem:[#allocation6 + $0x1a0] sm:$0xff]  ;;  %v177_v49 = vld [vmem:[#allocation6 + $0x1a8] sm:$0xff] }
  0x7a   :  { %3230 = vmatprep.subr.bf16.mxu0 %v11565_v28  ;;  %3394 = vmatprep.subr.bf16.mxu1 %v11567_v29  ;;  %v11589_v52 = vcombine.high %v172_v46, %v176_v47  ;;  %v13545_v53 = vld [vmem:[#allocation3] sm:$0xff]  ;;  %v11591_v54 = vcombine.high %v173_v48, %v177_v49  ;;  %v181_v58 = vld [vmem:[#allocation6 + $0x1c8] sm:$0xff]  ;;  %v11588_v60 = vcombine.low %v172_v46, %v176_v47 }
  0x7b   :  { %v180_v55 = vld [vmem:[#allocation6 + $0x1c0] sm:$0xff]  ;;  %v13549_v57 = vcombine.high %v13545_v53, %v13545_v53  ;;  %v185_v59 = vld [vmem:[#allocation6 + $0x1e8] sm:$0xff]  ;;  %v11590_v61 = vcombine.low %v173_v48, %v177_v49 }
  0x7c   :  { %v184_v56 = vld [vmem:[#allocation6 + $0x1e0] sm:$0xff]  ;;  %v11599_v63 = vcombine.high %v181_v58, %v185_v59  ;;  %v189_v2 = vld [vmem:[#allocation6 + $0x208] sm:$0xff]  ;;  %v11598_v5 = vcombine.low %v181_v58, %v185_v59 }
  0x7d   :  { %3231 = vmatpush1.bf16.msra.mxu0 %v11564_v34  ;;  %3395 = vmatpush1.bf16.msra.mxu1 %v11566_v35  ;;  %v11597_v62 = vcombine.high %v180_v55, %v184_v56  ;;  %v188_v0 = vld [vmem:[#allocation6 + $0x200] sm:$0xff]  ;;  %v193_v3 = vld [vmem:[#allocation6 + $0x228] sm:$0xff]  ;;  %v11596_v4 = vcombine.low %v180_v55, %v184_v56 }
  0x7e   :  { %3232 = vmatprep.subr.bf16.mxu0 %v11573_v36  ;;  %3396 = vmatprep.subr.bf16.mxu1 %v11575_v37  ;;  %v192_v1 = vld [vmem:[#allocation6 + $0x220] sm:$0xff]  ;;  %v11607_v7 = vcombine.high %v189_v2, %v193_v3  ;;  %v197_v10 = vld [vmem:[#allocation6 + $0x248] sm:$0xff]  ;;  %v11606_v13 = vcombine.low %v189_v2, %v193_v3 }
  0x7f   :  { %3256 = vmatprep.mubr.bf16.mxu0 %v13549_v57  ;;  %3420 = vmatprep.mubr.bf16.mxu1 %v13549_v57  ;;  %v11605_v6 = vcombine.high %v188_v0, %v192_v1  ;;  %v196_v8 = vld [vmem:[#allocation6 + $0x240] sm:$0xff]  ;;  %v201_v11 = vld [vmem:[#allocation6 + $0x268] sm:$0xff]  ;;  %v11604_v12 = vcombine.low %v188_v0, %v192_v1 }
  0x80   :  { %v200_v9 = vld [vmem:[#allocation6 + $0x260] sm:$0xff]  ;;  %v11615_v15 = vcombine.high %v197_v10, %v201_v11  ;;  %v205_v18 = vld [vmem:[#allocation6 + $0x288] sm:$0xff]  ;;  %v11614_v21 = vcombine.low %v197_v10, %v201_v11 }
  0x81   :  { %3233 = vmatpush1.bf16.msra.mxu0 %v11572_v42  ;;  %3397 = vmatpush1.bf16.msra.mxu1 %v11574_v43  ;;  %v11613_v14 = vcombine.high %v196_v8, %v200_v9  ;;  %v204_v16 = vld [vmem:[#allocation6 + $0x280] sm:$0xff]  ;;  %v209_v19 = vld [vmem:[#allocation6 + $0x2a8] sm:$0xff]  ;;  %v11612_v20 = vcombine.low %v196_v8, %v200_v9 }
  0x82   :  { %3234 = vmatprep.subr.bf16.mxu0 %v11581_v44  ;;  %3398 = vmatprep.subr.bf16.mxu1 %v11583_v45  ;;  %v208_v17 = vld [vmem:[#allocation6 + $0x2a0] sm:$0xff]  ;;  %v11623_v23 = vcombine.high %v205_v18, %v209_v19  ;;  %v213_v26 = vld [vmem:[#allocation6 + $0x2c8] sm:$0xff]  ;;  %v11622_v29 = vcombine.low %v205_v18, %v209_v19 }
  0x83   :  { %v11621_v22 = vcombine.high %v204_v16, %v208_v17  ;;  %v212_v24 = vld [vmem:[#allocation6 + $0x2c0] sm:$0xff]  ;;  %v217_v27 = vld [vmem:[#allocation6 + $0x2e8] sm:$0xff]  ;;  %v11620_v28 = vcombine.low %v204_v16, %v208_v17 }
  0x84   :  { %v216_v25 = vld [vmem:[#allocation6 + $0x2e0] sm:$0xff]  ;;  %v11631_v31 = vcombine.high %v213_v26, %v217_v27  ;;  %v221_v34 = vld [vmem:[#allocation6 + $0x308] sm:$0xff]  ;;  %v11630_v37 = vcombine.low %v213_v26, %v217_v27 }
  0x85   :  { %3235 = vmatpush1.bf16.msra.mxu0 %v11580_v50  ;;  %3399 = vmatpush1.bf16.msra.mxu1 %v11582_v51  ;;  %v11629_v30 = vcombine.high %v212_v24, %v216_v25  ;;  %v220_v32 = vld [vmem:[#allocation6 + $0x300] sm:$0xff]  ;;  %v225_v35 = vld [vmem:[#allocation6 + $0x328] sm:$0xff]  ;;  %v11628_v36 = vcombine.low %v212_v24, %v216_v25 }
  0x86   :  { %3236 = vmatprep.subr.bf16.mxu0 %v11589_v52  ;;  %3400 = vmatprep.subr.bf16.mxu1 %v11591_v54  ;;  %v224_v33 = vld [vmem:[#allocation6 + $0x320] sm:$0xff]  ;;  %v11639_v39 = vcombine.high %v221_v34, %v225_v35  ;;  %v229_v42 = vld [vmem:[#allocation6 + $0x348] sm:$0xff]  ;;  %v11638_v45 = vcombine.low %v221_v34, %v225_v35 }
  0x87   :  { %v11637_v38 = vcombine.high %v220_v32, %v224_v33  ;;  %v228_v40 = vld [vmem:[#allocation6 + $0x340] sm:$0xff]  ;;  %v233_v43 = vld [vmem:[#allocation6 + $0x368] sm:$0xff]  ;;  %v11636_v44 = vcombine.low %v220_v32, %v224_v33 }
  0x88   :  { %v232_v41 = vld [vmem:[#allocation6 + $0x360] sm:$0xff]  ;;  %v11647_v47 = vcombine.high %v229_v42, %v233_v43  ;;  %v237_v50 = vld [vmem:[#allocation6 + $0x388] sm:$0xff]  ;;  %v11646_v54 = vcombine.low %v229_v42, %v233_v43 }
  0x89   :  { %3237 = vmatpush1.bf16.msra.mxu0 %v11588_v60  ;;  %3401 = vmatpush1.bf16.msra.mxu1 %v11590_v61  ;;  %v11645_v46 = vcombine.high %v228_v40, %v232_v41  ;;  %v236_v48 = vld [vmem:[#allocation6 + $0x380] sm:$0xff]  ;;  %v241_v51 = vld [vmem:[#allocation6 + $0x3a8] sm:$0xff]  ;;  %v11644_v52 = vcombine.low %v228_v40, %v232_v41 }
  0x8a   :  { %3238 = vmatprep.subr.bf16.mxu0 %v11597_v62  ;;  %3402 = vmatprep.subr.bf16.mxu1 %v11599_v63  ;;  %v240_v49 = vld [vmem:[#allocation6 + $0x3a0] sm:$0xff]  ;;  %v11655_v56 = vcombine.high %v237_v50, %v241_v51  ;;  %v245_v60 = vld [vmem:[#allocation6 + $0x3c8] sm:$0xff]  ;;  %v11654_v63 = vcombine.low %v237_v50, %v241_v51 }
  0x8b   :  { %v11653_v55 = vcombine.high %v236_v48, %v240_v49  ;;  %v244_v58 = vld [vmem:[#allocation6 + $0x3c0] sm:$0xff]  ;;  %v249_v61 = vld [vmem:[#allocation6 + $0x3e8] sm:$0xff]  ;;  %v11652_v62 = vcombine.low %v236_v48, %v240_v49 }
  0x8c   :  { %v248_v59 = vld [vmem:[#allocation6 + $0x3e0] sm:$0xff]  ;;  %v11663_v1 = vcombine.high %v245_v60, %v249_v61 }
  0x8d   :  { %3239 = vmatpush1.bf16.msra.mxu0 %v11596_v4  ;;  %3403 = vmatpush1.bf16.msra.mxu1 %v11598_v5  ;;  %v11661_v0 = vcombine.high %v244_v58, %v248_v59  ;;  %v252_v2 = vld [vmem:[#allocation6 + $0x400] sm:$0xff]  ;;  %v253_v4 = vld [vmem:[#allocation6 + $0x408] sm:$0xff] }
  0x8e   :  { %3240 = vmatprep.subr.bf16.mxu0 %v11605_v6  ;;  %3404 = vmatprep.subr.bf16.mxu1 %v11607_v7  ;;  %v256_v3 = vld [vmem:[#allocation6 + $0x420] sm:$0xff]  ;;  %v257_v5 = vld [vmem:[#allocation6 + $0x428] sm:$0xff]  ;;  %v11660_v6 = vcombine.low %v244_v58, %v248_v59  ;;  %v11662_v7 = vcombine.low %v245_v60, %v249_v61 }
  0x8f   :  { %v11669_v8 = vcombine.high %v252_v2, %v256_v3  ;;  %v11671_v9 = vcombine.high %v253_v4, %v257_v5  ;;  %v260_v10 = vld [vmem:[#allocation6 + $0x440] sm:$0xff]  ;;  %v11668_v16 = vcombine.low %v252_v2, %v256_v3  ;;  %v11670_v17 = vcombine.low %v253_v4, %v257_v5 }
  0x90   :  { %v264_v11 = vld [vmem:[#allocation6 + $0x460] sm:$0xff] }
  0x91   :  { %3241 = vmatpush1.bf16.msra.mxu0 %v11604_v12  ;;  %3405 = vmatpush1.bf16.msra.mxu1 %v11606_v13  ;;  %v13555_v12 = vcombine.low %v13545_v53, %v13545_v53  ;;  %v261_v13 = vld [vmem:[#allocation6 + $0x448] sm:$0xff]  ;;  %v11677_v18 = vcombine.high %v260_v10, %v264_v11  ;;  %v11676_v24 = vcombine.low %v260_v10, %v264_v11 }
  0x92   :  { %3242 = vmatprep.subr.bf16.mxu0 %v11613_v14  ;;  %3406 = vmatprep.subr.bf16.mxu1 %v11615_v15  ;;  %v265_v14 = vld [vmem:[#allocation6 + $0x468] sm:$0xff] }
  0x93   :  { %v13557_v15 = vld [vmem:[#allocation3 + $0x8] sm:$0xff]  ;;  %v11679_v19 = vcombine.high %v261_v13, %v265_v14  ;;  %v11678_v25 = vcombine.low %v261_v13, %v265_v14 }
  0x94   :  { %v269_v53 = vld [vmem:[#allocation6 + $0x488] sm:$0xff] }
  0x95   :  { %3243 = vmatpush1.bf16.msra.mxu0 %v11612_v20  ;;  %3407 = vmatpush1.bf16.msra.mxu1 %v11614_v21  ;;  %v268_v20 = vld [vmem:[#allocation6 + $0x480] sm:$0xff] }
  0x96   :  { %3244 = vmatprep.subr.bf16.mxu0 %v11621_v22  ;;  %3408 = vmatprep.subr.bf16.mxu1 %v11623_v23  ;;  %v272_v21 = vld [vmem:[#allocation6 + $0x4a0] sm:$0xff]  ;;  %v13561_v22 = vcombine.high %v13557_v15, %v13557_v15  ;;  %v273_v23 = vld [vmem:[#allocation6 + $0x4a8] sm:$0xff] }
  0x97   :  { %v11685_v26 = vcombine.high %v268_v20, %v272_v21  ;;  %v11687_v27 = vcombine.high %v269_v53, %v273_v23  ;;  %v11684_v32 = vcombine.low %v268_v20, %v272_v21  ;;  %v11686_v33 = vcombine.low %v269_v53, %v273_v23 }
  0x99   :  { %3245 = vmatpush1.bf16.msra.mxu0 %v11620_v28  ;;  %3409 = vmatpush1.bf16.msra.mxu1 %v11622_v29  ;;  %v276_v28 = vld [vmem:[#allocation6 + $0x4c0] sm:$0xff] }
  0x9a   :  { %3246 = vmatprep.subr.bf16.mxu0 %v11629_v30  ;;  %3410 = vmatprep.subr.bf16.mxu1 %v11631_v31  ;;  %v280_v29 = vld [vmem:[#allocation6 + $0x4e0] sm:$0xff]  ;;  %v277_v30 = vld [vmem:[#allocation6 + $0x4c8] sm:$0xff] }
  0x9b   :  { %v281_v31 = vld [vmem:[#allocation6 + $0x4e8] sm:$0xff]  ;;  %v11693_v34 = vcombine.high %v276_v28, %v280_v29  ;;  %v11692_v40 = vcombine.low %v276_v28, %v280_v29 }
  0x9c   :  { %v11695_v35 = vcombine.high %v277_v30, %v281_v31  ;;  %v11694_v41 = vcombine.low %v277_v30, %v281_v31 }
  0x9d   :  { %3247 = vmatpush1.bf16.msra.mxu0 %v11628_v36  ;;  %3411 = vmatpush1.bf16.msra.mxu1 %v11630_v37  ;;  %v284_v36 = vld [vmem:[#allocation6 + $0x500] sm:$0xff] }
  0x9e   :  { %3248 = vmatprep.subr.bf16.mxu0 %v11637_v38  ;;  %3412 = vmatprep.subr.bf16.mxu1 %v11639_v39  ;;  %v288_v37 = vld [vmem:[#allocation6 + $0x520] sm:$0xff]  ;;  %v285_v38 = vld [vmem:[#allocation6 + $0x508] sm:$0xff] }
  0x9f   :  { %v289_v39 = vld [vmem:[#allocation6 + $0x528] sm:$0xff]  ;;  %v11701_v42 = vcombine.high %v284_v36, %v288_v37  ;;  %v11700_v48 = vcombine.low %v284_v36, %v288_v37 }
  0xa0   :  { %v11703_v43 = vcombine.high %v285_v38, %v289_v39  ;;  %v11702_v49 = vcombine.low %v285_v38, %v289_v39 }
  0xa1   :  { %3249 = vmatpush1.bf16.msra.mxu0 %v11636_v44  ;;  %3413 = vmatpush1.bf16.msra.mxu1 %v11638_v45  ;;  %v292_v44 = vld [vmem:[#allocation6 + $0x540] sm:$0xff] }
  0xa2   :  { %3250 = vmatprep.subr.bf16.mxu0 %v11645_v46  ;;  %3414 = vmatprep.subr.bf16.mxu1 %v11647_v47  ;;  %v296_v45 = vld [vmem:[#allocation6 + $0x560] sm:$0xff]  ;;  %v293_v46 = vld [vmem:[#allocation6 + $0x548] sm:$0xff] }
  0xa3   :  { %v297_v47 = vld [vmem:[#allocation6 + $0x568] sm:$0xff]  ;;  %v11709_v50 = vcombine.high %v292_v44, %v296_v45  ;;  %v11708_v58 = vcombine.low %v292_v44, %v296_v45 }
  0xa4   :  { %v11711_v51 = vcombine.high %v293_v46, %v297_v47  ;;  %v11710_v59 = vcombine.low %v293_v46, %v297_v47 }
  0xa5   :  { %3251 = vmatpush1.bf16.msra.mxu0 %v11644_v52  ;;  %3415 = vmatpush1.bf16.msra.mxu1 %v11646_v54  ;;  %v300_v52 = vld [vmem:[#allocation6 + $0x580] sm:$0xff] }
  0xa6   :  { %3252 = vmatprep.subr.bf16.mxu0 %v11653_v55  ;;  %3416 = vmatprep.subr.bf16.mxu1 %v11655_v56  ;;  %v304_v54 = vld [vmem:[#allocation6 + $0x5a0] sm:$0xff]  ;;  %v301_v55 = vld [vmem:[#allocation6 + $0x588] sm:$0xff] }
  0xa7   :  { %v305_v56 = vld [vmem:[#allocation6 + $0x5a8] sm:$0xff]  ;;  %v11717_v60 = vcombine.high %v300_v52, %v304_v54  ;;  %v11716_v2 = vcombine.low %v300_v52, %v304_v54 }
  0xa8   :  { %v11719_v61 = vcombine.high %v301_v55, %v305_v56  ;;  %v11718_v3 = vcombine.low %v301_v55, %v305_v56 }
  0xa9   :  { %3253 = vmatpush1.bf16.msra.mxu0 %v11652_v62  ;;  %3417 = vmatpush1.bf16.msra.mxu1 %v11654_v63  ;;  %v308_v62 = vld [vmem:[#allocation6 + $0x5c0] sm:$0xff] }
  0xaa   :  { %3254 = vmatprep.subr.bf16.mxu0 %v11661_v0  ;;  %3418 = vmatprep.subr.bf16.mxu1 %v11663_v1  ;;  %v312_v63 = vld [vmem:[#allocation6 + $0x5e0] sm:$0xff]  ;;  %v309_v0 = vld [vmem:[#allocation6 + $0x5c8] sm:$0xff] }
  0xab   :  { %v313_v1 = vld [vmem:[#allocation6 + $0x5e8] sm:$0xff]  ;;  %v11725_v4 = vcombine.high %v308_v62, %v312_v63  ;;  %v11724_v10 = vcombine.low %v308_v62, %v312_v63 }
  0xac   :  { %v11727_v5 = vcombine.high %v309_v0, %v313_v1  ;;  %v11726_v11 = vcombine.low %v309_v0, %v313_v1 }
  0xad   :  { %3255 = vmatpush1.bf16.msra.mxu0 %v11660_v6  ;;  %3419 = vmatpush1.bf16.msra.mxu1 %v11662_v7  ;;  %v316_v6 = vld [vmem:[#allocation6 + $0x600] sm:$0xff] }
  0xae   :  { %3265 = vmatprep.subr.bf16.mxu0 %v11669_v8  ;;  %3429 = vmatprep.subr.bf16.mxu1 %v11671_v9  ;;  %v320_v7 = vld [vmem:[#allocation6 + $0x620] sm:$0xff]  ;;  %v317_v8 = vld [vmem:[#allocation6 + $0x608] sm:$0xff] }
  0xaf   :  { %v321_v9 = vld [vmem:[#allocation6 + $0x628] sm:$0xff]  ;;  %v11733_v13 = vcombine.high %v316_v6, %v320_v7  ;;  %v11732_v20 = vcombine.low %v316_v6, %v320_v7 }
  0xb0   :  { %3257 = vmatmul.mubr.bf16.vlgmr.msra.gmra.mrb[0].mxu0 %v13555_v12  ;;  %3421 = vmatmul.mubr.bf16.vlgmr.msra.gmra.mrb[0].mxu1 %v13555_v12  ;;  %v11735_v14 = vcombine.high %v317_v8, %v321_v9  ;;  %v11734_v21 = vcombine.low %v317_v8, %v321_v9 }
  0xb1   :  { %3266 = vmatpush1.bf16.msra.mxu0 %v11668_v16  ;;  %3430 = vmatpush1.bf16.msra.mxu1 %v11670_v17  ;;  %v324_v16 = vld [vmem:[#allocation6 + $0x640] sm:$0xff] }
  0xb2   :  { %3267 = vmatprep.subr.bf16.mxu0 %v11677_v18  ;;  %3431 = vmatprep.subr.bf16.mxu1 %v11679_v19  ;;  %v328_v17 = vld [vmem:[#allocation6 + $0x660] sm:$0xff]  ;;  %v325_v18 = vld [vmem:[#allocation6 + $0x648] sm:$0xff] }
  0xb3   :  { %3297 = vmatprep.mubr.bf16.mxu0 %v13561_v22  ;;  %3461 = vmatprep.mubr.bf16.mxu1 %v13561_v22  ;;  %v329_v19 = vld [vmem:[#allocation6 + $0x668] sm:$0xff]  ;;  %v11741_v53 = vcombine.high %v324_v16, %v328_v17  ;;  %v11740_v28 = vcombine.low %v324_v16, %v328_v17 }
  0xb4   :  { %v11743_v23 = vcombine.high %v325_v18, %v329_v19  ;;  %v11742_v29 = vcombine.low %v325_v18, %v329_v19 }
  0xb5   :  { %3268 = vmatpush1.bf16.msra.mxu0 %v11676_v24  ;;  %3432 = vmatpush1.bf16.msra.mxu1 %v11678_v25  ;;  %v332_v24 = vld [vmem:[#allocation6 + $0x680] sm:$0xff] }
  0xb6   :  { %3269 = vmatprep.subr.bf16.mxu0 %v11685_v26  ;;  %3433 = vmatprep.subr.bf16.mxu1 %v11687_v27  ;;  %v336_v25 = vld [vmem:[#allocation6 + $0x6a0] sm:$0xff]  ;;  %v333_v26 = vld [vmem:[#allocation6 + $0x688] sm:$0xff] }
  0xb7   :  { %v337_v27 = vld [vmem:[#allocation6 + $0x6a8] sm:$0xff]  ;;  %v11749_v30 = vcombine.high %v332_v24, %v336_v25  ;;  %v11748_v36 = vcombine.low %v332_v24, %v336_v25  ;;  %v13571_v25 = vld [vmem:[#allocation3 + $0x10] sm:$0xff] }
  0xb8   :  { %v11751_v31 = vcombine.high %v333_v26, %v337_v27  ;;  %v11750_v37 = vcombine.low %v333_v26, %v337_v27  ;;  %v393_v24 = vld [vmem:[#allocation6 + $0x868] sm:$0xff] }
  0xb9   :  { %3270 = vmatpush1.bf16.msra.mxu0 %v11684_v32  ;;  %3434 = vmatpush1.bf16.msra.mxu1 %v11686_v33  ;;  %v340_v32 = vld [vmem:[#allocation6 + $0x6c0] sm:$0xff] }
  0xba   :  { %3271 = vmatprep.subr.bf16.mxu0 %v11693_v34  ;;  %3435 = vmatprep.subr.bf16.mxu1 %v11695_v35  ;;  %v344_v33 = vld [vmem:[#allocation6 + $0x6e0] sm:$0xff]  ;;  %v341_v34 = vld [vmem:[#allocation6 + $0x6c8] sm:$0xff] }
  0xbb   :  { %v345_v35 = vld [vmem:[#allocation6 + $0x6e8] sm:$0xff]  ;;  %v11757_v38 = vcombine.high %v340_v32, %v344_v33  ;;  %v11756_v44 = vcombine.low %v340_v32, %v344_v33  ;;  %v13575_v32 = vcombine.high %v13571_v25, %v13571_v25 }
  0xbc   :  { %v11759_v39 = vcombine.high %v341_v34, %v345_v35  ;;  %v11758_v45 = vcombine.low %v341_v34, %v345_v35  ;;  %v401_v33 = vld [vmem:[#allocation6 + $0x8a8] sm:$0xff] }
  0xbd   :  { %3272 = vmatpush1.bf16.msra.mxu0 %v11692_v40  ;;  %3436 = vmatpush1.bf16.msra.mxu1 %v11694_v41  ;;  %v348_v40 = vld [vmem:[#allocation6 + $0x700] sm:$0xff] }
  0xbe   :  { %3273 = vmatprep.subr.bf16.mxu0 %v11701_v42  ;;  %3437 = vmatprep.subr.bf16.mxu1 %v11703_v43  ;;  %v352_v41 = vld [vmem:[#allocation6 + $0x720] sm:$0xff]  ;;  %v349_v42 = vld [vmem:[#allocation6 + $0x708] sm:$0xff] }
  0xbf   :  { %v353_v43 = vld [vmem:[#allocation6 + $0x728] sm:$0xff]  ;;  %v11765_v46 = vcombine.high %v348_v40, %v352_v41  ;;  %v11764_v52 = vcombine.low %v348_v40, %v352_v41 }
  0xc0   :  { %v11767_v47 = vcombine.high %v349_v42, %v353_v43  ;;  %v11766_v54 = vcombine.low %v349_v42, %v353_v43  ;;  %v405_v40 = vld [vmem:[#allocation6 + $0x8c8] sm:$0xff] }
  0xc1   :  { %3274 = vmatpush1.bf16.msra.mxu0 %v11700_v48  ;;  %3438 = vmatpush1.bf16.msra.mxu1 %v11702_v49  ;;  %v356_v48 = vld [vmem:[#allocation6 + $0x740] sm:$0xff]  ;;  %v409_v41 = vld [vmem:[#allocation6 + $0x8e8] sm:$0xff] }
  0xc2   :  { %3275 = vmatprep.subr.bf16.mxu0 %v11709_v50  ;;  %3439 = vmatprep.subr.bf16.mxu1 %v11711_v51  ;;  %v360_v49 = vld [vmem:[#allocation6 + $0x760] sm:$0xff]  ;;  %v357_v50 = vld [vmem:[#allocation6 + $0x748] sm:$0xff] }
  0xc3   :  { %v361_v51 = vld [vmem:[#allocation6 + $0x768] sm:$0xff]  ;;  %v11773_v55 = vcombine.high %v356_v48, %v360_v49  ;;  %v11772_v62 = vcombine.low %v356_v48, %v360_v49 }
  0xc4   :  { %v11775_v56 = vcombine.high %v357_v50, %v361_v51  ;;  %v11774_v63 = vcombine.low %v357_v50, %v361_v51  ;;  %v413_v48 = vld [vmem:[#allocation6 + $0x908] sm:$0xff]  ;;  %v11822_v51 = vcombine.low %v405_v40, %v409_v41 }
  0xc5   :  { %3276 = vmatpush1.bf16.msra.mxu0 %v11708_v58  ;;  %3440 = vmatpush1.bf16.msra.mxu1 %v11710_v59  ;;  %v364_v58 = vld [vmem:[#allocation6 + $0x780] sm:$0xff]  ;;  %v417_v49 = vld [vmem:[#allocation6 + $0x928] sm:$0xff] }
  0xc6   :  { %3277 = vmatprep.subr.bf16.mxu0 %v11717_v60  ;;  %3441 = vmatprep.subr.bf16.mxu1 %v11719_v61  ;;  %v368_v59 = vld [vmem:[#allocation6 + $0x7a0] sm:$0xff]  ;;  %v365_v60 = vld [vmem:[#allocation6 + $0x788] sm:$0xff] }
  0xc7   :  { %v369_v61 = vld [vmem:[#allocation6 + $0x7a8] sm:$0xff]  ;;  %v11781_v0 = vcombine.high %v364_v58, %v368_v59  ;;  %v11780_v6 = vcombine.low %v364_v58, %v368_v59 }
  0xc8   :  { %v11783_v1 = vcombine.high %v365_v60, %v369_v61  ;;  %v11782_v7 = vcombine.low %v365_v60, %v369_v61  ;;  %v421_v58 = vld [vmem:[#allocation6 + $0x948] sm:$0xff]  ;;  %v11830_v61 = vcombine.low %v413_v48, %v417_v49 }
  0xc9   :  { %3278 = vmatpush1.bf16.msra.mxu0 %v11716_v2  ;;  %3442 = vmatpush1.bf16.msra.mxu1 %v11718_v3  ;;  %v372_v2 = vld [vmem:[#allocation6 + $0x7c0] sm:$0xff]  ;;  %v425_v59 = vld [vmem:[#allocation6 + $0x968] sm:$0xff] }
  0xca   :  { %3279 = vmatprep.subr.bf16.mxu0 %v11725_v4  ;;  %3443 = vmatprep.subr.bf16.mxu1 %v11727_v5  ;;  %v376_v3 = vld [vmem:[#allocation6 + $0x7e0] sm:$0xff]  ;;  %v373_v4 = vld [vmem:[#allocation6 + $0x7c8] sm:$0xff] }
  0xcb   :  { %v377_v5 = vld [vmem:[#allocation6 + $0x7e8] sm:$0xff]  ;;  %v11789_v8 = vcombine.high %v372_v2, %v376_v3  ;;  %v11788_v16 = vcombine.low %v372_v2, %v376_v3 }
  0xcc   :  { %v11791_v9 = vcombine.high %v373_v4, %v377_v5  ;;  %v11790_v17 = vcombine.low %v373_v4, %v377_v5  ;;  %v429_v2 = vld [vmem:[#allocation6 + $0x988] sm:$0xff]  ;;  %v11838_v5 = vcombine.low %v421_v58, %v425_v59 }
  0xcd   :  { %3280 = vmatpush1.bf16.msra.mxu0 %v11724_v10  ;;  %3444 = vmatpush1.bf16.msra.mxu1 %v11726_v11  ;;  %v380_v10 = vld [vmem:[#allocation6 + $0x800] sm:$0xff]  ;;  %v433_v3 = vld [vmem:[#allocation6 + $0x9a8] sm:$0xff] }
  0xce   :  { %3281 = vmatprep.subr.bf16.mxu0 %v11733_v13  ;;  %3445 = vmatprep.subr.bf16.mxu1 %v11735_v14  ;;  %v384_v11 = vld [vmem:[#allocation6 + $0x820] sm:$0xff]  ;;  %v381_v13 = vld [vmem:[#allocation6 + $0x808] sm:$0xff] }
  0xcf   :  { %v385_v14 = vld [vmem:[#allocation6 + $0x828] sm:$0xff]  ;;  %v11797_v18 = vcombine.high %v380_v10, %v384_v11  ;;  %v11796_v26 = vcombine.low %v380_v10, %v384_v11 }
  0xd0   :  { %v11799_v19 = vcombine.high %v381_v13, %v385_v14  ;;  %v11798_v27 = vcombine.low %v381_v13, %v385_v14  ;;  %v437_v10 = vld [vmem:[#allocation6 + $0x9c8] sm:$0xff]  ;;  %v11846_v14 = vcombine.low %v429_v2, %v433_v3 }
  0xd1   :  { %3282 = vmatpush1.bf16.msra.mxu0 %v11732_v20  ;;  %3446 = vmatpush1.bf16.msra.mxu1 %v11734_v21  ;;  %v388_v20 = vld [vmem:[#allocation6 + $0x840] sm:$0xff]  ;;  %v441_v11 = vld [vmem:[#allocation6 + $0x9e8] sm:$0xff] }
  0xd2   :  { %3283 = vmatprep.subr.bf16.mxu0 %v11741_v53  ;;  %3447 = vmatprep.subr.bf16.mxu1 %v11743_v23  ;;  %v392_v21 = vld [vmem:[#allocation6 + $0x860] sm:$0xff]  ;;  %v13569_v53 = vcombine.low %v13557_v15, %v13557_v15  ;;  %v389_v23 = vld [vmem:[#allocation6 + $0x848] sm:$0xff] }
  0xd3   :  { %v397_v15 = vld [vmem:[#allocation6 + $0x888] sm:$0xff]  ;;  %v11804_v34 = vcombine.low %v388_v20, %v392_v21  ;;  %v11806_v35 = vcombine.low %v389_v23, %v393_v24 }
  0xd4   :  { %v11814_v43 = vcombine.low %v397_v15, %v401_v33 }
  0xd5   :  { %3284 = vmatpush1.bf16.msra.mxu0 %v11740_v28  ;;  %3448 = vmatpush1.bf16.msra.mxu1 %v11742_v29  ;;  %v11805_v28 = vcombine.high %v388_v20, %v392_v21  ;;  %v11807_v29 = vcombine.high %v389_v23, %v393_v24  ;;  %v445_v20 = vld [vmem:[#allocation6 + $0xa08] sm:$0xff]  ;;  %v11854_v24 = vcombine.low %v437_v10, %v441_v11 }
  0xd6   :  { %3285 = vmatprep.subr.bf16.mxu0 %v11749_v30  ;;  %3449 = vmatprep.subr.bf16.mxu1 %v11751_v31  ;;  %v396_v30 = vld [vmem:[#allocation6 + $0x880] sm:$0xff]  ;;  %v449_v21 = vld [vmem:[#allocation6 + $0xa28] sm:$0xff] }
  0xd7   :  { %v400_v31 = vld [vmem:[#allocation6 + $0x8a0] sm:$0xff] }
  0xd8   :  { %v11812_v42 = vcombine.low %v396_v30, %v400_v31 }
  0xd9   :  { %3286 = vmatpush1.bf16.msra.mxu0 %v11748_v36  ;;  %3450 = vmatpush1.bf16.msra.mxu1 %v11750_v37  ;;  %v11813_v36 = vcombine.high %v396_v30, %v400_v31  ;;  %v11815_v37 = vcombine.high %v397_v15, %v401_v33  ;;  %v453_v30 = vld [vmem:[#allocation6 + $0xa48] sm:$0xff]  ;;  %v11862_v33 = vcombine.low %v445_v20, %v449_v21 }
  0xda   :  { %3287 = vmatprep.subr.bf16.mxu0 %v11757_v38  ;;  %3451 = vmatprep.subr.bf16.mxu1 %v11759_v39  ;;  %v404_v38 = vld [vmem:[#allocation6 + $0x8c0] sm:$0xff]  ;;  %v457_v31 = vld [vmem:[#allocation6 + $0xa68] sm:$0xff] }
  0xdb   :  { %v408_v39 = vld [vmem:[#allocation6 + $0x8e0] sm:$0xff] }
  0xdc   :  { %v11820_v50 = vcombine.low %v404_v38, %v408_v39 }
  0xdd   :  { %3288 = vmatpush1.bf16.msra.mxu0 %v11756_v44  ;;  %3452 = vmatpush1.bf16.msra.mxu1 %v11758_v45  ;;  %v11821_v44 = vcombine.high %v404_v38, %v408_v39  ;;  %v11823_v45 = vcombine.high %v405_v40, %v409_v41  ;;  %v461_v38 = vld [vmem:[#allocation6 + $0xa88] sm:$0xff]  ;;  %v11870_v41 = vcombine.low %v453_v30, %v457_v31 }
  0xde   :  { %3289 = vmatprep.subr.bf16.mxu0 %v11765_v46  ;;  %3453 = vmatprep.subr.bf16.mxu1 %v11767_v47  ;;  %v412_v46 = vld [vmem:[#allocation6 + $0x900] sm:$0xff]  ;;  %v465_v39 = vld [vmem:[#allocation6 + $0xaa8] sm:$0xff] }
  0xdf   :  { %v416_v47 = vld [vmem:[#allocation6 + $0x920] sm:$0xff] }
  0xe0   :  { %v11828_v60 = vcombine.low %v412_v46, %v416_v47 }
  0xe1   :  { %3290 = vmatpush1.bf16.msra.mxu0 %v11764_v52  ;;  %3454 = vmatpush1.bf16.msra.mxu1 %v11766_v54  ;;  %v11829_v52 = vcombine.high %v412_v46, %v416_v47  ;;  %v11831_v54 = vcombine.high %v413_v48, %v417_v49  ;;  %v469_v46 = vld [vmem:[#allocation6 + $0xac8] sm:$0xff]  ;;  %v11878_v49 = vcombine.low %v461_v38, %v465_v39 }
  0xe2   :  { %3291 = vmatprep.subr.bf16.mxu0 %v11773_v55  ;;  %3455 = vmatprep.subr.bf16.mxu1 %v11775_v56  ;;  %v420_v55 = vld [vmem:[#allocation6 + $0x940] sm:$0xff]  ;;  %v473_v47 = vld [vmem:[#allocation6 + $0xae8] sm:$0xff] }
  0xe3   :  { %v424_v56 = vld [vmem:[#allocation6 + $0x960] sm:$0xff] }
  0xe4   :  { %v11836_v4 = vcombine.low %v420_v55, %v424_v56 }
  0xe5   :  { %3292 = vmatpush1.bf16.msra.mxu0 %v11772_v62  ;;  %3456 = vmatpush1.bf16.msra.mxu1 %v11774_v63  ;;  %v11837_v62 = vcombine.high %v420_v55, %v424_v56  ;;  %v11839_v63 = vcombine.high %v421_v58, %v425_v59  ;;  %v477_v55 = vld [vmem:[#allocation6 + $0xb08] sm:$0xff]  ;;  %v11886_v59 = vcombine.low %v469_v46, %v473_v47 }
  0xe6   :  { %3293 = vmatprep.subr.bf16.mxu0 %v11781_v0  ;;  %3457 = vmatprep.subr.bf16.mxu1 %v11783_v1  ;;  %v428_v0 = vld [vmem:[#allocation6 + $0x980] sm:$0xff]  ;;  %v481_v56 = vld [vmem:[#allocation6 + $0xb28] sm:$0xff] }
  0xe7   :  { %v432_v1 = vld [vmem:[#allocation6 + $0x9a0] sm:$0xff] }
  0xe8   :  { %v11844_v13 = vcombine.low %v428_v0, %v432_v1 }
  0xe9   :  { %3294 = vmatpush1.bf16.msra.mxu0 %v11780_v6  ;;  %3458 = vmatpush1.bf16.msra.mxu1 %v11782_v7  ;;  %v11845_v6 = vcombine.high %v428_v0, %v432_v1  ;;  %v11847_v7 = vcombine.high %v429_v2, %v433_v3  ;;  %v485_v0 = vld [vmem:[#allocation6 + $0xb48] sm:$0xff]  ;;  %v11894_v3 = vcombine.low %v477_v55, %v481_v56 }
  0xea   :  { %3295 = vmatprep.subr.bf16.mxu0 %v11789_v8  ;;  %3459 = vmatprep.subr.bf16.mxu1 %v11791_v9  ;;  %v436_v8 = vld [vmem:[#allocation6 + $0x9c0] sm:$0xff]  ;;  %v489_v1 = vld [vmem:[#allocation6 + $0xb68] sm:$0xff] }
  0xeb   :  { %v440_v9 = vld [vmem:[#allocation6 + $0x9e0] sm:$0xff] }
  0xec   :  { %v11852_v23 = vcombine.low %v436_v8, %v440_v9 }
  0xed   :  { %3296 = vmatpush1.bf16.msra.mxu0 %v11788_v16  ;;  %3460 = vmatpush1.bf16.msra.mxu1 %v11790_v17  ;;  %v11853_v16 = vcombine.high %v436_v8, %v440_v9  ;;  %v11855_v17 = vcombine.high %v437_v10, %v441_v11  ;;  %v493_v8 = vld [vmem:[#allocation6 + $0xb88] sm:$0xff]  ;;  %v11902_v11 = vcombine.low %v485_v0, %v489_v1 }
  0xee   :  { %3306 = vmatprep.subr.bf16.mxu0 %v11797_v18  ;;  %3470 = vmatprep.subr.bf16.mxu1 %v11799_v19  ;;  %v444_v18 = vld [vmem:[#allocation6 + $0xa00] sm:$0xff]  ;;  %v497_v9 = vld [vmem:[#allocation6 + $0xba8] sm:$0xff] }
  0xef   :  { %v448_v19 = vld [vmem:[#allocation6 + $0xa20] sm:$0xff] }
  0xf0   :  { %3298 = vmatmul.mubr.bf16.vlgmr.msra.gmra.mrb[0].mxu0 %v13569_v53  ;;  %3462 = vmatmul.mubr.bf16.vlgmr.msra.gmra.mrb[0].mxu1 %v13569_v53  ;;  %v11860_v15 = vcombine.low %v444_v18, %v448_v19 }
  0xf1   :  { %3307 = vmatpush1.bf16.msra.mxu0 %v11796_v26  ;;  %3471 = vmatpush1.bf16.msra.mxu1 %v11798_v27  ;;  %v11861_v26 = vcombine.high %v444_v18, %v448_v19  ;;  %v11863_v27 = vcombine.high %v445_v20, %v449_v21  ;;  %v501_v18 = vld [vmem:[#allocation6 + $0xbc8] sm:$0xff]  ;;  %v11910_v21 = vcombine.low %v493_v8, %v497_v9 }
  0xf2   :  { %3308 = vmatprep.subr.bf16.mxu0 %v11805_v28  ;;  %3472 = vmatprep.subr.bf16.mxu1 %v11807_v29  ;;  %v452_v28 = vld [vmem:[#allocation6 + $0xa40] sm:$0xff]  ;;  %v505_v19 = vld [vmem:[#allocation6 + $0xbe8] sm:$0xff] }
  0xf3   :  { %3338 = vmatprep.mubr.bf16.mxu0 %v13575_v32  ;;  %3502 = vmatprep.mubr.bf16.mxu1 %v13575_v32  ;;  %v456_v29 = vld [vmem:[#allocation6 + $0xa60] sm:$0xff] }
  0xf4   :  { %v11868_v40 = vcombine.low %v452_v28, %v456_v29 }
  0xf5   :  { %3309 = vmatpush1.bf16.msra.mxu0 %v11804_v34  ;;  %3473 = vmatpush1.bf16.msra.mxu1 %v11806_v35  ;;  %v11869_v34 = vcombine.high %v452_v28, %v456_v29  ;;  %v11871_v35 = vcombine.high %v453_v30, %v457_v31  ;;  %v509_v28 = vld [vmem:[#allocation6 + $0xc08] sm:$0xff]  ;;  %v11918_v31 = vcombine.low %v501_v18, %v505_v19 }
  0xf6   :  { %3310 = vmatprep.subr.bf16.mxu0 %v11813_v36  ;;  %3474 = vmatprep.subr.bf16.mxu1 %v11815_v37  ;;  %v460_v36 = vld [vmem:[#allocation6 + $0xa80] sm:$0xff]  ;;  %v513_v29 = vld [vmem:[#allocation6 + $0xc28] sm:$0xff] }
  0xf7   :  { %v464_v37 = vld [vmem:[#allocation6 + $0xaa0] sm:$0xff] }
  0xf8   :  { %v11876_v48 = vcombine.low %v460_v36, %v464_v37 }
  0xf9   :  { %3311 = vmatpush1.bf16.msra.mxu0 %v11812_v42  ;;  %3475 = vmatpush1.bf16.msra.mxu1 %v11814_v43  ;;  %v11877_v42 = vcombine.high %v460_v36, %v464_v37  ;;  %v11879_v43 = vcombine.high %v461_v38, %v465_v39  ;;  %v13583_v36 = vcombine.low %v13571_v25, %v13571_v25  ;;  %v517_v37 = vld [vmem:[#allocation6 + $0xc48] sm:$0xff]  ;;  %v13585_v39 = vld [vmem:[#allocation3 + $0x18] sm:$0xff] }
  0xfa   :  { %3312 = vmatprep.subr.bf16.mxu0 %v11821_v44  ;;  %3476 = vmatprep.subr.bf16.mxu1 %v11823_v45  ;;  %v468_v44 = vld [vmem:[#allocation6 + $0xac0] sm:$0xff]  ;;  %v521_v38 = vld [vmem:[#allocation6 + $0xc68] sm:$0xff] }
  0xfb   :  { %v472_v45 = vld [vmem:[#allocation6 + $0xae0] sm:$0xff]  ;;  %v525_v25 = vld [vmem:[#allocation6 + $0xc88] sm:$0xff] }
  0xfc   :  { %v11884_v58 = vcombine.low %v468_v44, %v472_v45 }
  0xfd   :  { %3313 = vmatpush1.bf16.msra.mxu0 %v11820_v50  ;;  %3477 = vmatpush1.bf16.msra.mxu1 %v11822_v51  ;;  %v11885_v50 = vcombine.high %v468_v44, %v472_v45  ;;  %v11887_v51 = vcombine.high %v469_v46, %v473_v47  ;;  %v524_v44 = vld [vmem:[#allocation6 + $0xc80] sm:$0xff]  ;;  %v13589_v46 = vcombine.high %v13585_v39, %v13585_v39  ;;  %v529_v47 = vld [vmem:[#allocation6 + $0xca8] sm:$0xff] }
  0xfe   :  { %3314 = vmatprep.subr.bf16.mxu0 %v11829_v52  ;;  %3478 = vmatprep.subr.bf16.mxu1 %v11831_v54  ;;  %v476_v52 = vld [vmem:[#allocation6 + $0xb00] sm:$0xff] }
  0xff   :  { %v480_v54 = vld [vmem:[#allocation6 + $0xb20] sm:$0xff] }
 0x100   :  { %v11892_v2 = vcombine.low %v476_v52, %v480_v54  ;;  %v528_v45 = vld [vmem:[#allocation6 + $0xca0] sm:$0xff] }
 0x101   :  { %3315 = vmatpush1.bf16.msra.mxu0 %v11828_v60  ;;  %3479 = vmatpush1.bf16.msra.mxu1 %v11830_v61  ;;  %v11893_v60 = vcombine.high %v476_v52, %v480_v54  ;;  %v11895_v61 = vcombine.high %v477_v55, %v481_v56  ;;  %v532_v52 = vld [vmem:[#allocation6 + $0xcc0] sm:$0xff]  ;;  %v533_v55 = vld [vmem:[#allocation6 + $0xcc8] sm:$0xff] }
 0x102   :  { %3316 = vmatprep.subr.bf16.mxu0 %v11837_v62  ;;  %3480 = vmatprep.subr.bf16.mxu1 %v11839_v63  ;;  %v484_v62 = vld [vmem:[#allocation6 + $0xb40] sm:$0xff]  ;;  %v537_v56 = vld [vmem:[#allocation6 + $0xce8] sm:$0xff] }
 0x103   :  { %v488_v63 = vld [vmem:[#allocation6 + $0xb60] sm:$0xff] }
 0x104   :  { %v11900_v10 = vcombine.low %v484_v62, %v488_v63  ;;  %v536_v54 = vld [vmem:[#allocation6 + $0xce0] sm:$0xff] }
 0x105   :  { %3317 = vmatpush1.bf16.msra.mxu0 %v11836_v4  ;;  %3481 = vmatpush1.bf16.msra.mxu1 %v11838_v5  ;;  %v11901_v4 = vcombine.high %v484_v62, %v488_v63  ;;  %v11903_v5 = vcombine.high %v485_v0, %v489_v1  ;;  %v540_v62 = vld [vmem:[#allocation6 + $0xd00] sm:$0xff]  ;;  %v541_v0 = vld [vmem:[#allocation6 + $0xd08] sm:$0xff] }
 0x106   :  { %3318 = vmatprep.subr.bf16.mxu0 %v11845_v6  ;;  %3482 = vmatprep.subr.bf16.mxu1 %v11847_v7  ;;  %v492_v6 = vld [vmem:[#allocation6 + $0xb80] sm:$0xff]  ;;  %v545_v1 = vld [vmem:[#allocation6 + $0xd28] sm:$0xff] }
 0x107   :  { %v496_v7 = vld [vmem:[#allocation6 + $0xba0] sm:$0xff] }
 0x108   :  { %v11908_v20 = vcombine.low %v492_v6, %v496_v7  ;;  %v544_v63 = vld [vmem:[#allocation6 + $0xd20] sm:$0xff] }
 0x109   :  { %3319 = vmatpush1.bf16.msra.mxu0 %v11844_v13  ;;  %3483 = vmatpush1.bf16.msra.mxu1 %v11846_v14  ;;  %v11909_v13 = vcombine.high %v492_v6, %v496_v7  ;;  %v11911_v14 = vcombine.high %v493_v8, %v497_v9  ;;  %v548_v6 = vld [vmem:[#allocation6 + $0xd40] sm:$0xff]  ;;  %v549_v8 = vld [vmem:[#allocation6 + $0xd48] sm:$0xff] }
 0x10a   :  { %3320 = vmatprep.subr.bf16.mxu0 %v11853_v16  ;;  %3484 = vmatprep.subr.bf16.mxu1 %v11855_v17  ;;  %v500_v16 = vld [vmem:[#allocation6 + $0xbc0] sm:$0xff]  ;;  %v553_v9 = vld [vmem:[#allocation6 + $0xd68] sm:$0xff] }
 0x10b   :  { %v504_v17 = vld [vmem:[#allocation6 + $0xbe0] sm:$0xff] }
 0x10c   :  { %v11916_v30 = vcombine.low %v500_v16, %v504_v17  ;;  %v552_v7 = vld [vmem:[#allocation6 + $0xd60] sm:$0xff] }
 0x10d   :  { %3321 = vmatpush1.bf16.msra.mxu0 %v11852_v23  ;;  %3485 = vmatpush1.bf16.msra.mxu1 %v11854_v24  ;;  %v11917_v23 = vcombine.high %v500_v16, %v504_v17  ;;  %v11919_v24 = vcombine.high %v501_v18, %v505_v19  ;;  %v556_v16 = vld [vmem:[#allocation6 + $0xd80] sm:$0xff]  ;;  %v557_v18 = vld [vmem:[#allocation6 + $0xd88] sm:$0xff] }
 0x10e   :  { %3322 = vmatprep.subr.bf16.mxu0 %v11861_v26  ;;  %3486 = vmatprep.subr.bf16.mxu1 %v11863_v27  ;;  %v508_v26 = vld [vmem:[#allocation6 + $0xc00] sm:$0xff]  ;;  %v561_v19 = vld [vmem:[#allocation6 + $0xda8] sm:$0xff] }
 0x10f   :  { %v512_v27 = vld [vmem:[#allocation6 + $0xc20] sm:$0xff] }
 0x110   :  { %v560_v17 = vld [vmem:[#allocation6 + $0xda0] sm:$0xff] }
 0x111   :  { %3323 = vmatpush1.bf16.msra.mxu0 %v11860_v15  ;;  %3487 = vmatpush1.bf16.msra.mxu1 %v11862_v33  ;;  %v11925_v15 = vcombine.high %v508_v26, %v512_v27  ;;  %v11927_v33 = vcombine.high %v509_v28, %v513_v29 }
 0x112   :  { %3324 = vmatprep.subr.bf16.mxu0 %v11869_v34  ;;  %3488 = vmatprep.subr.bf16.mxu1 %v11871_v35  ;;  %v516_v34 = vld [vmem:[#allocation6 + $0xc40] sm:$0xff] }
 0x113   :  { %v520_v35 = vld [vmem:[#allocation6 + $0xc60] sm:$0xff] }
 0x115   :  { %3325 = vmatpush1.bf16.msra.mxu0 %v11868_v40  ;;  %3489 = vmatpush1.bf16.msra.mxu1 %v11870_v41  ;;  %v11924_v40 = vcombine.low %v508_v26, %v512_v27  ;;  %v11926_v41 = vcombine.low %v509_v28, %v513_v29  ;;  %v564_v26 = vld [vmem:[#allocation6 + $0xdc0] sm:$0xff]  ;;  %v565_v28 = vld [vmem:[#allocation6 + $0xdc8] sm:$0xff] }
 0x116   :  { %3326 = vmatprep.subr.bf16.mxu0 %v11877_v42  ;;  %3490 = vmatprep.subr.bf16.mxu1 %v11879_v43  ;;  %v11933_v42 = vcombine.high %v516_v34, %v520_v35  ;;  %v11935_v43 = vcombine.high %v517_v37, %v521_v38  ;;  %v568_v27 = vld [vmem:[#allocation6 + $0xde0] sm:$0xff]  ;;  %v569_v29 = vld [vmem:[#allocation6 + $0xde8] sm:$0xff] }
 0x119   :  { %3327 = vmatpush1.bf16.msra.mxu0 %v11876_v48  ;;  %3491 = vmatpush1.bf16.msra.mxu1 %v11878_v49  ;;  %v11932_v48 = vcombine.low %v516_v34, %v520_v35  ;;  %v11934_v49 = vcombine.low %v517_v37, %v521_v38  ;;  %v572_v34 = vld [vmem:[#allocation6 + $0xe00] sm:$0xff]  ;;  %v573_v37 = vld [vmem:[#allocation6 + $0xe08] sm:$0xff] }
 0x11a   :  { %3328 = vmatprep.subr.bf16.mxu0 %v11885_v50  ;;  %3492 = vmatprep.subr.bf16.mxu1 %v11887_v51  ;;  %v11941_v50 = vcombine.high %v524_v44, %v528_v45  ;;  %v11943_v51 = vcombine.high %v525_v25, %v529_v47  ;;  %v576_v35 = vld [vmem:[#allocation6 + $0xe20] sm:$0xff]  ;;  %v577_v38 = vld [vmem:[#allocation6 + $0xe28] sm:$0xff] }
 0x11d   :  { %3329 = vmatpush1.bf16.msra.mxu0 %v11884_v58  ;;  %3493 = vmatpush1.bf16.msra.mxu1 %v11886_v59  ;;  %v11940_v58 = vcombine.low %v524_v44, %v528_v45  ;;  %v11942_v59 = vcombine.low %v525_v25, %v529_v47  ;;  %v580_v44 = vld [vmem:[#allocation6 + $0xe40] sm:$0xff]  ;;  %v581_v25 = vld [vmem:[#allocation6 + $0xe48] sm:$0xff] }
 0x11e   :  { %3330 = vmatprep.subr.bf16.mxu0 %v11893_v60  ;;  %3494 = vmatprep.subr.bf16.mxu1 %v11895_v61  ;;  %v11949_v60 = vcombine.high %v532_v52, %v536_v54  ;;  %v11951_v61 = vcombine.high %v533_v55, %v537_v56  ;;  %v584_v45 = vld [vmem:[#allocation6 + $0xe60] sm:$0xff]  ;;  %v585_v47 = vld [vmem:[#allocation6 + $0xe68] sm:$0xff] }
 0x121   :  { %3331 = vmatpush1.bf16.msra.mxu0 %v11892_v2  ;;  %3495 = vmatpush1.bf16.msra.mxu1 %v11894_v3  ;;  %v11948_v2 = vcombine.low %v532_v52, %v536_v54  ;;  %v11950_v3 = vcombine.low %v533_v55, %v537_v56  ;;  %v588_v52 = vld [vmem:[#allocation6 + $0xe80] sm:$0xff]  ;;  %v589_v55 = vld [vmem:[#allocation6 + $0xe88] sm:$0xff] }
 0x122   :  { %3332 = vmatprep.subr.bf16.mxu0 %v11901_v4  ;;  %3496 = vmatprep.subr.bf16.mxu1 %v11903_v5  ;;  %v11957_v4 = vcombine.high %v540_v62, %v544_v63  ;;  %v11959_v5 = vcombine.high %v541_v0, %v545_v1  ;;  %v592_v54 = vld [vmem:[#allocation6 + $0xea0] sm:$0xff]  ;;  %v593_v56 = vld [vmem:[#allocation6 + $0xea8] sm:$0xff] }
 0x125   :  { %3333 = vmatpush1.bf16.msra.mxu0 %v11900_v10  ;;  %3497 = vmatpush1.bf16.msra.mxu1 %v11902_v11  ;;  %v11956_v10 = vcombine.low %v540_v62, %v544_v63  ;;  %v11958_v11 = vcombine.low %v541_v0, %v545_v1  ;;  %v596_v62 = vld [vmem:[#allocation6 + $0xec0] sm:$0xff]  ;;  %v597_v0 = vld [vmem:[#allocation6 + $0xec8] sm:$0xff] }
 0x126   :  { %3334 = vmatprep.subr.bf16.mxu0 %v11909_v13  ;;  %3498 = vmatprep.subr.bf16.mxu1 %v11911_v14  ;;  %v11965_v13 = vcombine.high %v548_v6, %v552_v7  ;;  %v11967_v14 = vcombine.high %v549_v8, %v553_v9  ;;  %v600_v63 = vld [vmem:[#allocation6 + $0xee0] sm:$0xff]  ;;  %v601_v1 = vld [vmem:[#allocation6 + $0xee8] sm:$0xff] }
 0x129   :  { %3335 = vmatpush1.bf16.msra.mxu0 %v11908_v20  ;;  %3499 = vmatpush1.bf16.msra.mxu1 %v11910_v21  ;;  %v11964_v20 = vcombine.low %v548_v6, %v552_v7  ;;  %v11966_v21 = vcombine.low %v549_v8, %v553_v9  ;;  %v604_v6 = vld [vmem:[#allocation6 + $0xf00] sm:$0xff]  ;;  %v605_v8 = vld [vmem:[#allocation6 + $0xf08] sm:$0xff] }
 0x12a   :  { %3336 = vmatprep.subr.bf16.mxu0 %v11917_v23  ;;  %3500 = vmatprep.subr.bf16.mxu1 %v11919_v24  ;;  %v11973_v23 = vcombine.high %v556_v16, %v560_v17  ;;  %v11975_v24 = vcombine.high %v557_v18, %v561_v19  ;;  %v608_v7 = vld [vmem:[#allocation6 + $0xf20] sm:$0xff]  ;;  %v609_v9 = vld [vmem:[#allocation6 + $0xf28] sm:$0xff] }
 0x12d   :  { %3337 = vmatpush1.bf16.msra.mxu0 %v11916_v30  ;;  %3501 = vmatpush1.bf16.msra.mxu1 %v11918_v31  ;;  %v11972_v30 = vcombine.low %v556_v16, %v560_v17  ;;  %v11974_v31 = vcombine.low %v557_v18, %v561_v19  ;;  %v612_v16 = vld [vmem:[#allocation6 + $0xf40] sm:$0xff]  ;;  %v613_v18 = vld [vmem:[#allocation6 + $0xf48] sm:$0xff] }
 0x12e   :  { %3347 = vmatprep.subr.bf16.mxu0 %v11925_v15  ;;  %3511 = vmatprep.subr.bf16.mxu1 %v11927_v33  ;;  %v11981_v15 = vcombine.high %v564_v26, %v568_v27  ;;  %v11983_v33 = vcombine.high %v565_v28, %v569_v29  ;;  %v616_v17 = vld [vmem:[#allocation6 + $0xf60] sm:$0xff]  ;;  %v617_v19 = vld [vmem:[#allocation6 + $0xf68] sm:$0xff] }
 0x130   :  { %3339 = vmatmul.mubr.bf16.vlgmr.msra.gmra.mrb[0].mxu0 %v13583_v36  ;;  %3503 = vmatmul.mubr.bf16.vlgmr.msra.gmra.mrb[0].mxu1 %v13583_v36 }
 0x131   :  { %3348 = vmatpush1.bf16.msra.mxu0 %v11924_v40  ;;  %3512 = vmatpush1.bf16.msra.mxu1 %v11926_v41  ;;  %v11980_v40 = vcombine.low %v564_v26, %v568_v27  ;;  %v11982_v41 = vcombine.low %v565_v28, %v569_v29  ;;  %v620_v26 = vld [vmem:[#allocation6 + $0xf80] sm:$0xff]  ;;  %v621_v28 = vld [vmem:[#allocation6 + $0xf88] sm:$0xff] }
 0x132   :  { %3349 = vmatprep.subr.bf16.mxu0 %v11933_v42  ;;  %3513 = vmatprep.subr.bf16.mxu1 %v11935_v43  ;;  %v11989_v42 = vcombine.high %v572_v34, %v576_v35  ;;  %v11991_v43 = vcombine.high %v573_v37, %v577_v38  ;;  %v624_v27 = vld [vmem:[#allocation6 + $0xfa0] sm:$0xff]  ;;  %v625_v29 = vld [vmem:[#allocation6 + $0xfa8] sm:$0xff] }
 0x133   :  { %3379 = vmatprep.mubr.bf16.mxu0 %v13589_v46  ;;  %3543 = vmatprep.mubr.bf16.mxu1 %v13589_v46 }
 0x135   :  { %3350 = vmatpush1.bf16.msra.mxu0 %v11932_v48  ;;  %3514 = vmatpush1.bf16.msra.mxu1 %v11934_v49  ;;  %v11988_v48 = vcombine.low %v572_v34, %v576_v35  ;;  %v11990_v49 = vcombine.low %v573_v37, %v577_v38  ;;  %v628_v34 = vld [vmem:[#allocation6 + $0xfc0] sm:$0xff]  ;;  %v629_v37 = vld [vmem:[#allocation6 + $0xfc8] sm:$0xff] }
 0x136   :  { %3351 = vmatprep.subr.bf16.mxu0 %v11941_v50  ;;  %3515 = vmatprep.subr.bf16.mxu1 %v11943_v51  ;;  %v11997_v50 = vcombine.high %v580_v44, %v584_v45  ;;  %v11999_v51 = vcombine.high %v581_v25, %v585_v47  ;;  %v632_v35 = vld [vmem:[#allocation6 + $0xfe0] sm:$0xff]  ;;  %v633_v38 = vld [vmem:[#allocation6 + $0xfe8] sm:$0xff] }
 0x139   :  { %3352 = vmatpush1.bf16.msra.mxu0 %v11940_v58  ;;  %3516 = vmatpush1.bf16.msra.mxu1 %v11942_v59  ;;  %v11996_v58 = vcombine.low %v580_v44, %v584_v45  ;;  %v11998_v59 = vcombine.low %v581_v25, %v585_v47  ;;  %v126_v44 = vld [vmem:[#allocation6 + $0x10] sm:$0xff]  ;;  %v127_v25 = vld [vmem:[#allocation6 + $0x18] sm:$0xff] }
 0x13a   :  { %3353 = vmatprep.subr.bf16.mxu0 %v11949_v60  ;;  %3517 = vmatprep.subr.bf16.mxu1 %v11951_v61  ;;  %v12005_v60 = vcombine.high %v588_v52, %v592_v54  ;;  %v12007_v61 = vcombine.high %v589_v55, %v593_v56  ;;  %v130_v45 = vld [vmem:[#allocation6 + $0x30] sm:$0xff]  ;;  %v131_v47 = vld [vmem:[#allocation6 + $0x38] sm:$0xff] }
 0x13d   :  { %3354 = vmatpush1.bf16.msra.mxu0 %v11948_v2  ;;  %3518 = vmatpush1.bf16.msra.mxu1 %v11950_v3  ;;  %v12004_v2 = vcombine.low %v588_v52, %v592_v54  ;;  %v12006_v3 = vcombine.low %v589_v55, %v593_v56  ;;  %v134_v52 = vld [vmem:[#allocation6 + $0x50] sm:$0xff]  ;;  %v13597_v55 = vcombine.low %v13585_v39, %v13585_v39  ;;  %v135_v56 = vld [vmem:[#allocation6 + $0x58] sm:$0xff] }
 0x13e   :  { %3355 = vmatprep.subr.bf16.mxu0 %v11957_v4  ;;  %3519 = vmatprep.subr.bf16.mxu1 %v11959_v5  ;;  %v12013_v4 = vcombine.high %v596_v62, %v600_v63  ;;  %v12015_v5 = vcombine.high %v597_v0, %v601_v1  ;;  %v138_v54 = vld [vmem:[#allocation6 + $0x70] sm:$0xff] }
 0x13f   :  { %v11552_v39 = vcombine.low %v134_v52, %v138_v54 }
 0x141   :  { %3356 = vmatpush1.bf16.msra.mxu0 %v11956_v10  ;;  %3520 = vmatpush1.bf16.msra.mxu1 %v11958_v11  ;;  %v12012_v10 = vcombine.low %v596_v62, %v600_v63  ;;  %v12014_v11 = vcombine.low %v597_v0, %v601_v1  ;;  %v142_v63 = vld [vmem:[#allocation6 + $0x90] sm:$0xff]  ;;  %v143_v1 = vld [vmem:[#allocation6 + $0x98] sm:$0xff] }
 0x142   :  { %3357 = vmatprep.subr.bf16.mxu0 %v11965_v13  ;;  %3521 = vmatprep.subr.bf16.mxu1 %v11967_v14  ;;  %v12021_v13 = vcombine.high %v604_v6, %v608_v7  ;;  %v12023_v14 = vcombine.high %v605_v8, %v609_v9  ;;  %v146_v0 = vld [vmem:[#allocation6 + $0xb0] sm:$0xff] }
 0x145   :  { %3358 = vmatpush1.bf16.msra.mxu0 %v11964_v20  ;;  %3522 = vmatpush1.bf16.msra.mxu1 %v11966_v21  ;;  %v12020_v20 = vcombine.low %v604_v6, %v608_v7  ;;  %v12022_v21 = vcombine.low %v605_v8, %v609_v9  ;;  %v150_v6 = vld [vmem:[#allocation6 + $0xd0] sm:$0xff]  ;;  %v151_v8 = vld [vmem:[#allocation6 + $0xd8] sm:$0xff] }
 0x146   :  { %3359 = vmatprep.subr.bf16.mxu0 %v11973_v23  ;;  %3523 = vmatprep.subr.bf16.mxu1 %v11975_v24  ;;  %v12029_v23 = vcombine.high %v612_v16, %v616_v17  ;;  %v12031_v24 = vcombine.high %v613_v18, %v617_v19  ;;  %v154_v7 = vld [vmem:[#allocation6 + $0xf0] sm:$0xff]  ;;  %v155_v9 = vld [vmem:[#allocation6 + $0xf8] sm:$0xff] }
 0x149   :  { %3360 = vmatpush1.bf16.msra.mxu0 %v11972_v30  ;;  %3524 = vmatpush1.bf16.msra.mxu1 %v11974_v31  ;;  %v12028_v30 = vcombine.low %v612_v16, %v616_v17  ;;  %v12030_v31 = vcombine.low %v613_v18, %v617_v19  ;;  %v158_v16 = vld [vmem:[#allocation6 + $0x110] sm:$0xff]  ;;  %v159_v18 = vld [vmem:[#allocation6 + $0x118] sm:$0xff] }
 0x14a   :  { %3361 = vmatprep.subr.bf16.mxu0 %v11981_v15  ;;  %3525 = vmatprep.subr.bf16.mxu1 %v11983_v33  ;;  %v12037_v15 = vcombine.high %v620_v26, %v624_v27  ;;  %v12039_v33 = vcombine.high %v621_v28, %v625_v29  ;;  %v162_v17 = vld [vmem:[#allocation6 + $0x130] sm:$0xff]  ;;  %v163_v19 = vld [vmem:[#allocation6 + $0x138] sm:$0xff] }
 0x14d   :  { %3362 = vmatpush1.bf16.msra.mxu0 %v11980_v40  ;;  %3526 = vmatpush1.bf16.msra.mxu1 %v11982_v41  ;;  %v12036_v40 = vcombine.low %v620_v26, %v624_v27  ;;  %v12038_v41 = vcombine.low %v621_v28, %v625_v29  ;;  %v170_v26 = vld [vmem:[#allocation6 + $0x170] sm:$0xff]  ;;  %v167_v27 = vld [vmem:[#allocation6 + $0x158] sm:$0xff]  ;;  %v11576_v29 = vcombine.low %v158_v16, %v162_v17 }
 0x14e   :  { %3363 = vmatprep.subr.bf16.mxu0 %v11989_v42  ;;  %3527 = vmatprep.subr.bf16.mxu1 %v11991_v43  ;;  %v12045_v42 = vcombine.high %v628_v34, %v632_v35  ;;  %v12047_v43 = vcombine.high %v629_v37, %v633_v38  ;;  %v171_v28 = vld [vmem:[#allocation6 + $0x178] sm:$0xff] }
 0x151   :  { %3364 = vmatpush1.bf16.msra.mxu0 %v11988_v48  ;;  %3528 = vmatpush1.bf16.msra.mxu1 %v11990_v49  ;;  %v12044_v48 = vcombine.low %v628_v34, %v632_v35  ;;  %v12046_v49 = vcombine.low %v629_v37, %v633_v38  ;;  %v178_v34 = vld [vmem:[#allocation6 + $0x1b0] sm:$0xff]  ;;  %v175_v35 = vld [vmem:[#allocation6 + $0x198] sm:$0xff] }
 0x152   :  { %3365 = vmatprep.subr.bf16.mxu0 %v11997_v50  ;;  %3529 = vmatprep.subr.bf16.mxu1 %v11999_v51  ;;  %v11545_v50 = vcombine.high %v126_v44, %v130_v45  ;;  %v11547_v51 = vcombine.high %v127_v25, %v131_v47  ;;  %v179_v37 = vld [vmem:[#allocation6 + $0x1b8] sm:$0xff] }
 0x155   :  { %3366 = vmatpush1.bf16.msra.mxu0 %v11996_v58  ;;  %3530 = vmatpush1.bf16.msra.mxu1 %v11998_v59  ;;  %v139_v58 = vld [vmem:[#allocation6 + $0x78] sm:$0xff]  ;;  %v11544_v59 = vcombine.low %v126_v44, %v130_v45  ;;  %v186_v44 = vld [vmem:[#allocation6 + $0x1f0] sm:$0xff] }
 0x156   :  { %3367 = vmatprep.subr.bf16.mxu0 %v12005_v60  ;;  %3531 = vmatprep.subr.bf16.mxu1 %v12007_v61  ;;  %v11546_v60 = vcombine.low %v127_v25, %v131_v47  ;;  %v11553_v61 = vcombine.high %v134_v52, %v138_v54  ;;  %v11555_v62 = vcombine.high %v135_v56, %v139_v58  ;;  %v183_v45 = vld [vmem:[#allocation6 + $0x1d8] sm:$0xff]  ;;  %v194_v52 = vld [vmem:[#allocation6 + $0x230] sm:$0xff] }
 0x157   :  { %v187_v25 = vld [vmem:[#allocation6 + $0x1f8] sm:$0xff] }
 0x158   :  { %v191_v54 = vld [vmem:[#allocation6 + $0x218] sm:$0xff] }
 0x159   :  { %3368 = vmatpush1.bf16.msra.mxu0 %v12004_v2  ;;  %3532 = vmatpush1.bf16.msra.mxu1 %v12006_v3  ;;  %v147_v2 = vld [vmem:[#allocation6 + $0xb8] sm:$0xff]  ;;  %v11554_v3 = vcombine.low %v135_v56, %v139_v58 }
 0x15a   :  { %3369 = vmatprep.subr.bf16.mxu0 %v12013_v4  ;;  %3533 = vmatprep.subr.bf16.mxu1 %v12015_v5  ;;  %v11561_v4 = vcombine.high %v142_v63, %v146_v0  ;;  %v11563_v5 = vcombine.high %v143_v1, %v147_v2  ;;  %v195_v56 = vld [vmem:[#allocation6 + $0x238] sm:$0xff] }
 0x15d   :  { %3370 = vmatpush1.bf16.msra.mxu0 %v12012_v10  ;;  %3534 = vmatpush1.bf16.msra.mxu1 %v12014_v11  ;;  %v11560_v10 = vcombine.low %v142_v63, %v146_v0  ;;  %v11562_v11 = vcombine.low %v143_v1, %v147_v2  ;;  %v202_v63 = vld [vmem:[#allocation6 + $0x270] sm:$0xff]  ;;  %v199_v0 = vld [vmem:[#allocation6 + $0x258] sm:$0xff] }
 0x15e   :  { %3371 = vmatprep.subr.bf16.mxu0 %v12021_v13  ;;  %3535 = vmatprep.subr.bf16.mxu1 %v12023_v14  ;;  %v11569_v13 = vcombine.high %v150_v6, %v154_v7  ;;  %v11571_v14 = vcombine.high %v151_v8, %v155_v9  ;;  %v203_v1 = vld [vmem:[#allocation6 + $0x278] sm:$0xff] }
 0x161   :  { %3372 = vmatpush1.bf16.msra.mxu0 %v12020_v20  ;;  %3536 = vmatpush1.bf16.msra.mxu1 %v12022_v21  ;;  %v11568_v20 = vcombine.low %v150_v6, %v154_v7  ;;  %v11570_v21 = vcombine.low %v151_v8, %v155_v9  ;;  %v210_v6 = vld [vmem:[#allocation6 + $0x2b0] sm:$0xff]  ;;  %v207_v7 = vld [vmem:[#allocation6 + $0x298] sm:$0xff] }
 0x162   :  { %3373 = vmatprep.subr.bf16.mxu0 %v12029_v23  ;;  %3537 = vmatprep.subr.bf16.mxu1 %v12031_v24  ;;  %v11577_v23 = vcombine.high %v158_v16, %v162_v17  ;;  %v166_v24 = vld [vmem:[#allocation6 + $0x150] sm:$0xff]  ;;  %v211_v8 = vld [vmem:[#allocation6 + $0x2b8] sm:$0xff] }
 0x163   :  { %v11584_v38 = vcombine.low %v166_v24, %v170_v26  ;;  %v218_v16 = vld [vmem:[#allocation6 + $0x2f0] sm:$0xff]  ;;  %v215_v17 = vld [vmem:[#allocation6 + $0x2d8] sm:$0xff] }
 0x165   :  { %3374 = vmatpush1.bf16.msra.mxu0 %v12028_v30  ;;  %3538 = vmatpush1.bf16.msra.mxu1 %v12030_v31  ;;  %v11578_v30 = vcombine.low %v159_v18, %v163_v19  ;;  %v11585_v31 = vcombine.high %v166_v24, %v170_v26  ;;  %v226_v24 = vld [vmem:[#allocation6 + $0x330] sm:$0xff]  ;;  %v223_v26 = vld [vmem:[#allocation6 + $0x318] sm:$0xff] }
 0x166   :  { %3375 = vmatprep.subr.bf16.mxu0 %v12037_v15  ;;  %3539 = vmatprep.subr.bf16.mxu1 %v12039_v33  ;;  %v11587_v15 = vcombine.high %v167_v27, %v171_v28  ;;  %v174_v33 = vld [vmem:[#allocation6 + $0x190] sm:$0xff] }
 0x167   :  { %v11592_v47 = vcombine.low %v174_v33, %v178_v34 }
 0x169   :  { %3376 = vmatpush1.bf16.msra.mxu0 %v12036_v40  ;;  %3540 = vmatpush1.bf16.msra.mxu1 %v12038_v41  ;;  %v11586_v40 = vcombine.low %v167_v27, %v171_v28  ;;  %v11593_v41 = vcombine.high %v174_v33, %v178_v34  ;;  %v227_v27 = vld [vmem:[#allocation6 + $0x338] sm:$0xff]  ;;  %v234_v33 = vld [vmem:[#allocation6 + $0x370] sm:$0xff] }
 0x16a   :  { %3377 = vmatprep.subr.bf16.mxu0 %v12045_v42  ;;  %3541 = vmatprep.subr.bf16.mxu1 %v12047_v43  ;;  %v11595_v42 = vcombine.high %v175_v35, %v179_v37  ;;  %v182_v43 = vld [vmem:[#allocation6 + $0x1d0] sm:$0xff]  ;;  %v231_v34 = vld [vmem:[#allocation6 + $0x358] sm:$0xff] }
 0x16b   :  { %v11600_v58 = vcombine.low %v182_v43, %v186_v44 }
 0x16d   :  { %3378 = vmatpush1.bf16.msra.mxu0 %v12044_v48  ;;  %3542 = vmatpush1.bf16.msra.mxu1 %v12046_v49  ;;  %v11594_v48 = vcombine.low %v175_v35, %v179_v37  ;;  %v11601_v49 = vcombine.high %v182_v43, %v186_v44  ;;  %v235_v35 = vld [vmem:[#allocation6 + $0x378] sm:$0xff]  ;;  %v242_v43 = vld [vmem:[#allocation6 + $0x3b0] sm:$0xff] }
 0x16e   :  { %3552 = vmatprep.subr.bf16.mxu0 %v11545_v50  ;;  %3716 = vmatprep.subr.bf16.mxu1 %v11547_v51  ;;  %v11603_v50 = vcombine.high %v183_v45, %v187_v25  ;;  %v190_v51 = vld [vmem:[#allocation6 + $0x210] sm:$0xff]  ;;  %v239_v44 = vld [vmem:[#allocation6 + $0x398] sm:$0xff] }
 0x16f   :  { %v11608_v2 = vcombine.low %v190_v51, %v194_v52 }
 0x170   :  { %3380 = vmatmul.mubr.bf16.vlgmr.msra.gmra.mrb[0].mxu0 %v13597_v55  ;;  %3544 = vmatmul.mubr.bf16.vlgmr.msra.gmra.mrb[0].mxu1 %v13597_v55 }
 0x171   :  { %3553 = vmatpush1.bf16.msra.mxu0 %v11544_v59  ;;  %3717 = vmatpush1.bf16.msra.mxu1 %v11546_v60  ;;  %v11602_v59 = vcombine.low %v183_v45, %v187_v25  ;;  %v11609_v60 = vcombine.high %v190_v51, %v194_v52  ;;  %v243_v45 = vld [vmem:[#allocation6 + $0x3b8] sm:$0xff]  ;;  %v250_v51 = vld [vmem:[#allocation6 + $0x3f0] sm:$0xff] }
 0x172   :  { %3554 = vmatprep.subr.bf16.mxu0 %v11553_v61  ;;  %3718 = vmatprep.subr.bf16.mxu1 %v11555_v62  ;;  %v11611_v61 = vcombine.high %v191_v54, %v195_v56  ;;  %v198_v62 = vld [vmem:[#allocation6 + $0x250] sm:$0xff]  ;;  %v247_v52 = vld [vmem:[#allocation6 + $0x3d8] sm:$0xff] }
 0x173   :  { %3584 = vmatprep.mubr.bf16.mxu0 %v13549_v57  ;;  %3748 = vmatprep.mubr.bf16.mxu1 %v13549_v57  ;;  %v11579_v57 = vcombine.high %v159_v18, %v163_v19  ;;  %v11616_v9 = vcombine.low %v198_v62, %v202_v63  ;;  %v219_v18 = vld [vmem:[#allocation6 + $0x2f8] sm:$0xff] }
 0x175   :  { %3555 = vmatpush1.bf16.msra.mxu0 %v11552_v39  ;;  %3719 = vmatpush1.bf16.msra.mxu1 %v11554_v3  ;;  %v11610_v39 = vcombine.low %v191_v54, %v195_v56  ;;  %v11617_v3 = vcombine.high %v198_v62, %v202_v63  ;;  %v251_v54 = vld [vmem:[#allocation6 + $0x3f8] sm:$0xff]  ;;  %v258_v62 = vld [vmem:[#allocation6 + $0x430] sm:$0xff] }
 0x176   :  { %3556 = vmatprep.subr.bf16.mxu0 %v11561_v4  ;;  %3720 = vmatprep.subr.bf16.mxu1 %v11563_v5  ;;  %v11619_v4 = vcombine.high %v199_v0, %v203_v1  ;;  %v206_v5 = vld [vmem:[#allocation6 + $0x290] sm:$0xff]  ;;  %v255_v63 = vld [vmem:[#allocation6 + $0x418] sm:$0xff] }
 0x177   :  { %v11624_v19 = vcombine.low %v206_v5, %v210_v6 }
 0x179   :  { %3557 = vmatpush1.bf16.msra.mxu0 %v11560_v10  ;;  %3721 = vmatpush1.bf16.msra.mxu1 %v11562_v11  ;;  %v11618_v10 = vcombine.low %v199_v0, %v203_v1  ;;  %v11625_v11 = vcombine.high %v206_v5, %v210_v6  ;;  %v259_v0 = vld [vmem:[#allocation6 + $0x438] sm:$0xff]  ;;  %v266_v5 = vld [vmem:[#allocation6 + $0x470] sm:$0xff] }
 0x17a   :  { %3558 = vmatprep.subr.bf16.mxu0 %v11569_v13  ;;  %3722 = vmatprep.subr.bf16.mxu1 %v11571_v14  ;;  %v11627_v13 = vcombine.high %v207_v7, %v211_v8  ;;  %v214_v14 = vld [vmem:[#allocation6 + $0x2d0] sm:$0xff]  ;;  %v263_v6 = vld [vmem:[#allocation6 + $0x458] sm:$0xff] }
 0x17b   :  { %v11632_v28 = vcombine.low %v214_v14, %v218_v16 }
 0x17d   :  { %3559 = vmatpush1.bf16.msra.mxu0 %v11568_v20  ;;  %3723 = vmatpush1.bf16.msra.mxu1 %v11570_v21  ;;  %v11626_v20 = vcombine.low %v207_v7, %v211_v8  ;;  %v11633_v21 = vcombine.high %v214_v14, %v218_v16  ;;  %v267_v7 = vld [vmem:[#allocation6 + $0x478] sm:$0xff]  ;;  %v274_v14 = vld [vmem:[#allocation6 + $0x4b0] sm:$0xff] }
 0x17e   :  { %3560 = vmatprep.subr.bf16.mxu0 %v11577_v23  ;;  %3724 = vmatprep.subr.bf16.mxu1 %v11579_v57  ;;  %v11635_v23 = vcombine.high %v215_v17, %v219_v18  ;;  %v222_v57 = vld [vmem:[#allocation6 + $0x310] sm:$0xff]  ;;  %v271_v16 = vld [vmem:[#allocation6 + $0x498] sm:$0xff] }
 0x17f   :  { %v11640_v37 = vcombine.low %v222_v57, %v226_v24 }
 0x181   :  { %3561 = vmatpush1.bf16.msra.mxu0 %v11576_v29  ;;  %3725 = vmatpush1.bf16.msra.mxu1 %v11578_v30  ;;  %v11634_v29 = vcombine.low %v215_v17, %v219_v18  ;;  %v11641_v30 = vcombine.high %v222_v57, %v226_v24  ;;  %v275_v17 = vld [vmem:[#allocation6 + $0x4b8] sm:$0xff]  ;;  %v282_v57 = vld [vmem:[#allocation6 + $0x4f0] sm:$0xff] }
 0x182   :  { %3562 = vmatprep.subr.bf16.mxu0 %v11585_v31  ;;  %3726 = vmatprep.subr.bf16.mxu1 %v11587_v15  ;;  %v11643_v31 = vcombine.high %v223_v26, %v227_v27  ;;  %v230_v15 = vld [vmem:[#allocation6 + $0x350] sm:$0xff]  ;;  %v279_v24 = vld [vmem:[#allocation6 + $0x4d8] sm:$0xff] }
 0x183   :  { %v11648_v25 = vcombine.low %v230_v15, %v234_v33 }
 0x185   :  { %3563 = vmatpush1.bf16.msra.mxu0 %v11584_v38  ;;  %3727 = vmatpush1.bf16.msra.mxu1 %v11586_v40  ;;  %v11642_v38 = vcombine.low %v223_v26, %v227_v27  ;;  %v11649_v40 = vcombine.high %v230_v15, %v234_v33  ;;  %v283_v26 = vld [vmem:[#allocation6 + $0x4f8] sm:$0xff] }
 0x186   :  { %3564 = vmatprep.subr.bf16.mxu0 %v11593_v41  ;;  %3728 = vmatprep.subr.bf16.mxu1 %v11595_v42  ;;  %v11651_v41 = vcombine.high %v231_v34, %v235_v35  ;;  %v238_v42 = vld [vmem:[#allocation6 + $0x390] sm:$0xff]  ;;  %v287_v15 = vld [vmem:[#allocation6 + $0x518] sm:$0xff] }
 0x187   :  { %v11656_v56 = vcombine.low %v238_v42, %v242_v43  ;;  %v291_v33 = vld [vmem:[#allocation6 + $0x538] sm:$0xff] }
 0x189   :  { %3565 = vmatpush1.bf16.msra.mxu0 %v11592_v47  ;;  %3729 = vmatpush1.bf16.msra.mxu1 %v11594_v48  ;;  %v11650_v47 = vcombine.low %v231_v34, %v235_v35  ;;  %v11657_v48 = vcombine.high %v238_v42, %v242_v43  ;;  %v11698_v35 = vcombine.low %v279_v24, %v283_v26  ;;  %v299_v42 = vld [vmem:[#allocation6 + $0x578] sm:$0xff] }
 0x18a   :  { %3566 = vmatprep.subr.bf16.mxu0 %v11601_v49  ;;  %3730 = vmatprep.subr.bf16.mxu1 %v11603_v50  ;;  %v11659_v49 = vcombine.high %v239_v44, %v243_v45  ;;  %v246_v50 = vld [vmem:[#allocation6 + $0x3d0] sm:$0xff] }
 0x18b   :  { %v11664_v1 = vcombine.low %v246_v50, %v250_v51 }
 0x18d   :  { %3567 = vmatpush1.bf16.msra.mxu0 %v11600_v58  ;;  %3731 = vmatpush1.bf16.msra.mxu1 %v11602_v59  ;;  %v11658_v58 = vcombine.low %v239_v44, %v243_v45  ;;  %v11665_v59 = vcombine.high %v246_v50, %v250_v51  ;;  %v11706_v44 = vcombine.low %v287_v15, %v291_v33  ;;  %v307_v50 = vld [vmem:[#allocation6 + $0x5b8] sm:$0xff] }
 0x18e   :  { %3568 = vmatprep.subr.bf16.mxu0 %v11609_v60  ;;  %3732 = vmatprep.subr.bf16.mxu1 %v11611_v61  ;;  %v11667_v60 = vcombine.high %v247_v52, %v251_v54  ;;  %v254_v61 = vld [vmem:[#allocation6 + $0x410] sm:$0xff] }
 0x18f   :  { %v11672_v8 = vcombine.low %v254_v61, %v258_v62 }
 0x191   :  { %3569 = vmatpush1.bf16.msra.mxu0 %v11608_v2  ;;  %3733 = vmatpush1.bf16.msra.mxu1 %v11610_v39  ;;  %v11666_v2 = vcombine.low %v247_v52, %v251_v54  ;;  %v11673_v39 = vcombine.high %v254_v61, %v258_v62  ;;  %v315_v61 = vld [vmem:[#allocation6 + $0x5f8] sm:$0xff] }
 0x192   :  { %3570 = vmatprep.subr.bf16.mxu0 %v11617_v3  ;;  %3734 = vmatprep.subr.bf16.mxu1 %v11619_v4  ;;  %v11675_v3 = vcombine.high %v255_v63, %v259_v0  ;;  %v262_v4 = vld [vmem:[#allocation6 + $0x450] sm:$0xff] }
 0x193   :  { %v11680_v18 = vcombine.low %v262_v4, %v266_v5 }
 0x195   :  { %3571 = vmatpush1.bf16.msra.mxu0 %v11616_v9  ;;  %3735 = vmatpush1.bf16.msra.mxu1 %v11618_v10  ;;  %v11674_v9 = vcombine.low %v255_v63, %v259_v0  ;;  %v11681_v10 = vcombine.high %v262_v4, %v266_v5  ;;  %v323_v4 = vld [vmem:[#allocation6 + $0x638] sm:$0xff] }
 0x196   :  { %3572 = vmatprep.subr.bf16.mxu0 %v11625_v11  ;;  %3736 = vmatprep.subr.bf16.mxu1 %v11627_v13  ;;  %v11683_v11 = vcombine.high %v263_v6, %v267_v7  ;;  %v270_v13 = vld [vmem:[#allocation6 + $0x490] sm:$0xff] }
 0x197   :  { %v11688_v27 = vcombine.low %v270_v13, %v274_v14 }
 0x199   :  { %3573 = vmatpush1.bf16.msra.mxu0 %v11624_v19  ;;  %3737 = vmatpush1.bf16.msra.mxu1 %v11626_v20  ;;  %v11682_v19 = vcombine.low %v263_v6, %v267_v7  ;;  %v11689_v20 = vcombine.high %v270_v13, %v274_v14  ;;  %v331_v13 = vld [vmem:[#allocation6 + $0x678] sm:$0xff] }
 0x19a   :  { %3574 = vmatprep.subr.bf16.mxu0 %v11633_v21  ;;  %3738 = vmatprep.subr.bf16.mxu1 %v11635_v23  ;;  %v11691_v21 = vcombine.high %v271_v16, %v275_v17  ;;  %v278_v23 = vld [vmem:[#allocation6 + $0x4d0] sm:$0xff] }
 0x19b   :  { %v11696_v34 = vcombine.low %v278_v23, %v282_v57 }
 0x19d   :  { %3575 = vmatpush1.bf16.msra.mxu0 %v11632_v28  ;;  %3739 = vmatpush1.bf16.msra.mxu1 %v11634_v29  ;;  %v11697_v28 = vcombine.high %v278_v23, %v282_v57  ;;  %v11699_v29 = vcombine.high %v279_v24, %v283_v26  ;;  %v339_v23 = vld [vmem:[#allocation6 + $0x6b8] sm:$0xff] }
 0x19e   :  { %3576 = vmatprep.subr.bf16.mxu0 %v11641_v30  ;;  %3740 = vmatprep.subr.bf16.mxu1 %v11643_v31  ;;  %v286_v30 = vld [vmem:[#allocation6 + $0x510] sm:$0xff] }
 0x19f   :  { %v290_v31 = vld [vmem:[#allocation6 + $0x530] sm:$0xff] }
 0x1a0   :  { %v11704_v43 = vcombine.low %v286_v30, %v290_v31 }
 0x1a1   :  { %3577 = vmatpush1.bf16.msra.mxu0 %v11640_v37  ;;  %3741 = vmatpush1.bf16.msra.mxu1 %v11642_v38  ;;  %v11705_v37 = vcombine.high %v286_v30, %v290_v31  ;;  %v294_v38 = vld [vmem:[#allocation6 + $0x550] sm:$0xff]  ;;  %v347_v30 = vld [vmem:[#allocation6 + $0x6f8] sm:$0xff] }
 0x1a2   :  { %3578 = vmatprep.subr.bf16.mxu0 %v11649_v40  ;;  %3742 = vmatprep.subr.bf16.mxu1 %v11651_v41  ;;  %v298_v40 = vld [vmem:[#allocation6 + $0x570] sm:$0xff]  ;;  %v295_v41 = vld [vmem:[#allocation6 + $0x558] sm:$0xff] }
 0x1a3   :  { %v11713_v45 = vcombine.high %v294_v38, %v298_v40  ;;  %v11712_v51 = vcombine.low %v294_v38, %v298_v40  ;;  %v11714_v52 = vcombine.low %v295_v41, %v299_v42  ;;  %v355_v38 = vld [vmem:[#allocation6 + $0x738] sm:$0xff] }
 0x1a5   :  { %3579 = vmatpush1.bf16.msra.mxu0 %v11648_v25  ;;  %3743 = vmatpush1.bf16.msra.mxu1 %v11650_v47  ;;  %v11715_v25 = vcombine.high %v295_v41, %v299_v42  ;;  %v302_v47 = vld [vmem:[#allocation6 + $0x590] sm:$0xff] }
 0x1a6   :  { %3580 = vmatprep.subr.bf16.mxu0 %v11657_v48  ;;  %3744 = vmatprep.subr.bf16.mxu1 %v11659_v49  ;;  %v306_v48 = vld [vmem:[#allocation6 + $0x5b0] sm:$0xff]  ;;  %v303_v49 = vld [vmem:[#allocation6 + $0x598] sm:$0xff] }
 0x1a7   :  { %v11721_v54 = vcombine.high %v302_v47, %v306_v48  ;;  %v11720_v62 = vcombine.low %v302_v47, %v306_v48  ;;  %v11722_v63 = vcombine.low %v303_v49, %v307_v50  ;;  %v363_v47 = vld [vmem:[#allocation6 + $0x778] sm:$0xff] }
 0x1a9   :  { %3581 = vmatpush1.bf16.msra.mxu0 %v11656_v56  ;;  %3745 = vmatpush1.bf16.msra.mxu1 %v11658_v58  ;;  %v11723_v56 = vcombine.high %v303_v49, %v307_v50  ;;  %v310_v58 = vld [vmem:[#allocation6 + $0x5d0] sm:$0xff] }
 0x1aa   :  { %3582 = vmatprep.subr.bf16.mxu0 %v11665_v59  ;;  %3746 = vmatprep.subr.bf16.mxu1 %v11667_v60  ;;  %v314_v59 = vld [vmem:[#allocation6 + $0x5f0] sm:$0xff]  ;;  %v311_v60 = vld [vmem:[#allocation6 + $0x5d8] sm:$0xff] }
 0x1ab   :  { %v11729_v0 = vcombine.high %v310_v58, %v314_v59  ;;  %v11728_v5 = vcombine.low %v310_v58, %v314_v59  ;;  %v11730_v6 = vcombine.low %v311_v60, %v315_v61  ;;  %v371_v58 = vld [vmem:[#allocation6 + $0x7b8] sm:$0xff] }
 0x1ad   :  { %3583 = vmatpush1.bf16.msra.mxu0 %v11664_v1  ;;  %3747 = vmatpush1.bf16.msra.mxu1 %v11666_v2  ;;  %v11731_v1 = vcombine.high %v311_v60, %v315_v61  ;;  %v318_v2 = vld [vmem:[#allocation6 + $0x610] sm:$0xff] }
 0x1ae   :  { %3593 = vmatprep.subr.bf16.mxu0 %v11673_v39  ;;  %3757 = vmatprep.subr.bf16.mxu1 %v11675_v3  ;;  %v322_v39 = vld [vmem:[#allocation6 + $0x630] sm:$0xff]  ;;  %v319_v3 = vld [vmem:[#allocation6 + $0x618] sm:$0xff] }
 0x1af   :  { %v11737_v7 = vcombine.high %v318_v2, %v322_v39  ;;  %v11736_v14 = vcombine.low %v318_v2, %v322_v39  ;;  %v379_v2 = vld [vmem:[#allocation6 + $0x7f8] sm:$0xff] }
 0x1b0   :  { %3585 = vmatmul.mubr.bf16.vlgmr.msra.gmra.mrb[4].mxu0 %v13555_v12  ;;  %3749 = vmatmul.mubr.bf16.vlgmr.msra.gmra.mrb[4].mxu1 %v13555_v12  ;;  %v11690_v12 = vcombine.low %v271_v16, %v275_v17  ;;  %v11738_v16 = vcombine.low %v319_v3, %v323_v4 }
 0x1b1   :  { %3594 = vmatpush1.bf16.msra.mxu0 %v11672_v8  ;;  %3758 = vmatpush1.bf16.msra.mxu1 %v11674_v9  ;;  %v11739_v8 = vcombine.high %v319_v3, %v323_v4  ;;  %v326_v9 = vld [vmem:[#allocation6 + $0x650] sm:$0xff] }
 0x1b2   :  { %3595 = vmatprep.subr.bf16.mxu0 %v11681_v10  ;;  %3759 = vmatprep.subr.bf16.mxu1 %v11683_v11  ;;  %v330_v10 = vld [vmem:[#allocation6 + $0x670] sm:$0xff]  ;;  %v327_v11 = vld [vmem:[#allocation6 + $0x658] sm:$0xff] }
 0x1b3   :  { %3625 = vmatprep.mubr.bf16.mxu0 %v13561_v22  ;;  %3789 = vmatprep.mubr.bf16.mxu1 %v13561_v22  ;;  %v11707_v22 = vcombine.high %v287_v15, %v291_v33  ;;  %v11745_v17 = vcombine.high %v326_v9, %v330_v10  ;;  %v11744_v57 = vcombine.low %v326_v9, %v330_v10  ;;  %v387_v9 = vld [vmem:[#allocation6 + $0x838] sm:$0xff] }
 0x1b4   :  { %v11746_v24 = vcombine.low %v327_v11, %v331_v13 }
 0x1b5   :  { %3596 = vmatpush1.bf16.msra.mxu0 %v11680_v18  ;;  %3760 = vmatpush1.bf16.msra.mxu1 %v11682_v19  ;;  %v11747_v18 = vcombine.high %v327_v11, %v331_v13  ;;  %v334_v19 = vld [vmem:[#allocation6 + $0x690] sm:$0xff] }
 0x1b6   :  { %3597 = vmatprep.subr.bf16.mxu0 %v11689_v20  ;;  %3761 = vmatprep.subr.bf16.mxu1 %v11691_v21  ;;  %v338_v20 = vld [vmem:[#allocation6 + $0x6b0] sm:$0xff]  ;;  %v335_v21 = vld [vmem:[#allocation6 + $0x698] sm:$0xff] }
 0x1b7   :  { %v11753_v26 = vcombine.high %v334_v19, %v338_v20  ;;  %v11752_v31 = vcombine.low %v334_v19, %v338_v20  ;;  %v11754_v15 = vcombine.low %v335_v21, %v339_v23  ;;  %v395_v19 = vld [vmem:[#allocation6 + $0x878] sm:$0xff] }
 0x1b9   :  { %3598 = vmatpush1.bf16.msra.mxu0 %v11688_v27  ;;  %3762 = vmatpush1.bf16.msra.mxu1 %v11690_v12  ;;  %v11755_v27 = vcombine.high %v335_v21, %v339_v23  ;;  %v342_v12 = vld [vmem:[#allocation6 + $0x6d0] sm:$0xff] }
 0x1ba   :  { %3599 = vmatprep.subr.bf16.mxu0 %v11697_v28  ;;  %3763 = vmatprep.subr.bf16.mxu1 %v11699_v29  ;;  %v346_v28 = vld [vmem:[#allocation6 + $0x6f0] sm:$0xff]  ;;  %v343_v29 = vld [vmem:[#allocation6 + $0x6d8] sm:$0xff] }
 0x1bb   :  { %v11761_v33 = vcombine.high %v342_v12, %v346_v28  ;;  %v11760_v40 = vcombine.low %v342_v12, %v346_v28  ;;  %v11762_v41 = vcombine.low %v343_v29, %v347_v30  ;;  %v403_v12 = vld [vmem:[#allocation6 + $0x8b8] sm:$0xff] }
 0x1bd   :  { %3600 = vmatpush1.bf16.msra.mxu0 %v11696_v34  ;;  %3764 = vmatpush1.bf16.msra.mxu1 %v11698_v35  ;;  %v11763_v34 = vcombine.high %v343_v29, %v347_v30  ;;  %v350_v35 = vld [vmem:[#allocation6 + $0x710] sm:$0xff] }
 0x1be   :  { %3601 = vmatprep.subr.bf16.mxu0 %v11705_v37  ;;  %3765 = vmatprep.subr.bf16.mxu1 %v11707_v22  ;;  %v354_v37 = vld [vmem:[#allocation6 + $0x730] sm:$0xff]  ;;  %v351_v22 = vld [vmem:[#allocation6 + $0x718] sm:$0xff] }
 0x1bf   :  { %v11769_v42 = vcombine.high %v350_v35, %v354_v37  ;;  %v11768_v48 = vcombine.low %v350_v35, %v354_v37  ;;  %v11770_v49 = vcombine.low %v351_v22, %v355_v38  ;;  %v411_v35 = vld [vmem:[#allocation6 + $0x8f8] sm:$0xff] }
 0x1c1   :  { %3602 = vmatpush1.bf16.msra.mxu0 %v11704_v43  ;;  %3766 = vmatpush1.bf16.msra.mxu1 %v11706_v44  ;;  %v11771_v43 = vcombine.high %v351_v22, %v355_v38  ;;  %v358_v44 = vld [vmem:[#allocation6 + $0x750] sm:$0xff] }
 0x1c2   :  { %3603 = vmatprep.subr.bf16.mxu0 %v11713_v45  ;;  %3767 = vmatprep.subr.bf16.mxu1 %v11715_v25  ;;  %v362_v45 = vld [vmem:[#allocation6 + $0x770] sm:$0xff]  ;;  %v359_v25 = vld [vmem:[#allocation6 + $0x758] sm:$0xff] }
 0x1c3   :  { %v11777_v50 = vcombine.high %v358_v44, %v362_v45  ;;  %v11776_v59 = vcombine.low %v358_v44, %v362_v45  ;;  %v11778_v60 = vcombine.low %v359_v25, %v363_v47 }
 0x1c5   :  { %3604 = vmatpush1.bf16.msra.mxu0 %v11712_v51  ;;  %3768 = vmatpush1.bf16.msra.mxu1 %v11714_v52  ;;  %v11779_v51 = vcombine.high %v359_v25, %v363_v47  ;;  %v366_v52 = vld [vmem:[#allocation6 + $0x790] sm:$0xff] }
 0x1c6   :  { %3605 = vmatprep.subr.bf16.mxu0 %v11721_v54  ;;  %3769 = vmatprep.subr.bf16.mxu1 %v11723_v56  ;;  %v370_v54 = vld [vmem:[#allocation6 + $0x7b0] sm:$0xff]  ;;  %v367_v56 = vld [vmem:[#allocation6 + $0x798] sm:$0xff] }
 0x1c7   :  { %v11785_v61 = vcombine.high %v366_v52, %v370_v54  ;;  %v11784_v39 = vcombine.low %v366_v52, %v370_v54  ;;  %v11786_v3 = vcombine.low %v367_v56, %v371_v58  ;;  %v422_v47 = vld [vmem:[#allocation6 + $0x950] sm:$0xff] }
 0x1c9   :  { %3606 = vmatpush1.bf16.msra.mxu0 %v11720_v62  ;;  %3770 = vmatpush1.bf16.msra.mxu1 %v11722_v63  ;;  %v11787_v62 = vcombine.high %v367_v56, %v371_v58  ;;  %v374_v63 = vld [vmem:[#allocation6 + $0x7d0] sm:$0xff] }
 0x1ca   :  { %3607 = vmatprep.subr.bf16.mxu0 %v11729_v0  ;;  %3771 = vmatprep.subr.bf16.mxu1 %v11731_v1  ;;  %v378_v0 = vld [vmem:[#allocation6 + $0x7f0] sm:$0xff]  ;;  %v375_v1 = vld [vmem:[#allocation6 + $0x7d8] sm:$0xff] }
 0x1cb   :  { %v11793_v4 = vcombine.high %v374_v63, %v378_v0  ;;  %v11792_v10 = vcombine.low %v374_v63, %v378_v0  ;;  %v11794_v11 = vcombine.low %v375_v1, %v379_v2  ;;  %v430_v58 = vld [vmem:[#allocation6 + $0x990] sm:$0xff] }
 0x1cd   :  { %3608 = vmatpush1.bf16.msra.mxu0 %v11728_v5  ;;  %3772 = vmatpush1.bf16.msra.mxu1 %v11730_v6  ;;  %v11795_v5 = vcombine.high %v375_v1, %v379_v2  ;;  %v382_v6 = vld [vmem:[#allocation6 + $0x810] sm:$0xff] }
 0x1ce   :  { %3609 = vmatprep.subr.bf16.mxu0 %v11737_v7  ;;  %3773 = vmatprep.subr.bf16.mxu1 %v11739_v8  ;;  %v386_v7 = vld [vmem:[#allocation6 + $0x830] sm:$0xff]  ;;  %v383_v8 = vld [vmem:[#allocation6 + $0x818] sm:$0xff] }
 0x1cf   :  { %v11801_v13 = vcombine.high %v382_v6, %v386_v7  ;;  %v11800_v20 = vcombine.low %v382_v6, %v386_v7  ;;  %v11802_v21 = vcombine.low %v383_v8, %v387_v9  ;;  %v438_v2 = vld [vmem:[#allocation6 + $0x9d0] sm:$0xff] }
 0x1d1   :  { %3610 = vmatpush1.bf16.msra.mxu0 %v11736_v14  ;;  %3774 = vmatpush1.bf16.msra.mxu1 %v11738_v16  ;;  %v11803_v14 = vcombine.high %v383_v8, %v387_v9  ;;  %v390_v16 = vld [vmem:[#allocation6 + $0x850] sm:$0xff] }
 0x1d2   :  { %3611 = vmatprep.subr.bf16.mxu0 %v11745_v17  ;;  %3775 = vmatprep.subr.bf16.mxu1 %v11747_v18  ;;  %v394_v17 = vld [vmem:[#allocation6 + $0x870] sm:$0xff]  ;;  %v391_v18 = vld [vmem:[#allocation6 + $0x858] sm:$0xff] }
 0x1d3   :  { %v11809_v23 = vcombine.high %v390_v16, %v394_v17  ;;  %v11808_v28 = vcombine.low %v390_v16, %v394_v17  ;;  %v11810_v29 = vcombine.low %v391_v18, %v395_v19  ;;  %v446_v9 = vld [vmem:[#allocation6 + $0xa10] sm:$0xff] }
 0x1d5   :  { %3612 = vmatpush1.bf16.msra.mxu0 %v11744_v57  ;;  %3776 = vmatpush1.bf16.msra.mxu1 %v11746_v24  ;;  %v11811_v57 = vcombine.high %v391_v18, %v395_v19  ;;  %v398_v24 = vld [vmem:[#allocation6 + $0x890] sm:$0xff] }
 0x1d6   :  { %3613 = vmatprep.subr.bf16.mxu0 %v11753_v26  ;;  %3777 = vmatprep.subr.bf16.mxu1 %v11755_v27  ;;  %v402_v26 = vld [vmem:[#allocation6 + $0x8b0] sm:$0xff]  ;;  %v399_v27 = vld [vmem:[#allocation6 + $0x898] sm:$0xff] }
 0x1d7   :  { %v11817_v30 = vcombine.high %v398_v24, %v402_v26  ;;  %v11816_v37 = vcombine.low %v398_v24, %v402_v26  ;;  %v454_v19 = vld [vmem:[#allocation6 + $0xa50] sm:$0xff] }
 0x1d9   :  { %3614 = vmatpush1.bf16.msra.mxu0 %v11752_v31  ;;  %3778 = vmatpush1.bf16.msra.mxu1 %v11754_v15  ;;  %v11819_v31 = vcombine.high %v399_v27, %v403_v12  ;;  %v406_v15 = vld [vmem:[#allocation6 + $0x8d0] sm:$0xff] }
 0x1da   :  { %3615 = vmatprep.subr.bf16.mxu0 %v11761_v33  ;;  %3779 = vmatprep.subr.bf16.mxu1 %v11763_v34  ;;  %v410_v33 = vld [vmem:[#allocation6 + $0x8f0] sm:$0xff]  ;;  %v407_v34 = vld [vmem:[#allocation6 + $0x8d8] sm:$0xff] }
 0x1db   :  { %v11825_v22 = vcombine.high %v406_v15, %v410_v33  ;;  %v11827_v38 = vcombine.high %v407_v34, %v411_v35  ;;  %v11824_v44 = vcombine.low %v406_v15, %v410_v33  ;;  %v11826_v45 = vcombine.low %v407_v34, %v411_v35  ;;  %v470_v35 = vld [vmem:[#allocation6 + $0xad0] sm:$0xff] }
 0x1dd   :  { %3616 = vmatpush1.bf16.msra.mxu0 %v11760_v40  ;;  %3780 = vmatpush1.bf16.msra.mxu1 %v11762_v41  ;;  %v414_v40 = vld [vmem:[#allocation6 + $0x910] sm:$0xff] }
 0x1de   :  { %3617 = vmatprep.subr.bf16.mxu0 %v11769_v42  ;;  %3781 = vmatprep.subr.bf16.mxu1 %v11771_v43  ;;  %v418_v41 = vld [vmem:[#allocation6 + $0x930] sm:$0xff]  ;;  %v415_v42 = vld [vmem:[#allocation6 + $0x918] sm:$0xff] }
 0x1df   :  { %v419_v43 = vld [vmem:[#allocation6 + $0x938] sm:$0xff]  ;;  %v11833_v25 = vcombine.high %v414_v40, %v418_v41 }
 0x1e0   :  { %v11834_v52 = vcombine.low %v415_v42, %v419_v43 }
 0x1e1   :  { %3618 = vmatpush1.bf16.msra.mxu0 %v11768_v48  ;;  %3782 = vmatpush1.bf16.msra.mxu1 %v11770_v49  ;;  %v426_v48 = vld [vmem:[#allocation6 + $0x970] sm:$0xff]  ;;  %v423_v49 = vld [vmem:[#allocation6 + $0x958] sm:$0xff] }
 0x1e2   :  { %3619 = vmatprep.subr.bf16.mxu0 %v11777_v50  ;;  %3783 = vmatprep.subr.bf16.mxu1 %v11779_v51  ;;  %v427_v50 = vld [vmem:[#allocation6 + $0x978] sm:$0xff]  ;;  %v11832_v51 = vcombine.low %v414_v40, %v418_v41  ;;  %v11841_v54 = vcombine.high %v422_v47, %v426_v48 }
 0x1e3   :  { %v11843_v56 = vcombine.high %v423_v49, %v427_v50  ;;  %v11842_v63 = vcombine.low %v423_v49, %v427_v50  ;;  %v486_v50 = vld [vmem:[#allocation6 + $0xb50] sm:$0xff] }
 0x1e5   :  { %3620 = vmatpush1.bf16.msra.mxu0 %v11776_v59  ;;  %3784 = vmatpush1.bf16.msra.mxu1 %v11778_v60  ;;  %v434_v59 = vld [vmem:[#allocation6 + $0x9b0] sm:$0xff]  ;;  %v431_v60 = vld [vmem:[#allocation6 + $0x998] sm:$0xff] }
 0x1e6   :  { %3621 = vmatprep.subr.bf16.mxu0 %v11785_v61  ;;  %3785 = vmatprep.subr.bf16.mxu1 %v11787_v62  ;;  %v435_v61 = vld [vmem:[#allocation6 + $0x9b8] sm:$0xff]  ;;  %v11840_v62 = vcombine.low %v422_v47, %v426_v48  ;;  %v11849_v0 = vcombine.high %v430_v58, %v434_v59 }
 0x1e7   :  { %v11851_v1 = vcombine.high %v431_v60, %v435_v61  ;;  %v11850_v6 = vcombine.low %v431_v60, %v435_v61  ;;  %v494_v61 = vld [vmem:[#allocation6 + $0xb90] sm:$0xff] }
 0x1e9   :  { %3622 = vmatpush1.bf16.msra.mxu0 %v11784_v39  ;;  %3786 = vmatpush1.bf16.msra.mxu1 %v11786_v3  ;;  %v442_v39 = vld [vmem:[#allocation6 + $0x9f0] sm:$0xff]  ;;  %v439_v3 = vld [vmem:[#allocation6 + $0x9d8] sm:$0xff] }
 0x1ea   :  { %3623 = vmatprep.subr.bf16.mxu0 %v11793_v4  ;;  %3787 = vmatprep.subr.bf16.mxu1 %v11795_v5  ;;  %v443_v4 = vld [vmem:[#allocation6 + $0x9f8] sm:$0xff]  ;;  %v11848_v5 = vcombine.low %v430_v58, %v434_v59  ;;  %v11857_v7 = vcombine.high %v438_v2, %v442_v39 }
 0x1eb   :  { %v11859_v8 = vcombine.high %v439_v3, %v443_v4  ;;  %v11858_v16 = vcombine.low %v439_v3, %v443_v4  ;;  %v502_v4 = vld [vmem:[#allocation6 + $0xbd0] sm:$0xff] }
 0x1ed   :  { %3624 = vmatpush1.bf16.msra.mxu0 %v11792_v10  ;;  %3788 = vmatpush1.bf16.msra.mxu1 %v11794_v11  ;;  %v450_v10 = vld [vmem:[#allocation6 + $0xa30] sm:$0xff]  ;;  %v447_v11 = vld [vmem:[#allocation6 + $0xa18] sm:$0xff] }
 0x1ee   :  { %3634 = vmatprep.subr.bf16.mxu0 %v11801_v13  ;;  %3798 = vmatprep.subr.bf16.mxu1 %v11803_v14  ;;  %v451_v13 = vld [vmem:[#allocation6 + $0xa38] sm:$0xff]  ;;  %v11856_v14 = vcombine.low %v438_v2, %v442_v39  ;;  %v11865_v17 = vcombine.high %v446_v9, %v450_v10 }
 0x1ef   :  { %v11867_v18 = vcombine.high %v447_v11, %v451_v13  ;;  %v11866_v24 = vcombine.low %v447_v11, %v451_v13  ;;  %v510_v13 = vld [vmem:[#allocation6 + $0xc10] sm:$0xff] }
 0x1f0   :  { %3626 = vmatmul.mubr.bf16.vlgmr.msra.gmra.mrb[4].mxu0 %v13569_v53  ;;  %3790 = vmatmul.mubr.bf16.vlgmr.msra.gmra.mrb[4].mxu1 %v13569_v53  ;;  %v11818_v53 = vcombine.low %v399_v27, %v403_v12  ;;  %v462_v12 = vld [vmem:[#allocation6 + $0xa90] sm:$0xff] }
 0x1f1   :  { %3635 = vmatpush1.bf16.msra.mxu0 %v11800_v20  ;;  %3799 = vmatpush1.bf16.msra.mxu1 %v11802_v21  ;;  %v458_v20 = vld [vmem:[#allocation6 + $0xa70] sm:$0xff]  ;;  %v455_v21 = vld [vmem:[#allocation6 + $0xa58] sm:$0xff] }
 0x1f2   :  { %3636 = vmatprep.subr.bf16.mxu0 %v11809_v23  ;;  %3800 = vmatprep.subr.bf16.mxu1 %v11811_v57  ;;  %v459_v23 = vld [vmem:[#allocation6 + $0xa78] sm:$0xff]  ;;  %v11864_v57 = vcombine.low %v446_v9, %v450_v10  ;;  %v11873_v26 = vcombine.high %v454_v19, %v458_v20 }
 0x1f3   :  { %3666 = vmatprep.mubr.bf16.mxu0 %v13575_v32  ;;  %3830 = vmatprep.mubr.bf16.mxu1 %v13575_v32  ;;  %v11835_v32 = vcombine.high %v415_v42, %v419_v43  ;;  %v11875_v27 = vcombine.high %v455_v21, %v459_v23  ;;  %v11874_v15 = vcombine.low %v455_v21, %v459_v23  ;;  %v478_v43 = vld [vmem:[#allocation6 + $0xb10] sm:$0xff] }
 0x1f4   :  { %v518_v23 = vld [vmem:[#allocation6 + $0xc50] sm:$0xff] }
 0x1f5   :  { %3637 = vmatpush1.bf16.msra.mxu0 %v11808_v28  ;;  %3801 = vmatpush1.bf16.msra.mxu1 %v11810_v29  ;;  %v466_v28 = vld [vmem:[#allocation6 + $0xab0] sm:$0xff]  ;;  %v463_v29 = vld [vmem:[#allocation6 + $0xa98] sm:$0xff] }
 0x1f6   :  { %3638 = vmatprep.subr.bf16.mxu0 %v11817_v30  ;;  %3802 = vmatprep.subr.bf16.mxu1 %v11819_v31  ;;  %v467_v30 = vld [vmem:[#allocation6 + $0xab8] sm:$0xff]  ;;  %v11872_v31 = vcombine.low %v454_v19, %v458_v20  ;;  %v11881_v33 = vcombine.high %v462_v12, %v466_v28 }
 0x1f7   :  { %v11883_v34 = vcombine.high %v463_v29, %v467_v30  ;;  %v11882_v40 = vcombine.low %v463_v29, %v467_v30  ;;  %v526_v30 = vld [vmem:[#allocation6 + $0xc90] sm:$0xff] }
 0x1f9   :  { %3639 = vmatpush1.bf16.msra.mxu0 %v11816_v37  ;;  %3803 = vmatpush1.bf16.msra.mxu1 %v11818_v53  ;;  %v474_v37 = vld [vmem:[#allocation6 + $0xaf0] sm:$0xff]  ;;  %v471_v53 = vld [vmem:[#allocation6 + $0xad8] sm:$0xff] }
 0x1fa   :  { %3640 = vmatprep.subr.bf16.mxu0 %v11825_v22  ;;  %3804 = vmatprep.subr.bf16.mxu1 %v11827_v38  ;;  %v475_v22 = vld [vmem:[#allocation6 + $0xaf8] sm:$0xff]  ;;  %v11880_v38 = vcombine.low %v462_v12, %v466_v28  ;;  %v11889_v41 = vcombine.high %v470_v35, %v474_v37 }
 0x1fb   :  { %v11891_v42 = vcombine.high %v471_v53, %v475_v22  ;;  %v11890_v47 = vcombine.low %v471_v53, %v475_v22  ;;  %v534_v22 = vld [vmem:[#allocation6 + $0xcd0] sm:$0xff] }
 0x1fd   :  { %3641 = vmatpush1.bf16.msra.mxu0 %v11824_v44  ;;  %3805 = vmatpush1.bf16.msra.mxu1 %v11826_v45  ;;  %v482_v44 = vld [vmem:[#allocation6 + $0xb30] sm:$0xff]  ;;  %v479_v45 = vld [vmem:[#allocation6 + $0xb18] sm:$0xff] }
 0x1fe   :  { %3642 = vmatprep.subr.bf16.mxu0 %v11833_v25  ;;  %3806 = vmatprep.subr.bf16.mxu1 %v11835_v32  ;;  %v483_v25 = vld [vmem:[#allocation6 + $0xb38] sm:$0xff]  ;;  %v11888_v32 = vcombine.low %v470_v35, %v474_v37  ;;  %v11897_v48 = vcombine.high %v478_v43, %v482_v44 }
 0x1ff   :  { %v11899_v49 = vcombine.high %v479_v45, %v483_v25  ;;  %v11898_v58 = vcombine.low %v479_v45, %v483_v25  ;;  %v542_v45 = vld [vmem:[#allocation6 + $0xd10] sm:$0xff] }
 0x200   :  { %v546_v25 = vld [vmem:[#allocation6 + $0xd30] sm:$0xff] }
 0x201   :  { %3643 = vmatpush1.bf16.msra.mxu0 %v11832_v51  ;;  %3807 = vmatpush1.bf16.msra.mxu1 %v11834_v52  ;;  %v490_v51 = vld [vmem:[#allocation6 + $0xb70] sm:$0xff]  ;;  %v487_v52 = vld [vmem:[#allocation6 + $0xb58] sm:$0xff] }
 0x202   :  { %3644 = vmatprep.subr.bf16.mxu0 %v11841_v54  ;;  %3808 = vmatprep.subr.bf16.mxu1 %v11843_v56  ;;  %v491_v54 = vld [vmem:[#allocation6 + $0xb78] sm:$0xff]  ;;  %v11896_v56 = vcombine.low %v478_v43, %v482_v44  ;;  %v11905_v59 = vcombine.high %v486_v50, %v490_v51 }
 0x203   :  { %v11907_v60 = vcombine.high %v487_v52, %v491_v54  ;;  %v11906_v2 = vcombine.low %v487_v52, %v491_v54  ;;  %v554_v52 = vld [vmem:[#allocation6 + $0xd70] sm:$0xff]  ;;  %v551_v54 = vld [vmem:[#allocation6 + $0xd58] sm:$0xff] }
 0x205   :  { %3645 = vmatpush1.bf16.msra.mxu0 %v11840_v62  ;;  %3809 = vmatpush1.bf16.msra.mxu1 %v11842_v63  ;;  %v498_v62 = vld [vmem:[#allocation6 + $0xbb0] sm:$0xff]  ;;  %v495_v63 = vld [vmem:[#allocation6 + $0xb98] sm:$0xff] }
 0x206   :  { %3646 = vmatprep.subr.bf16.mxu0 %v11849_v0  ;;  %3810 = vmatprep.subr.bf16.mxu1 %v11851_v1  ;;  %v499_v0 = vld [vmem:[#allocation6 + $0xbb8] sm:$0xff]  ;;  %v11904_v1 = vcombine.low %v486_v50, %v490_v51  ;;  %v11913_v39 = vcombine.high %v494_v61, %v498_v62  ;;  %v11961_v50 = vcombine.high %v542_v45, %v546_v25  ;;  %v550_v51 = vld [vmem:[#allocation6 + $0xd50] sm:$0xff] }
 0x207   :  { %v11915_v3 = vcombine.high %v495_v63, %v499_v0  ;;  %v11914_v9 = vcombine.low %v495_v63, %v499_v0  ;;  %v562_v63 = vld [vmem:[#allocation6 + $0xdb0] sm:$0xff]  ;;  %v559_v0 = vld [vmem:[#allocation6 + $0xd98] sm:$0xff] }
 0x209   :  { %3647 = vmatpush1.bf16.msra.mxu0 %v11848_v5  ;;  %3811 = vmatpush1.bf16.msra.mxu1 %v11850_v6  ;;  %v506_v5 = vld [vmem:[#allocation6 + $0xbf0] sm:$0xff]  ;;  %v503_v6 = vld [vmem:[#allocation6 + $0xbd8] sm:$0xff] }
 0x20a   :  { %3648 = vmatprep.subr.bf16.mxu0 %v11857_v7  ;;  %3812 = vmatprep.subr.bf16.mxu1 %v11859_v8  ;;  %v507_v7 = vld [vmem:[#allocation6 + $0xbf8] sm:$0xff]  ;;  %v11912_v8 = vcombine.low %v494_v61, %v498_v62  ;;  %v11921_v10 = vcombine.high %v502_v4, %v506_v5  ;;  %v558_v62 = vld [vmem:[#allocation6 + $0xd90] sm:$0xff] }
 0x20b   :  { %v11923_v11 = vcombine.high %v503_v6, %v507_v7  ;;  %v11922_v19 = vcombine.low %v503_v6, %v507_v7  ;;  %v566_v6 = vld [vmem:[#allocation6 + $0xdd0] sm:$0xff] }
 0x20c   :  { %v570_v7 = vld [vmem:[#allocation6 + $0xdf0] sm:$0xff] }
 0x20d   :  { %3649 = vmatpush1.bf16.msra.mxu0 %v11856_v14  ;;  %3813 = vmatpush1.bf16.msra.mxu1 %v11858_v16  ;;  %v514_v14 = vld [vmem:[#allocation6 + $0xc30] sm:$0xff]  ;;  %v511_v16 = vld [vmem:[#allocation6 + $0xc18] sm:$0xff] }
 0x20e   :  { %3650 = vmatprep.subr.bf16.mxu0 %v11865_v17  ;;  %3814 = vmatprep.subr.bf16.mxu1 %v11867_v18  ;;  %v515_v17 = vld [vmem:[#allocation6 + $0xc38] sm:$0xff]  ;;  %v11920_v18 = vcombine.low %v502_v4, %v506_v5  ;;  %v11929_v20 = vcombine.high %v510_v13, %v514_v14 }
 0x20f   :  { %v11931_v21 = vcombine.high %v511_v16, %v515_v17  ;;  %v11930_v12 = vcombine.low %v511_v16, %v515_v17  ;;  %v11976_v16 = vcombine.low %v558_v62, %v562_v63 }
 0x211   :  { %3651 = vmatpush1.bf16.msra.mxu0 %v11864_v57  ;;  %3815 = vmatpush1.bf16.msra.mxu1 %v11866_v24  ;;  %v522_v57 = vld [vmem:[#allocation6 + $0xc70] sm:$0xff]  ;;  %v519_v24 = vld [vmem:[#allocation6 + $0xc58] sm:$0xff] }
 0x212   :  { %3652 = vmatprep.subr.bf16.mxu0 %v11873_v26  ;;  %3816 = vmatprep.subr.bf16.mxu1 %v11875_v27  ;;  %v523_v26 = vld [vmem:[#allocation6 + $0xc78] sm:$0xff]  ;;  %v11928_v27 = vcombine.low %v510_v13, %v514_v14  ;;  %v11937_v28 = vcombine.high %v518_v23, %v522_v57 }
 0x213   :  { %v11939_v29 = vcombine.high %v519_v24, %v523_v26  ;;  %v11938_v35 = vcombine.low %v519_v24, %v523_v26  ;;  %v578_v24 = vld [vmem:[#allocation6 + $0xe30] sm:$0xff]  ;;  %v575_v26 = vld [vmem:[#allocation6 + $0xe18] sm:$0xff] }
 0x215   :  { %3653 = vmatpush1.bf16.msra.mxu0 %v11872_v31  ;;  %3817 = vmatpush1.bf16.msra.mxu1 %v11874_v15  ;;  %v530_v31 = vld [vmem:[#allocation6 + $0xcb0] sm:$0xff]  ;;  %v527_v15 = vld [vmem:[#allocation6 + $0xc98] sm:$0xff] }
 0x216   :  { %3654 = vmatprep.subr.bf16.mxu0 %v11881_v33  ;;  %3818 = vmatprep.subr.bf16.mxu1 %v11883_v34  ;;  %v531_v33 = vld [vmem:[#allocation6 + $0xcb8] sm:$0xff]  ;;  %v11936_v34 = vcombine.low %v518_v23, %v522_v57  ;;  %v11945_v37 = vcombine.high %v526_v30, %v530_v31  ;;  %v574_v57 = vld [vmem:[#allocation6 + $0xe10] sm:$0xff] }
 0x217   :  { %v11947_v53 = vcombine.high %v527_v15, %v531_v33 }
 0x219   :  { %3655 = vmatpush1.bf16.msra.mxu0 %v11880_v38  ;;  %3819 = vmatpush1.bf16.msra.mxu1 %v11882_v40  ;;  %v538_v38 = vld [vmem:[#allocation6 + $0xcf0] sm:$0xff]  ;;  %v535_v40 = vld [vmem:[#allocation6 + $0xcd8] sm:$0xff] }
 0x21a   :  { %3656 = vmatprep.subr.bf16.mxu0 %v11889_v41  ;;  %3820 = vmatprep.subr.bf16.mxu1 %v11891_v42  ;;  %v539_v41 = vld [vmem:[#allocation6 + $0xcf8] sm:$0xff]  ;;  %v11944_v42 = vcombine.low %v526_v30, %v530_v31  ;;  %v11953_v43 = vcombine.high %v534_v22, %v538_v38  ;;  %v582_v31 = vld [vmem:[#allocation6 + $0xe50] sm:$0xff] }
 0x21b   :  { %v11955_v44 = vcombine.high %v535_v40, %v539_v41 }
 0x21d   :  { %3657 = vmatpush1.bf16.msra.mxu0 %v11888_v32  ;;  %3821 = vmatpush1.bf16.msra.mxu1 %v11890_v47  ;;  %v543_v32 = vld [vmem:[#allocation6 + $0xd18] sm:$0xff] }
 0x21e   :  { %3658 = vmatprep.subr.bf16.mxu0 %v11897_v48  ;;  %3822 = vmatprep.subr.bf16.mxu1 %v11899_v49  ;;  %v547_v47 = vld [vmem:[#allocation6 + $0xd38] sm:$0xff]  ;;  %v11952_v48 = vcombine.low %v534_v22, %v538_v38  ;;  %v11954_v49 = vcombine.low %v535_v40, %v539_v41  ;;  %v590_v38 = vld [vmem:[#allocation6 + $0xe90] sm:$0xff] }
 0x21f   :  { %v594_v40 = vld [vmem:[#allocation6 + $0xeb0] sm:$0xff]  ;;  %v591_v41 = vld [vmem:[#allocation6 + $0xe98] sm:$0xff] }
 0x221   :  { %3659 = vmatpush1.bf16.msra.mxu0 %v11896_v56  ;;  %3823 = vmatpush1.bf16.msra.mxu1 %v11898_v58  ;;  %v555_v56 = vld [vmem:[#allocation6 + $0xd78] sm:$0xff]  ;;  %v11960_v58 = vcombine.low %v542_v45, %v546_v25  ;;  %v598_v25 = vld [vmem:[#allocation6 + $0xed0] sm:$0xff] }
 0x222   :  { %3660 = vmatprep.subr.bf16.mxu0 %v11905_v59  ;;  %3824 = vmatprep.subr.bf16.mxu1 %v11907_v60  ;;  %v11962_v59 = vcombine.low %v543_v32, %v547_v47  ;;  %v11969_v60 = vcombine.high %v550_v51, %v554_v52  ;;  %v11971_v61 = vcombine.high %v551_v54, %v555_v56 }
 0x225   :  { %3661 = vmatpush1.bf16.msra.mxu0 %v11904_v1  ;;  %3825 = vmatpush1.bf16.msra.mxu1 %v11906_v2  ;;  %v563_v1 = vld [vmem:[#allocation6 + $0xdb8] sm:$0xff]  ;;  %v11968_v2 = vcombine.low %v550_v51, %v554_v52  ;;  %v606_v52 = vld [vmem:[#allocation6 + $0xf10] sm:$0xff] }
 0x226   :  { %3662 = vmatprep.subr.bf16.mxu0 %v11913_v39  ;;  %3826 = vmatprep.subr.bf16.mxu1 %v11915_v3  ;;  %v11970_v39 = vcombine.low %v551_v54, %v555_v56  ;;  %v11977_v3 = vcombine.high %v558_v62, %v562_v63  ;;  %v11979_v5 = vcombine.high %v559_v0, %v563_v1  ;;  %v610_v54 = vld [vmem:[#allocation6 + $0xf30] sm:$0xff]  ;;  %v607_v56 = vld [vmem:[#allocation6 + $0xf18] sm:$0xff] }
 0x227   :  { %v614_v63 = vld [vmem:[#allocation6 + $0xf50] sm:$0xff] }
 0x229   :  { %3663 = vmatpush1.bf16.msra.mxu0 %v11912_v8  ;;  %3827 = vmatpush1.bf16.msra.mxu1 %v11914_v9 }
 0x22a   :  { %3664 = vmatprep.subr.bf16.mxu0 %v11921_v10  ;;  %3828 = vmatprep.subr.bf16.mxu1 %v11923_v11  ;;  %v567_v10 = vld [vmem:[#allocation6 + $0xdd8] sm:$0xff] }
 0x22b   :  { %v571_v11 = vld [vmem:[#allocation6 + $0xdf8] sm:$0xff] }
 0x22c   :  { %v11987_v23 = vcombine.high %v567_v10, %v571_v11 }
 0x22d   :  { %3665 = vmatpush1.bf16.msra.mxu0 %v11920_v18  ;;  %3829 = vmatpush1.bf16.msra.mxu1 %v11922_v19  ;;  %v11978_v19 = vcombine.low %v559_v0, %v563_v1  ;;  %v618_v0 = vld [vmem:[#allocation6 + $0xf70] sm:$0xff]  ;;  %v615_v1 = vld [vmem:[#allocation6 + $0xf58] sm:$0xff] }
 0x22e   :  { %3675 = vmatprep.subr.bf16.mxu0 %v11929_v20  ;;  %3839 = vmatprep.subr.bf16.mxu1 %v11931_v21  ;;  %v11985_v20 = vcombine.high %v566_v6, %v570_v7 }
 0x230   :  { %3667 = vmatmul.mubr.bf16.vlgmr.msra.gmra.mrb[4].mxu0 %v13583_v36  ;;  %3831 = vmatmul.mubr.bf16.vlgmr.msra.gmra.mrb[4].mxu1 %v13583_v36  ;;  %v11946_v36 = vcombine.low %v527_v15, %v531_v33  ;;  %v586_v15 = vld [vmem:[#allocation6 + $0xe70] sm:$0xff]  ;;  %v583_v33 = vld [vmem:[#allocation6 + $0xe58] sm:$0xff] }
 0x231   :  { %3676 = vmatpush1.bf16.msra.mxu0 %v11928_v27  ;;  %3840 = vmatpush1.bf16.msra.mxu1 %v11930_v12  ;;  %v579_v27 = vld [vmem:[#allocation6 + $0xe38] sm:$0xff]  ;;  %v11984_v12 = vcombine.low %v566_v6, %v570_v7  ;;  %v622_v7 = vld [vmem:[#allocation6 + $0xf90] sm:$0xff] }
 0x232   :  { %3677 = vmatprep.subr.bf16.mxu0 %v11937_v28  ;;  %3841 = vmatprep.subr.bf16.mxu1 %v11939_v29  ;;  %v11986_v28 = vcombine.low %v567_v10, %v571_v11  ;;  %v11993_v29 = vcombine.high %v574_v57, %v578_v24  ;;  %v11995_v30 = vcombine.high %v575_v26, %v579_v27  ;;  %v626_v10 = vld [vmem:[#allocation6 + $0xfb0] sm:$0xff]  ;;  %v623_v11 = vld [vmem:[#allocation6 + $0xf98] sm:$0xff] }
 0x233   :  { %3707 = vmatprep.mubr.bf16.mxu0 %v13589_v46  ;;  %3871 = vmatprep.mubr.bf16.mxu1 %v13589_v46  ;;  %v11963_v46 = vcombine.high %v543_v32, %v547_v47  ;;  %v602_v32 = vld [vmem:[#allocation6 + $0xef0] sm:$0xff]  ;;  %v599_v47 = vld [vmem:[#allocation6 + $0xed8] sm:$0xff] }
 0x235   :  { %3678 = vmatpush1.bf16.msra.mxu0 %v11936_v34  ;;  %3842 = vmatpush1.bf16.msra.mxu1 %v11938_v35  ;;  %v587_v34 = vld [vmem:[#allocation6 + $0xe78] sm:$0xff]  ;;  %v11992_v35 = vcombine.low %v574_v57, %v578_v24  ;;  %v12040_v24 = vcombine.low %v622_v7, %v626_v10 }
 0x236   :  { %3679 = vmatprep.subr.bf16.mxu0 %v11945_v37  ;;  %3843 = vmatprep.subr.bf16.mxu1 %v11947_v53  ;;  %v11994_v37 = vcombine.low %v575_v26, %v579_v27  ;;  %v12001_v53 = vcombine.high %v582_v31, %v586_v15  ;;  %v12003_v22 = vcombine.high %v583_v33, %v587_v34  ;;  %v635_v57 = vld [vmem:[#allocation6 + $0xff8] sm:$0xff] }
 0x239   :  { %3680 = vmatpush1.bf16.msra.mxu0 %v11944_v42  ;;  %3844 = vmatpush1.bf16.msra.mxu1 %v11946_v36  ;;  %v595_v42 = vld [vmem:[#allocation6 + $0xeb8] sm:$0xff]  ;;  %v12000_v36 = vcombine.low %v582_v31, %v586_v15  ;;  %v3928_v31 = vld [vmem:[#allocation8 + $0x28] sm:$0xff] }
 0x23a   :  { %3681 = vmatprep.subr.bf16.mxu0 %v11953_v43  ;;  %3845 = vmatprep.subr.bf16.mxu1 %v11955_v44  ;;  %v12002_v43 = vcombine.low %v583_v33, %v587_v34  ;;  %v12009_v44 = vcombine.high %v590_v38, %v594_v40  ;;  %v12011_v45 = vcombine.high %v591_v41, %v595_v42 }
 0x23d   :  { %3682 = vmatpush1.bf16.msra.mxu0 %v11952_v48  ;;  %3846 = vmatpush1.bf16.msra.mxu1 %v11954_v49  ;;  %v603_v48 = vld [vmem:[#allocation6 + $0xef8] sm:$0xff]  ;;  %v12008_v49 = vcombine.low %v590_v38, %v594_v40  ;;  %v3932_v40 = vld [vmem:[#allocation8 + $0x48] sm:$0xff] }
 0x23e   :  { %3683 = vmatprep.subr.bf16.mxu0 %v11961_v50  ;;  %3847 = vmatprep.subr.bf16.mxu1 %v11963_v46  ;;  %v12010_v50 = vcombine.low %v591_v41, %v595_v42  ;;  %v12017_v46 = vcombine.high %v598_v25, %v602_v32  ;;  %v12019_v51 = vcombine.high %v599_v47, %v603_v48  ;;  %v3936_v41 = vld [vmem:[#allocation8 + $0x68] sm:$0xff] }
 0x241   :  { %3684 = vmatpush1.bf16.msra.mxu0 %v11960_v58  ;;  %3848 = vmatpush1.bf16.msra.mxu1 %v11962_v59  ;;  %v611_v58 = vld [vmem:[#allocation6 + $0xf38] sm:$0xff]  ;;  %v12016_v59 = vcombine.low %v598_v25, %v602_v32  ;;  %v12063_v25 = vcombine.high %v3932_v40, %v3936_v41  ;;  %v3940_v32 = vld [vmem:[#allocation8 + $0x88] sm:$0xff] }
 0x242   :  { %3685 = vmatprep.subr.bf16.mxu0 %v11969_v60  ;;  %3849 = vmatprep.subr.bf16.mxu1 %v11971_v61  ;;  %v12018_v60 = vcombine.low %v599_v47, %v603_v48  ;;  %v12025_v61 = vcombine.high %v606_v52, %v610_v54  ;;  %v12027_v62 = vcombine.high %v607_v56, %v611_v58 }
 0x243   :  { %v13615_v4 = vpop.f32.mrb[0].mxu0  ;;  %v13617_v8 = vpop.f32.mrb[0].mxu1  ;;  %v12062_v48 = vcombine.low %v3932_v40, %v3936_v41  ;;  %v3995_v41 = vld [vmem:[#allocation8 + $0x240] sm:$0xff] }
 0x244   :  { %v13619_v9 = vpop.f32.mrb[1].mxu0  ;;  %v13621_v13 = vpop.f32.mrb[1].mxu1 }
 0x245   :  { %v3385_v14 = vpop.f32.mrb[2].mxu0  ;;  %3686 = vmatpush1.bf16.msra.mxu0 %v11968_v2  ;;  %v3549_v17 = vpop.f32.mrb[2].mxu1  ;;  %3850 = vmatpush1.bf16.msra.mxu1 %v11970_v39  ;;  %v619_v2 = vld [vmem:[#allocation6 + $0xf78] sm:$0xff]  ;;  %v12024_v39 = vcombine.low %v606_v52, %v610_v54  ;;  %v3948_v52 = vld [vmem:[#allocation8 + $0xc8] sm:$0xff] }
 0x246   :  { %v3386_v18 = vpop.f32.mrb[3].mxu0  ;;  %3687 = vmatprep.subr.bf16.mxu0 %v11977_v3  ;;  %v3550_v21 = vpop.f32.mrb[3].mxu1  ;;  %3851 = vmatprep.subr.bf16.mxu1 %v11979_v5  ;;  %v12026_v3 = vcombine.low %v607_v56, %v611_v58  ;;  %v12033_v5 = vcombine.high %v614_v63, %v618_v0  ;;  %v12035_v6 = vcombine.high %v615_v1, %v619_v2  ;;  %v627_v14 = vld [vmem:[#allocation6 + $0xfb8] sm:$0xff]  ;;  %v3952_v54 = vld [vmem:[#allocation8 + $0xe8] sm:$0xff] }
 0x247   :  { %v12034_v17 = vcombine.low %v615_v1, %v619_v2  ;;  %v12041_v18 = vcombine.high %v622_v7, %v626_v10  ;;  %v634_v21 = vld [vmem:[#allocation6 + $0xff0] sm:$0xff]  ;;  %v12042_v26 = vcombine.low %v623_v11, %v627_v14  ;;  %v12078_v1 = vcombine.low %v3948_v52, %v3952_v54  ;;  %v3968_v7 = vld [vmem:[#allocation8 + $0x168] sm:$0xff] }
 0x249   :  { %3688 = vmatpush1.bf16.msra.mxu0 %v11976_v16  ;;  %3852 = vmatpush1.bf16.msra.mxu1 %v11978_v19  ;;  %v12032_v16 = vcombine.low %v614_v63, %v618_v0  ;;  %v12043_v19 = vcombine.high %v623_v11, %v627_v14  ;;  %v3960_v63 = vld [vmem:[#allocation8 + $0x128] sm:$0xff] }
 0x24a   :  { %3689 = vmatprep.subr.bf16.mxu0 %v11985_v20  ;;  %3853 = vmatprep.subr.bf16.mxu1 %v11987_v23  ;;  %v630_v20 = vld [vmem:[#allocation6 + $0xfd0] sm:$0xff]  ;;  %v631_v23 = vld [vmem:[#allocation6 + $0xfd8] sm:$0xff] }
 0x24b   :  { %v12049_v27 = vcombine.high %v630_v20, %v634_v21  ;;  %v12048_v15 = vcombine.low %v630_v20, %v634_v21  ;;  %v12050_v33 = vcombine.low %v631_v23, %v635_v57  ;;  %v3976_v20 = vld [vmem:[#allocation8 + $0x1a8] sm:$0xff] }
 0x24d   :  { %3690 = vmatpush1.bf16.msra.mxu0 %v11984_v12  ;;  %3854 = vmatpush1.bf16.msra.mxu1 %v11986_v28  ;;  %v12051_v12 = vcombine.high %v631_v23, %v635_v57  ;;  %v3923_v28 = vld [vmem:[#allocation8] sm:$0xff] }
 0x24e   :  { %3691 = vmatprep.subr.bf16.mxu0 %v11993_v29  ;;  %3855 = vmatprep.subr.bf16.mxu1 %v11995_v30  ;;  %v3927_v29 = vld [vmem:[#allocation8 + $0x20] sm:$0xff]  ;;  %v3924_v30 = vld [vmem:[#allocation8 + $0x8] sm:$0xff] }
 0x24f   :  { %v12053_v34 = vcombine.high %v3923_v28, %v3927_v29  ;;  %v12052_v38 = vcombine.low %v3923_v28, %v3927_v29  ;;  %v12054_v42 = vcombine.low %v3924_v30, %v3928_v31  ;;  %v3984_v28 = vld [vmem:[#allocation8 + $0x1e8] sm:$0xff] }
 0x251   :  { %3692 = vmatpush1.bf16.msra.mxu0 %v11992_v35  ;;  %3856 = vmatpush1.bf16.msra.mxu1 %v11994_v37  ;;  %v12055_v35 = vcombine.high %v3924_v30, %v3928_v31  ;;  %v3908_v37 = vmax.f32 %v13619_v9, 0.0  ;;  %v3944_v9 = vld [vmem:[#allocation8 + $0xa8] sm:$0xff] }
 0x252   :  { %3693 = vmatprep.subr.bf16.mxu0 %v12001_v53  ;;  %3857 = vmatprep.subr.bf16.mxu1 %v12003_v22  ;;  %v3931_v53 = vld [vmem:[#allocation8 + $0x40] sm:$0xff] }
 0x253   :  { %v3935_v22 = vld [vmem:[#allocation8 + $0x60] sm:$0xff] }
 0x254   :  { %v12060_v47 = vcombine.low %v3931_v53, %v3935_v22 }
 0x255   :  { %3694 = vmatpush1.bf16.msra.mxu0 %v12000_v36  ;;  %3858 = vmatpush1.bf16.msra.mxu1 %v12002_v43  ;;  %v12061_v36 = vcombine.high %v3931_v53, %v3935_v22  ;;  %v3939_v43 = vld [vmem:[#allocation8 + $0x80] sm:$0xff] }
 0x256   :  { %3695 = vmatprep.subr.bf16.mxu0 %v12009_v44  ;;  %3859 = vmatprep.subr.bf16.mxu1 %v12011_v45  ;;  %v3943_v44 = vld [vmem:[#allocation8 + $0xa0] sm:$0xff]  ;;  %v13624_v45 = vpack.c.bf16 %v3908_v37, %v3908_v37  ;;  %v3992_v37 = vld [vmem:[#allocation8 + $0x228] sm:$0xff] }
 0x257   :  { %v12068_v56 = vcombine.low %v3939_v43, %v3943_v44 }
 0x259   :  { %3696 = vmatpush1.bf16.msra.mxu0 %v12008_v49  ;;  %3860 = vmatpush1.bf16.msra.mxu1 %v12010_v50  ;;  %v12069_v49 = vcombine.high %v3939_v43, %v3943_v44  ;;  %v12071_v50 = vcombine.high %v3940_v32, %v3944_v9  ;;  %v4000_v43 = vld [vmem:[#allocation8 + $0x268] sm:$0xff] }
 0x25a   :  { %3697 = vmatprep.subr.bf16.mxu0 %v12017_v46  ;;  %3861 = vmatprep.subr.bf16.mxu1 %v12019_v51  ;;  %v3947_v46 = vld [vmem:[#allocation8 + $0xc0] sm:$0xff] }
 0x25b   :  { %v3951_v51 = vld [vmem:[#allocation8 + $0xe0] sm:$0xff] }
 0x25c   :  { %v12077_v58 = vcombine.high %v3947_v46, %v3951_v51  ;;  %v12076_v0 = vcombine.low %v3947_v46, %v3951_v51 }
 0x25d   :  { %3698 = vmatpush1.bf16.msra.mxu0 %v12016_v59  ;;  %3862 = vmatpush1.bf16.msra.mxu1 %v12018_v60  ;;  %v12079_v59 = vcombine.high %v3948_v52, %v3952_v54  ;;  %v3955_v60 = vld [vmem:[#allocation8 + $0x100] sm:$0xff] }
 0x25e   :  { %3699 = vmatprep.subr.bf16.mxu0 %v12025_v61  ;;  %3863 = vmatprep.subr.bf16.mxu1 %v12027_v62  ;;  %v3959_v61 = vld [vmem:[#allocation8 + $0x120] sm:$0xff]  ;;  %v3956_v62 = vld [vmem:[#allocation8 + $0x108] sm:$0xff] }
 0x25f   :  { %v12085_v2 = vcombine.high %v3955_v60, %v3959_v61  ;;  %v12084_v10 = vcombine.low %v3955_v60, %v3959_v61  ;;  %v12086_v11 = vcombine.low %v3956_v62, %v3960_v63 }
 0x261   :  { %3700 = vmatpush1.bf16.msra.mxu0 %v12024_v39  ;;  %3864 = vmatpush1.bf16.msra.mxu1 %v12026_v3  ;;  %v12087_v39 = vcombine.high %v3956_v62, %v3960_v63  ;;  %v3963_v3 = vld [vmem:[#allocation8 + $0x140] sm:$0xff] }
 0x262   :  { %3701 = vmatprep.subr.bf16.mxu0 %v12033_v5  ;;  %3865 = vmatprep.subr.bf16.mxu1 %v12035_v6  ;;  %v3967_v5 = vld [vmem:[#allocation8 + $0x160] sm:$0xff]  ;;  %v3964_v6 = vld [vmem:[#allocation8 + $0x148] sm:$0xff] }
 0x263   :  { %v12093_v14 = vcombine.high %v3963_v3, %v3967_v5  ;;  %v12092_v21 = vcombine.low %v3963_v3, %v3967_v5  ;;  %v12094_v23 = vcombine.low %v3964_v6, %v3968_v7 }
 0x265   :  { %3702 = vmatpush1.bf16.msra.mxu0 %v12032_v16  ;;  %3866 = vmatpush1.bf16.msra.mxu1 %v12034_v17  ;;  %v12095_v16 = vcombine.high %v3964_v6, %v3968_v7  ;;  %v3971_v17 = vld [vmem:[#allocation8 + $0x180] sm:$0xff] }
 0x266   :  { %3703 = vmatprep.subr.bf16.mxu0 %v12041_v18  ;;  %3867 = vmatprep.subr.bf16.mxu1 %v12043_v19  ;;  %v3975_v18 = vld [vmem:[#allocation8 + $0x1a0] sm:$0xff]  ;;  %v3972_v19 = vld [vmem:[#allocation8 + $0x188] sm:$0xff] }
 0x267   :  { %v12101_v57 = vcombine.high %v3971_v17, %v3975_v18  ;;  %v12100_v29 = vcombine.low %v3971_v17, %v3975_v18  ;;  %v12102_v30 = vcombine.low %v3972_v19, %v3976_v20 }
 0x269   :  { %3704 = vmatpush1.bf16.msra.mxu0 %v12040_v24  ;;  %3868 = vmatpush1.bf16.msra.mxu1 %v12042_v26  ;;  %v12103_v24 = vcombine.high %v3972_v19, %v3976_v20  ;;  %v3979_v26 = vld [vmem:[#allocation8 + $0x1c0] sm:$0xff] }
 0x26a   :  { %3705 = vmatprep.subr.bf16.mxu0 %v12049_v27  ;;  %3869 = vmatprep.subr.bf16.mxu1 %v12051_v12  ;;  %v3983_v27 = vld [vmem:[#allocation8 + $0x1e0] sm:$0xff]  ;;  %v3980_v12 = vld [vmem:[#allocation8 + $0x1c8] sm:$0xff] }
 0x26b   :  { %v12109_v31 = vcombine.high %v3979_v26, %v3983_v27  ;;  %v12108_v53 = vcombine.low %v3979_v26, %v3983_v27  ;;  %v12110_v22 = vcombine.low %v3980_v12, %v3984_v28 }
 0x26d   :  { %3706 = vmatpush1.bf16.msra.mxu0 %v12048_v15  ;;  %3870 = vmatpush1.bf16.msra.mxu1 %v12050_v33  ;;  %v12111_v15 = vcombine.high %v3980_v12, %v3984_v28  ;;  %v3987_v33 = vld [vmem:[#allocation8 + $0x200] sm:$0xff] }
 0x26e   :  { %7037 = vmatprep.subr.bf16.mxu0 %v12053_v34  ;;  %7201 = vmatprep.subr.bf16.mxu1 %v12055_v35  ;;  %v3991_v34 = vld [vmem:[#allocation8 + $0x220] sm:$0xff]  ;;  %v3988_v35 = vld [vmem:[#allocation8 + $0x208] sm:$0xff] }
 0x26f   :  { %v12119_v40 = vcombine.high %v3988_v35, %v3992_v37  ;;  %v12116_v44 = vcombine.low %v3987_v33, %v3991_v34 }
 0x270   :  { %3708 = vmatmul.mubr.bf16.vlgmr.msra.gmra.mrb[4].mxu0 %v13597_v55  ;;  %3872 = vmatmul.mubr.bf16.vlgmr.msra.gmra.mrb[4].mxu1 %v13597_v55  ;;  %v12070_v55 = vcombine.low %v3940_v32, %v3944_v9 }
 0x271   :  { %7038 = vmatpush1.bf16.msra.mxu0 %v12052_v38  ;;  %7069 = vmatprep.mubr.bf16.mxu0 %v13624_v45  ;;  %v12117_v38 = vcombine.high %v3987_v33, %v3991_v34 }
 0x272   :  { %7202 = vmatpush1.bf16.msra.mxu1 %v12054_v42  ;;  %7233 = vmatprep.mubr.bf16.mxu1 %v13624_v45  ;;  %v3999_v42 = vld [vmem:[#allocation8 + $0x260] sm:$0xff] }
 0x273   :  { %7039 = vmatprep.subr.bf16.mxu0 %v12061_v36  ;;  %7203 = vmatprep.subr.bf16.mxu1 %v12063_v25  ;;  %v3996_v36 = vld [vmem:[#allocation8 + $0x248] sm:$0xff]  ;;  %v12118_v25 = vcombine.low %v3988_v35, %v3992_v37  ;;  %v12125_v32 = vcombine.high %v3995_v41, %v3999_v42  ;;  %v12124_v46 = vcombine.low %v3995_v41, %v3999_v42  ;;  %v3907_v42 = vmax.f32 %v13615_v4, 0.0 }
 0x274   :  { %v12127_v9 = vcombine.high %v3996_v36, %v4000_v43  ;;  %v12126_v51 = vcombine.low %v3996_v36, %v4000_v43 }
 0x275   :  { %7040 = vmatpush1.bf16.msra.mxu0 %v12060_v47  ;;  %v4003_v47 = vld [vmem:[#allocation8 + $0x280] sm:$0xff] }
 0x276   :  { %7204 = vmatpush1.bf16.msra.mxu1 %v12062_v48  ;;  %7041 = vmatprep.subr.bf16.mxu0 %v12069_v49  ;;  %v4007_v48 = vld [vmem:[#allocation8 + $0x2a0] sm:$0xff]  ;;  %v4004_v49 = vld [vmem:[#allocation8 + $0x288] sm:$0xff] }
 0x277   :  { %7205 = vmatprep.subr.bf16.mxu1 %v12071_v50  ;;  %v4008_v50 = vld [vmem:[#allocation8 + $0x2a8] sm:$0xff]  ;;  %v12133_v52 = vcombine.high %v4003_v47, %v4007_v48  ;;  %v12132_v60 = vcombine.low %v4003_v47, %v4007_v48 }
 0x278   :  { %v12135_v54 = vcombine.high %v4004_v49, %v4008_v50  ;;  %v12134_v61 = vcombine.low %v4004_v49, %v4008_v50  ;;  %v4060_v48 = vld [vmem:[#allocation8 + $0x448] sm:$0xff]  ;;  %v13632_v50 = vpack.c.bf16 %v3907_v42, %v3907_v42 }
 0x279   :  { %7042 = vmatpush1.bf16.msra.mxu0 %v12068_v56  ;;  %v4011_v56 = vld [vmem:[#allocation8 + $0x2c0] sm:$0xff]  ;;  %v4064_v49 = vld [vmem:[#allocation8 + $0x468] sm:$0xff] }
 0x27a   :  { %7206 = vmatpush1.bf16.msra.mxu1 %v12070_v55  ;;  %7043 = vmatprep.subr.bf16.mxu0 %v12077_v58  ;;  %v4015_v55 = vld [vmem:[#allocation8 + $0x2e0] sm:$0xff]  ;;  %v4012_v58 = vld [vmem:[#allocation8 + $0x2c8] sm:$0xff] }
 0x27b   :  { %7207 = vmatprep.subr.bf16.mxu1 %v12079_v59  ;;  %v4016_v59 = vld [vmem:[#allocation8 + $0x2e8] sm:$0xff]  ;;  %v12141_v62 = vcombine.high %v4011_v56, %v4015_v55  ;;  %v12140_v3 = vcombine.low %v4011_v56, %v4015_v55 }
 0x27c   :  { %v12143_v63 = vcombine.high %v4012_v58, %v4016_v59  ;;  %v12142_v5 = vcombine.low %v4012_v58, %v4016_v59  ;;  %v4068_v56 = vld [vmem:[#allocation8 + $0x488] sm:$0xff]  ;;  %v12190_v59 = vcombine.low %v4060_v48, %v4064_v49 }
 0x27d   :  { %7044 = vmatpush1.bf16.msra.mxu0 %v12076_v0  ;;  %v4019_v0 = vld [vmem:[#allocation8 + $0x300] sm:$0xff]  ;;  %v4072_v55 = vld [vmem:[#allocation8 + $0x4a8] sm:$0xff] }
 0x27e   :  { %7208 = vmatpush1.bf16.msra.mxu1 %v12078_v1  ;;  %7045 = vmatprep.subr.bf16.mxu0 %v12085_v2  ;;  %v4023_v1 = vld [vmem:[#allocation8 + $0x320] sm:$0xff]  ;;  %v4020_v2 = vld [vmem:[#allocation8 + $0x308] sm:$0xff] }
 0x27f   :  { %7209 = vmatprep.subr.bf16.mxu1 %v12087_v39  ;;  %v4024_v39 = vld [vmem:[#allocation8 + $0x328] sm:$0xff]  ;;  %v12149_v6 = vcombine.high %v4019_v0, %v4023_v1  ;;  %v12148_v17 = vcombine.low %v4019_v0, %v4023_v1 }
 0x280   :  { %v12151_v7 = vcombine.high %v4020_v2, %v4024_v39  ;;  %v12150_v18 = vcombine.low %v4020_v2, %v4024_v39  ;;  %v4076_v0 = vld [vmem:[#allocation8 + $0x4c8] sm:$0xff]  ;;  %v12198_v39 = vcombine.low %v4068_v56, %v4072_v55 }
 0x281   :  { %7046 = vmatpush1.bf16.msra.mxu0 %v12084_v10  ;;  %v4027_v10 = vld [vmem:[#allocation8 + $0x340] sm:$0xff]  ;;  %v4080_v1 = vld [vmem:[#allocation8 + $0x4e8] sm:$0xff] }
 0x282   :  { %7210 = vmatpush1.bf16.msra.mxu1 %v12086_v11  ;;  %7047 = vmatprep.subr.bf16.mxu0 %v12093_v14  ;;  %v4031_v11 = vld [vmem:[#allocation8 + $0x360] sm:$0xff]  ;;  %v4028_v14 = vld [vmem:[#allocation8 + $0x348] sm:$0xff] }
 0x283   :  { %7211 = vmatprep.subr.bf16.mxu1 %v12095_v16  ;;  %v4032_v16 = vld [vmem:[#allocation8 + $0x368] sm:$0xff]  ;;  %v12157_v19 = vcombine.high %v4027_v10, %v4031_v11  ;;  %v12156_v26 = vcombine.low %v4027_v10, %v4031_v11 }
 0x284   :  { %v12159_v20 = vcombine.high %v4028_v14, %v4032_v16  ;;  %v12158_v27 = vcombine.low %v4028_v14, %v4032_v16  ;;  %v4084_v10 = vld [vmem:[#allocation8 + $0x508] sm:$0xff]  ;;  %v12206_v16 = vcombine.low %v4076_v0, %v4080_v1 }
 0x285   :  { %7048 = vmatpush1.bf16.msra.mxu0 %v12092_v21  ;;  %v4035_v21 = vld [vmem:[#allocation8 + $0x380] sm:$0xff]  ;;  %v4088_v11 = vld [vmem:[#allocation8 + $0x528] sm:$0xff] }
 0x286   :  { %7212 = vmatpush1.bf16.msra.mxu1 %v12094_v23  ;;  %7049 = vmatprep.subr.bf16.mxu0 %v12101_v57  ;;  %v4039_v23 = vld [vmem:[#allocation8 + $0x3a0] sm:$0xff]  ;;  %v4036_v57 = vld [vmem:[#allocation8 + $0x388] sm:$0xff] }
 0x287   :  { %7213 = vmatprep.subr.bf16.mxu1 %v12103_v24  ;;  %v4040_v24 = vld [vmem:[#allocation8 + $0x3a8] sm:$0xff]  ;;  %v12165_v12 = vcombine.high %v4035_v21, %v4039_v23  ;;  %v12164_v33 = vcombine.low %v4035_v21, %v4039_v23 }
 0x288   :  { %v12167_v28 = vcombine.high %v4036_v57, %v4040_v24  ;;  %v12166_v34 = vcombine.low %v4036_v57, %v4040_v24  ;;  %v4092_v21 = vld [vmem:[#allocation8 + $0x548] sm:$0xff]  ;;  %v12214_v24 = vcombine.low %v4084_v10, %v4088_v11 }
 0x289   :  { %7050 = vmatpush1.bf16.msra.mxu0 %v12100_v29  ;;  %v4043_v29 = vld [vmem:[#allocation8 + $0x3c0] sm:$0xff]  ;;  %v4096_v23 = vld [vmem:[#allocation8 + $0x568] sm:$0xff] }
 0x28a   :  { %7214 = vmatpush1.bf16.msra.mxu1 %v12102_v30  ;;  %7051 = vmatprep.subr.bf16.mxu0 %v12109_v31  ;;  %v4047_v30 = vld [vmem:[#allocation8 + $0x3e0] sm:$0xff]  ;;  %v4044_v31 = vld [vmem:[#allocation8 + $0x3c8] sm:$0xff] }
 0x28b   :  { %7215 = vmatprep.subr.bf16.mxu1 %v12111_v15  ;;  %v4048_v15 = vld [vmem:[#allocation8 + $0x3e8] sm:$0xff]  ;;  %v12173_v35 = vcombine.high %v4043_v29, %v4047_v30  ;;  %v12172_v41 = vcombine.low %v4043_v29, %v4047_v30 }
 0x28c   :  { %v12175_v37 = vcombine.high %v4044_v31, %v4048_v15  ;;  %v12174_v36 = vcombine.low %v4044_v31, %v4048_v15  ;;  %v4100_v29 = vld [vmem:[#allocation8 + $0x588] sm:$0xff]  ;;  %v12222_v15 = vcombine.low %v4092_v21, %v4096_v23 }
 0x28d   :  { %7052 = vmatpush1.bf16.msra.mxu0 %v12108_v53  ;;  %v4051_v53 = vld [vmem:[#allocation8 + $0x400] sm:$0xff]  ;;  %v4104_v30 = vld [vmem:[#allocation8 + $0x5a8] sm:$0xff] }
 0x28e   :  { %7216 = vmatpush1.bf16.msra.mxu1 %v12110_v22  ;;  %7053 = vmatprep.subr.bf16.mxu0 %v12117_v38  ;;  %v4055_v22 = vld [vmem:[#allocation8 + $0x420] sm:$0xff]  ;;  %v4052_v38 = vld [vmem:[#allocation8 + $0x408] sm:$0xff] }
 0x28f   :  { %7217 = vmatprep.subr.bf16.mxu1 %v12119_v40  ;;  %v4056_v40 = vld [vmem:[#allocation8 + $0x428] sm:$0xff]  ;;  %v12181_v43 = vcombine.high %v4051_v53, %v4055_v22  ;;  %v12180_v47 = vcombine.low %v4051_v53, %v4055_v22 }
 0x290   :  { %v4108_v53 = vld [vmem:[#allocation8 + $0x5c8] sm:$0xff] }
 0x291   :  { %7054 = vmatpush1.bf16.msra.mxu0 %v12116_v44  ;;  %v12183_v44 = vcombine.high %v4052_v38, %v4056_v40  ;;  %v4112_v22 = vld [vmem:[#allocation8 + $0x5e8] sm:$0xff] }
 0x292   :  { %7218 = vmatpush1.bf16.msra.mxu1 %v12118_v25  ;;  %7055 = vmatprep.subr.bf16.mxu0 %v12125_v32  ;;  %v3910_v25 = vmax.f32 %v13621_v13, 0.0  ;;  %v4059_v32 = vld [vmem:[#allocation8 + $0x440] sm:$0xff]  ;;  %v12191_v13 = vcombine.high %v4060_v48, %v4064_v49  ;;  %v12239_v42 = vcombine.high %v4108_v53, %v4112_v22 }
 0x293   :  { %7219 = vmatprep.subr.bf16.mxu1 %v12127_v9  ;;  %v4063_v9 = vld [vmem:[#allocation8 + $0x460] sm:$0xff] }
 0x294   :  { %v12189_v4 = vcombine.high %v4059_v32, %v4063_v9  ;;  %v12188_v58 = vcombine.low %v4059_v32, %v4063_v9  ;;  %v12238_v9 = vcombine.low %v4108_v53, %v4112_v22  ;;  %v4123_v49 = vld [vmem:[#allocation8 + $0x640] sm:$0xff] }
 0x295   :  { %7056 = vmatpush1.bf16.msra.mxu0 %v12124_v46  ;;  %v12182_v46 = vcombine.low %v4052_v38, %v4056_v40  ;;  %v12230_v40 = vcombine.low %v4100_v29, %v4104_v30 }
 0x296   :  { %7220 = vmatpush1.bf16.msra.mxu1 %v12126_v51  ;;  %7057 = vmatprep.subr.bf16.mxu0 %v12133_v52  ;;  %v4067_v51 = vld [vmem:[#allocation8 + $0x480] sm:$0xff] }
 0x297   :  { %7221 = vmatprep.subr.bf16.mxu1 %v12135_v54  ;;  %v4071_v52 = vld [vmem:[#allocation8 + $0x4a0] sm:$0xff]  ;;  %v13634_v54 = vpack.c.bf16 %v3910_v25, %v3910_v25  ;;  %v4120_v25 = vld [vmem:[#allocation8 + $0x628] sm:$0xff] }
 0x298   :  { %v12196_v2 = vcombine.low %v4067_v51, %v4071_v52 }
 0x299   :  { %7058 = vmatpush1.bf16.msra.mxu0 %v12132_v60  ;;  %v12197_v60 = vcombine.high %v4067_v51, %v4071_v52  ;;  %v4128_v51 = vld [vmem:[#allocation8 + $0x668] sm:$0xff] }
 0x29a   :  { %7222 = vmatpush1.bf16.msra.mxu1 %v12134_v61  ;;  %7059 = vmatprep.subr.bf16.mxu0 %v12141_v62  ;;  %v12199_v61 = vcombine.high %v4068_v56, %v4072_v55  ;;  %v4075_v62 = vld [vmem:[#allocation8 + $0x4c0] sm:$0xff] }
 0x29b   :  { %7223 = vmatprep.subr.bf16.mxu1 %v12143_v63  ;;  %v4079_v63 = vld [vmem:[#allocation8 + $0x4e0] sm:$0xff] }
 0x29c   :  { %v12204_v14 = vcombine.low %v4075_v62, %v4079_v63 }
 0x29d   :  { %7060 = vmatpush1.bf16.msra.mxu0 %v12140_v3  ;;  %v12205_v3 = vcombine.high %v4075_v62, %v4079_v63 }
 0x29e   :  { %7224 = vmatpush1.bf16.msra.mxu1 %v12142_v5  ;;  %7061 = vmatprep.subr.bf16.mxu0 %v12149_v6  ;;  %v12207_v5 = vcombine.high %v4076_v0, %v4080_v1  ;;  %v4083_v6 = vld [vmem:[#allocation8 + $0x500] sm:$0xff] }
 0x29f   :  { %7225 = vmatprep.subr.bf16.mxu1 %v12151_v7  ;;  %v4087_v7 = vld [vmem:[#allocation8 + $0x520] sm:$0xff] }
 0x2a0   :  { %v12212_v57 = vcombine.low %v4083_v6, %v4087_v7 }
 0x2a1   :  { %7062 = vmatpush1.bf16.msra.mxu0 %v12148_v17  ;;  %v12213_v17 = vcombine.high %v4083_v6, %v4087_v7 }
 0x2a2   :  { %7226 = vmatpush1.bf16.msra.mxu1 %v12150_v18  ;;  %7063 = vmatprep.subr.bf16.mxu0 %v12157_v19  ;;  %v12215_v18 = vcombine.high %v4084_v10, %v4088_v11  ;;  %v4091_v19 = vld [vmem:[#allocation8 + $0x540] sm:$0xff] }
 0x2a3   :  { %7227 = vmatprep.subr.bf16.mxu1 %v12159_v20  ;;  %v4095_v20 = vld [vmem:[#allocation8 + $0x560] sm:$0xff] }
 0x2a4   :  { %v12220_v31 = vcombine.low %v4091_v19, %v4095_v20 }
 0x2a5   :  { %7064 = vmatpush1.bf16.msra.mxu0 %v12156_v26  ;;  %v12221_v26 = vcombine.high %v4091_v19, %v4095_v20 }
 0x2a6   :  { %7228 = vmatpush1.bf16.msra.mxu1 %v12158_v27  ;;  %7065 = vmatprep.subr.bf16.mxu0 %v12165_v12  ;;  %v12223_v27 = vcombine.high %v4092_v21, %v4096_v23  ;;  %v4099_v12 = vld [vmem:[#allocation8 + $0x580] sm:$0xff] }
 0x2a7   :  { %7229 = vmatprep.subr.bf16.mxu1 %v12167_v28  ;;  %v4103_v28 = vld [vmem:[#allocation8 + $0x5a0] sm:$0xff] }
 0x2a8   :  { %v12228_v38 = vcombine.low %v4099_v12, %v4103_v28 }
 0x2a9   :  { %7066 = vmatpush1.bf16.msra.mxu0 %v12164_v33  ;;  %v12229_v33 = vcombine.high %v4099_v12, %v4103_v28 }
 0x2aa   :  { %7230 = vmatpush1.bf16.msra.mxu1 %v12166_v34  ;;  %7067 = vmatprep.subr.bf16.mxu0 %v12173_v35  ;;  %v12231_v34 = vcombine.high %v4100_v29, %v4104_v30  ;;  %v4107_v35 = vld [vmem:[#allocation8 + $0x5c0] sm:$0xff] }
 0x2ab   :  { %7231 = vmatprep.subr.bf16.mxu1 %v12175_v37  ;;  %v4111_v37 = vld [vmem:[#allocation8 + $0x5e0] sm:$0xff] }
 0x2ac   :  { %v12236_v32 = vcombine.low %v4107_v35, %v4111_v37 }
 0x2ad   :  { %7068 = vmatpush1.bf16.msra.mxu0 %v12172_v41  ;;  %v12237_v41 = vcombine.high %v4107_v35, %v4111_v37 }
 0x2ae   :  { %7232 = vmatpush1.bf16.msra.mxu1 %v12174_v36  ;;  %7078 = vmatprep.subr.bf16.mxu0 %v12181_v43  ;;  %v4115_v36 = vld [vmem:[#allocation8 + $0x600] sm:$0xff] }
 0x2af   :  { %7242 = vmatprep.subr.bf16.mxu1 %v12183_v44  ;;  %v4119_v43 = vld [vmem:[#allocation8 + $0x620] sm:$0xff]  ;;  %v4116_v44 = vld [vmem:[#allocation8 + $0x608] sm:$0xff] }
 0x2b0   :  { %7070 = vmatmul.mubr.bf16.vlgmr.msra.gmra.mrb[8].mxu0 %v13632_v50  ;;  %v12247_v48 = vcombine.high %v4116_v44, %v4120_v25  ;;  %v12244_v52 = vcombine.low %v4115_v36, %v4119_v43 }
 0x2b1   :  { %7234 = vmatmul.mubr.bf16.vlgmr.msra.gmra.mrb[8].mxu1 %v13632_v50  ;;  %7079 = vmatpush1.bf16.msra.mxu0 %v12180_v47  ;;  %v12245_v47 = vcombine.high %v4115_v36, %v4119_v43 }
 0x2b2   :  { %7110 = vmatprep.mubr.bf16.mxu0 %v13634_v54  ;;  %7243 = vmatpush1.bf16.msra.mxu1 %v12182_v46  ;;  %v4127_v46 = vld [vmem:[#allocation8 + $0x660] sm:$0xff] }
 0x2b3   :  { %7274 = vmatprep.mubr.bf16.mxu1 %v13634_v54  ;;  %7080 = vmatprep.subr.bf16.mxu0 %v12189_v4  ;;  %v4124_v4 = vld [vmem:[#allocation8 + $0x648] sm:$0xff]  ;;  %v12253_v56 = vcombine.high %v4123_v49, %v4127_v46  ;;  %v12252_v62 = vcombine.low %v4123_v49, %v4127_v46  ;;  %v3909_v46 = vmax.f32 %v13617_v8, 0.0 }
 0x2b4   :  { %7244 = vmatprep.subr.bf16.mxu1 %v12191_v13  ;;  %v12246_v13 = vcombine.low %v4116_v44, %v4120_v25  ;;  %v12255_v55 = vcombine.high %v4124_v4, %v4128_v51  ;;  %v12254_v63 = vcombine.low %v4124_v4, %v4128_v51 }
 0x2b5   :  { %7081 = vmatpush1.bf16.msra.mxu0 %v12188_v58  ;;  %v4131_v58 = vld [vmem:[#allocation8 + $0x680] sm:$0xff] }
 0x2b6   :  { %7245 = vmatpush1.bf16.msra.mxu1 %v12190_v59  ;;  %7082 = vmatprep.subr.bf16.mxu0 %v12197_v60  ;;  %v4135_v59 = vld [vmem:[#allocation8 + $0x6a0] sm:$0xff]  ;;  %v4132_v60 = vld [vmem:[#allocation8 + $0x688] sm:$0xff] }
 0x2b7   :  { %7246 = vmatprep.subr.bf16.mxu1 %v12199_v61  ;;  %v4136_v61 = vld [vmem:[#allocation8 + $0x6a8] sm:$0xff]  ;;  %v12261_v0 = vcombine.high %v4131_v58, %v4135_v59  ;;  %v12260_v6 = vcombine.low %v4131_v58, %v4135_v59 }
 0x2b8   :  { %v12263_v1 = vcombine.high %v4132_v60, %v4136_v61  ;;  %v12262_v7 = vcombine.low %v4132_v60, %v4136_v61  ;;  %v4192_v58 = vld [vmem:[#allocation8 + $0x868] sm:$0xff]  ;;  %v13641_v60 = vpack.c.bf16 %v3909_v46, %v3909_v46  ;;  %v4243_v46 = vld [vmem:[#allocation8 + $0xa00] sm:$0xff] }
 0x2b9   :  { %7083 = vmatpush1.bf16.msra.mxu0 %v12196_v2  ;;  %v4139_v2 = vld [vmem:[#allocation8 + $0x6c0] sm:$0xff] }
 0x2ba   :  { %7247 = vmatpush1.bf16.msra.mxu1 %v12198_v39  ;;  %7084 = vmatprep.subr.bf16.mxu0 %v12205_v3  ;;  %v4143_v39 = vld [vmem:[#allocation8 + $0x6e0] sm:$0xff]  ;;  %v4140_v3 = vld [vmem:[#allocation8 + $0x6c8] sm:$0xff] }
 0x2bb   :  { %7248 = vmatprep.subr.bf16.mxu1 %v12207_v5  ;;  %v4144_v5 = vld [vmem:[#allocation8 + $0x6e8] sm:$0xff]  ;;  %v12269_v10 = vcombine.high %v4139_v2, %v4143_v39  ;;  %v12268_v19 = vcombine.low %v4139_v2, %v4143_v39 }
 0x2bc   :  { %v12271_v11 = vcombine.high %v4140_v3, %v4144_v5  ;;  %v12270_v20 = vcombine.low %v4140_v3, %v4144_v5  ;;  %v4200_v2 = vld [vmem:[#allocation8 + $0x8a8] sm:$0xff] }
 0x2bd   :  { %7085 = vmatpush1.bf16.msra.mxu0 %v12204_v14  ;;  %v4147_v14 = vld [vmem:[#allocation8 + $0x700] sm:$0xff] }
 0x2be   :  { %7249 = vmatpush1.bf16.msra.mxu1 %v12206_v16  ;;  %7086 = vmatprep.subr.bf16.mxu0 %v12213_v17  ;;  %v4151_v16 = vld [vmem:[#allocation8 + $0x720] sm:$0xff]  ;;  %v4148_v17 = vld [vmem:[#allocation8 + $0x708] sm:$0xff] }
 0x2bf   :  { %7250 = vmatprep.subr.bf16.mxu1 %v12215_v18  ;;  %v4152_v18 = vld [vmem:[#allocation8 + $0x728] sm:$0xff]  ;;  %v12277_v21 = vcombine.high %v4147_v14, %v4151_v16  ;;  %v12276_v12 = vcombine.low %v4147_v14, %v4151_v16 }
 0x2c0   :  { %v12279_v23 = vcombine.high %v4148_v17, %v4152_v18  ;;  %v12278_v28 = vcombine.low %v4148_v17, %v4152_v18  ;;  %v4208_v14 = vld [vmem:[#allocation8 + $0x8e8] sm:$0xff] }
 0x2c1   :  { %7087 = vmatpush1.bf16.msra.mxu0 %v12212_v57  ;;  %v4155_v57 = vld [vmem:[#allocation8 + $0x740] sm:$0xff] }
 0x2c2   :  { %7251 = vmatpush1.bf16.msra.mxu1 %v12214_v24  ;;  %7088 = vmatprep.subr.bf16.mxu0 %v12221_v26  ;;  %v4159_v24 = vld [vmem:[#allocation8 + $0x760] sm:$0xff]  ;;  %v4156_v26 = vld [vmem:[#allocation8 + $0x748] sm:$0xff] }
 0x2c3   :  { %7252 = vmatprep.subr.bf16.mxu1 %v12223_v27  ;;  %v4160_v27 = vld [vmem:[#allocation8 + $0x768] sm:$0xff]  ;;  %v12285_v29 = vcombine.high %v4155_v57, %v4159_v24  ;;  %v12284_v35 = vcombine.low %v4155_v57, %v4159_v24 }
 0x2c4   :  { %v12287_v30 = vcombine.high %v4156_v26, %v4160_v27  ;;  %v12286_v37 = vcombine.low %v4156_v26, %v4160_v27  ;;  %v4216_v57 = vld [vmem:[#allocation8 + $0x928] sm:$0xff] }
 0x2c5   :  { %7089 = vmatpush1.bf16.msra.mxu0 %v12220_v31  ;;  %v4163_v31 = vld [vmem:[#allocation8 + $0x780] sm:$0xff] }
 0x2c6   :  { %7253 = vmatpush1.bf16.msra.mxu1 %v12222_v15  ;;  %7090 = vmatprep.subr.bf16.mxu0 %v12229_v33  ;;  %v4167_v15 = vld [vmem:[#allocation8 + $0x7a0] sm:$0xff]  ;;  %v4164_v33 = vld [vmem:[#allocation8 + $0x788] sm:$0xff] }
 0x2c7   :  { %7254 = vmatprep.subr.bf16.mxu1 %v12231_v34  ;;  %v4168_v34 = vld [vmem:[#allocation8 + $0x7a8] sm:$0xff]  ;;  %v12293_v53 = vcombine.high %v4163_v31, %v4167_v15  ;;  %v12292_v36 = vcombine.low %v4163_v31, %v4167_v15 }
 0x2c8   :  { %v12295_v22 = vcombine.high %v4164_v33, %v4168_v34  ;;  %v12294_v43 = vcombine.low %v4164_v33, %v4168_v34  ;;  %v4224_v31 = vld [vmem:[#allocation8 + $0x968] sm:$0xff] }
 0x2c9   :  { %7091 = vmatpush1.bf16.msra.mxu0 %v12228_v38  ;;  %v4171_v38 = vld [vmem:[#allocation8 + $0x7c0] sm:$0xff] }
 0x2ca   :  { %7255 = vmatpush1.bf16.msra.mxu1 %v12230_v40  ;;  %7092 = vmatprep.subr.bf16.mxu0 %v12237_v41  ;;  %v4175_v40 = vld [vmem:[#allocation8 + $0x7e0] sm:$0xff]  ;;  %v4172_v41 = vld [vmem:[#allocation8 + $0x7c8] sm:$0xff] }
 0x2cb   :  { %7256 = vmatprep.subr.bf16.mxu1 %v12239_v42  ;;  %v4176_v42 = vld [vmem:[#allocation8 + $0x7e8] sm:$0xff]  ;;  %v12301_v44 = vcombine.high %v4171_v38, %v4175_v40  ;;  %v12300_v49 = vcombine.low %v4171_v38, %v4175_v40 }
 0x2cc   :  { %v12303_v25 = vcombine.high %v4172_v41, %v4176_v42  ;;  %v12302_v4 = vcombine.low %v4172_v41, %v4176_v42  ;;  %v4232_v38 = vld [vmem:[#allocation8 + $0x9a8] sm:$0xff] }
 0x2cd   :  { %7093 = vmatpush1.bf16.msra.mxu0 %v12236_v32  ;;  %v4179_v32 = vld [vmem:[#allocation8 + $0x800] sm:$0xff] }
 0x2ce   :  { %7257 = vmatpush1.bf16.msra.mxu1 %v12238_v9  ;;  %7094 = vmatprep.subr.bf16.mxu0 %v12245_v47  ;;  %v4183_v9 = vld [vmem:[#allocation8 + $0x820] sm:$0xff]  ;;  %v4180_v47 = vld [vmem:[#allocation8 + $0x808] sm:$0xff] }
 0x2cf   :  { %7258 = vmatprep.subr.bf16.mxu1 %v12247_v48  ;;  %v4184_v48 = vld [vmem:[#allocation8 + $0x828] sm:$0xff]  ;;  %v12309_v51 = vcombine.high %v4179_v32, %v4183_v9  ;;  %v12308_v59 = vcombine.low %v4179_v32, %v4183_v9 }
 0x2d0   :  { %v12310_v61 = vcombine.low %v4180_v47, %v4184_v48  ;;  %v4240_v32 = vld [vmem:[#allocation8 + $0x9e8] sm:$0xff] }
 0x2d1   :  { %7095 = vmatpush1.bf16.msra.mxu0 %v12244_v52  ;;  %v12311_v52 = vcombine.high %v4180_v47, %v4184_v48 }
 0x2d2   :  { %7259 = vmatpush1.bf16.msra.mxu1 %v12246_v13  ;;  %7096 = vmatprep.subr.bf16.mxu0 %v12253_v56  ;;  %v4187_v13 = vld [vmem:[#allocation8 + $0x840] sm:$0xff] }
 0x2d3   :  { %7260 = vmatprep.subr.bf16.mxu1 %v12255_v55  ;;  %v4191_v56 = vld [vmem:[#allocation8 + $0x860] sm:$0xff]  ;;  %v4188_v55 = vld [vmem:[#allocation8 + $0x848] sm:$0xff] }
 0x2d4   :  { %v12319_v8 = vcombine.high %v4188_v55, %v4192_v58  ;;  %v12316_v39 = vcombine.low %v4187_v13, %v4191_v56  ;;  %v12318_v3 = vcombine.low %v4188_v55, %v4192_v58 }
 0x2d5   :  { %7097 = vmatpush1.bf16.msra.mxu0 %v12252_v62  ;;  %v12317_v62 = vcombine.high %v4187_v13, %v4191_v56 }
 0x2d6   :  { %7261 = vmatpush1.bf16.msra.mxu1 %v12254_v63  ;;  %7098 = vmatprep.subr.bf16.mxu0 %v12261_v0  ;;  %v4195_v63 = vld [vmem:[#allocation8 + $0x880] sm:$0xff] }
 0x2d7   :  { %7262 = vmatprep.subr.bf16.mxu1 %v12263_v1  ;;  %v4199_v0 = vld [vmem:[#allocation8 + $0x8a0] sm:$0xff]  ;;  %v4196_v1 = vld [vmem:[#allocation8 + $0x888] sm:$0xff] }
 0x2d8   :  { %v12325_v5 = vcombine.high %v4195_v63, %v4199_v0  ;;  %v12324_v16 = vcombine.low %v4195_v63, %v4199_v0  ;;  %v12326_v17 = vcombine.low %v4196_v1, %v4200_v2 }
 0x2d9   :  { %7099 = vmatpush1.bf16.msra.mxu0 %v12260_v6  ;;  %v12327_v6 = vcombine.high %v4196_v1, %v4200_v2 }
 0x2da   :  { %7263 = vmatpush1.bf16.msra.mxu1 %v12262_v7  ;;  %7100 = vmatprep.subr.bf16.mxu0 %v12269_v10  ;;  %v4203_v7 = vld [vmem:[#allocation8 + $0x8c0] sm:$0xff] }
 0x2db   :  { %7264 = vmatprep.subr.bf16.mxu1 %v12271_v11  ;;  %v4207_v10 = vld [vmem:[#allocation8 + $0x8e0] sm:$0xff]  ;;  %v4204_v11 = vld [vmem:[#allocation8 + $0x8c8] sm:$0xff] }
 0x2dc   :  { %v12333_v18 = vcombine.high %v4203_v7, %v4207_v10  ;;  %v12332_v24 = vcombine.low %v4203_v7, %v4207_v10  ;;  %v12334_v26 = vcombine.low %v4204_v11, %v4208_v14 }
 0x2dd   :  { %7101 = vmatpush1.bf16.msra.mxu0 %v12268_v19  ;;  %v12335_v19 = vcombine.high %v4204_v11, %v4208_v14 }
 0x2de   :  { %7265 = vmatpush1.bf16.msra.mxu1 %v12270_v20  ;;  %7102 = vmatprep.subr.bf16.mxu0 %v12277_v21  ;;  %v4211_v20 = vld [vmem:[#allocation8 + $0x900] sm:$0xff] }
 0x2df   :  { %7266 = vmatprep.subr.bf16.mxu1 %v12279_v23  ;;  %v4215_v21 = vld [vmem:[#allocation8 + $0x920] sm:$0xff]  ;;  %v4212_v23 = vld [vmem:[#allocation8 + $0x908] sm:$0xff] }
 0x2e0   :  { %v12341_v27 = vcombine.high %v4211_v20, %v4215_v21  ;;  %v12340_v15 = vcombine.low %v4211_v20, %v4215_v21  ;;  %v12342_v33 = vcombine.low %v4212_v23, %v4216_v57 }
 0x2e1   :  { %7103 = vmatpush1.bf16.msra.mxu0 %v12276_v12  ;;  %v12343_v12 = vcombine.high %v4212_v23, %v4216_v57 }
 0x2e2   :  { %7267 = vmatpush1.bf16.msra.mxu1 %v12278_v28  ;;  %7104 = vmatprep.subr.bf16.mxu0 %v12285_v29  ;;  %v4219_v28 = vld [vmem:[#allocation8 + $0x940] sm:$0xff] }
 0x2e3   :  { %7268 = vmatprep.subr.bf16.mxu1 %v12287_v30  ;;  %v4223_v29 = vld [vmem:[#allocation8 + $0x960] sm:$0xff]  ;;  %v4220_v30 = vld [vmem:[#allocation8 + $0x948] sm:$0xff] }
 0x2e4   :  { %v12349_v34 = vcombine.high %v4219_v28, %v4223_v29  ;;  %v12348_v40 = vcombine.low %v4219_v28, %v4223_v29  ;;  %v12350_v41 = vcombine.low %v4220_v30, %v4224_v31 }
 0x2e5   :  { %7105 = vmatpush1.bf16.msra.mxu0 %v12284_v35  ;;  %v12351_v35 = vcombine.high %v4220_v30, %v4224_v31 }
 0x2e6   :  { %7269 = vmatpush1.bf16.msra.mxu1 %v12286_v37  ;;  %7106 = vmatprep.subr.bf16.mxu0 %v12293_v53  ;;  %v4227_v37 = vld [vmem:[#allocation8 + $0x980] sm:$0xff] }
 0x2e7   :  { %7270 = vmatprep.subr.bf16.mxu1 %v12295_v22  ;;  %v4231_v53 = vld [vmem:[#allocation8 + $0x9a0] sm:$0xff]  ;;  %v4228_v22 = vld [vmem:[#allocation8 + $0x988] sm:$0xff] }
 0x2e8   :  { %v12357_v42 = vcombine.high %v4227_v37, %v4231_v53  ;;  %v12356_v9 = vcombine.low %v4227_v37, %v4231_v53  ;;  %v12358_v47 = vcombine.low %v4228_v22, %v4232_v38 }
 0x2e9   :  { %7107 = vmatpush1.bf16.msra.mxu0 %v12292_v36  ;;  %v12359_v36 = vcombine.high %v4228_v22, %v4232_v38 }
 0x2ea   :  { %7271 = vmatpush1.bf16.msra.mxu1 %v12294_v43  ;;  %7108 = vmatprep.subr.bf16.mxu0 %v12301_v44  ;;  %v4235_v43 = vld [vmem:[#allocation8 + $0x9c0] sm:$0xff] }
 0x2eb   :  { %7272 = vmatprep.subr.bf16.mxu1 %v12303_v25  ;;  %v4239_v44 = vld [vmem:[#allocation8 + $0x9e0] sm:$0xff]  ;;  %v4236_v25 = vld [vmem:[#allocation8 + $0x9c8] sm:$0xff] }
 0x2ec   :  { %v12365_v48 = vcombine.high %v4235_v43, %v4239_v44  ;;  %v12364_v13 = vcombine.low %v4235_v43, %v4239_v44  ;;  %v12366_v56 = vcombine.low %v4236_v25, %v4240_v32 }
 0x2ed   :  { %7109 = vmatpush1.bf16.msra.mxu0 %v12300_v49  ;;  %v12367_v49 = vcombine.high %v4236_v25, %v4240_v32 }
 0x2ee   :  { %7273 = vmatpush1.bf16.msra.mxu1 %v12302_v4  ;;  %7119 = vmatprep.subr.bf16.mxu0 %v12309_v51  ;;  %v4247_v4 = vld [vmem:[#allocation8 + $0xa20] sm:$0xff]  ;;  %v4244_v51 = vld [vmem:[#allocation8 + $0xa08] sm:$0xff] }
 0x2ef   :  { %7283 = vmatprep.subr.bf16.mxu1 %v12311_v52  ;;  %v4248_v52 = vld [vmem:[#allocation8 + $0xa28] sm:$0xff]  ;;  %v12373_v55 = vcombine.high %v4243_v46, %v4247_v4  ;;  %v12372_v63 = vcombine.low %v4243_v46, %v4247_v4 }
 0x2f0   :  { %7111 = vmatmul.mubr.bf16.vlgmr.msra.gmra.mrb[8].mxu0 %v13641_v60  ;;  %v12375_v58 = vcombine.high %v4244_v51, %v4248_v52  ;;  %v12374_v0 = vcombine.low %v4244_v51, %v4248_v52 }
 0x2f1   :  { %7275 = vmatmul.mubr.bf16.vlgmr.msra.gmra.mrb[8].mxu1 %v13641_v60  ;;  %7120 = vmatpush1.bf16.msra.mxu0 %v12308_v59  ;;  %v4251_v59 = vld [vmem:[#allocation8 + $0xa40] sm:$0xff] }
 0x2f2   :  { %7284 = vmatpush1.bf16.msra.mxu1 %v12310_v61  ;;  %7121 = vmatprep.subr.bf16.mxu0 %v12317_v62  ;;  %v4255_v61 = vld [vmem:[#allocation8 + $0xa60] sm:$0xff]  ;;  %v4252_v62 = vld [vmem:[#allocation8 + $0xa48] sm:$0xff] }
 0x2f3   :  { %7285 = vmatprep.subr.bf16.mxu1 %v12319_v8  ;;  %v4256_v8 = vld [vmem:[#allocation8 + $0xa68] sm:$0xff]  ;;  %v12381_v1 = vcombine.high %v4251_v59, %v4255_v61  ;;  %v12380_v7 = vcombine.low %v4251_v59, %v4255_v61 }
 0x2f4   :  { %v12383_v2 = vcombine.high %v4252_v62, %v4256_v8  ;;  %v12382_v10 = vcombine.low %v4252_v62, %v4256_v8 }
 0x2f5   :  { %7122 = vmatpush1.bf16.msra.mxu0 %v12316_v39  ;;  %v4259_v39 = vld [vmem:[#allocation8 + $0xa80] sm:$0xff] }
 0x2f6   :  { %7286 = vmatpush1.bf16.msra.mxu1 %v12318_v3  ;;  %7123 = vmatprep.subr.bf16.mxu0 %v12325_v5  ;;  %v4263_v3 = vld [vmem:[#allocation8 + $0xaa0] sm:$0xff]  ;;  %v4260_v5 = vld [vmem:[#allocation8 + $0xa88] sm:$0xff] }
 0x2f7   :  { %7287 = vmatprep.subr.bf16.mxu1 %v12327_v6  ;;  %v4264_v6 = vld [vmem:[#allocation8 + $0xaa8] sm:$0xff]  ;;  %v12389_v11 = vcombine.high %v4259_v39, %v4263_v3  ;;  %v12388_v20 = vcombine.low %v4259_v39, %v4263_v3 }
 0x2f8   :  { %v12391_v14 = vcombine.high %v4260_v5, %v4264_v6  ;;  %v12390_v21 = vcombine.low %v4260_v5, %v4264_v6  ;;  %v4315_v6 = vld [vmem:[#allocation8 + $0xc40] sm:$0xff] }
 0x2f9   :  { %7124 = vmatpush1.bf16.msra.mxu0 %v12324_v16  ;;  %v4267_v16 = vld [vmem:[#allocation8 + $0xac0] sm:$0xff] }
 0x2fa   :  { %7288 = vmatpush1.bf16.msra.mxu1 %v12326_v17  ;;  %7125 = vmatprep.subr.bf16.mxu0 %v12333_v18  ;;  %v4271_v17 = vld [vmem:[#allocation8 + $0xae0] sm:$0xff]  ;;  %v4268_v18 = vld [vmem:[#allocation8 + $0xac8] sm:$0xff] }
 0x2fb   :  { %7289 = vmatprep.subr.bf16.mxu1 %v12335_v19  ;;  %v4272_v19 = vld [vmem:[#allocation8 + $0xae8] sm:$0xff]  ;;  %v12397_v23 = vcombine.high %v4267_v16, %v4271_v17  ;;  %v12396_v28 = vcombine.low %v4267_v16, %v4271_v17 }
 0x2fc   :  { %v12399_v57 = vcombine.high %v4268_v18, %v4272_v19  ;;  %v12398_v29 = vcombine.low %v4268_v18, %v4272_v19  ;;  %v4316_v16 = vld [vmem:[#allocation8 + $0xc48] sm:$0xff] }
 0x2fd   :  { %7126 = vmatpush1.bf16.msra.mxu0 %v12332_v24  ;;  %v4275_v24 = vld [vmem:[#allocation8 + $0xb00] sm:$0xff]  ;;  %v4320_v17 = vld [vmem:[#allocation8 + $0xc68] sm:$0xff] }
 0x2fe   :  { %7290 = vmatpush1.bf16.msra.mxu1 %v12334_v26  ;;  %7127 = vmatprep.subr.bf16.mxu0 %v12341_v27  ;;  %v4279_v26 = vld [vmem:[#allocation8 + $0xb20] sm:$0xff]  ;;  %v4276_v27 = vld [vmem:[#allocation8 + $0xb08] sm:$0xff] }
 0x2ff   :  { %7291 = vmatprep.subr.bf16.mxu1 %v12343_v12  ;;  %v4280_v12 = vld [vmem:[#allocation8 + $0xb28] sm:$0xff]  ;;  %v12405_v30 = vcombine.high %v4275_v24, %v4279_v26  ;;  %v12404_v37 = vcombine.low %v4275_v24, %v4279_v26  ;;  %v12447_v26 = vcombine.high %v4316_v16, %v4320_v17 }
 0x300   :  { %v12407_v31 = vcombine.high %v4276_v27, %v4280_v12  ;;  %v12406_v53 = vcombine.low %v4276_v27, %v4280_v12  ;;  %v4327_v27 = vld [vmem:[#allocation8 + $0xca0] sm:$0xff]  ;;  %v4324_v12 = vld [vmem:[#allocation8 + $0xc88] sm:$0xff] }
 0x301   :  { %7128 = vmatpush1.bf16.msra.mxu0 %v12340_v15  ;;  %v4283_v15 = vld [vmem:[#allocation8 + $0xb40] sm:$0xff] }
 0x302   :  { %7292 = vmatpush1.bf16.msra.mxu1 %v12342_v33  ;;  %7129 = vmatprep.subr.bf16.mxu0 %v12349_v34  ;;  %v4287_v33 = vld [vmem:[#allocation8 + $0xb60] sm:$0xff]  ;;  %v4284_v34 = vld [vmem:[#allocation8 + $0xb48] sm:$0xff] }
 0x303   :  { %7293 = vmatprep.subr.bf16.mxu1 %v12351_v35  ;;  %v4288_v35 = vld [vmem:[#allocation8 + $0xb68] sm:$0xff]  ;;  %v12413_v22 = vcombine.high %v4283_v15, %v4287_v33  ;;  %v12412_v43 = vcombine.low %v4283_v15, %v4287_v33 }
 0x304   :  { %v12415_v38 = vcombine.high %v4284_v34, %v4288_v35  ;;  %v12414_v44 = vcombine.low %v4284_v34, %v4288_v35  ;;  %v4331_v34 = vld [vmem:[#allocation8 + $0xcc0] sm:$0xff] }
 0x305   :  { %7130 = vmatpush1.bf16.msra.mxu0 %v12348_v40  ;;  %v4291_v40 = vld [vmem:[#allocation8 + $0xb80] sm:$0xff] }
 0x306   :  { %7294 = vmatpush1.bf16.msra.mxu1 %v12350_v41  ;;  %7131 = vmatprep.subr.bf16.mxu0 %v12357_v42  ;;  %v4295_v41 = vld [vmem:[#allocation8 + $0xba0] sm:$0xff]  ;;  %v4292_v42 = vld [vmem:[#allocation8 + $0xb88] sm:$0xff] }
 0x307   :  { %7295 = vmatprep.subr.bf16.mxu1 %v12359_v36  ;;  %v4296_v36 = vld [vmem:[#allocation8 + $0xba8] sm:$0xff]  ;;  %v12421_v25 = vcombine.high %v4291_v40, %v4295_v41  ;;  %v12420_v46 = vcombine.low %v4291_v40, %v4295_v41  ;;  %v4335_v35 = vld [vmem:[#allocation8 + $0xce0] sm:$0xff] }
 0x308   :  { %v12423_v32 = vcombine.high %v4292_v42, %v4296_v36  ;;  %v12422_v4 = vcombine.low %v4292_v42, %v4296_v36  ;;  %v12461_v40 = vcombine.high %v4331_v34, %v4335_v35  ;;  %v4339_v42 = vld [vmem:[#allocation8 + $0xd00] sm:$0xff] }
 0x309   :  { %7132 = vmatpush1.bf16.msra.mxu0 %v12356_v9  ;;  %v4299_v9 = vld [vmem:[#allocation8 + $0xbc0] sm:$0xff] }
 0x30a   :  { %7296 = vmatpush1.bf16.msra.mxu1 %v12358_v47  ;;  %7133 = vmatprep.subr.bf16.mxu0 %v12365_v48  ;;  %v4303_v47 = vld [vmem:[#allocation8 + $0xbe0] sm:$0xff]  ;;  %v4300_v48 = vld [vmem:[#allocation8 + $0xbc8] sm:$0xff] }
 0x30b   :  { %7297 = vmatprep.subr.bf16.mxu1 %v12367_v49  ;;  %v4304_v49 = vld [vmem:[#allocation8 + $0xbe8] sm:$0xff]  ;;  %v12429_v51 = vcombine.high %v4299_v9, %v4303_v47  ;;  %v12428_v59 = vcombine.low %v4299_v9, %v4303_v47  ;;  %v4343_v36 = vld [vmem:[#allocation8 + $0xd20] sm:$0xff] }
 0x30c   :  { %v12431_v52 = vcombine.high %v4300_v48, %v4304_v49  ;;  %v12430_v61 = vcombine.low %v4300_v48, %v4304_v49  ;;  %v12469_v9 = vcombine.high %v4339_v42, %v4343_v36  ;;  %v4347_v48 = vld [vmem:[#allocation8 + $0xd40] sm:$0xff] }
 0x30d   :  { %7134 = vmatpush1.bf16.msra.mxu0 %v12364_v13  ;;  %v4307_v13 = vld [vmem:[#allocation8 + $0xc00] sm:$0xff] }
 0x30e   :  { %7298 = vmatpush1.bf16.msra.mxu1 %v12366_v56  ;;  %7135 = vmatprep.subr.bf16.mxu0 %v12373_v55  ;;  %v4311_v56 = vld [vmem:[#allocation8 + $0xc20] sm:$0xff]  ;;  %v4308_v55 = vld [vmem:[#allocation8 + $0xc08] sm:$0xff] }
 0x30f   :  { %7299 = vmatprep.subr.bf16.mxu1 %v12375_v58  ;;  %v4312_v58 = vld [vmem:[#allocation8 + $0xc28] sm:$0xff]  ;;  %v12437_v62 = vcombine.high %v4307_v13, %v4311_v56  ;;  %v4351_v49 = vld [vmem:[#allocation8 + $0xd60] sm:$0xff] }
 0x310   :  { %v12439_v8 = vcombine.high %v4308_v55, %v4312_v58 }
 0x311   :  { %7136 = vmatpush1.bf16.msra.mxu0 %v12372_v63 }
 0x312   :  { %7300 = vmatpush1.bf16.msra.mxu1 %v12374_v0  ;;  %7137 = vmatprep.subr.bf16.mxu0 %v12381_v1 }
 0x313   :  { %7301 = vmatprep.subr.bf16.mxu1 %v12383_v2 }
 0x315   :  { %7138 = vmatpush1.bf16.msra.mxu0 %v12380_v7 }
 0x316   :  { %7302 = vmatpush1.bf16.msra.mxu1 %v12382_v10  ;;  %7139 = vmatprep.subr.bf16.mxu0 %v12389_v11 }
 0x317   :  { %7303 = vmatprep.subr.bf16.mxu1 %v12391_v14  ;;  %v4319_v14 = vld [vmem:[#allocation8 + $0xc60] sm:$0xff] }
 0x318   :  { %v12445_v24 = vcombine.high %v4315_v6, %v4319_v14 }
 0x319   :  { %7140 = vmatpush1.bf16.msra.mxu0 %v12388_v20  ;;  %v12436_v20 = vcombine.low %v4307_v13, %v4311_v56  ;;  %v12477_v13 = vcombine.high %v4347_v48, %v4351_v49 }
 0x31a   :  { %7304 = vmatpush1.bf16.msra.mxu1 %v12390_v21  ;;  %7141 = vmatprep.subr.bf16.mxu0 %v12397_v23  ;;  %v12438_v21 = vcombine.low %v4308_v55, %v4312_v58  ;;  %v4355_v55 = vld [vmem:[#allocation8 + $0xd80] sm:$0xff] }
 0x31b   :  { %7305 = vmatprep.subr.bf16.mxu1 %v12399_v57  ;;  %v4323_v57 = vld [vmem:[#allocation8 + $0xc80] sm:$0xff] }
 0x31c   :  { %v12453_v15 = vcombine.high %v4323_v57, %v4327_v27  ;;  %v4359_v58 = vld [vmem:[#allocation8 + $0xda0] sm:$0xff] }
 0x31d   :  { %7142 = vmatpush1.bf16.msra.mxu0 %v12396_v28  ;;  %v4328_v28 = vld [vmem:[#allocation8 + $0xca8] sm:$0xff] }
 0x31e   :  { %7306 = vmatpush1.bf16.msra.mxu1 %v12398_v29  ;;  %7143 = vmatprep.subr.bf16.mxu0 %v12405_v30  ;;  %v12444_v30 = vcombine.low %v4315_v6, %v4319_v14  ;;  %v12455_v33 = vcombine.high %v4324_v12, %v4328_v28  ;;  %v12484_v6 = vcombine.low %v4355_v55, %v4359_v58  ;;  %v4371_v14 = vld [vmem:[#allocation8 + $0xe00] sm:$0xff] }
 0x31f   :  { %7307 = vmatprep.subr.bf16.mxu1 %v12407_v31  ;;  %v12446_v31 = vcombine.low %v4316_v16, %v4320_v17  ;;  %v4375_v16 = vld [vmem:[#allocation8 + $0xe20] sm:$0xff]  ;;  %v4372_v17 = vld [vmem:[#allocation8 + $0xe08] sm:$0xff] }
 0x321   :  { %7144 = vmatpush1.bf16.msra.mxu0 %v12404_v37  ;;  %v4332_v37 = vld [vmem:[#allocation8 + $0xcc8] sm:$0xff] }
 0x322   :  { %7308 = vmatpush1.bf16.msra.mxu1 %v12406_v53  ;;  %7145 = vmatprep.subr.bf16.mxu0 %v12413_v22  ;;  %v4336_v53 = vld [vmem:[#allocation8 + $0xce8] sm:$0xff]  ;;  %v12452_v22 = vcombine.low %v4323_v57, %v4327_v27  ;;  %v12501_v57 = vcombine.high %v4371_v14, %v4375_v16  ;;  %v4383_v27 = vld [vmem:[#allocation8 + $0xe60] sm:$0xff] }
 0x323   :  { %7309 = vmatprep.subr.bf16.mxu1 %v12415_v38  ;;  %v12454_v38 = vcombine.low %v4324_v12, %v4328_v28  ;;  %v12463_v41 = vcombine.high %v4332_v37, %v4336_v53  ;;  %v4380_v12 = vld [vmem:[#allocation8 + $0xe48] sm:$0xff] }
 0x324   :  { %v4384_v28 = vld [vmem:[#allocation8 + $0xe68] sm:$0xff] }
 0x325   :  { %7146 = vmatpush1.bf16.msra.mxu0 %v12412_v43  ;;  %v4340_v43 = vld [vmem:[#allocation8 + $0xd08] sm:$0xff] }
 0x326   :  { %7310 = vmatpush1.bf16.msra.mxu1 %v12414_v44  ;;  %7147 = vmatprep.subr.bf16.mxu0 %v12421_v25  ;;  %v4344_v44 = vld [vmem:[#allocation8 + $0xd28] sm:$0xff]  ;;  %v12460_v25 = vcombine.low %v4331_v34, %v4335_v35  ;;  %v4387_v34 = vld [vmem:[#allocation8 + $0xe80] sm:$0xff] }
 0x327   :  { %7311 = vmatprep.subr.bf16.mxu1 %v12423_v32  ;;  %v12462_v32 = vcombine.low %v4332_v37, %v4336_v53  ;;  %v12471_v47 = vcombine.high %v4340_v43, %v4344_v44  ;;  %v4391_v35 = vld [vmem:[#allocation8 + $0xea0] sm:$0xff]  ;;  %v4388_v37 = vld [vmem:[#allocation8 + $0xe88] sm:$0xff] }
 0x328   :  { %v4392_v53 = vld [vmem:[#allocation8 + $0xea8] sm:$0xff] }
 0x329   :  { %7148 = vmatpush1.bf16.msra.mxu0 %v12420_v46  ;;  %v4348_v46 = vld [vmem:[#allocation8 + $0xd48] sm:$0xff] }
 0x32a   :  { %7312 = vmatpush1.bf16.msra.mxu1 %v12422_v4  ;;  %7149 = vmatprep.subr.bf16.mxu0 %v12429_v51  ;;  %v4352_v4 = vld [vmem:[#allocation8 + $0xd68] sm:$0xff]  ;;  %v12468_v51 = vcombine.low %v4339_v42, %v4343_v36  ;;  %v4395_v42 = vld [vmem:[#allocation8 + $0xec0] sm:$0xff] }
 0x32b   :  { %7313 = vmatprep.subr.bf16.mxu1 %v12431_v52  ;;  %v12470_v52 = vcombine.low %v4340_v43, %v4344_v44  ;;  %v12479_v56 = vcombine.high %v4348_v46, %v4352_v4  ;;  %v4399_v36 = vld [vmem:[#allocation8 + $0xee0] sm:$0xff]  ;;  %v4396_v43 = vld [vmem:[#allocation8 + $0xec8] sm:$0xff] }
 0x32c   :  { %v4400_v44 = vld [vmem:[#allocation8 + $0xee8] sm:$0xff] }
 0x32d   :  { %7150 = vmatpush1.bf16.msra.mxu0 %v12428_v59  ;;  %v4356_v59 = vld [vmem:[#allocation8 + $0xd88] sm:$0xff] }
 0x32e   :  { %7314 = vmatpush1.bf16.msra.mxu1 %v12430_v61  ;;  %7160 = vmatprep.subr.bf16.mxu0 %v12437_v62  ;;  %v4360_v61 = vld [vmem:[#allocation8 + $0xda8] sm:$0xff]  ;;  %v12476_v62 = vcombine.low %v4347_v48, %v4351_v49  ;;  %v4403_v48 = vld [vmem:[#allocation8 + $0xf00] sm:$0xff] }
 0x32f   :  { %7324 = vmatprep.subr.bf16.mxu1 %v12439_v8  ;;  %v12478_v8 = vcombine.low %v4348_v46, %v4352_v4  ;;  %v4407_v49 = vld [vmem:[#allocation8 + $0xf20] sm:$0xff]  ;;  %v4404_v46 = vld [vmem:[#allocation8 + $0xf08] sm:$0xff] }
 0x330   :  { %v4408_v4 = vld [vmem:[#allocation8 + $0xf28] sm:$0xff] }
 0x343   :  { %v3709_v63 = vpop.f32.mrb[4].mxu0  ;;  %v13645_v1 = vpop.f32.mrb[4].mxu1 }
 0x344   :  { %v3911_v0 = vmax.f32 %v3709_v63, 0.0  ;;  %v3711_v2 = vpop.f32.mrb[5].mxu0  ;;  %v3875_v3 = vpop.f32.mrb[5].mxu1  ;;  %v12485_v63 = vcombine.high %v4355_v55, %v4359_v58  ;;  %v4411_v55 = vld [vmem:[#allocation8 + $0xf40] sm:$0xff] }
 0x345   :  { %v3912_v39 = vmax.f32 %v3711_v2, 0.0  ;;  %v3713_v5 = vpop.f32.mrb[6].mxu0  ;;  %v3914_v7 = vmax.f32 %v3875_v3, 0.0  ;;  %v3877_v10 = vpop.f32.mrb[6].mxu1  ;;  %v4363_v2 = vld [vmem:[#allocation8 + $0xdc0] sm:$0xff]  ;;  %v4364_v3 = vld [vmem:[#allocation8 + $0xdc8] sm:$0xff] }
 0x346   :  { %v3714_v11 = vpop.f32.mrb[7].mxu0  ;;  %v3878_v19 = vpop.f32.mrb[7].mxu1  ;;  %v13649_v23 = vpack.c.bf16 %v3911_v0, %v3911_v0  ;;  %v12487_v0 = vcombine.high %v4356_v59, %v4360_v61  ;;  %v4368_v5 = vld [vmem:[#allocation8 + $0xde8] sm:$0xff]  ;;  %v4415_v58 = vld [vmem:[#allocation8 + $0xf60] sm:$0xff] }
 0x347   :  { %v13647_v18 = vpack.c.bf16 %v3912_v39, %v3912_v39  ;;  %v13653_v29 = vpack.c.bf16 %v3914_v7, %v3914_v7  ;;  %v4367_v39 = vld [vmem:[#allocation8 + $0xde0] sm:$0xff]  ;;  %v12486_v7 = vcombine.low %v4356_v59, %v4360_v61  ;;  %v12495_v11 = vcombine.high %v4364_v3, %v4368_v5  ;;  %v4376_v19 = vld [vmem:[#allocation8 + $0xe28] sm:$0xff] }
 0x348   :  { %v12493_v10 = vcombine.high %v4363_v2, %v4367_v39  ;;  %v4412_v59 = vld [vmem:[#allocation8 + $0xf48] sm:$0xff] }
 0x349   :  { %7151 = vmatprep.mubr.bf16.mxu0 %v13647_v18  ;;  %7315 = vmatprep.mubr.bf16.mxu1 %v13647_v18  ;;  %v4416_v61 = vld [vmem:[#allocation8 + $0xf68] sm:$0xff] }
 0x34a   :  { %7152 = vmatmul.mubr.bf16.vlgmr.msra.gmra.mrb[8].mxu0 %v13649_v23  ;;  %7316 = vmatmul.mubr.bf16.vlgmr.msra.gmra.mrb[8].mxu1 %v13649_v23 }
 0x34b   :  { %7161 = vmatpush1.bf16.msra.mxu0 %v12436_v20  ;;  %7325 = vmatpush1.bf16.msra.mxu1 %v12438_v21  ;;  %v12492_v20 = vcombine.low %v4363_v2, %v4367_v39  ;;  %v12494_v21 = vcombine.low %v4364_v3, %v4368_v5  ;;  %v4419_v2 = vld [vmem:[#allocation8 + $0xf80] sm:$0xff]  ;;  %v4420_v3 = vld [vmem:[#allocation8 + $0xf88] sm:$0xff] }
 0x34c   :  { %7192 = vmatprep.mubr.bf16.mxu0 %v13653_v29  ;;  %7356 = vmatprep.mubr.bf16.mxu1 %v13653_v29  ;;  %v4423_v39 = vld [vmem:[#allocation8 + $0xfa0] sm:$0xff]  ;;  %v4424_v5 = vld [vmem:[#allocation8 + $0xfa8] sm:$0xff] }
 0x34d   :  { %7162 = vmatprep.subr.bf16.mxu0 %v12445_v24  ;;  %7326 = vmatprep.subr.bf16.mxu1 %v12447_v26  ;;  %v12503_v24 = vcombine.high %v4372_v17, %v4376_v19  ;;  %v4379_v26 = vld [vmem:[#allocation8 + $0xe40] sm:$0xff] }
 0x34f   :  { %7163 = vmatpush1.bf16.msra.mxu0 %v12444_v30  ;;  %7327 = vmatpush1.bf16.msra.mxu1 %v12446_v31  ;;  %v12500_v30 = vcombine.low %v4371_v14, %v4375_v16  ;;  %v12502_v31 = vcombine.low %v4372_v17, %v4376_v19  ;;  %v4427_v14 = vld [vmem:[#allocation8 + $0xfc0] sm:$0xff]  ;;  %v4428_v17 = vld [vmem:[#allocation8 + $0xfc8] sm:$0xff] }
 0x350   :  { %7164 = vmatprep.subr.bf16.mxu0 %v12453_v15  ;;  %7328 = vmatprep.subr.bf16.mxu1 %v12455_v33  ;;  %v12509_v15 = vcombine.high %v4379_v26, %v4383_v27  ;;  %v12511_v33 = vcombine.high %v4380_v12, %v4384_v28  ;;  %v4431_v16 = vld [vmem:[#allocation8 + $0xfe0] sm:$0xff]  ;;  %v4432_v19 = vld [vmem:[#allocation8 + $0xfe8] sm:$0xff] }
 0x353   :  { %7165 = vmatpush1.bf16.msra.mxu0 %v12452_v22  ;;  %7329 = vmatpush1.bf16.msra.mxu1 %v12454_v38  ;;  %v12508_v22 = vcombine.low %v4379_v26, %v4383_v27  ;;  %v12510_v38 = vcombine.low %v4380_v12, %v4384_v28  ;;  %v3925_v26 = vld [vmem:[#allocation8 + $0x10] sm:$0xff]  ;;  %v3926_v12 = vld [vmem:[#allocation8 + $0x18] sm:$0xff] }
 0x354   :  { %7166 = vmatprep.subr.bf16.mxu0 %v12461_v40  ;;  %7330 = vmatprep.subr.bf16.mxu1 %v12463_v41  ;;  %v12517_v40 = vcombine.high %v4387_v34, %v4391_v35  ;;  %v12519_v41 = vcombine.high %v4388_v37, %v4392_v53  ;;  %v3929_v27 = vld [vmem:[#allocation8 + $0x30] sm:$0xff]  ;;  %v3930_v28 = vld [vmem:[#allocation8 + $0x38] sm:$0xff] }
 0x357   :  { %7167 = vmatpush1.bf16.msra.mxu0 %v12460_v25  ;;  %7331 = vmatpush1.bf16.msra.mxu1 %v12462_v32  ;;  %v12516_v25 = vcombine.low %v4387_v34, %v4391_v35  ;;  %v12518_v32 = vcombine.low %v4388_v37, %v4392_v53  ;;  %v12059_v34 = vcombine.high %v3926_v12, %v3930_v28  ;;  %v3933_v35 = vld [vmem:[#allocation8 + $0x50] sm:$0xff]  ;;  %v3934_v53 = vld [vmem:[#allocation8 + $0x58] sm:$0xff] }
 0x358   :  { %7168 = vmatprep.subr.bf16.mxu0 %v12469_v9  ;;  %7332 = vmatprep.subr.bf16.mxu1 %v12471_v47  ;;  %v12525_v9 = vcombine.high %v4395_v42, %v4399_v36  ;;  %v12527_v47 = vcombine.high %v4396_v43, %v4400_v44  ;;  %v3937_v37 = vld [vmem:[#allocation8 + $0x70] sm:$0xff] }
 0x35b   :  { %7169 = vmatpush1.bf16.msra.mxu0 %v12468_v51  ;;  %7333 = vmatpush1.bf16.msra.mxu1 %v12470_v52  ;;  %v12524_v51 = vcombine.low %v4395_v42, %v4399_v36  ;;  %v12526_v52 = vcombine.low %v4396_v43, %v4400_v44  ;;  %v12065_v42 = vcombine.high %v3933_v35, %v3937_v37  ;;  %v3941_v43 = vld [vmem:[#allocation8 + $0x90] sm:$0xff]  ;;  %v3942_v44 = vld [vmem:[#allocation8 + $0x98] sm:$0xff] }
 0x35c   :  { %7170 = vmatprep.subr.bf16.mxu0 %v12477_v13  ;;  %7334 = vmatprep.subr.bf16.mxu1 %v12479_v56  ;;  %v12533_v13 = vcombine.high %v4403_v48, %v4407_v49  ;;  %v12535_v56 = vcombine.high %v4404_v46, %v4408_v4 }
 0x35f   :  { %7171 = vmatpush1.bf16.msra.mxu0 %v12476_v62  ;;  %7335 = vmatpush1.bf16.msra.mxu1 %v12478_v8  ;;  %v12532_v62 = vcombine.low %v4403_v48, %v4407_v49  ;;  %v12534_v8 = vcombine.low %v4404_v46, %v4408_v4  ;;  %v3949_v49 = vld [vmem:[#allocation8 + $0xd0] sm:$0xff]  ;;  %v3950_v4 = vld [vmem:[#allocation8 + $0xd8] sm:$0xff] }
 0x360   :  { %7172 = vmatprep.subr.bf16.mxu0 %v12485_v63  ;;  %7336 = vmatprep.subr.bf16.mxu1 %v12487_v0  ;;  %v12541_v63 = vcombine.high %v4411_v55, %v4415_v58  ;;  %v12543_v0 = vcombine.high %v4412_v59, %v4416_v61  ;;  %v3953_v46 = vld [vmem:[#allocation8 + $0xf0] sm:$0xff] }
 0x363   :  { %7173 = vmatpush1.bf16.msra.mxu0 %v12484_v6  ;;  %7337 = vmatpush1.bf16.msra.mxu1 %v12486_v7  ;;  %v12540_v6 = vcombine.low %v4411_v55, %v4415_v58  ;;  %v12542_v7 = vcombine.low %v4412_v59, %v4416_v61  ;;  %v3957_v58 = vld [vmem:[#allocation8 + $0x110] sm:$0xff]  ;;  %v3962_v61 = vld [vmem:[#allocation8 + $0x138] sm:$0xff] }
 0x364   :  { %7174 = vmatprep.subr.bf16.mxu0 %v12493_v10  ;;  %7338 = vmatprep.subr.bf16.mxu1 %v12495_v11  ;;  %v12549_v10 = vcombine.high %v4419_v2, %v4423_v39  ;;  %v12551_v11 = vcombine.high %v4420_v3, %v4424_v5  ;;  %v3961_v59 = vld [vmem:[#allocation8 + $0x130] sm:$0xff] }
 0x367   :  { %7175 = vmatpush1.bf16.msra.mxu0 %v12492_v20  ;;  %7339 = vmatpush1.bf16.msra.mxu1 %v12494_v21  ;;  %v12548_v20 = vcombine.low %v4419_v2, %v4423_v39  ;;  %v12550_v21 = vcombine.low %v4420_v3, %v4424_v5  ;;  %v3965_v2 = vld [vmem:[#allocation8 + $0x150] sm:$0xff]  ;;  %v3966_v3 = vld [vmem:[#allocation8 + $0x158] sm:$0xff] }
 0x368   :  { %7176 = vmatprep.subr.bf16.mxu0 %v12501_v57  ;;  %7340 = vmatprep.subr.bf16.mxu1 %v12503_v24  ;;  %v12557_v57 = vcombine.high %v4427_v14, %v4431_v16  ;;  %v12559_v24 = vcombine.high %v4428_v17, %v4432_v19  ;;  %v3969_v39 = vld [vmem:[#allocation8 + $0x170] sm:$0xff]  ;;  %v3970_v5 = vld [vmem:[#allocation8 + $0x178] sm:$0xff] }
 0x36b   :  { %7177 = vmatpush1.bf16.msra.mxu0 %v12500_v30  ;;  %7341 = vmatpush1.bf16.msra.mxu1 %v12502_v31  ;;  %v12556_v30 = vcombine.low %v4427_v14, %v4431_v16  ;;  %v12558_v31 = vcombine.low %v4428_v17, %v4432_v19  ;;  %v3973_v14 = vld [vmem:[#allocation8 + $0x190] sm:$0xff]  ;;  %v3974_v17 = vld [vmem:[#allocation8 + $0x198] sm:$0xff] }
 0x36c   :  { %7178 = vmatprep.subr.bf16.mxu0 %v12509_v15  ;;  %7342 = vmatprep.subr.bf16.mxu1 %v12511_v33  ;;  %v3913_v15 = vmax.f32 %v13645_v1, 0.0  ;;  %v12057_v33 = vcombine.high %v3925_v26, %v3929_v27  ;;  %v3945_v1 = vld [vmem:[#allocation8 + $0xb0] sm:$0xff]  ;;  %v3978_v19 = vld [vmem:[#allocation8 + $0x1b8] sm:$0xff] }
 0x36d   :  { %v3977_v16 = vld [vmem:[#allocation8 + $0x1b0] sm:$0xff] }
 0x36f   :  { %7179 = vmatpush1.bf16.msra.mxu0 %v12508_v22  ;;  %7343 = vmatpush1.bf16.msra.mxu1 %v12510_v38  ;;  %v3938_v22 = vld [vmem:[#allocation8 + $0x78] sm:$0xff]  ;;  %v12056_v38 = vcombine.low %v3925_v26, %v3929_v27  ;;  %v3981_v26 = vld [vmem:[#allocation8 + $0x1d0] sm:$0xff] }
 0x370   :  { %7180 = vmatprep.subr.bf16.mxu0 %v12517_v40  ;;  %7344 = vmatprep.subr.bf16.mxu1 %v12519_v41  ;;  %v13660_v40 = vpack.c.bf16 %v3913_v15, %v3913_v15  ;;  %v12058_v41 = vcombine.low %v3926_v12, %v3930_v28  ;;  %v12067_v36 = vcombine.high %v3934_v53, %v3938_v22  ;;  %v3985_v27 = vld [vmem:[#allocation8 + $0x1f0] sm:$0xff]  ;;  %v3982_v12 = vld [vmem:[#allocation8 + $0x1d8] sm:$0xff] }
 0x371   :  { %v3986_v28 = vld [vmem:[#allocation8 + $0x1f8] sm:$0xff]  ;;  %v12113_v15 = vcombine.high %v3981_v26, %v3985_v27 }
 0x373   :  { %7181 = vmatpush1.bf16.msra.mxu0 %v12516_v25  ;;  %7345 = vmatpush1.bf16.msra.mxu1 %v12518_v32  ;;  %v3946_v25 = vld [vmem:[#allocation8 + $0xb8] sm:$0xff]  ;;  %v12064_v32 = vcombine.low %v3933_v35, %v3937_v37  ;;  %v3993_v35 = vld [vmem:[#allocation8 + $0x230] sm:$0xff] }
 0x374   :  { %7182 = vmatprep.subr.bf16.mxu0 %v12525_v9  ;;  %7346 = vmatprep.subr.bf16.mxu1 %v12527_v47  ;;  %v12066_v9 = vcombine.low %v3934_v53, %v3938_v22  ;;  %v12073_v47 = vcombine.high %v3941_v43, %v3945_v1  ;;  %v12075_v48 = vcombine.high %v3942_v44, %v3946_v25  ;;  %v3990_v37 = vld [vmem:[#allocation8 + $0x218] sm:$0xff] }
 0x375   :  { %v3994_v53 = vld [vmem:[#allocation8 + $0x238] sm:$0xff]  ;;  %v12112_v22 = vcombine.low %v3981_v26, %v3985_v27  ;;  %v4041_v26 = vld [vmem:[#allocation8 + $0x3b0] sm:$0xff] }
 0x376   :  { %v4038_v27 = vld [vmem:[#allocation8 + $0x398] sm:$0xff] }
 0x377   :  { %7183 = vmatpush1.bf16.msra.mxu0 %v12524_v51  ;;  %7347 = vmatpush1.bf16.msra.mxu1 %v12526_v52  ;;  %v3954_v51 = vld [vmem:[#allocation8 + $0xf8] sm:$0xff]  ;;  %v12072_v52 = vcombine.low %v3941_v43, %v3945_v1  ;;  %v4001_v43 = vld [vmem:[#allocation8 + $0x270] sm:$0xff] }
 0x378   :  { %7184 = vmatprep.subr.bf16.mxu0 %v12533_v13  ;;  %7348 = vmatprep.subr.bf16.mxu1 %v12535_v56  ;;  %v12074_v13 = vcombine.low %v3942_v44, %v3946_v25  ;;  %v12081_v56 = vcombine.high %v3949_v49, %v3953_v46  ;;  %v12083_v55 = vcombine.high %v3950_v4, %v3954_v51  ;;  %v3998_v1 = vld [vmem:[#allocation8 + $0x258] sm:$0xff] }
 0x379   :  { %v4002_v44 = vld [vmem:[#allocation8 + $0x278] sm:$0xff] }
 0x37b   :  { %7185 = vmatpush1.bf16.msra.mxu0 %v12532_v62  ;;  %7349 = vmatpush1.bf16.msra.mxu1 %v12534_v8  ;;  %v12080_v62 = vcombine.low %v3949_v49, %v3953_v46  ;;  %v12082_v8 = vcombine.low %v3950_v4, %v3954_v51  ;;  %v4009_v49 = vld [vmem:[#allocation8 + $0x2b0] sm:$0xff]  ;;  %v4006_v46 = vld [vmem:[#allocation8 + $0x298] sm:$0xff] }
 0x37c   :  { %7186 = vmatprep.subr.bf16.mxu0 %v12541_v63  ;;  %7350 = vmatprep.subr.bf16.mxu1 %v12543_v0  ;;  %v12089_v63 = vcombine.high %v3957_v58, %v3961_v59  ;;  %v4010_v4 = vld [vmem:[#allocation8 + $0x2b8] sm:$0xff] }
 0x37f   :  { %7187 = vmatpush1.bf16.msra.mxu0 %v12540_v6  ;;  %7351 = vmatpush1.bf16.msra.mxu1 %v12542_v7  ;;  %v12088_v6 = vcombine.low %v3957_v58, %v3961_v59  ;;  %v4017_v58 = vld [vmem:[#allocation8 + $0x2f0] sm:$0xff]  ;;  %v4014_v59 = vld [vmem:[#allocation8 + $0x2d8] sm:$0xff] }
 0x380   :  { %7188 = vmatprep.subr.bf16.mxu0 %v12549_v10  ;;  %7352 = vmatprep.subr.bf16.mxu1 %v12551_v11  ;;  %v12097_v10 = vcombine.high %v3965_v2, %v3969_v39  ;;  %v12099_v11 = vcombine.high %v3966_v3, %v3970_v5 }
 0x383   :  { %7189 = vmatpush1.bf16.msra.mxu0 %v12548_v20  ;;  %7353 = vmatpush1.bf16.msra.mxu1 %v12550_v21  ;;  %v12096_v20 = vcombine.low %v3965_v2, %v3969_v39  ;;  %v12098_v21 = vcombine.low %v3966_v3, %v3970_v5  ;;  %v4025_v2 = vld [vmem:[#allocation8 + $0x330] sm:$0xff]  ;;  %v4022_v39 = vld [vmem:[#allocation8 + $0x318] sm:$0xff] }
 0x384   :  { %7190 = vmatprep.subr.bf16.mxu0 %v12557_v57  ;;  %7354 = vmatprep.subr.bf16.mxu1 %v12559_v24  ;;  %v12105_v57 = vcombine.high %v3973_v14, %v3977_v16  ;;  %v12107_v24 = vcombine.high %v3974_v17, %v3978_v19  ;;  %v4026_v3 = vld [vmem:[#allocation8 + $0x338] sm:$0xff] }
 0x387   :  { %7191 = vmatpush1.bf16.msra.mxu0 %v12556_v30  ;;  %7355 = vmatpush1.bf16.msra.mxu1 %v12558_v31  ;;  %v12104_v30 = vcombine.low %v3973_v14, %v3977_v16  ;;  %v12106_v31 = vcombine.low %v3974_v17, %v3978_v19  ;;  %v4033_v14 = vld [vmem:[#allocation8 + $0x370] sm:$0xff]  ;;  %v4030_v16 = vld [vmem:[#allocation8 + $0x358] sm:$0xff] }
 0x388   :  { %7365 = vmatprep.subr.bf16.mxu0 %v12057_v33  ;;  %7529 = vmatprep.subr.bf16.mxu1 %v12059_v34  ;;  %v12115_v33 = vcombine.high %v3982_v12, %v3986_v28  ;;  %v3989_v34 = vld [vmem:[#allocation8 + $0x210] sm:$0xff]  ;;  %v4034_v17 = vld [vmem:[#allocation8 + $0x378] sm:$0xff] }
 0x389   :  { %v12120_v25 = vcombine.low %v3989_v34, %v3993_v35 }
 0x38a   :  { %7193 = vmatmul.mubr.bf16.vlgmr.msra.gmra.mrb[8].mxu0 %v13660_v40  ;;  %7357 = vmatmul.mubr.bf16.vlgmr.msra.gmra.mrb[8].mxu1 %v13660_v40 }
 0x38b   :  { %7366 = vmatpush1.bf16.msra.mxu0 %v12056_v38  ;;  %7397 = vmatprep.mubr.bf16.mxu0 %v13624_v45  ;;  %v12114_v38 = vcombine.low %v3982_v12, %v3986_v28  ;;  %v4042_v12 = vld [vmem:[#allocation8 + $0x3b8] sm:$0xff] }
 0x38c   :  { %7530 = vmatpush1.bf16.msra.mxu1 %v12058_v41  ;;  %7561 = vmatprep.mubr.bf16.mxu1 %v13624_v45  ;;  %v3958_v45 = vld [vmem:[#allocation8 + $0x118] sm:$0xff]  ;;  %v12121_v41 = vcombine.high %v3989_v34, %v3993_v35  ;;  %v4049_v34 = vld [vmem:[#allocation8 + $0x3f0] sm:$0xff] }
 0x38d   :  { %7367 = vmatprep.subr.bf16.mxu0 %v12065_v42  ;;  %7531 = vmatprep.subr.bf16.mxu1 %v12067_v36  ;;  %v12091_v0 = vcombine.high %v3958_v45, %v3962_v61  ;;  %v12090_v7 = vcombine.low %v3958_v45, %v3962_v61  ;;  %v12123_v42 = vcombine.high %v3990_v37, %v3994_v53  ;;  %v3997_v36 = vld [vmem:[#allocation8 + $0x250] sm:$0xff]  ;;  %v4018_v45 = vld [vmem:[#allocation8 + $0x2f8] sm:$0xff] }
 0x38e   :  { %v12128_v51 = vcombine.low %v3997_v36, %v4001_v43  ;;  %v4046_v35 = vld [vmem:[#allocation8 + $0x3d8] sm:$0xff] }
 0x38f   :  { %7368 = vmatpush1.bf16.msra.mxu0 %v12064_v32  ;;  %v12122_v32 = vcombine.low %v3990_v37, %v3994_v53  ;;  %v4050_v37 = vld [vmem:[#allocation8 + $0x3f8] sm:$0xff] }
 0x390   :  { %7532 = vmatpush1.bf16.msra.mxu1 %v12066_v9  ;;  %7369 = vmatprep.subr.bf16.mxu0 %v12073_v47  ;;  %v12129_v9 = vcombine.high %v3997_v36, %v4001_v43  ;;  %v12131_v47 = vcombine.high %v3998_v1, %v4002_v44  ;;  %v4057_v36 = vld [vmem:[#allocation8 + $0x430] sm:$0xff]  ;;  %v4054_v43 = vld [vmem:[#allocation8 + $0x418] sm:$0xff] }
 0x391   :  { %7533 = vmatprep.subr.bf16.mxu1 %v12075_v48  ;;  %v4005_v48 = vld [vmem:[#allocation8 + $0x290] sm:$0xff] }
 0x392   :  { %v12136_v61 = vcombine.low %v4005_v48, %v4009_v49 }
 0x393   :  { %7370 = vmatpush1.bf16.msra.mxu0 %v12072_v52  ;;  %v12130_v52 = vcombine.low %v3998_v1, %v4002_v44  ;;  %v4058_v1 = vld [vmem:[#allocation8 + $0x438] sm:$0xff] }
 0x394   :  { %7534 = vmatpush1.bf16.msra.mxu1 %v12074_v13  ;;  %7371 = vmatprep.subr.bf16.mxu0 %v12081_v56  ;;  %v12137_v13 = vcombine.high %v4005_v48, %v4009_v49  ;;  %v12139_v56 = vcombine.high %v4006_v46, %v4010_v4  ;;  %v4065_v48 = vld [vmem:[#allocation8 + $0x470] sm:$0xff] }
 0x395   :  { %7535 = vmatprep.subr.bf16.mxu1 %v12083_v55  ;;  %v4013_v55 = vld [vmem:[#allocation8 + $0x2d0] sm:$0xff] }
 0x396   :  { %v12144_v5 = vcombine.low %v4013_v55, %v4017_v58 }
 0x397   :  { %7372 = vmatpush1.bf16.msra.mxu0 %v12080_v62  ;;  %v12138_v62 = vcombine.low %v4006_v46, %v4010_v4  ;;  %v4062_v46 = vld [vmem:[#allocation8 + $0x458] sm:$0xff] }
 0x398   :  { %7536 = vmatpush1.bf16.msra.mxu1 %v12082_v8  ;;  %7373 = vmatprep.subr.bf16.mxu0 %v12089_v63  ;;  %v12145_v8 = vcombine.high %v4013_v55, %v4017_v58  ;;  %v12147_v63 = vcombine.high %v4014_v59, %v4018_v45  ;;  %v4066_v4 = vld [vmem:[#allocation8 + $0x478] sm:$0xff] }
 0x399   :  { %7537 = vmatprep.subr.bf16.mxu1 %v12091_v0  ;;  %v4021_v0 = vld [vmem:[#allocation8 + $0x310] sm:$0xff]  ;;  %v12195_v55 = vcombine.high %v4062_v46, %v4066_v4  ;;  %v4070_v58 = vld [vmem:[#allocation8 + $0x498] sm:$0xff] }
 0x39a   :  { %v12152_v19 = vcombine.low %v4021_v0, %v4025_v2 }
 0x39b   :  { %7374 = vmatpush1.bf16.msra.mxu0 %v12088_v6  ;;  %v12146_v6 = vcombine.low %v4014_v59, %v4018_v45  ;;  %v4074_v59 = vld [vmem:[#allocation8 + $0x4b8] sm:$0xff] }
 0x39c   :  { %7538 = vmatpush1.bf16.msra.mxu1 %v12090_v7  ;;  %7375 = vmatprep.subr.bf16.mxu0 %v12097_v10  ;;  %v12153_v7 = vcombine.high %v4021_v0, %v4025_v2  ;;  %v12155_v10 = vcombine.high %v4022_v39, %v4026_v3  ;;  %v4081_v0 = vld [vmem:[#allocation8 + $0x4f0] sm:$0xff]  ;;  %v4078_v2 = vld [vmem:[#allocation8 + $0x4d8] sm:$0xff] }
 0x39d   :  { %7539 = vmatprep.subr.bf16.mxu1 %v12099_v11  ;;  %v4029_v11 = vld [vmem:[#allocation8 + $0x350] sm:$0xff] }
 0x39e   :  { %v12160_v28 = vcombine.low %v4029_v11, %v4033_v14 }
 0x39f   :  { %7376 = vmatpush1.bf16.msra.mxu0 %v12096_v20  ;;  %v12154_v20 = vcombine.low %v4022_v39, %v4026_v3  ;;  %v4082_v39 = vld [vmem:[#allocation8 + $0x4f8] sm:$0xff] }
 0x3a0   :  { %7540 = vmatpush1.bf16.msra.mxu1 %v12098_v21  ;;  %7377 = vmatprep.subr.bf16.mxu0 %v12105_v57  ;;  %v12161_v21 = vcombine.high %v4029_v11, %v4033_v14  ;;  %v12163_v57 = vcombine.high %v4030_v16, %v4034_v17  ;;  %v4086_v11 = vld [vmem:[#allocation8 + $0x518] sm:$0xff] }
 0x3a1   :  { %7541 = vmatprep.subr.bf16.mxu1 %v12107_v24  ;;  %v4037_v24 = vld [vmem:[#allocation8 + $0x390] sm:$0xff]  ;;  %v4090_v14 = vld [vmem:[#allocation8 + $0x538] sm:$0xff] }
 0x3a2   :  { %v12168_v53 = vcombine.low %v4037_v24, %v4041_v26 }
 0x3a3   :  { %7378 = vmatpush1.bf16.msra.mxu0 %v12104_v30  ;;  %v12162_v30 = vcombine.low %v4030_v16, %v4034_v17  ;;  %v12210_v16 = vcombine.low %v4078_v2, %v4082_v39 }
 0x3a4   :  { %7542 = vmatpush1.bf16.msra.mxu1 %v12106_v31  ;;  %7379 = vmatprep.subr.bf16.mxu0 %v12113_v15  ;;  %v12169_v31 = vcombine.high %v4037_v24, %v4041_v26  ;;  %v12171_v15 = vcombine.high %v4038_v27, %v4042_v12  ;;  %v4098_v24 = vld [vmem:[#allocation8 + $0x578] sm:$0xff] }
 0x3a5   :  { %7543 = vmatprep.subr.bf16.mxu1 %v12115_v33  ;;  %v4045_v33 = vld [vmem:[#allocation8 + $0x3d0] sm:$0xff] }
 0x3a6   :  { %v12176_v44 = vcombine.low %v4045_v33, %v4049_v34 }
 0x3a7   :  { %7380 = vmatpush1.bf16.msra.mxu0 %v12112_v22  ;;  %v12170_v22 = vcombine.low %v4038_v27, %v4042_v12  ;;  %v12218_v27 = vcombine.low %v4086_v11, %v4090_v14 }
 0x3a8   :  { %7544 = vmatpush1.bf16.msra.mxu1 %v12114_v38  ;;  %7381 = vmatprep.subr.bf16.mxu0 %v12121_v41  ;;  %v12177_v38 = vcombine.high %v4045_v33, %v4049_v34  ;;  %v12179_v41 = vcombine.high %v4046_v35, %v4050_v37  ;;  %v4106_v33 = vld [vmem:[#allocation8 + $0x5b8] sm:$0xff] }
 0x3a9   :  { %7545 = vmatprep.subr.bf16.mxu1 %v12123_v42  ;;  %v4053_v42 = vld [vmem:[#allocation8 + $0x410] sm:$0xff] }
 0x3aa   :  { %v12184_v49 = vcombine.low %v4053_v42, %v4057_v36 }
 0x3ab   :  { %7382 = vmatpush1.bf16.msra.mxu0 %v12120_v25  ;;  %v12178_v25 = vcombine.low %v4046_v35, %v4050_v37 }
 0x3ac   :  { %7546 = vmatpush1.bf16.msra.mxu1 %v12122_v32  ;;  %7383 = vmatprep.subr.bf16.mxu0 %v12129_v9  ;;  %v12185_v32 = vcombine.high %v4053_v42, %v4057_v36  ;;  %v12187_v9 = vcombine.high %v4054_v43, %v4058_v1  ;;  %v4114_v42 = vld [vmem:[#allocation8 + $0x5f8] sm:$0xff] }
 0x3ad   :  { %7547 = vmatprep.subr.bf16.mxu1 %v12131_v47  ;;  %v4061_v47 = vld [vmem:[#allocation8 + $0x450] sm:$0xff] }
 0x3ae   :  { %v12192_v45 = vcombine.low %v4061_v47, %v4065_v48 }
 0x3af   :  { %7384 = vmatpush1.bf16.msra.mxu0 %v12128_v51  ;;  %v12186_v51 = vcombine.low %v4054_v43, %v4058_v1 }
 0x3b0   :  { %7548 = vmatpush1.bf16.msra.mxu1 %v12130_v52  ;;  %7385 = vmatprep.subr.bf16.mxu0 %v12137_v13  ;;  %v12193_v52 = vcombine.high %v4061_v47, %v4065_v48  ;;  %v4069_v13 = vld [vmem:[#allocation8 + $0x490] sm:$0xff]  ;;  %v4122_v47 = vld [vmem:[#allocation8 + $0x638] sm:$0xff] }
 0x3b1   :  { %7549 = vmatprep.subr.bf16.mxu1 %v12139_v56  ;;  %v4073_v56 = vld [vmem:[#allocation8 + $0x4b0] sm:$0xff] }
 0x3b2   :  { %v12200_v3 = vcombine.low %v4069_v13, %v4073_v56 }
 0x3b3   :  { %7386 = vmatpush1.bf16.msra.mxu0 %v12136_v61  ;;  %v12194_v61 = vcombine.low %v4062_v46, %v4066_v4 }
 0x3b4   :  { %7550 = vmatpush1.bf16.msra.mxu1 %v12138_v62  ;;  %7387 = vmatprep.subr.bf16.mxu0 %v12145_v8  ;;  %v12201_v62 = vcombine.high %v4069_v13, %v4073_v56  ;;  %v12203_v8 = vcombine.high %v4070_v58, %v4074_v59  ;;  %v4126_v13 = vld [vmem:[#allocation8 + $0x658] sm:$0xff] }
 0x3b5   :  { %7551 = vmatprep.subr.bf16.mxu1 %v12147_v63  ;;  %v4077_v63 = vld [vmem:[#allocation8 + $0x4d0] sm:$0xff]  ;;  %v4130_v56 = vld [vmem:[#allocation8 + $0x678] sm:$0xff] }
 0x3b7   :  { %7388 = vmatpush1.bf16.msra.mxu0 %v12144_v5  ;;  %v12209_v5 = vcombine.high %v4077_v63, %v4081_v0 }
 0x3b8   :  { %7552 = vmatpush1.bf16.msra.mxu1 %v12146_v6  ;;  %7389 = vmatprep.subr.bf16.mxu0 %v12153_v7  ;;  %v12211_v6 = vcombine.high %v4078_v2, %v4082_v39  ;;  %v4085_v7 = vld [vmem:[#allocation8 + $0x510] sm:$0xff]  ;;  %v12258_v2 = vcombine.low %v4126_v13, %v4130_v56 }
 0x3b9   :  { %7553 = vmatprep.subr.bf16.mxu1 %v12155_v10  ;;  %v4089_v10 = vld [vmem:[#allocation8 + $0x530] sm:$0xff] }
 0x3ba   :  { %v12217_v17 = vcombine.high %v4085_v7, %v4089_v10  ;;  %v12216_v26 = vcombine.low %v4085_v7, %v4089_v10  ;;  %v4146_v7 = vld [vmem:[#allocation8 + $0x6f8] sm:$0xff] }
 0x3bb   :  { %7390 = vmatpush1.bf16.msra.mxu0 %v12152_v19  ;;  %v12219_v19 = vcombine.high %v4086_v11, %v4090_v14 }
 0x3bc   :  { %7554 = vmatpush1.bf16.msra.mxu1 %v12154_v20  ;;  %7391 = vmatprep.subr.bf16.mxu0 %v12161_v21  ;;  %v4093_v20 = vld [vmem:[#allocation8 + $0x550] sm:$0xff] }
 0x3bd   :  { %7555 = vmatprep.subr.bf16.mxu1 %v12163_v57  ;;  %v4097_v21 = vld [vmem:[#allocation8 + $0x570] sm:$0xff]  ;;  %v4094_v57 = vld [vmem:[#allocation8 + $0x558] sm:$0xff] }
 0x3be   :  { %v12225_v12 = vcombine.high %v4093_v20, %v4097_v21  ;;  %v12224_v34 = vcombine.low %v4093_v20, %v4097_v21  ;;  %v12226_v35 = vcombine.low %v4094_v57, %v4098_v24  ;;  %v4154_v20 = vld [vmem:[#allocation8 + $0x738] sm:$0xff] }
 0x3bf   :  { %7392 = vmatpush1.bf16.msra.mxu0 %v12160_v28  ;;  %v12227_v28 = vcombine.high %v4094_v57, %v4098_v24 }
 0x3c0   :  { %7556 = vmatpush1.bf16.msra.mxu1 %v12162_v30  ;;  %7393 = vmatprep.subr.bf16.mxu0 %v12169_v31  ;;  %v4101_v30 = vld [vmem:[#allocation8 + $0x590] sm:$0xff] }
 0x3c1   :  { %7557 = vmatprep.subr.bf16.mxu1 %v12171_v15  ;;  %v4105_v31 = vld [vmem:[#allocation8 + $0x5b0] sm:$0xff]  ;;  %v4102_v15 = vld [vmem:[#allocation8 + $0x598] sm:$0xff] }
 0x3c2   :  { %v12233_v37 = vcombine.high %v4101_v30, %v4105_v31  ;;  %v12232_v36 = vcombine.low %v4101_v30, %v4105_v31  ;;  %v12234_v43 = vcombine.low %v4102_v15, %v4106_v33  ;;  %v4162_v30 = vld [vmem:[#allocation8 + $0x778] sm:$0xff] }
 0x3c3   :  { %7394 = vmatpush1.bf16.msra.mxu0 %v12168_v53  ;;  %v12235_v53 = vcombine.high %v4102_v15, %v4106_v33 }
 0x3c4   :  { %7558 = vmatpush1.bf16.msra.mxu1 %v12170_v22  ;;  %7395 = vmatprep.subr.bf16.mxu0 %v12177_v38  ;;  %v4109_v22 = vld [vmem:[#allocation8 + $0x5d0] sm:$0xff] }
 0x3c5   :  { %7559 = vmatprep.subr.bf16.mxu1 %v12179_v41  ;;  %v4113_v38 = vld [vmem:[#allocation8 + $0x5f0] sm:$0xff]  ;;  %v4110_v41 = vld [vmem:[#allocation8 + $0x5d8] sm:$0xff] }
 0x3c6   :  { %v12241_v1 = vcombine.high %v4109_v22, %v4113_v38  ;;  %v12240_v48 = vcombine.low %v4109_v22, %v4113_v38  ;;  %v4170_v22 = vld [vmem:[#allocation8 + $0x7b8] sm:$0xff] }
 0x3c7   :  { %7396 = vmatpush1.bf16.msra.mxu0 %v12176_v44  ;;  %v12243_v44 = vcombine.high %v4110_v41, %v4114_v42 }
 0x3c8   :  { %7560 = vmatpush1.bf16.msra.mxu1 %v12178_v25  ;;  %7406 = vmatprep.subr.bf16.mxu0 %v12185_v32  ;;  %v4117_v25 = vld [vmem:[#allocation8 + $0x610] sm:$0xff] }
 0x3c9   :  { %7570 = vmatprep.subr.bf16.mxu1 %v12187_v9  ;;  %v4121_v32 = vld [vmem:[#allocation8 + $0x630] sm:$0xff]  ;;  %v4118_v9 = vld [vmem:[#allocation8 + $0x618] sm:$0xff] }
 0x3ca   :  { %7398 = vmatmul.mubr.bf16.vlgmr.msra.gmra.mrb[12].mxu0 %v13632_v50  ;;  %v12249_v46 = vcombine.high %v4117_v25, %v4121_v32  ;;  %v12251_v4 = vcombine.high %v4118_v9, %v4122_v47 }
 0x3cb   :  { %7562 = vmatmul.mubr.bf16.vlgmr.msra.gmra.mrb[12].mxu1 %v13632_v50  ;;  %7407 = vmatpush1.bf16.msra.mxu0 %v12184_v49  ;;  %v12202_v50 = vcombine.low %v4070_v58, %v4074_v59  ;;  %v12242_v49 = vcombine.low %v4110_v41, %v4114_v42  ;;  %v12250_v58 = vcombine.low %v4118_v9, %v4122_v47 }
 0x3cc   :  { %7438 = vmatprep.mubr.bf16.mxu0 %v13634_v54  ;;  %7571 = vmatpush1.bf16.msra.mxu1 %v12186_v51  ;;  %v4125_v51 = vld [vmem:[#allocation8 + $0x650] sm:$0xff] }
 0x3cd   :  { %7602 = vmatprep.mubr.bf16.mxu1 %v13634_v54  ;;  %7408 = vmatprep.subr.bf16.mxu0 %v12193_v52  ;;  %v12208_v54 = vcombine.low %v4077_v63, %v4081_v0  ;;  %v4129_v52 = vld [vmem:[#allocation8 + $0x670] sm:$0xff]  ;;  %v4138_v63 = vld [vmem:[#allocation8 + $0x6b8] sm:$0xff] }
 0x3ce   :  { %7572 = vmatprep.subr.bf16.mxu1 %v12195_v55  ;;  %v12248_v55 = vcombine.low %v4117_v25, %v4121_v32  ;;  %v12257_v59 = vcombine.high %v4125_v51, %v4129_v52  ;;  %v12256_v0 = vcombine.low %v4125_v51, %v4129_v52  ;;  %v4178_v25 = vld [vmem:[#allocation8 + $0x7f8] sm:$0xff] }
 0x3cf   :  { %7409 = vmatpush1.bf16.msra.mxu0 %v12192_v45  ;;  %v12259_v45 = vcombine.high %v4126_v13, %v4130_v56  ;;  %v4186_v51 = vld [vmem:[#allocation8 + $0x838] sm:$0xff] }
 0x3d0   :  { %7573 = vmatpush1.bf16.msra.mxu1 %v12194_v61  ;;  %7410 = vmatprep.subr.bf16.mxu0 %v12201_v62  ;;  %v4133_v61 = vld [vmem:[#allocation8 + $0x690] sm:$0xff] }
 0x3d1   :  { %7574 = vmatprep.subr.bf16.mxu1 %v12203_v8  ;;  %v4137_v62 = vld [vmem:[#allocation8 + $0x6b0] sm:$0xff]  ;;  %v4134_v8 = vld [vmem:[#allocation8 + $0x698] sm:$0xff] }
 0x3d2   :  { %v12265_v39 = vcombine.high %v4133_v61, %v4137_v62  ;;  %v12264_v10 = vcombine.low %v4133_v61, %v4137_v62  ;;  %v12266_v11 = vcombine.low %v4134_v8, %v4138_v63  ;;  %v4190_v61 = vld [vmem:[#allocation8 + $0x858] sm:$0xff] }
 0x3d3   :  { %7411 = vmatpush1.bf16.msra.mxu0 %v12200_v3  ;;  %v12267_v3 = vcombine.high %v4134_v8, %v4138_v63  ;;  %v4194_v62 = vld [vmem:[#allocation8 + $0x878] sm:$0xff] }
 0x3d4   :  { %7575 = vmatpush1.bf16.msra.mxu1 %v12202_v50  ;;  %7412 = vmatprep.subr.bf16.mxu0 %v12209_v5  ;;  %v4141_v50 = vld [vmem:[#allocation8 + $0x6d0] sm:$0xff] }
 0x3d5   :  { %7576 = vmatprep.subr.bf16.mxu1 %v12211_v6  ;;  %v4145_v5 = vld [vmem:[#allocation8 + $0x6f0] sm:$0xff]  ;;  %v4142_v6 = vld [vmem:[#allocation8 + $0x6d8] sm:$0xff] }
 0x3d6   :  { %v12273_v14 = vcombine.high %v4141_v50, %v4145_v5  ;;  %v12272_v21 = vcombine.low %v4141_v50, %v4145_v5  ;;  %v12274_v57 = vcombine.low %v4142_v6, %v4146_v7  ;;  %v4202_v50 = vld [vmem:[#allocation8 + $0x8b8] sm:$0xff] }
 0x3d7   :  { %7413 = vmatpush1.bf16.msra.mxu0 %v12208_v54  ;;  %v12275_v54 = vcombine.high %v4142_v6, %v4146_v7  ;;  %v12322_v6 = vcombine.low %v4190_v61, %v4194_v62 }
 0x3d8   :  { %7577 = vmatpush1.bf16.msra.mxu1 %v12210_v16  ;;  %7414 = vmatprep.subr.bf16.mxu0 %v12217_v17  ;;  %v4149_v16 = vld [vmem:[#allocation8 + $0x710] sm:$0xff] }
 0x3d9   :  { %7578 = vmatprep.subr.bf16.mxu1 %v12219_v19  ;;  %v4153_v17 = vld [vmem:[#allocation8 + $0x730] sm:$0xff]  ;;  %v4150_v19 = vld [vmem:[#allocation8 + $0x718] sm:$0xff] }
 0x3da   :  { %v12281_v24 = vcombine.high %v4149_v16, %v4153_v17  ;;  %v12280_v31 = vcombine.low %v4149_v16, %v4153_v17  ;;  %v12282_v15 = vcombine.low %v4150_v19, %v4154_v20  ;;  %v4210_v16 = vld [vmem:[#allocation8 + $0x8f8] sm:$0xff] }
 0x3db   :  { %7415 = vmatpush1.bf16.msra.mxu0 %v12216_v26  ;;  %v12283_v26 = vcombine.high %v4150_v19, %v4154_v20 }
 0x3dc   :  { %7579 = vmatpush1.bf16.msra.mxu1 %v12218_v27  ;;  %7416 = vmatprep.subr.bf16.mxu0 %v12225_v12  ;;  %v4157_v27 = vld [vmem:[#allocation8 + $0x750] sm:$0xff] }
 0x3dd   :  { %7580 = vmatprep.subr.bf16.mxu1 %v12227_v28  ;;  %v4161_v12 = vld [vmem:[#allocation8 + $0x770] sm:$0xff]  ;;  %v4158_v28 = vld [vmem:[#allocation8 + $0x758] sm:$0xff] }
 0x3de   :  { %v12289_v33 = vcombine.high %v4157_v27, %v4161_v12  ;;  %v12288_v38 = vcombine.low %v4157_v27, %v4161_v12  ;;  %v12290_v41 = vcombine.low %v4158_v28, %v4162_v30 }
 0x3df   :  { %7417 = vmatpush1.bf16.msra.mxu0 %v12224_v34  ;;  %v12291_v34 = vcombine.high %v4158_v28, %v4162_v30  ;;  %v4221_v30 = vld [vmem:[#allocation8 + $0x950] sm:$0xff] }
 0x3e0   :  { %7581 = vmatpush1.bf16.msra.mxu1 %v12226_v35  ;;  %7418 = vmatprep.subr.bf16.mxu0 %v12233_v37  ;;  %v4165_v35 = vld [vmem:[#allocation8 + $0x790] sm:$0xff] }
 0x3e1   :  { %7582 = vmatprep.subr.bf16.mxu1 %v12235_v53  ;;  %v4169_v37 = vld [vmem:[#allocation8 + $0x7b0] sm:$0xff]  ;;  %v4166_v53 = vld [vmem:[#allocation8 + $0x798] sm:$0xff] }
 0x3e2   :  { %v12297_v42 = vcombine.high %v4165_v35, %v4169_v37  ;;  %v12296_v32 = vcombine.low %v4165_v35, %v4169_v37  ;;  %v12298_v9 = vcombine.low %v4166_v53, %v4170_v22 }
 0x3e3   :  { %7419 = vmatpush1.bf16.msra.mxu0 %v12232_v36  ;;  %v12299_v36 = vcombine.high %v4166_v53, %v4170_v22  ;;  %v4229_v22 = vld [vmem:[#allocation8 + $0x990] sm:$0xff] }
 0x3e4   :  { %7583 = vmatpush1.bf16.msra.mxu1 %v12234_v43  ;;  %7420 = vmatprep.subr.bf16.mxu0 %v12241_v1  ;;  %v4173_v43 = vld [vmem:[#allocation8 + $0x7d0] sm:$0xff] }
 0x3e5   :  { %7584 = vmatprep.subr.bf16.mxu1 %v12243_v44  ;;  %v4177_v1 = vld [vmem:[#allocation8 + $0x7f0] sm:$0xff]  ;;  %v4174_v44 = vld [vmem:[#allocation8 + $0x7d8] sm:$0xff] }
 0x3e6   :  { %v12305_v47 = vcombine.high %v4173_v43, %v4177_v1  ;;  %v12304_v52 = vcombine.low %v4173_v43, %v4177_v1  ;;  %v12306_v13 = vcombine.low %v4174_v44, %v4178_v25 }
 0x3e7   :  { %7421 = vmatpush1.bf16.msra.mxu0 %v12240_v48  ;;  %v12307_v48 = vcombine.high %v4174_v44, %v4178_v25  ;;  %v4237_v25 = vld [vmem:[#allocation8 + $0x9d0] sm:$0xff] }
 0x3e8   :  { %7585 = vmatpush1.bf16.msra.mxu1 %v12242_v49  ;;  %7422 = vmatprep.subr.bf16.mxu0 %v12249_v46  ;;  %v4181_v49 = vld [vmem:[#allocation8 + $0x810] sm:$0xff] }
 0x3e9   :  { %7586 = vmatprep.subr.bf16.mxu1 %v12251_v4  ;;  %v4185_v46 = vld [vmem:[#allocation8 + $0x830] sm:$0xff]  ;;  %v4182_v4 = vld [vmem:[#allocation8 + $0x818] sm:$0xff] }
 0x3ea   :  { %v12313_v56 = vcombine.high %v4181_v49, %v4185_v46  ;;  %v12314_v8 = vcombine.low %v4182_v4, %v4186_v51 }
 0x3eb   :  { %7423 = vmatpush1.bf16.msra.mxu0 %v12248_v55  ;;  %v12315_v55 = vcombine.high %v4182_v4, %v4186_v51  ;;  %v4245_v51 = vld [vmem:[#allocation8 + $0xa10] sm:$0xff] }
 0x3ec   :  { %7587 = vmatpush1.bf16.msra.mxu1 %v12250_v58  ;;  %7424 = vmatprep.subr.bf16.mxu0 %v12257_v59  ;;  %v4189_v58 = vld [vmem:[#allocation8 + $0x850] sm:$0xff] }
 0x3ed   :  { %7588 = vmatprep.subr.bf16.mxu1 %v12259_v45  ;;  %v4193_v59 = vld [vmem:[#allocation8 + $0x870] sm:$0xff]  ;;  %v12312_v45 = vcombine.low %v4181_v49, %v4185_v46 }
 0x3ee   :  { %v12321_v63 = vcombine.high %v4189_v58, %v4193_v59  ;;  %v12320_v5 = vcombine.low %v4189_v58, %v4193_v59 }
 0x3ef   :  { %7425 = vmatpush1.bf16.msra.mxu0 %v12256_v0  ;;  %v4197_v0 = vld [vmem:[#allocation8 + $0x890] sm:$0xff] }
 0x3f0   :  { %7589 = vmatpush1.bf16.msra.mxu1 %v12258_v2  ;;  %7426 = vmatprep.subr.bf16.mxu0 %v12265_v39  ;;  %v4201_v2 = vld [vmem:[#allocation8 + $0x8b0] sm:$0xff]  ;;  %v12323_v39 = vcombine.high %v4190_v61, %v4194_v62 }
 0x3f1   :  { %7590 = vmatprep.subr.bf16.mxu1 %v12267_v3  ;;  %v4198_v3 = vld [vmem:[#allocation8 + $0x898] sm:$0xff]  ;;  %v12329_v7 = vcombine.high %v4197_v0, %v4201_v2  ;;  %v12328_v17 = vcombine.low %v4197_v0, %v4201_v2  ;;  %v4253_v61 = vld [vmem:[#allocation8 + $0xa50] sm:$0xff] }
 0x3f2   :  { %v4257_v62 = vld [vmem:[#allocation8 + $0xa70] sm:$0xff] }
 0x3f3   :  { %7427 = vmatpush1.bf16.msra.mxu0 %v12264_v10  ;;  %v12331_v10 = vcombine.high %v4198_v3, %v4202_v50 }
 0x3f4   :  { %7591 = vmatpush1.bf16.msra.mxu1 %v12266_v11  ;;  %7428 = vmatprep.subr.bf16.mxu0 %v12273_v14  ;;  %v4205_v11 = vld [vmem:[#allocation8 + $0x8d0] sm:$0xff] }
 0x3f5   :  { %7592 = vmatprep.subr.bf16.mxu1 %v12275_v54  ;;  %v4209_v14 = vld [vmem:[#allocation8 + $0x8f0] sm:$0xff]  ;;  %v4206_v54 = vld [vmem:[#allocation8 + $0x8d8] sm:$0xff] }
 0x3f6   :  { %v12337_v19 = vcombine.high %v4205_v11, %v4209_v14  ;;  %v12339_v20 = vcombine.high %v4206_v54, %v4210_v16  ;;  %v12338_v27 = vcombine.low %v4206_v54, %v4210_v16  ;;  %v4269_v16 = vld [vmem:[#allocation8 + $0xad0] sm:$0xff] }
 0x3f7   :  { %7429 = vmatpush1.bf16.msra.mxu0 %v12272_v21  ;;  %v4213_v21 = vld [vmem:[#allocation8 + $0x910] sm:$0xff] }
 0x3f8   :  { %7593 = vmatpush1.bf16.msra.mxu1 %v12274_v57  ;;  %7430 = vmatprep.subr.bf16.mxu0 %v12281_v24  ;;  %v4217_v57 = vld [vmem:[#allocation8 + $0x930] sm:$0xff]  ;;  %v4214_v24 = vld [vmem:[#allocation8 + $0x918] sm:$0xff] }
 0x3f9   :  { %7594 = vmatprep.subr.bf16.mxu1 %v12283_v26  ;;  %v4218_v26 = vld [vmem:[#allocation8 + $0x938] sm:$0xff]  ;;  %v12345_v12 = vcombine.high %v4213_v21, %v4217_v57 }
 0x3fa   :  { %v12347_v28 = vcombine.high %v4214_v24, %v4218_v26  ;;  %v12346_v35 = vcombine.low %v4214_v24, %v4218_v26  ;;  %v4277_v26 = vld [vmem:[#allocation8 + $0xb10] sm:$0xff] }
 0x3fb   :  { %7431 = vmatpush1.bf16.msra.mxu0 %v12280_v31  ;;  %v4225_v31 = vld [vmem:[#allocation8 + $0x970] sm:$0xff] }
 0x3fc   :  { %7595 = vmatpush1.bf16.msra.mxu1 %v12282_v15  ;;  %7432 = vmatprep.subr.bf16.mxu0 %v12289_v33  ;;  %v4222_v15 = vld [vmem:[#allocation8 + $0x958] sm:$0xff]  ;;  %v12353_v37 = vcombine.high %v4221_v30, %v4225_v31 }
 0x3fd   :  { %7596 = vmatprep.subr.bf16.mxu1 %v12291_v34  ;;  %v4226_v33 = vld [vmem:[#allocation8 + $0x978] sm:$0xff]  ;;  %v12344_v34 = vcombine.low %v4213_v21, %v4217_v57 }
 0x3fe   :  { %v12355_v53 = vcombine.high %v4222_v15, %v4226_v33  ;;  %v12354_v43 = vcombine.low %v4222_v15, %v4226_v33  ;;  %v4285_v33 = vld [vmem:[#allocation8 + $0xb50] sm:$0xff] }
 0x3ff   :  { %7433 = vmatpush1.bf16.msra.mxu0 %v12288_v38  ;;  %v4233_v38 = vld [vmem:[#allocation8 + $0x9b0] sm:$0xff] }
 0x400   :  { %7597 = vmatpush1.bf16.msra.mxu1 %v12290_v41  ;;  %7434 = vmatprep.subr.bf16.mxu0 %v12297_v42  ;;  %v4230_v41 = vld [vmem:[#allocation8 + $0x998] sm:$0xff]  ;;  %v12361_v1 = vcombine.high %v4229_v22, %v4233_v38 }
 0x401   :  { %7598 = vmatprep.subr.bf16.mxu1 %v12299_v36  ;;  %v4234_v42 = vld [vmem:[#allocation8 + $0x9b8] sm:$0xff]  ;;  %v12352_v36 = vcombine.low %v4221_v30, %v4225_v31 }
 0x402   :  { %v12363_v44 = vcombine.high %v4230_v41, %v4234_v42  ;;  %v12362_v49 = vcombine.low %v4230_v41, %v4234_v42  ;;  %v4293_v42 = vld [vmem:[#allocation8 + $0xb90] sm:$0xff] }
 0x403   :  { %7435 = vmatpush1.bf16.msra.mxu0 %v12296_v32  ;;  %v4241_v32 = vld [vmem:[#allocation8 + $0x9f0] sm:$0xff] }
 0x404   :  { %7599 = vmatpush1.bf16.msra.mxu1 %v12298_v9  ;;  %7436 = vmatprep.subr.bf16.mxu0 %v12305_v47  ;;  %v4238_v9 = vld [vmem:[#allocation8 + $0x9d8] sm:$0xff]  ;;  %v12369_v46 = vcombine.high %v4237_v25, %v4241_v32 }
 0x405   :  { %7600 = vmatprep.subr.bf16.mxu1 %v12307_v48  ;;  %v4242_v47 = vld [vmem:[#allocation8 + $0x9f8] sm:$0xff]  ;;  %v12360_v48 = vcombine.low %v4229_v22, %v4233_v38 }
 0x406   :  { %v12371_v4 = vcombine.high %v4238_v9, %v4242_v47  ;;  %v12370_v58 = vcombine.low %v4238_v9, %v4242_v47  ;;  %v4301_v47 = vld [vmem:[#allocation8 + $0xbd0] sm:$0xff] }
 0x407   :  { %7437 = vmatpush1.bf16.msra.mxu0 %v12304_v52  ;;  %v4249_v52 = vld [vmem:[#allocation8 + $0xa30] sm:$0xff] }
 0x408   :  { %7601 = vmatpush1.bf16.msra.mxu1 %v12306_v13  ;;  %7447 = vmatprep.subr.bf16.mxu0 %v12313_v56  ;;  %v4246_v13 = vld [vmem:[#allocation8 + $0xa18] sm:$0xff]  ;;  %v12377_v59 = vcombine.high %v4245_v51, %v4249_v52  ;;  %v12376_v0 = vcombine.low %v4245_v51, %v4249_v52 }
 0x409   :  { %7611 = vmatprep.subr.bf16.mxu1 %v12315_v55  ;;  %v4250_v56 = vld [vmem:[#allocation8 + $0xa38] sm:$0xff]  ;;  %v12368_v55 = vcombine.low %v4237_v25, %v4241_v32 }
 0x40a   :  { %7439 = vmatmul.mubr.bf16.vlgmr.msra.gmra.mrb[12].mxu0 %v13641_v60  ;;  %v12378_v2 = vcombine.low %v4246_v13, %v4250_v56 }
 0x40b   :  { %7603 = vmatmul.mubr.bf16.vlgmr.msra.gmra.mrb[12].mxu1 %v13641_v60  ;;  %7448 = vmatpush1.bf16.msra.mxu0 %v12312_v45  ;;  %v12330_v60 = vcombine.low %v4198_v3, %v4202_v50  ;;  %v12379_v45 = vcombine.high %v4246_v13, %v4250_v56  ;;  %v4261_v50 = vld [vmem:[#allocation8 + $0xa90] sm:$0xff] }
 0x40c   :  { %7479 = vmatprep.mubr.bf16.mxu0 %v13647_v18  ;;  %7612 = vmatpush1.bf16.msra.mxu1 %v12314_v8  ;;  %v4254_v8 = vld [vmem:[#allocation8 + $0xa58] sm:$0xff]  ;;  %v4309_v56 = vld [vmem:[#allocation8 + $0xc10] sm:$0xff] }
 0x40d   :  { %7643 = vmatprep.mubr.bf16.mxu1 %v13647_v18  ;;  %7449 = vmatprep.subr.bf16.mxu0 %v12321_v63  ;;  %v12336_v18 = vcombine.low %v4205_v11, %v4209_v14  ;;  %v4258_v63 = vld [vmem:[#allocation8 + $0xa78] sm:$0xff] }
 0x40e   :  { %7613 = vmatprep.subr.bf16.mxu1 %v12323_v39  ;;  %v12385_v39 = vcombine.high %v4253_v61, %v4257_v62  ;;  %v12387_v3 = vcombine.high %v4254_v8, %v4258_v63  ;;  %v12386_v11 = vcombine.low %v4254_v8, %v4258_v63  ;;  %v4317_v63 = vld [vmem:[#allocation8 + $0xc50] sm:$0xff] }
 0x40f   :  { %7450 = vmatpush1.bf16.msra.mxu0 %v12320_v5  ;;  %v4265_v5 = vld [vmem:[#allocation8 + $0xab0] sm:$0xff] }
 0x410   :  { %7614 = vmatpush1.bf16.msra.mxu1 %v12322_v6  ;;  %7451 = vmatprep.subr.bf16.mxu0 %v12329_v7  ;;  %v4262_v6 = vld [vmem:[#allocation8 + $0xa98] sm:$0xff]  ;;  %v12393_v14 = vcombine.high %v4261_v50, %v4265_v5 }
 0x411   :  { %7615 = vmatprep.subr.bf16.mxu1 %v12331_v10  ;;  %v4266_v7 = vld [vmem:[#allocation8 + $0xab8] sm:$0xff]  ;;  %v12384_v10 = vcombine.low %v4253_v61, %v4257_v62 }
 0x412   :  { %v12395_v54 = vcombine.high %v4262_v6, %v4266_v7  ;;  %v12394_v21 = vcombine.low %v4262_v6, %v4266_v7  ;;  %v4325_v6 = vld [vmem:[#allocation8 + $0xc90] sm:$0xff] }
 0x413   :  { %7452 = vmatpush1.bf16.msra.mxu0 %v12328_v17  ;;  %v4273_v17 = vld [vmem:[#allocation8 + $0xaf0] sm:$0xff] }
 0x414   :  { %7616 = vmatpush1.bf16.msra.mxu1 %v12330_v60  ;;  %7453 = vmatprep.subr.bf16.mxu0 %v12337_v19  ;;  %v4270_v60 = vld [vmem:[#allocation8 + $0xad8] sm:$0xff]  ;;  %v12401_v57 = vcombine.high %v4269_v16, %v4273_v17  ;;  %v4329_v7 = vld [vmem:[#allocation8 + $0xcb0] sm:$0xff] }
 0x415   :  { %7617 = vmatprep.subr.bf16.mxu1 %v12339_v20  ;;  %v4274_v19 = vld [vmem:[#allocation8 + $0xaf8] sm:$0xff]  ;;  %v12392_v20 = vcombine.low %v4261_v50, %v4265_v5 }
 0x416   :  { %v12403_v24 = vcombine.high %v4270_v60, %v4274_v19  ;;  %v12402_v30 = vcombine.low %v4270_v60, %v4274_v19  ;;  %v4333_v19 = vld [vmem:[#allocation8 + $0xcd0] sm:$0xff] }
 0x417   :  { %7454 = vmatpush1.bf16.msra.mxu0 %v12336_v18  ;;  %v4281_v18 = vld [vmem:[#allocation8 + $0xb30] sm:$0xff] }
 0x418   :  { %7618 = vmatpush1.bf16.msra.mxu1 %v12338_v27  ;;  %7455 = vmatprep.subr.bf16.mxu0 %v12345_v12  ;;  %v4278_v27 = vld [vmem:[#allocation8 + $0xb18] sm:$0xff]  ;;  %v12409_v31 = vcombine.high %v4277_v26, %v4281_v18 }
 0x419   :  { %7619 = vmatprep.subr.bf16.mxu1 %v12347_v28  ;;  %v4282_v12 = vld [vmem:[#allocation8 + $0xb38] sm:$0xff]  ;;  %v12400_v28 = vcombine.low %v4269_v16, %v4273_v17  ;;  %v12457_v17 = vcombine.high %v4325_v6, %v4329_v7 }
 0x41a   :  { %v12411_v15 = vcombine.high %v4278_v27, %v4282_v12  ;;  %v12410_v22 = vcombine.low %v4278_v27, %v4282_v12  ;;  %v4341_v27 = vld [vmem:[#allocation8 + $0xd10] sm:$0xff] }
 0x41b   :  { %7456 = vmatpush1.bf16.msra.mxu0 %v12344_v34  ;;  %v4289_v34 = vld [vmem:[#allocation8 + $0xb70] sm:$0xff] }
 0x41c   :  { %7620 = vmatpush1.bf16.msra.mxu1 %v12346_v35  ;;  %7457 = vmatprep.subr.bf16.mxu0 %v12353_v37  ;;  %v4286_v35 = vld [vmem:[#allocation8 + $0xb58] sm:$0xff]  ;;  %v12417_v38 = vcombine.high %v4285_v33, %v4289_v34  ;;  %v4345_v12 = vld [vmem:[#allocation8 + $0xd30] sm:$0xff] }
 0x41d   :  { %7621 = vmatprep.subr.bf16.mxu1 %v12355_v53  ;;  %v4290_v37 = vld [vmem:[#allocation8 + $0xb78] sm:$0xff]  ;;  %v12408_v53 = vcombine.low %v4277_v26, %v4281_v18 }
 0x41e   :  { %v12419_v41 = vcombine.high %v4286_v35, %v4290_v37  ;;  %v12418_v25 = vcombine.low %v4286_v35, %v4290_v37  ;;  %v4353_v35 = vld [vmem:[#allocation8 + $0xd70] sm:$0xff]  ;;  %v4350_v37 = vld [vmem:[#allocation8 + $0xd58] sm:$0xff] }
 0x41f   :  { %7458 = vmatpush1.bf16.msra.mxu0 %v12352_v36  ;;  %v4297_v36 = vld [vmem:[#allocation8 + $0xbb0] sm:$0xff] }
 0x420   :  { %7622 = vmatpush1.bf16.msra.mxu1 %v12354_v43  ;;  %7459 = vmatprep.subr.bf16.mxu0 %v12361_v1  ;;  %v4294_v43 = vld [vmem:[#allocation8 + $0xb98] sm:$0xff]  ;;  %v12425_v32 = vcombine.high %v4293_v42, %v4297_v36 }
 0x421   :  { %7623 = vmatprep.subr.bf16.mxu1 %v12363_v44  ;;  %v4298_v1 = vld [vmem:[#allocation8 + $0xbb8] sm:$0xff]  ;;  %v12416_v44 = vcombine.low %v4285_v33, %v4289_v34  ;;  %v4349_v34 = vld [vmem:[#allocation8 + $0xd50] sm:$0xff] }
 0x422   :  { %v12427_v9 = vcombine.high %v4294_v43, %v4298_v1  ;;  %v12426_v51 = vcombine.low %v4294_v43, %v4298_v1  ;;  %v4361_v43 = vld [vmem:[#allocation8 + $0xdb0] sm:$0xff]  ;;  %v4358_v1 = vld [vmem:[#allocation8 + $0xd98] sm:$0xff] }
 0x423   :  { %7460 = vmatpush1.bf16.msra.mxu0 %v12360_v48  ;;  %v4305_v48 = vld [vmem:[#allocation8 + $0xbf0] sm:$0xff] }
 0x424   :  { %7624 = vmatpush1.bf16.msra.mxu1 %v12362_v49  ;;  %7461 = vmatprep.subr.bf16.mxu0 %v12369_v46  ;;  %v4302_v49 = vld [vmem:[#allocation8 + $0xbd8] sm:$0xff]  ;;  %v12433_v52 = vcombine.high %v4301_v47, %v4305_v48 }
 0x425   :  { %7625 = vmatprep.subr.bf16.mxu1 %v12371_v4  ;;  %v4306_v46 = vld [vmem:[#allocation8 + $0xbf8] sm:$0xff]  ;;  %v12424_v4 = vcombine.low %v4293_v42, %v4297_v36  ;;  %v4357_v36 = vld [vmem:[#allocation8 + $0xd90] sm:$0xff] }
 0x426   :  { %v12435_v13 = vcombine.high %v4302_v49, %v4306_v46  ;;  %v12434_v61 = vcombine.low %v4302_v49, %v4306_v46  ;;  %v4365_v46 = vld [vmem:[#allocation8 + $0xdd0] sm:$0xff] }
 0x427   :  { %7462 = vmatpush1.bf16.msra.mxu0 %v12368_v55  ;;  %v4313_v55 = vld [vmem:[#allocation8 + $0xc30] sm:$0xff] }
 0x428   :  { %7626 = vmatpush1.bf16.msra.mxu1 %v12370_v58  ;;  %7463 = vmatprep.subr.bf16.mxu0 %v12377_v59  ;;  %v4310_v58 = vld [vmem:[#allocation8 + $0xc18] sm:$0xff]  ;;  %v12441_v62 = vcombine.high %v4309_v56, %v4313_v55 }
 0x429   :  { %7627 = vmatprep.subr.bf16.mxu1 %v12379_v45  ;;  %v4314_v59 = vld [vmem:[#allocation8 + $0xc38] sm:$0xff]  ;;  %v12432_v45 = vcombine.low %v4301_v47, %v4305_v48 }
 0x42a   :  { %v12443_v8 = vcombine.high %v4310_v58, %v4314_v59  ;;  %v12442_v50 = vcombine.low %v4310_v58, %v4314_v59  ;;  %v12488_v59 = vcombine.low %v4357_v36, %v4361_v43 }
 0x42b   :  { %7464 = vmatpush1.bf16.msra.mxu0 %v12376_v0  ;;  %v4321_v0 = vld [vmem:[#allocation8 + $0xc70] sm:$0xff] }
 0x42c   :  { %7628 = vmatpush1.bf16.msra.mxu1 %v12378_v2  ;;  %7465 = vmatprep.subr.bf16.mxu0 %v12385_v39  ;;  %v12440_v2 = vcombine.low %v4309_v56, %v4313_v55  ;;  %v4318_v39 = vld [vmem:[#allocation8 + $0xc58] sm:$0xff]  ;;  %v12449_v5 = vcombine.high %v4317_v63, %v4321_v0 }
 0x42d   :  { %7629 = vmatprep.subr.bf16.mxu1 %v12387_v3  ;;  %v4322_v3 = vld [vmem:[#allocation8 + $0xc78] sm:$0xff] }
 0x42e   :  { %v12450_v16 = vcombine.low %v4318_v39, %v4322_v3  ;;  %v4370_v56 = vld [vmem:[#allocation8 + $0xdf8] sm:$0xff] }
 0x42f   :  { %7466 = vmatpush1.bf16.msra.mxu0 %v12384_v10  ;;  %v12451_v10 = vcombine.high %v4318_v39, %v4322_v3  ;;  %v4374_v39 = vld [vmem:[#allocation8 + $0xe18] sm:$0xff] }
 0x430   :  { %7630 = vmatpush1.bf16.msra.mxu1 %v12386_v11  ;;  %7467 = vmatprep.subr.bf16.mxu0 %v12393_v14  ;;  %v4326_v11 = vld [vmem:[#allocation8 + $0xc98] sm:$0xff] }
 0x431   :  { %7631 = vmatprep.subr.bf16.mxu1 %v12395_v54  ;;  %v4330_v14 = vld [vmem:[#allocation8 + $0xcb8] sm:$0xff]  ;;  %v12448_v54 = vcombine.low %v4317_v63, %v4321_v0  ;;  %v4373_v0 = vld [vmem:[#allocation8 + $0xe10] sm:$0xff] }
 0x432   :  { %v12459_v60 = vcombine.high %v4326_v11, %v4330_v14  ;;  %v4378_v3 = vld [vmem:[#allocation8 + $0xe38] sm:$0xff] }
 0x433   :  { %7468 = vmatpush1.bf16.msra.mxu0 %v12392_v20  ;;  %v4337_v20 = vld [vmem:[#allocation8 + $0xcf0] sm:$0xff] }
 0x434   :  { %7632 = vmatpush1.bf16.msra.mxu1 %v12394_v21  ;;  %7469 = vmatprep.subr.bf16.mxu0 %v12401_v57  ;;  %v4334_v21 = vld [vmem:[#allocation8 + $0xcd8] sm:$0xff]  ;;  %v12465_v26 = vcombine.high %v4333_v19, %v4337_v20 }
 0x435   :  { %7633 = vmatprep.subr.bf16.mxu1 %v12403_v24  ;;  %v4338_v57 = vld [vmem:[#allocation8 + $0xcf8] sm:$0xff]  ;;  %v12456_v24 = vcombine.low %v4325_v6, %v4329_v7  ;;  %v12507_v7 = vcombine.high %v4374_v39, %v4378_v3 }
 0x436   :  { %v12467_v18 = vcombine.high %v4334_v21, %v4338_v57 }
 0x437   :  { %7470 = vmatpush1.bf16.msra.mxu0 %v12400_v28  ;;  %v4342_v28 = vld [vmem:[#allocation8 + $0xd18] sm:$0xff] }
 0x438   :  { %7634 = vmatpush1.bf16.msra.mxu1 %v12402_v30  ;;  %7471 = vmatprep.subr.bf16.mxu0 %v12409_v31  ;;  %v4346_v30 = vld [vmem:[#allocation8 + $0xd38] sm:$0xff]  ;;  %v12466_v31 = vcombine.low %v4334_v21, %v4338_v57  ;;  %v4393_v21 = vld [vmem:[#allocation8 + $0xeb0] sm:$0xff] }
 0x439   :  { %7635 = vmatprep.subr.bf16.mxu1 %v12411_v15  ;;  %v12473_v15 = vcombine.high %v4341_v27, %v4345_v12  ;;  %v12475_v33 = vcombine.high %v4342_v28, %v4346_v30  ;;  %v4390_v57 = vld [vmem:[#allocation8 + $0xe98] sm:$0xff] }
 0x43b   :  { %7472 = vmatpush1.bf16.msra.mxu0 %v12408_v53  ;;  %v4354_v53 = vld [vmem:[#allocation8 + $0xd78] sm:$0xff] }
 0x43c   :  { %7636 = vmatpush1.bf16.msra.mxu1 %v12410_v22  ;;  %7473 = vmatprep.subr.bf16.mxu0 %v12417_v38  ;;  %v12472_v22 = vcombine.low %v4341_v27, %v4345_v12  ;;  %v12474_v38 = vcombine.low %v4342_v28, %v4346_v30  ;;  %v12483_v42 = vcombine.high %v4350_v37, %v4354_v53  ;;  %v4397_v12 = vld [vmem:[#allocation8 + $0xed0] sm:$0xff]  ;;  %v4398_v30 = vld [vmem:[#allocation8 + $0xed8] sm:$0xff] }
 0x43d   :  { %7637 = vmatprep.subr.bf16.mxu1 %v12419_v41  ;;  %v12481_v41 = vcombine.high %v4349_v34, %v4353_v35  ;;  %v4401_v28 = vld [vmem:[#allocation8 + $0xef0] sm:$0xff] }
 0x43f   :  { %7474 = vmatpush1.bf16.msra.mxu0 %v12416_v44  ;;  %v4362_v44 = vld [vmem:[#allocation8 + $0xdb8] sm:$0xff] }
 0x440   :  { %7638 = vmatpush1.bf16.msra.mxu1 %v12418_v25  ;;  %7475 = vmatprep.subr.bf16.mxu0 %v12425_v32  ;;  %v12480_v25 = vcombine.low %v4349_v34, %v4353_v35  ;;  %v12482_v32 = vcombine.low %v4350_v37, %v4354_v53  ;;  %v12491_v49 = vcombine.high %v4358_v1, %v4362_v44  ;;  %v4405_v35 = vld [vmem:[#allocation8 + $0xf10] sm:$0xff]  ;;  %v4437_v53 = vlaneseq }
 0x441   :  { %7639 = vmatprep.subr.bf16.mxu1 %v12427_v9  ;;  %v12489_v9 = vcombine.high %v4357_v36, %v4361_v43  ;;  %v4409_v37 = vld [vmem:[#allocation8 + $0xf30] sm:$0xff] }
 0x442   :  { %v12537_v36 = vcombine.high %v4405_v35, %v4409_v37 }
 0x443   :  { %7476 = vmatpush1.bf16.msra.mxu0 %v12424_v4  ;;  %v4369_v4 = vld [vmem:[#allocation8 + $0xdf0] sm:$0xff] }
 0x444   :  { %7640 = vmatpush1.bf16.msra.mxu1 %v12426_v51  ;;  %7477 = vmatprep.subr.bf16.mxu0 %v12433_v52 }
 0x445   :  { %7641 = vmatprep.subr.bf16.mxu1 %v12435_v13  ;;  %v4366_v13 = vld [vmem:[#allocation8 + $0xdd8] sm:$0xff] }
 0x446   :  { %v12499_v63 = vcombine.high %v4366_v13, %v4370_v56 }
 0x447   :  { %7478 = vmatpush1.bf16.msra.mxu0 %v12432_v45 }
 0x448   :  { %7642 = vmatpush1.bf16.msra.mxu1 %v12434_v61  ;;  %7488 = vmatprep.subr.bf16.mxu0 %v12441_v62  ;;  %v12490_v62 = vcombine.low %v4358_v1, %v4362_v44  ;;  %v4413_v1 = vld [vmem:[#allocation8 + $0xf50] sm:$0xff] }
 0x449   :  { %7652 = vmatprep.subr.bf16.mxu1 %v12443_v8  ;;  %v12497_v8 = vcombine.high %v4365_v46, %v4369_v4  ;;  %v4417_v44 = vld [vmem:[#allocation8 + $0xf70] sm:$0xff] }
 0x44a   :  { %7480 = vmatmul.mubr.bf16.vlgmr.msra.gmra.mrb[12].mxu0 %v13649_v23 }
 0x44b   :  { %7644 = vmatmul.mubr.bf16.vlgmr.msra.gmra.mrb[12].mxu1 %v13649_v23  ;;  %7489 = vmatpush1.bf16.msra.mxu0 %v12440_v2  ;;  %v12458_v23 = vcombine.low %v4326_v11, %v4330_v14  ;;  %v4377_v2 = vld [vmem:[#allocation8 + $0xe30] sm:$0xff]  ;;  %v4382_v14 = vld [vmem:[#allocation8 + $0xe58] sm:$0xff] }
 0x44c   :  { %7520 = vmatprep.mubr.bf16.mxu0 %v13653_v29  ;;  %7653 = vmatpush1.bf16.msra.mxu1 %v12442_v50  ;;  %v12496_v50 = vcombine.low %v4365_v46, %v4369_v4  ;;  %v12505_v6 = vcombine.high %v4373_v0, %v4377_v2  ;;  %v4385_v11 = vld [vmem:[#allocation8 + $0xe70] sm:$0xff]  ;;  %v12545_v4 = vcombine.high %v4413_v1, %v4417_v44 }
 0x44d   :  { %7684 = vmatprep.mubr.bf16.mxu1 %v13653_v29  ;;  %7490 = vmatprep.subr.bf16.mxu0 %v12449_v5  ;;  %v12464_v29 = vcombine.low %v4333_v19, %v4337_v20  ;;  %v12498_v5 = vcombine.low %v4366_v13, %v4370_v56  ;;  %v4389_v20 = vld [vmem:[#allocation8 + $0xe90] sm:$0xff] }
 0x44e   :  { %7654 = vmatprep.subr.bf16.mxu1 %v12451_v10  ;;  %v4381_v10 = vld [vmem:[#allocation8 + $0xe50] sm:$0xff] }
 0x44f   :  { %7491 = vmatpush1.bf16.msra.mxu0 %v12448_v54  ;;  %v4386_v54 = vld [vmem:[#allocation8 + $0xe78] sm:$0xff]  ;;  %v4421_v56 = vld [vmem:[#allocation8 + $0xf90] sm:$0xff] }
 0x450   :  { %7655 = vmatpush1.bf16.msra.mxu1 %v12450_v16  ;;  %7492 = vmatprep.subr.bf16.mxu0 %v12457_v17  ;;  %v12504_v16 = vcombine.low %v4373_v0, %v4377_v2  ;;  %v12506_v17 = vcombine.low %v4374_v39, %v4378_v3  ;;  %v12515_v19 = vcombine.high %v4382_v14, %v4386_v54  ;;  %v4429_v2 = vld [vmem:[#allocation8 + $0xfd0] sm:$0xff] }
 0x451   :  { %7656 = vmatprep.subr.bf16.mxu1 %v12459_v60  ;;  %v12513_v60 = vcombine.high %v4381_v10, %v4385_v11  ;;  %v4433_v39 = vld [vmem:[#allocation8 + $0xff0] sm:$0xff] }
 0x453   :  { %7493 = vmatpush1.bf16.msra.mxu0 %v12456_v24  ;;  %v4394_v24 = vld [vmem:[#allocation8 + $0xeb8] sm:$0xff] }
 0x454   :  { %7657 = vmatpush1.bf16.msra.mxu1 %v12458_v23  ;;  %7494 = vmatprep.subr.bf16.mxu0 %v12465_v26  ;;  %v12512_v23 = vcombine.low %v4381_v10, %v4385_v11  ;;  %v12514_v26 = vcombine.low %v4382_v14, %v4386_v54  ;;  %v12523_v27 = vcombine.high %v4390_v57, %v4394_v24  ;;  %v7709_v14 = vld [vmem:[#allocation11] sm:$0xff] }
 0x455   :  { %7658 = vmatprep.subr.bf16.mxu1 %v12467_v18  ;;  %v12521_v18 = vcombine.high %v4389_v20, %v4393_v21  ;;  %v12561_v10 = vcombine.high %v4429_v2, %v4433_v39  ;;  %v7713_v54 = vld [vmem:[#allocation11 + $0x20] sm:$0xff] }
 0x457   :  { %7495 = vmatpush1.bf16.msra.mxu0 %v12464_v29  ;;  %v4402_v29 = vld [vmem:[#allocation8 + $0xef8] sm:$0xff] }
 0x458   :  { %7659 = vmatpush1.bf16.msra.mxu1 %v12466_v31  ;;  %7496 = vmatprep.subr.bf16.mxu0 %v12473_v15  ;;  %v12520_v31 = vcombine.low %v4389_v20, %v4393_v21  ;;  %v12522_v15 = vcombine.low %v4390_v57, %v4394_v24  ;;  %v12531_v34 = vcombine.high %v4398_v30, %v4402_v29 }
 0x459   :  { %7660 = vmatprep.subr.bf16.mxu1 %v12475_v33  ;;  %v12529_v33 = vcombine.high %v4397_v12, %v4401_v28  ;;  %v12565_v21 = vcombine.high %v7709_v14, %v7713_v54 }
 0x45b   :  { %7497 = vmatpush1.bf16.msra.mxu0 %v12472_v22  ;;  %v4406_v22 = vld [vmem:[#allocation8 + $0xf18] sm:$0xff] }
 0x45c   :  { %7661 = vmatpush1.bf16.msra.mxu1 %v12474_v38  ;;  %7498 = vmatprep.subr.bf16.mxu0 %v12481_v41  ;;  %v4410_v38 = vld [vmem:[#allocation8 + $0xf38] sm:$0xff]  ;;  %v12528_v41 = vcombine.low %v4397_v12, %v4401_v28  ;;  %v7722_v12 = vld [vmem:[#allocation11 + $0x68] sm:$0xff] }
 0x45d   :  { %v13678_v47 = vpop.f32.mrb[8].mxu0  ;;  %v13680_v48 = vpop.f32.mrb[8].mxu1  ;;  %7662 = vmatprep.subr.bf16.mxu1 %v12483_v42  ;;  %v12530_v42 = vcombine.low %v4398_v30, %v4402_v29  ;;  %v12539_v43 = vcombine.high %v4406_v22, %v4410_v38  ;;  %v12538_v46 = vcombine.low %v4406_v22, %v4410_v38  ;;  %v7725_v30 = vld [vmem:[#allocation11 + $0x80] sm:$0xff] }
 0x45e   :  { %v13682_v51 = vpop.f32.mrb[9].mxu0  ;;  %v13684_v52 = vpop.f32.mrb[9].mxu1  ;;  %v7729_v29 = vld [vmem:[#allocation11 + $0xa0] sm:$0xff] }
 0x45f   :  { %v7198_v55 = vpop.f32.mrb[10].mxu0  ;;  %v7362_v58 = vpop.f32.mrb[10].mxu1  ;;  %7499 = vmatpush1.bf16.msra.mxu0 %v12480_v25  ;;  %v13686_v25 = vshrl.u32 %v4437_v53, 7  ;;  %v12581_v53 = vcombine.high %v7725_v30, %v7729_v29  ;;  %v7733_v38 = vld [vmem:[#allocation11 + $0xc0] sm:$0xff] }
 0x460   :  { %7663 = vmatpush1.bf16.msra.mxu1 %v12482_v32  ;;  %v7199_v45 = vpop.f32.mrb[11].mxu0  ;;  %v7363_v61 = vpop.f32.mrb[11].mxu1  ;;  %7500 = vmatprep.subr.bf16.mxu0 %v12489_v9  ;;  %v4414_v32 = vld [vmem:[#allocation8 + $0xf58] sm:$0xff]  ;;  %v4425_v55 = vld [vmem:[#allocation8 + $0xfb0] sm:$0xff] }
 0x461   :  { %7664 = vmatprep.subr.bf16.mxu1 %v12491_v49  ;;  %v4418_v9 = vld [vmem:[#allocation8 + $0xf78] sm:$0xff]  ;;  %v12536_v49 = vcombine.low %v4405_v35, %v4409_v37  ;;  %v4443_v58 = vsub.s32 1, %v13686_v25  ;;  %v13689_v61 = vld [vmem:[#allocation9] sm:$0xff] }
 0x462   :  { %v12547_v13 = vcombine.high %v4414_v32, %v4418_v9  ;;  %v4426_v45 = vld [vmem:[#allocation8 + $0xfb8] sm:$0xff] }
 0x463   :  { %7501 = vmatpush1.bf16.msra.mxu0 %v12488_v59  ;;  %v4422_v59 = vld [vmem:[#allocation8 + $0xf98] sm:$0xff]  ;;  %v4444_v3 = vrot.slane %v13689_v61, %v4443_v58 }
 0x464   :  { %7665 = vmatpush1.bf16.msra.mxu1 %v12490_v62  ;;  %7502 = vmatprep.subr.bf16.mxu0 %v12497_v8  ;;  %v12544_v62 = vcombine.low %v4413_v1, %v4417_v44  ;;  %v12546_v8 = vcombine.low %v4414_v32, %v4418_v9  ;;  %v12555_v0 = vcombine.high %v4422_v59, %v4426_v45  ;;  %v7741_v32 = vld [vmem:[#allocation11 + $0x100] sm:$0xff] }
 0x465   :  { %7666 = vmatprep.subr.bf16.mxu1 %v12499_v63  ;;  %v12553_v63 = vcombine.high %v4421_v56, %v4425_v55  ;;  %v7745_v9 = vld [vmem:[#allocation11 + $0x120] sm:$0xff] }
 0x467   :  { %7503 = vmatpush1.bf16.msra.mxu0 %v12496_v50  ;;  %v4430_v50 = vld [vmem:[#allocation8 + $0xfd8] sm:$0xff] }
 0x468   :  { %7667 = vmatpush1.bf16.msra.mxu1 %v12498_v5  ;;  %7504 = vmatprep.subr.bf16.mxu0 %v12505_v6  ;;  %v4434_v5 = vld [vmem:[#allocation8 + $0xff8] sm:$0xff]  ;;  %v12552_v6 = vcombine.low %v4421_v56, %v4425_v55  ;;  %v12597_v56 = vcombine.high %v7741_v32, %v7745_v9 }
 0x469   :  { %7668 = vmatprep.subr.bf16.mxu1 %v12507_v7  ;;  %v12554_v7 = vcombine.low %v4422_v59, %v4426_v45  ;;  %v12563_v11 = vcombine.high %v4430_v50, %v4434_v5  ;;  %v12562_v20 = vcombine.low %v4430_v50, %v4434_v5  ;;  %v7749_v59 = vld [vmem:[#allocation11 + $0x140] sm:$0xff]  ;;  %v7758_v5 = vld [vmem:[#allocation11 + $0x188] sm:$0xff] }
 0x46a   :  { %v7753_v45 = vld [vmem:[#allocation11 + $0x160] sm:$0xff] }
 0x46b   :  { %7505 = vmatpush1.bf16.msra.mxu0 %v12504_v16  ;;  %v13077_v16 = vadd.f32 %v13682_v51, %v4444_v3  ;;  %v7757_v3 = vld [vmem:[#allocation11 + $0x180] sm:$0xff] }
 0x46c   :  { %7669 = vmatpush1.bf16.msra.mxu1 %v12506_v17  ;;  %7506 = vmatprep.subr.bf16.mxu0 %v12513_v60  ;;  %v7710_v17 = vld [vmem:[#allocation11 + $0x8] sm:$0xff]  ;;  %v7761_v50 = vld [vmem:[#allocation11 + $0x1a0] sm:$0xff] }
 0x46d   :  { %7670 = vmatprep.subr.bf16.mxu1 %v12515_v19  ;;  %v7714_v60 = vld [vmem:[#allocation11 + $0x28] sm:$0xff]  ;;  %v12560_v19 = vcombine.low %v4429_v2, %v4433_v39  ;;  %v7694_v24 = vmax.f32 %v13077_v16, 0.0  ;;  %v12605_v2 = vcombine.high %v7749_v59, %v7753_v45  ;;  %v7769_v16 = vld [vmem:[#allocation11 + $0x1e0] sm:$0xff] }
 0x46e   :  { %v12567_v57 = vcombine.high %v7710_v17, %v7714_v60  ;;  %v12566_v51 = vcombine.low %v7710_v17, %v7714_v60  ;;  %v7766_v17 = vld [vmem:[#allocation11 + $0x1c8] sm:$0xff] }
 0x46f   :  { %7507 = vmatpush1.bf16.msra.mxu0 %v12512_v23  ;;  %v7717_v23 = vld [vmem:[#allocation11 + $0x40] sm:$0xff]  ;;  %v7770_v60 = vld [vmem:[#allocation11 + $0x1e8] sm:$0xff] }
 0x470   :  { %7671 = vmatpush1.bf16.msra.mxu1 %v12514_v26  ;;  %7508 = vmatprep.subr.bf16.mxu0 %v12521_v18  ;;  %v7721_v26 = vld [vmem:[#allocation11 + $0x60] sm:$0xff]  ;;  %v12564_v18 = vcombine.low %v7709_v14, %v7713_v54 }
 0x471   :  { %7672 = vmatprep.subr.bf16.mxu1 %v12523_v27  ;;  %v7718_v27 = vld [vmem:[#allocation11 + $0x48] sm:$0xff]  ;;  %v12573_v28 = vcombine.high %v7717_v23, %v7721_v26  ;;  %v12572_v35 = vcombine.low %v7717_v23, %v7721_v26  ;;  %v7765_v54 = vld [vmem:[#allocation11 + $0x1c0] sm:$0xff] }
 0x472   :  { %v12574_v37 = vcombine.low %v7718_v27, %v7722_v12  ;;  %v7777_v23 = vld [vmem:[#allocation11 + $0x220] sm:$0xff]  ;;  %v7774_v26 = vld [vmem:[#allocation11 + $0x208] sm:$0xff] }
 0x473   :  { %7509 = vmatpush1.bf16.msra.mxu0 %v12520_v31  ;;  %v13695_v31 = vpack.c.bf16 %v7694_v24, %v7694_v24  ;;  %v7773_v24 = vld [vmem:[#allocation11 + $0x200] sm:$0xff] }
 0x474   :  { %7673 = vmatpush1.bf16.msra.mxu1 %v12522_v15  ;;  %7510 = vmatprep.subr.bf16.mxu0 %v12529_v33  ;;  %v12575_v15 = vcombine.high %v7718_v27, %v7722_v12  ;;  %v7726_v33 = vld [vmem:[#allocation11 + $0x88] sm:$0xff]  ;;  %v12620_v27 = vcombine.low %v7765_v54, %v7769_v16  ;;  %v12622_v12 = vcombine.low %v7766_v17, %v7770_v60 }
 0x475   :  { %7674 = vmatprep.subr.bf16.mxu1 %v12531_v34  ;;  %v7730_v34 = vld [vmem:[#allocation11 + $0xa8] sm:$0xff] }
 0x476   :  { %v12583_v22 = vcombine.high %v7726_v33, %v7730_v34 }
 0x477   :  { %7511 = vmatpush1.bf16.msra.mxu0 %v12528_v41  ;;  %v7737_v41 = vld [vmem:[#allocation11 + $0xe0] sm:$0xff] }
 0x478   :  { %7675 = vmatpush1.bf16.msra.mxu1 %v12530_v42  ;;  %7512 = vmatprep.subr.bf16.mxu0 %v12537_v36  ;;  %v7734_v42 = vld [vmem:[#allocation11 + $0xc8] sm:$0xff]  ;;  %v12589_v1 = vcombine.high %v7733_v38, %v7737_v41 }
 0x479   :  { %7676 = vmatprep.subr.bf16.mxu1 %v12539_v43  ;;  %v7738_v36 = vld [vmem:[#allocation11 + $0xe8] sm:$0xff]  ;;  %v12580_v43 = vcombine.low %v7725_v30, %v7729_v29  ;;  %v7781_v30 = vld [vmem:[#allocation11 + $0x240] sm:$0xff] }
 0x47a   :  { %v12591_v44 = vcombine.high %v7734_v42, %v7738_v36  ;;  %v7785_v29 = vld [vmem:[#allocation11 + $0x260] sm:$0xff] }
 0x47b   :  { %7513 = vmatpush1.bf16.msra.mxu0 %v12536_v49  ;;  %v7742_v49 = vld [vmem:[#allocation11 + $0x108] sm:$0xff] }
 0x47c   :  { %7677 = vmatpush1.bf16.msra.mxu1 %v12538_v46  ;;  %7514 = vmatprep.subr.bf16.mxu0 %v12545_v4  ;;  %v7746_v46 = vld [vmem:[#allocation11 + $0x128] sm:$0xff]  ;;  %v12588_v4 = vcombine.low %v7733_v38, %v7737_v41  ;;  %v7793_v38 = vld [vmem:[#allocation11 + $0x2a0] sm:$0xff] }
 0x47d   :  { %7678 = vmatprep.subr.bf16.mxu1 %v12547_v13  ;;  %v12590_v13 = vcombine.low %v7734_v42, %v7738_v36  ;;  %v12599_v55 = vcombine.high %v7742_v49, %v7746_v46  ;;  %v7790_v41 = vld [vmem:[#allocation11 + $0x288] sm:$0xff]  ;;  %v12636_v36 = vcombine.low %v7781_v30, %v7785_v29 }
 0x47e   :  { %v7794_v42 = vld [vmem:[#allocation11 + $0x2a8] sm:$0xff] }
 0x47f   :  { %7515 = vmatpush1.bf16.msra.mxu0 %v12544_v62  ;;  %v7750_v62 = vld [vmem:[#allocation11 + $0x148] sm:$0xff] }
 0x480   :  { %7679 = vmatpush1.bf16.msra.mxu1 %v12546_v8  ;;  %7516 = vmatprep.subr.bf16.mxu0 %v12553_v63  ;;  %v7754_v8 = vld [vmem:[#allocation11 + $0x168] sm:$0xff]  ;;  %v12596_v63 = vcombine.low %v7741_v32, %v7745_v9  ;;  %v7801_v32 = vld [vmem:[#allocation11 + $0x2e0] sm:$0xff] }
 0x481   :  { %7680 = vmatprep.subr.bf16.mxu1 %v12555_v0  ;;  %v12598_v0 = vcombine.low %v7742_v49, %v7746_v46  ;;  %v12607_v39 = vcombine.high %v7750_v62, %v7754_v8  ;;  %v7798_v9 = vld [vmem:[#allocation11 + $0x2c8] sm:$0xff] }
 0x482   :  { %v7802_v49 = vld [vmem:[#allocation11 + $0x2e8] sm:$0xff] }
 0x483   :  { %7517 = vmatpush1.bf16.msra.mxu0 %v12552_v6  ;;  %v7762_v6 = vld [vmem:[#allocation11 + $0x1a8] sm:$0xff] }
 0x484   :  { %7681 = vmatpush1.bf16.msra.mxu1 %v12554_v7  ;;  %7518 = vmatprep.subr.bf16.mxu0 %v12561_v10  ;;  %v12604_v7 = vcombine.low %v7749_v59, %v7753_v45  ;;  %v12606_v10 = vcombine.low %v7750_v62, %v7754_v8  ;;  %v12615_v14 = vcombine.high %v7758_v5, %v7762_v6  ;;  %v7809_v59 = vld [vmem:[#allocation11 + $0x320] sm:$0xff]  ;;  %v7806_v45 = vld [vmem:[#allocation11 + $0x308] sm:$0xff] }
 0x485   :  { %7682 = vmatprep.subr.bf16.mxu1 %v12563_v11  ;;  %v12613_v11 = vcombine.high %v7757_v3, %v7761_v50  ;;  %v7810_v62 = vld [vmem:[#allocation11 + $0x328] sm:$0xff] }
 0x487   :  { %7519 = vmatpush1.bf16.msra.mxu0 %v12560_v19  ;;  %v12612_v19 = vcombine.low %v7757_v3, %v7761_v50  ;;  %v7817_v3 = vld [vmem:[#allocation11 + $0x360] sm:$0xff]  ;;  %v7814_v50 = vld [vmem:[#allocation11 + $0x348] sm:$0xff] }
 0x488   :  { %7683 = vmatpush1.bf16.msra.mxu1 %v12562_v20  ;;  %10823 = vmatprep.subr.bf16.mxu0 %v12565_v21  ;;  %v12614_v20 = vcombine.low %v7758_v5, %v7762_v6  ;;  %v12621_v21 = vcombine.high %v7765_v54, %v7769_v16  ;;  %v7818_v5 = vld [vmem:[#allocation11 + $0x368] sm:$0xff]  ;;  %v7821_v54 = vld [vmem:[#allocation11 + $0x380] sm:$0xff] }
 0x489   :  { %10987 = vmatprep.subr.bf16.mxu1 %v12567_v57  ;;  %v12623_v57 = vcombine.high %v7766_v17, %v7770_v60  ;;  %v7825_v16 = vld [vmem:[#allocation11 + $0x3a0] sm:$0xff]  ;;  %v4451_v17 = vsub.s32 3, %v13686_v25  ;;  %v7822_v60 = vld [vmem:[#allocation11 + $0x388] sm:$0xff] }
 0x48a   :  { %7521 = vmatmul.mubr.bf16.vlgmr.msra.gmra.mrb[12].mxu0 %v13660_v40 }
 0x48b   :  { %7685 = vmatmul.mubr.bf16.vlgmr.msra.gmra.mrb[12].mxu1 %v13660_v40  ;;  %10824 = vmatpush1.bf16.msra.mxu0 %v12564_v18  ;;  %v12582_v40 = vcombine.low %v7726_v33, %v7730_v34  ;;  %v7778_v18 = vld [vmem:[#allocation11 + $0x228] sm:$0xff]  ;;  %v12628_v34 = vcombine.low %v7773_v24, %v7777_v23 }
 0x48c   :  { %10855 = vmatprep.mubr.bf16.mxu0 %v13695_v31  ;;  %10988 = vmatpush1.bf16.msra.mxu1 %v12566_v51  ;;  %v12629_v51 = vcombine.high %v7773_v24, %v7777_v23  ;;  %v7786_v33 = vld [vmem:[#allocation11 + $0x268] sm:$0xff]  ;;  %v12677_v24 = vcombine.high %v7821_v54, %v7825_v16 }
 0x48d   :  { %11019 = vmatprep.mubr.bf16.mxu1 %v13695_v31  ;;  %10825 = vmatprep.subr.bf16.mxu0 %v12573_v28  ;;  %v12631_v28 = vcombine.high %v7774_v26, %v7778_v18 }
 0x48e   :  { %10989 = vmatprep.subr.bf16.mxu1 %v12575_v15  ;;  %v7782_v15 = vld [vmem:[#allocation11 + $0x248] sm:$0xff] }
 0x48f   :  { %10826 = vmatpush1.bf16.msra.mxu0 %v12572_v35  ;;  %v12630_v35 = vcombine.low %v7774_v26, %v7778_v18  ;;  %v7829_v26 = vld [vmem:[#allocation11 + $0x3c0] sm:$0xff] }
 0x490   :  { %10990 = vmatpush1.bf16.msra.mxu1 %v12574_v37  ;;  %10827 = vmatprep.subr.bf16.mxu0 %v12581_v53  ;;  %v12637_v37 = vcombine.high %v7781_v30, %v7785_v29  ;;  %v12639_v53 = vcombine.high %v7782_v15, %v7786_v33  ;;  %v7833_v18 = vld [vmem:[#allocation11 + $0x3e0] sm:$0xff] }
 0x491   :  { %10991 = vmatprep.subr.bf16.mxu1 %v12583_v22  ;;  %v7789_v22 = vld [vmem:[#allocation11 + $0x280] sm:$0xff] }
 0x492   :  { %v12644_v46 = vcombine.low %v7789_v22, %v7793_v38 }
 0x493   :  { %10828 = vmatpush1.bf16.msra.mxu0 %v12580_v43  ;;  %v12638_v43 = vcombine.low %v7782_v15, %v7786_v33  ;;  %v12685_v15 = vcombine.high %v7829_v26, %v7833_v18 }
 0x494   :  { %10992 = vmatpush1.bf16.msra.mxu1 %v12582_v40  ;;  %10829 = vmatprep.subr.bf16.mxu0 %v12589_v1  ;;  %v12645_v40 = vcombine.high %v7789_v22, %v7793_v38  ;;  %v12647_v1 = vcombine.high %v7790_v41, %v7794_v42  ;;  %v7842_v22 = vld [vmem:[#allocation11 + $0x428] sm:$0xff]  ;;  %v12684_v38 = vcombine.low %v7829_v26, %v7833_v18 }
 0x495   :  { %10993 = vmatprep.subr.bf16.mxu1 %v12591_v44  ;;  %v7797_v44 = vld [vmem:[#allocation11 + $0x2c0] sm:$0xff]  ;;  %v7878_v26 = vld [vmem:[#allocation11 + $0x548] sm:$0xff] }
 0x496   :  { %v12652_v8 = vcombine.low %v7797_v44, %v7801_v32  ;;  %v7882_v18 = vld [vmem:[#allocation11 + $0x568] sm:$0xff] }
 0x497   :  { %10830 = vmatpush1.bf16.msra.mxu0 %v12588_v4  ;;  %v12646_v4 = vcombine.low %v7790_v41, %v7794_v42 }
 0x498   :  { %10994 = vmatpush1.bf16.msra.mxu1 %v12590_v13  ;;  %10831 = vmatprep.subr.bf16.mxu0 %v12597_v56  ;;  %v12653_v13 = vcombine.high %v7797_v44, %v7801_v32  ;;  %v12655_v56 = vcombine.high %v7798_v9, %v7802_v49  ;;  %v7846_v32 = vld [vmem:[#allocation11 + $0x448] sm:$0xff] }
 0x499   :  { %10995 = vmatprep.subr.bf16.mxu1 %v12599_v55  ;;  %v7805_v55 = vld [vmem:[#allocation11 + $0x300] sm:$0xff] }
 0x49a   :  { %v12660_v6 = vcombine.low %v7805_v55, %v7809_v59 }
 0x49b   :  { %10832 = vmatpush1.bf16.msra.mxu0 %v12596_v63  ;;  %v12654_v63 = vcombine.low %v7798_v9, %v7802_v49  ;;  %v7850_v9 = vld [vmem:[#allocation11 + $0x468] sm:$0xff] }
 0x49c   :  { %10996 = vmatpush1.bf16.msra.mxu1 %v12598_v0  ;;  %10833 = vmatprep.subr.bf16.mxu0 %v12605_v2  ;;  %v12661_v0 = vcombine.high %v7805_v55, %v7809_v59  ;;  %v12663_v2 = vcombine.high %v7806_v45, %v7810_v62  ;;  %v12703_v55 = vcombine.high %v7846_v32, %v7850_v9  ;;  %v7854_v59 = vld [vmem:[#allocation11 + $0x488] sm:$0xff] }
 0x49d   :  { %10997 = vmatprep.subr.bf16.mxu1 %v12607_v39  ;;  %v7813_v39 = vld [vmem:[#allocation11 + $0x340] sm:$0xff] }
 0x49f   :  { %10834 = vmatpush1.bf16.msra.mxu0 %v12604_v7  ;;  %v4439_v7 = vsub.s32 0, %v13686_v25 }
 0x4a0   :  { %10998 = vmatpush1.bf16.msra.mxu1 %v12606_v10  ;;  %10835 = vmatprep.subr.bf16.mxu0 %v12613_v11  ;;  %v12662_v10 = vcombine.low %v7806_v45, %v7810_v62  ;;  %v12669_v11 = vcombine.high %v7813_v39, %v7817_v3  ;;  %v7858_v45 = vld [vmem:[#allocation11 + $0x4a8] sm:$0xff] }
 0x4a1   :  { %10999 = vmatprep.subr.bf16.mxu1 %v12615_v14  ;;  %v12671_v14 = vcombine.high %v7814_v50, %v7818_v5 }
 0x4a3   :  { %10836 = vmatpush1.bf16.msra.mxu0 %v12612_v19  ;;  %v7826_v19 = vld [vmem:[#allocation11 + $0x3a8] sm:$0xff] }
 0x4a4   :  { %11000 = vmatpush1.bf16.msra.mxu1 %v12614_v20  ;;  %10837 = vmatprep.subr.bf16.mxu0 %v12621_v21  ;;  %v12668_v20 = vcombine.low %v7813_v39, %v7817_v3  ;;  %v4440_v21 = vrot.slane %v13689_v61, %v4439_v7  ;;  %v12679_v23 = vcombine.high %v7822_v60, %v7826_v19  ;;  %v7865_v39 = vld [vmem:[#allocation11 + $0x4e0] sm:$0xff]  ;;  %v7862_v3 = vld [vmem:[#allocation11 + $0x4c8] sm:$0xff] }
 0x4a5   :  { %11001 = vmatprep.subr.bf16.mxu1 %v12623_v57  ;;  %v12670_v57 = vcombine.low %v7814_v50, %v7818_v5  ;;  %v12678_v29 = vcombine.low %v7822_v60, %v7826_v19  ;;  %v7866_v50 = vld [vmem:[#allocation11 + $0x4e8] sm:$0xff] }
 0x4a6   :  { %v13076_v30 = vadd.f32 %v13678_v47, %v4440_v21  ;;  %v7874_v60 = vld [vmem:[#allocation11 + $0x528] sm:$0xff] }
 0x4a7   :  { %10838 = vmatpush1.bf16.msra.mxu0 %v12620_v27  ;;  %v4452_v27 = vrot.slane %v13689_v61, %v4451_v17 }
 0x4a8   :  { %11002 = vmatpush1.bf16.msra.mxu1 %v12622_v12  ;;  %10839 = vmatprep.subr.bf16.mxu0 %v12629_v51  ;;  %v7830_v12 = vld [vmem:[#allocation11 + $0x3c8] sm:$0xff]  ;;  %v7693_v41 = vmax.f32 %v13076_v30, 0.0  ;;  %v7885_v30 = vld [vmem:[#allocation11 + $0x580] sm:$0xff] }
 0x4a9   :  { %11003 = vmatprep.subr.bf16.mxu1 %v12631_v28  ;;  %v7834_v51 = vld [vmem:[#allocation11 + $0x3e8] sm:$0xff]  ;;  %v12676_v28 = vcombine.low %v7821_v54, %v7825_v16  ;;  %v7873_v54 = vld [vmem:[#allocation11 + $0x520] sm:$0xff] }
 0x4aa   :  { %v12687_v33 = vcombine.high %v7830_v12, %v7834_v51  ;;  %v12686_v42 = vcombine.low %v7830_v12, %v7834_v51  ;;  %v13711_v49 = vpack.c.bf16 %v7693_v41, %v7693_v41  ;;  %v7870_v16 = vld [vmem:[#allocation11 + $0x508] sm:$0xff] }
 0x4ab   :  { %10840 = vmatpush1.bf16.msra.mxu0 %v12628_v34  ;;  %v7837_v34 = vld [vmem:[#allocation11 + $0x400] sm:$0xff]  ;;  %v12726_v12 = vcombine.low %v7870_v16, %v7874_v60  ;;  %v7894_v41 = vld [vmem:[#allocation11 + $0x5c8] sm:$0xff] }
 0x4ac   :  { %11004 = vmatpush1.bf16.msra.mxu1 %v12630_v35  ;;  %10841 = vmatprep.subr.bf16.mxu0 %v12637_v37  ;;  %v7841_v35 = vld [vmem:[#allocation11 + $0x420] sm:$0xff]  ;;  %v13079_v37 = vadd.f32 %v13684_v52, %v4452_v27 }
 0x4ad   :  { %11005 = vmatprep.subr.bf16.mxu1 %v12639_v53  ;;  %v7838_v53 = vld [vmem:[#allocation11 + $0x408] sm:$0xff]  ;;  %v12692_v44 = vcombine.low %v7837_v34, %v7841_v35 }
 0x4ae   :  { %v12695_v47 = vcombine.high %v7838_v53, %v7842_v22  ;;  %v12694_v52 = vcombine.low %v7838_v53, %v7842_v22  ;;  %v7893_v22 = vld [vmem:[#allocation11 + $0x5c0] sm:$0xff] }
 0x4af   :  { %10842 = vmatpush1.bf16.msra.mxu0 %v12636_v36  ;;  %v12693_v36 = vcombine.high %v7837_v34, %v7841_v35  ;;  %v12734_v35 = vcombine.low %v7878_v26, %v7882_v18 }
 0x4b0   :  { %11006 = vmatpush1.bf16.msra.mxu1 %v12638_v43  ;;  %10843 = vmatprep.subr.bf16.mxu0 %v12645_v40  ;;  %v7696_v43 = vmax.f32 %v13079_v37, 0.0  ;;  %v7845_v40 = vld [vmem:[#allocation11 + $0x440] sm:$0xff] }
 0x4b1   :  { %11007 = vmatprep.subr.bf16.mxu1 %v12647_v1  ;;  %v7849_v1 = vld [vmem:[#allocation11 + $0x460] sm:$0xff] }
 0x4b2   :  { %v12700_v62 = vcombine.low %v7845_v40, %v7849_v1 }
 0x4b3   :  { %10844 = vmatpush1.bf16.msra.mxu0 %v12644_v46  ;;  %v12701_v46 = vcombine.high %v7845_v40, %v7849_v1  ;;  %v7901_v1 = vld [vmem:[#allocation11 + $0x600] sm:$0xff] }
 0x4b4   :  { %11008 = vmatpush1.bf16.msra.mxu1 %v12646_v4  ;;  %10845 = vmatprep.subr.bf16.mxu0 %v12653_v13  ;;  %v7853_v4 = vld [vmem:[#allocation11 + $0x480] sm:$0xff] }
 0x4b5   :  { %11009 = vmatprep.subr.bf16.mxu1 %v12655_v56  ;;  %v7857_v13 = vld [vmem:[#allocation11 + $0x4a0] sm:$0xff]  ;;  %v13713_v56 = vpack.c.bf16 %v7696_v43, %v7696_v43 }
 0x4b6   :  { %v12708_v5 = vcombine.low %v7853_v4, %v7857_v13 }
 0x4b7   :  { %10846 = vmatpush1.bf16.msra.mxu0 %v12652_v8  ;;  %v12702_v8 = vcombine.low %v7846_v32, %v7850_v9  ;;  %v7902_v32 = vld [vmem:[#allocation11 + $0x608] sm:$0xff] }
 0x4b8   :  { %11010 = vmatpush1.bf16.msra.mxu1 %v12654_v63  ;;  %10847 = vmatprep.subr.bf16.mxu0 %v12661_v0  ;;  %v12709_v63 = vcombine.high %v7853_v4, %v7857_v13  ;;  %v12711_v0 = vcombine.high %v7854_v59, %v7858_v45  ;;  %v7906_v9 = vld [vmem:[#allocation11 + $0x628] sm:$0xff] }
 0x4b9   :  { %11011 = vmatprep.subr.bf16.mxu1 %v12663_v2  ;;  %v7861_v2 = vld [vmem:[#allocation11 + $0x4c0] sm:$0xff]  ;;  %v12759_v13 = vcombine.high %v7902_v32, %v7906_v9 }
 0x4ba   :  { %v12716_v19 = vcombine.low %v7861_v2, %v7865_v39 }
 0x4bb   :  { %10848 = vmatpush1.bf16.msra.mxu0 %v12660_v6  ;;  %v12710_v6 = vcombine.low %v7854_v59, %v7858_v45  ;;  %v7913_v59 = vld [vmem:[#allocation11 + $0x660] sm:$0xff]  ;;  %v7910_v45 = vld [vmem:[#allocation11 + $0x648] sm:$0xff] }
 0x4bc   :  { %11012 = vmatpush1.bf16.msra.mxu1 %v12662_v10  ;;  %10849 = vmatprep.subr.bf16.mxu0 %v12669_v11  ;;  %v12717_v10 = vcombine.high %v7861_v2, %v7865_v39  ;;  %v12719_v11 = vcombine.high %v7862_v3, %v7866_v50  ;;  %v7917_v39 = vld [vmem:[#allocation11 + $0x680] sm:$0xff] }
 0x4bd   :  { %11013 = vmatprep.subr.bf16.mxu1 %v12671_v14  ;;  %v7869_v14 = vld [vmem:[#allocation11 + $0x500] sm:$0xff] }
 0x4be   :  { %v12725_v21 = vcombine.high %v7869_v14, %v7873_v54  ;;  %v12724_v27 = vcombine.low %v7869_v14, %v7873_v54  ;;  %v7925_v54 = vld [vmem:[#allocation11 + $0x6c0] sm:$0xff] }
 0x4bf   :  { %10850 = vmatpush1.bf16.msra.mxu0 %v12668_v20  ;;  %v12718_v20 = vcombine.low %v7862_v3, %v7866_v50  ;;  %v7921_v3 = vld [vmem:[#allocation11 + $0x6a0] sm:$0xff]  ;;  %v7918_v50 = vld [vmem:[#allocation11 + $0x688] sm:$0xff] }
 0x4c0   :  { %11014 = vmatpush1.bf16.msra.mxu1 %v12670_v57  ;;  %10851 = vmatprep.subr.bf16.mxu0 %v12677_v24  ;;  %v12727_v57 = vcombine.high %v7870_v16, %v7874_v60  ;;  %v7877_v24 = vld [vmem:[#allocation11 + $0x540] sm:$0xff]  ;;  %v7926_v60 = vld [vmem:[#allocation11 + $0x6c8] sm:$0xff] }
 0x4c1   :  { %11015 = vmatprep.subr.bf16.mxu1 %v12679_v23  ;;  %v7881_v23 = vld [vmem:[#allocation11 + $0x560] sm:$0xff] }
 0x4c2   :  { %v12733_v51 = vcombine.high %v7877_v24, %v7881_v23  ;;  %v12732_v34 = vcombine.low %v7877_v24, %v7881_v23  ;;  %v7929_v16 = vld [vmem:[#allocation11 + $0x6e0] sm:$0xff] }
 0x4c3   :  { %10852 = vmatpush1.bf16.msra.mxu0 %v12676_v28  ;;  %v12735_v28 = vcombine.high %v7878_v26, %v7882_v18  ;;  %v7933_v23 = vld [vmem:[#allocation11 + $0x700] sm:$0xff]  ;;  %v7934_v18 = vld [vmem:[#allocation11 + $0x708] sm:$0xff] }
 0x4c4   :  { %11016 = vmatpush1.bf16.msra.mxu1 %v12678_v29  ;;  %10853 = vmatprep.subr.bf16.mxu0 %v12685_v15  ;;  %v7889_v29 = vld [vmem:[#allocation11 + $0x5a0] sm:$0xff]  ;;  %v7886_v15 = vld [vmem:[#allocation11 + $0x588] sm:$0xff] }
 0x4c5   :  { %11017 = vmatprep.subr.bf16.mxu1 %v12687_v33  ;;  %v7890_v33 = vld [vmem:[#allocation11 + $0x5a8] sm:$0xff]  ;;  %v12741_v37 = vcombine.high %v7885_v30, %v7889_v29  ;;  %v7937_v26 = vld [vmem:[#allocation11 + $0x720] sm:$0xff] }
 0x4c6   :  { %v12743_v53 = vcombine.high %v7886_v15, %v7890_v33 }
 0x4c7   :  { %10854 = vmatpush1.bf16.msra.mxu0 %v12684_v38  ;;  %v7897_v38 = vld [vmem:[#allocation11 + $0x5e0] sm:$0xff] }
 0x4c8   :  { %11018 = vmatpush1.bf16.msra.mxu1 %v12686_v42  ;;  %10864 = vmatprep.subr.bf16.mxu0 %v12693_v36  ;;  %v7898_v42 = vld [vmem:[#allocation11 + $0x5e8] sm:$0xff]  ;;  %v12740_v36 = vcombine.low %v7885_v30, %v7889_v29  ;;  %v12749_v43 = vcombine.high %v7893_v22, %v7897_v38  ;;  %v7941_v29 = vld [vmem:[#allocation11 + $0x740] sm:$0xff] }
 0x4c9   :  { %11028 = vmatprep.subr.bf16.mxu1 %v12695_v47  ;;  %v12742_v47 = vcombine.low %v7886_v15, %v7890_v33  ;;  %v12751_v40 = vcombine.high %v7894_v41, %v7898_v42  ;;  %v7945_v15 = vld [vmem:[#allocation11 + $0x760] sm:$0xff]  ;;  %v7942_v33 = vld [vmem:[#allocation11 + $0x748] sm:$0xff] }
 0x4ca   :  { %10856 = vmatmul.mubr.bf16.vlgmr.msra.gmra.mrb[16].mxu0 %v13711_v49 }
 0x4cb   :  { %11020 = vmatmul.mubr.bf16.vlgmr.msra.gmra.mrb[16].mxu1 %v13711_v49  ;;  %10865 = vmatpush1.bf16.msra.mxu0 %v12692_v44  ;;  %v7905_v44 = vld [vmem:[#allocation11 + $0x620] sm:$0xff] }
 0x4cc   :  { %10896 = vmatprep.mubr.bf16.mxu0 %v13713_v56  ;;  %11029 = vmatpush1.bf16.msra.mxu1 %v12694_v52  ;;  %v12748_v52 = vcombine.low %v7893_v22, %v7897_v38  ;;  %v12757_v4 = vcombine.high %v7901_v1, %v7905_v44  ;;  %v12797_v22 = vcombine.high %v7941_v29, %v7945_v15 }
 0x4cd   :  { %11060 = vmatprep.mubr.bf16.mxu1 %v13713_v56  ;;  %10866 = vmatprep.subr.bf16.mxu0 %v12701_v46  ;;  %v12750_v46 = vcombine.low %v7894_v41, %v7898_v42  ;;  %v7949_v41 = vld [vmem:[#allocation11 + $0x780] sm:$0xff] }
 0x4ce   :  { %11030 = vmatprep.subr.bf16.mxu1 %v12703_v55  ;;  %v7909_v55 = vld [vmem:[#allocation11 + $0x640] sm:$0xff] }
 0x4cf   :  { %10867 = vmatpush1.bf16.msra.mxu0 %v12700_v62  ;;  %v7914_v62 = vld [vmem:[#allocation11 + $0x668] sm:$0xff]  ;;  %v7953_v42 = vld [vmem:[#allocation11 + $0x7a0] sm:$0xff] }
 0x4d0   :  { %11031 = vmatpush1.bf16.msra.mxu1 %v12702_v8  ;;  %10868 = vmatprep.subr.bf16.mxu0 %v12709_v63  ;;  %v12756_v8 = vcombine.low %v7901_v1, %v7905_v44  ;;  %v12758_v63 = vcombine.low %v7902_v32, %v7906_v9  ;;  %v12767_v2 = vcombine.high %v7910_v45, %v7914_v62  ;;  %v7957_v9 = vld [vmem:[#allocation11 + $0x7c0] sm:$0xff] }
 0x4d1   :  { %11032 = vmatprep.subr.bf16.mxu1 %v12711_v0  ;;  %v12765_v0 = vcombine.high %v7909_v55, %v7913_v59  ;;  %v12805_v44 = vcombine.high %v7949_v41, %v7953_v42 }
 0x4d3   :  { %10869 = vmatpush1.bf16.msra.mxu0 %v12708_v5  ;;  %v7922_v5 = vld [vmem:[#allocation11 + $0x6a8] sm:$0xff] }
 0x4d4   :  { %11033 = vmatpush1.bf16.msra.mxu1 %v12710_v6  ;;  %10870 = vmatprep.subr.bf16.mxu0 %v12717_v10  ;;  %v12764_v6 = vcombine.low %v7909_v55, %v7913_v59  ;;  %v12766_v10 = vcombine.low %v7910_v45, %v7914_v62  ;;  %v12775_v14 = vcombine.high %v7918_v50, %v7922_v5  ;;  %v7965_v62 = vld [vmem:[#allocation11 + $0x800] sm:$0xff] }
 0x4d5   :  { %11034 = vmatprep.subr.bf16.mxu1 %v12719_v11  ;;  %v12773_v11 = vcombine.high %v7917_v39, %v7921_v3 }
 0x4d7   :  { %10871 = vmatpush1.bf16.msra.mxu0 %v12716_v19  ;;  %v7930_v19 = vld [vmem:[#allocation11 + $0x6e8] sm:$0xff] }
 0x4d8   :  { %11035 = vmatpush1.bf16.msra.mxu1 %v12718_v20  ;;  %10872 = vmatprep.subr.bf16.mxu0 %v12725_v21  ;;  %v12772_v20 = vcombine.low %v7917_v39, %v7921_v3  ;;  %v12774_v21 = vcombine.low %v7918_v50, %v7922_v5  ;;  %v12783_v24 = vcombine.high %v7926_v60, %v7930_v19 }
 0x4d9   :  { %11036 = vmatprep.subr.bf16.mxu1 %v12727_v57  ;;  %v12781_v57 = vcombine.high %v7925_v54, %v7929_v16 }
 0x4db   :  { %10873 = vmatpush1.bf16.msra.mxu0 %v12724_v27  ;;  %v7938_v27 = vld [vmem:[#allocation11 + $0x728] sm:$0xff] }
 0x4dc   :  { %11037 = vmatpush1.bf16.msra.mxu1 %v12726_v12  ;;  %10874 = vmatprep.subr.bf16.mxu0 %v12733_v51  ;;  %v12780_v12 = vcombine.low %v7925_v54, %v7929_v16  ;;  %v12782_v51 = vcombine.low %v7926_v60, %v7930_v19  ;;  %v12791_v30 = vcombine.high %v7934_v18, %v7938_v27 }
 0x4dd   :  { %11038 = vmatprep.subr.bf16.mxu1 %v12735_v28  ;;  %v12789_v28 = vcombine.high %v7933_v23, %v7937_v26 }
 0x4df   :  { %10875 = vmatpush1.bf16.msra.mxu0 %v12732_v34  ;;  %v7946_v34 = vld [vmem:[#allocation11 + $0x768] sm:$0xff] }
 0x4e0   :  { %11039 = vmatpush1.bf16.msra.mxu1 %v12734_v35  ;;  %10876 = vmatprep.subr.bf16.mxu0 %v12741_v37  ;;  %v12788_v35 = vcombine.low %v7933_v23, %v7937_v26  ;;  %v4447_v37 = vsub.s32 2, %v13686_v25  ;;  %v12799_v38 = vcombine.high %v7942_v33, %v7946_v34  ;;  %v12798_v1 = vcombine.low %v7942_v33, %v7946_v34 }
 0x4e1   :  { %11040 = vmatprep.subr.bf16.mxu1 %v12743_v53  ;;  %v12790_v53 = vcombine.low %v7934_v18, %v7938_v27 }
 0x4e3   :  { %10877 = vmatpush1.bf16.msra.mxu0 %v12740_v36  ;;  %v7950_v36 = vld [vmem:[#allocation11 + $0x788] sm:$0xff] }
 0x4e4   :  { %11041 = vmatpush1.bf16.msra.mxu1 %v12742_v47  ;;  %10878 = vmatprep.subr.bf16.mxu0 %v12749_v43  ;;  %v7954_v47 = vld [vmem:[#allocation11 + $0x7a8] sm:$0xff]  ;;  %v12796_v43 = vcombine.low %v7941_v29, %v7945_v15 }
 0x4e5   :  { %11042 = vmatprep.subr.bf16.mxu1 %v12751_v40  ;;  %v4448_v40 = vrot.slane %v13689_v61, %v4447_v37  ;;  %v12807_v32 = vcombine.high %v7950_v36, %v7954_v47  ;;  %v12806_v59 = vcombine.low %v7950_v36, %v7954_v47 }
 0x4e7   :  { %10879 = vmatpush1.bf16.msra.mxu0 %v12748_v52  ;;  %v7961_v52 = vld [vmem:[#allocation11 + $0x7e0] sm:$0xff]  ;;  %v13078_v55 = vadd.f32 %v13680_v48, %v4448_v40 }
 0x4e8   :  { %11043 = vmatpush1.bf16.msra.mxu1 %v12750_v46  ;;  %10880 = vmatprep.subr.bf16.mxu0 %v12757_v4  ;;  %v7958_v46 = vld [vmem:[#allocation11 + $0x7c8] sm:$0xff]  ;;  %v12813_v45 = vcombine.high %v7957_v9, %v7961_v52  ;;  %v7973_v48 = vld [vmem:[#allocation11 + $0x840] sm:$0xff] }
 0x4e9   :  { %11044 = vmatprep.subr.bf16.mxu1 %v12759_v13  ;;  %v7962_v4 = vld [vmem:[#allocation11 + $0x7e8] sm:$0xff]  ;;  %v12804_v13 = vcombine.low %v7949_v41, %v7953_v42  ;;  %v7695_v39 = vmax.f32 %v13078_v55, 0.0  ;;  %v8009_v40 = vld [vmem:[#allocation11 + $0x960] sm:$0xff] }
 0x4ea   :  { %v12815_v61 = vcombine.high %v7958_v46, %v7962_v4  ;;  %v12814_v3 = vcombine.low %v7958_v46, %v7962_v4  ;;  %v8013_v4 = vld [vmem:[#allocation11 + $0x980] sm:$0xff]  ;;  %v8014_v55 = vld [vmem:[#allocation11 + $0x988] sm:$0xff] }
 0x4eb   :  { %10881 = vmatpush1.bf16.msra.mxu0 %v12756_v8  ;;  %v7969_v8 = vld [vmem:[#allocation11 + $0x820] sm:$0xff]  ;;  %v13724_v54 = vpack.c.bf16 %v7695_v39, %v7695_v39  ;;  %v8026_v39 = vld [vmem:[#allocation11 + $0x9e8] sm:$0xff] }
 0x4ec   :  { %11045 = vmatpush1.bf16.msra.mxu1 %v12758_v63  ;;  %10882 = vmatprep.subr.bf16.mxu0 %v12765_v0  ;;  %v7966_v63 = vld [vmem:[#allocation11 + $0x808] sm:$0xff]  ;;  %v12821_v50 = vcombine.high %v7965_v62, %v7969_v8 }
 0x4ed   :  { %11046 = vmatprep.subr.bf16.mxu1 %v12767_v2  ;;  %v7970_v0 = vld [vmem:[#allocation11 + $0x828] sm:$0xff]  ;;  %v12812_v2 = vcombine.low %v7957_v9, %v7961_v52 }
 0x4ee   :  { %v12823_v5 = vcombine.high %v7966_v63, %v7970_v0  ;;  %v12822_v16 = vcombine.low %v7966_v63, %v7970_v0  ;;  %v8021_v63 = vld [vmem:[#allocation11 + $0x9c0] sm:$0xff] }
 0x4ef   :  { %10883 = vmatpush1.bf16.msra.mxu0 %v12764_v6  ;;  %v7977_v6 = vld [vmem:[#allocation11 + $0x860] sm:$0xff] }
 0x4f0   :  { %11047 = vmatpush1.bf16.msra.mxu1 %v12766_v10  ;;  %10884 = vmatprep.subr.bf16.mxu0 %v12773_v11  ;;  %v7974_v10 = vld [vmem:[#allocation11 + $0x848] sm:$0xff]  ;;  %v12829_v60 = vcombine.high %v7973_v48, %v7977_v6  ;;  %v12828_v23 = vcombine.low %v7973_v48, %v7977_v6  ;;  %v8025_v0 = vld [vmem:[#allocation11 + $0x9e0] sm:$0xff] }
 0x4f1   :  { %11048 = vmatprep.subr.bf16.mxu1 %v12775_v14  ;;  %v7978_v11 = vld [vmem:[#allocation11 + $0x868] sm:$0xff]  ;;  %v12820_v14 = vcombine.low %v7965_v62, %v7969_v8  ;;  %v8029_v6 = vld [vmem:[#allocation11 + $0xa00] sm:$0xff] }
 0x4f2   :  { %v12831_v19 = vcombine.high %v7974_v10, %v7978_v11  ;;  %v12830_v26 = vcombine.low %v7974_v10, %v7978_v11  ;;  %v8033_v10 = vld [vmem:[#allocation11 + $0xa20] sm:$0xff]  ;;  %v8030_v11 = vld [vmem:[#allocation11 + $0xa08] sm:$0xff] }
 0x4f3   :  { %10885 = vmatpush1.bf16.msra.mxu0 %v12772_v20  ;;  %v7981_v20 = vld [vmem:[#allocation11 + $0x880] sm:$0xff] }
 0x4f4   :  { %11049 = vmatpush1.bf16.msra.mxu1 %v12774_v21  ;;  %10886 = vmatprep.subr.bf16.mxu0 %v12781_v57  ;;  %v7985_v21 = vld [vmem:[#allocation11 + $0x8a0] sm:$0xff]  ;;  %v7982_v57 = vld [vmem:[#allocation11 + $0x888] sm:$0xff] }
 0x4f5   :  { %11050 = vmatprep.subr.bf16.mxu1 %v12783_v24  ;;  %v7986_v24 = vld [vmem:[#allocation11 + $0x8a8] sm:$0xff]  ;;  %v12837_v18 = vcombine.high %v7981_v20, %v7985_v21  ;;  %v12836_v29 = vcombine.low %v7981_v20, %v7985_v21  ;;  %v8037_v21 = vld [vmem:[#allocation11 + $0xa40] sm:$0xff] }
 0x4f6   :  { %v12839_v27 = vcombine.high %v7982_v57, %v7986_v24  ;;  %v12838_v15 = vcombine.low %v7982_v57, %v7986_v24  ;;  %v8041_v57 = vld [vmem:[#allocation11 + $0xa60] sm:$0xff]  ;;  %v8038_v24 = vld [vmem:[#allocation11 + $0xa48] sm:$0xff] }
 0x4f7   :  { %10887 = vmatpush1.bf16.msra.mxu0 %v12780_v12  ;;  %v7989_v12 = vld [vmem:[#allocation11 + $0x8c0] sm:$0xff] }
 0x4f8   :  { %11051 = vmatpush1.bf16.msra.mxu1 %v12782_v51  ;;  %10888 = vmatprep.subr.bf16.mxu0 %v12789_v28  ;;  %v7993_v51 = vld [vmem:[#allocation11 + $0x8e0] sm:$0xff]  ;;  %v7990_v28 = vld [vmem:[#allocation11 + $0x8c8] sm:$0xff] }
 0x4f9   :  { %11052 = vmatprep.subr.bf16.mxu1 %v12791_v30  ;;  %v7994_v30 = vld [vmem:[#allocation11 + $0x8e8] sm:$0xff]  ;;  %v12845_v33 = vcombine.high %v7989_v12, %v7993_v51  ;;  %v12844_v41 = vcombine.low %v7989_v12, %v7993_v51  ;;  %v8045_v51 = vld [vmem:[#allocation11 + $0xa80] sm:$0xff] }
 0x4fa   :  { %v12847_v34 = vcombine.high %v7990_v28, %v7994_v30  ;;  %v12846_v42 = vcombine.low %v7990_v28, %v7994_v30  ;;  %v8049_v28 = vld [vmem:[#allocation11 + $0xaa0] sm:$0xff]  ;;  %v8046_v30 = vld [vmem:[#allocation11 + $0xa88] sm:$0xff] }
 0x4fb   :  { %10889 = vmatpush1.bf16.msra.mxu0 %v12788_v35  ;;  %v7997_v35 = vld [vmem:[#allocation11 + $0x900] sm:$0xff] }
 0x4fc   :  { %11053 = vmatpush1.bf16.msra.mxu1 %v12790_v53  ;;  %10890 = vmatprep.subr.bf16.mxu0 %v12797_v22  ;;  %v8001_v53 = vld [vmem:[#allocation11 + $0x920] sm:$0xff]  ;;  %v7998_v22 = vld [vmem:[#allocation11 + $0x908] sm:$0xff] }
 0x4fd   :  { %11054 = vmatprep.subr.bf16.mxu1 %v12799_v38  ;;  %v8002_v38 = vld [vmem:[#allocation11 + $0x928] sm:$0xff]  ;;  %v12853_v36 = vcombine.high %v7997_v35, %v8001_v53 }
 0x4fe   :  { %v12855_v47 = vcombine.high %v7998_v22, %v8002_v38  ;;  %v12854_v9 = vcombine.low %v7998_v22, %v8002_v38  ;;  %v8057_v22 = vld [vmem:[#allocation11 + $0xae0] sm:$0xff]  ;;  %v8054_v38 = vld [vmem:[#allocation11 + $0xac8] sm:$0xff] }
 0x4ff   :  { %10891 = vmatpush1.bf16.msra.mxu0 %v12796_v43  ;;  %v8005_v43 = vld [vmem:[#allocation11 + $0x940] sm:$0xff] }
 0x500   :  { %11055 = vmatpush1.bf16.msra.mxu1 %v12798_v1  ;;  %10892 = vmatprep.subr.bf16.mxu0 %v12805_v44  ;;  %v8006_v1 = vld [vmem:[#allocation11 + $0x948] sm:$0xff]  ;;  %v12861_v52 = vcombine.high %v8005_v43, %v8009_v40 }
 0x501   :  { %11056 = vmatprep.subr.bf16.mxu1 %v12807_v32  ;;  %v8010_v44 = vld [vmem:[#allocation11 + $0x968] sm:$0xff]  ;;  %v12852_v32 = vcombine.low %v7997_v35, %v8001_v53  ;;  %v8053_v53 = vld [vmem:[#allocation11 + $0xac0] sm:$0xff] }
 0x502   :  { %v12863_v46 = vcombine.high %v8006_v1, %v8010_v44 }
 0x503   :  { %10893 = vmatpush1.bf16.msra.mxu0 %v12804_v13  ;;  %v8017_v13 = vld [vmem:[#allocation11 + $0x9a0] sm:$0xff] }
 0x504   :  { %11057 = vmatpush1.bf16.msra.mxu1 %v12806_v59  ;;  %10894 = vmatprep.subr.bf16.mxu0 %v12813_v45  ;;  %v8018_v59 = vld [vmem:[#allocation11 + $0x9a8] sm:$0xff]  ;;  %v12860_v45 = vcombine.low %v8005_v43, %v8009_v40  ;;  %v12869_v62 = vcombine.high %v8013_v4, %v8017_v13  ;;  %v8061_v40 = vld [vmem:[#allocation11 + $0xb00] sm:$0xff] }
 0x505   :  { %11058 = vmatprep.subr.bf16.mxu1 %v12815_v61  ;;  %v12862_v61 = vcombine.low %v8006_v1, %v8010_v44  ;;  %v12871_v8 = vcombine.high %v8014_v55, %v8018_v59  ;;  %v8065_v1 = vld [vmem:[#allocation11 + $0xb20] sm:$0xff]  ;;  %v8062_v44 = vld [vmem:[#allocation11 + $0xb08] sm:$0xff] }
 0x507   :  { %10895 = vmatpush1.bf16.msra.mxu0 %v12812_v2  ;;  %v8022_v2 = vld [vmem:[#allocation11 + $0x9c8] sm:$0xff] }
 0x508   :  { %11059 = vmatpush1.bf16.msra.mxu1 %v12814_v3  ;;  %10905 = vmatprep.subr.bf16.mxu0 %v12821_v50  ;;  %v12868_v3 = vcombine.low %v8013_v4, %v8017_v13  ;;  %v12870_v50 = vcombine.low %v8014_v55, %v8018_v59  ;;  %v12879_v48 = vcombine.high %v8022_v2, %v8026_v39  ;;  %v8069_v13 = vld [vmem:[#allocation11 + $0xb40] sm:$0xff]  ;;  %v8070_v59 = vld [vmem:[#allocation11 + $0xb48] sm:$0xff] }
 0x509   :  { %11069 = vmatprep.subr.bf16.mxu1 %v12823_v5  ;;  %v12877_v5 = vcombine.high %v8021_v63, %v8025_v0  ;;  %v8073_v55 = vld [vmem:[#allocation11 + $0xb60] sm:$0xff] }
 0x50a   :  { %10897 = vmatmul.mubr.bf16.vlgmr.msra.gmra.mrb[16].mxu0 %v13724_v54 }
 0x50b   :  { %11061 = vmatmul.mubr.bf16.vlgmr.msra.gmra.mrb[16].mxu1 %v13724_v54  ;;  %10906 = vmatpush1.bf16.msra.mxu0 %v12820_v14  ;;  %v8034_v14 = vld [vmem:[#allocation11 + $0xa28] sm:$0xff] }
 0x50c   :  { %11070 = vmatpush1.bf16.msra.mxu1 %v12822_v16  ;;  %10907 = vmatprep.subr.bf16.mxu0 %v12829_v60  ;;  %v12876_v16 = vcombine.low %v8021_v63, %v8025_v0  ;;  %v12878_v60 = vcombine.low %v8022_v2, %v8026_v39  ;;  %v12887_v20 = vcombine.high %v8030_v11, %v8034_v14  ;;  %v8077_v0 = vld [vmem:[#allocation11 + $0xb80] sm:$0xff]  ;;  %v8078_v39 = vld [vmem:[#allocation11 + $0xb88] sm:$0xff] }
 0x50d   :  { %11071 = vmatprep.subr.bf16.mxu1 %v12831_v19  ;;  %v12885_v19 = vcombine.high %v8029_v6, %v8033_v10  ;;  %v8081_v2 = vld [vmem:[#allocation11 + $0xba0] sm:$0xff] }
 0x50f   :  { %10908 = vmatpush1.bf16.msra.mxu0 %v12828_v23  ;;  %v8042_v23 = vld [vmem:[#allocation11 + $0xa68] sm:$0xff] }
 0x510   :  { %11072 = vmatpush1.bf16.msra.mxu1 %v12830_v26  ;;  %10909 = vmatprep.subr.bf16.mxu0 %v12837_v18  ;;  %v12884_v26 = vcombine.low %v8029_v6, %v8033_v10  ;;  %v12886_v18 = vcombine.low %v8030_v11, %v8034_v14  ;;  %v12895_v12 = vcombine.high %v8038_v24, %v8042_v23  ;;  %v8085_v10 = vld [vmem:[#allocation11 + $0xbc0] sm:$0xff]  ;;  %v8086_v14 = vld [vmem:[#allocation11 + $0xbc8] sm:$0xff] }
 0x511   :  { %11073 = vmatprep.subr.bf16.mxu1 %v12839_v27  ;;  %v12893_v27 = vcombine.high %v8037_v21, %v8041_v57  ;;  %v8089_v11 = vld [vmem:[#allocation11 + $0xbe0] sm:$0xff] }
 0x513   :  { %10910 = vmatpush1.bf16.msra.mxu0 %v12836_v29  ;;  %v8050_v29 = vld [vmem:[#allocation11 + $0xaa8] sm:$0xff] }
 0x514   :  { %11074 = vmatpush1.bf16.msra.mxu1 %v12838_v15  ;;  %10911 = vmatprep.subr.bf16.mxu0 %v12845_v33  ;;  %v12892_v15 = vcombine.low %v8037_v21, %v8041_v57  ;;  %v12894_v33 = vcombine.low %v8038_v24, %v8042_v23  ;;  %v12903_v35 = vcombine.high %v8046_v30, %v8050_v29  ;;  %v8093_v57 = vld [vmem:[#allocation11 + $0xc00] sm:$0xff]  ;;  %v8094_v23 = vld [vmem:[#allocation11 + $0xc08] sm:$0xff] }
 0x515   :  { %11075 = vmatprep.subr.bf16.mxu1 %v12847_v34  ;;  %v12901_v34 = vcombine.high %v8045_v51, %v8049_v28  ;;  %v8097_v24 = vld [vmem:[#allocation11 + $0xc20] sm:$0xff] }
 0x517   :  { %10912 = vmatpush1.bf16.msra.mxu0 %v12844_v41  ;;  %v8058_v41 = vld [vmem:[#allocation11 + $0xae8] sm:$0xff] }
 0x518   :  { %11076 = vmatpush1.bf16.msra.mxu1 %v12846_v42  ;;  %10913 = vmatprep.subr.bf16.mxu0 %v12853_v36  ;;  %v12900_v42 = vcombine.low %v8045_v51, %v8049_v28  ;;  %v12902_v36 = vcombine.low %v8046_v30, %v8050_v29  ;;  %v12911_v43 = vcombine.high %v8054_v38, %v8058_v41  ;;  %v4455_v28 = vsub.s32 4, %v13686_v25 }
 0x519   :  { %11077 = vmatprep.subr.bf16.mxu1 %v12855_v47  ;;  %v12909_v47 = vcombine.high %v8053_v53, %v8057_v22  ;;  %v4459_v30 = vsub.s32 5, %v13686_v25  ;;  %v4467_v29 = vsub.s32 7, %v13686_v25 }
 0x51b   :  { %10914 = vmatpush1.bf16.msra.mxu0 %v12852_v32  ;;  %v8066_v32 = vld [vmem:[#allocation11 + $0xb28] sm:$0xff] }
 0x51c   :  { %11078 = vmatpush1.bf16.msra.mxu1 %v12854_v9  ;;  %10915 = vmatprep.subr.bf16.mxu0 %v12861_v52  ;;  %v12908_v9 = vcombine.low %v8053_v53, %v8057_v22  ;;  %v12910_v52 = vcombine.low %v8054_v38, %v8058_v41  ;;  %v12919_v4 = vcombine.high %v8062_v44, %v8066_v32 }
 0x51d   :  { %11079 = vmatprep.subr.bf16.mxu1 %v12863_v46  ;;  %v12917_v46 = vcombine.high %v8061_v40, %v8065_v1 }
 0x51f   :  { %10916 = vmatpush1.bf16.msra.mxu0 %v12860_v45  ;;  %v8074_v45 = vld [vmem:[#allocation11 + $0xb68] sm:$0xff] }
 0x520   :  { %11080 = vmatpush1.bf16.msra.mxu1 %v12862_v61  ;;  %10917 = vmatprep.subr.bf16.mxu0 %v12869_v62  ;;  %v12916_v61 = vcombine.low %v8061_v40, %v8065_v1  ;;  %v12918_v62 = vcombine.low %v8062_v44, %v8066_v32  ;;  %v12927_v63 = vcombine.high %v8070_v59, %v8074_v45 }
 0x521   :  { %11081 = vmatprep.subr.bf16.mxu1 %v12871_v8  ;;  %v12925_v8 = vcombine.high %v8069_v13, %v8073_v55 }
 0x523   :  { %10918 = vmatpush1.bf16.msra.mxu0 %v12868_v3  ;;  %v8082_v3 = vld [vmem:[#allocation11 + $0xba8] sm:$0xff] }
 0x524   :  { %11082 = vmatpush1.bf16.msra.mxu1 %v12870_v50  ;;  %10919 = vmatprep.subr.bf16.mxu0 %v12877_v5  ;;  %v12924_v50 = vcombine.low %v8069_v13, %v8073_v55  ;;  %v12926_v5 = vcombine.low %v8070_v59, %v8074_v45  ;;  %v12935_v6 = vcombine.high %v8078_v39, %v8082_v3  ;;  %v8102_v13 = vld [vmem:[#allocation11 + $0xc48] sm:$0xff] }
 0x525   :  { %11083 = vmatprep.subr.bf16.mxu1 %v12879_v48  ;;  %v12933_v48 = vcombine.high %v8077_v0, %v8081_v2  ;;  %v8106_v55 = vld [vmem:[#allocation11 + $0xc68] sm:$0xff]  ;;  %v12948_v45 = vcombine.low %v8093_v57, %v8097_v24 }
 0x527   :  { %10920 = vmatpush1.bf16.msra.mxu0 %v12876_v16  ;;  %v8090_v16 = vld [vmem:[#allocation11 + $0xbe8] sm:$0xff] }
 0x528   :  { %11084 = vmatpush1.bf16.msra.mxu1 %v12878_v60  ;;  %10921 = vmatprep.subr.bf16.mxu0 %v12885_v19  ;;  %v12932_v60 = vcombine.low %v8077_v0, %v8081_v2  ;;  %v12934_v19 = vcombine.low %v8078_v39, %v8082_v3  ;;  %v12943_v21 = vcombine.high %v8086_v14, %v8090_v16  ;;  %v8113_v2 = vld [vmem:[#allocation11 + $0xca0] sm:$0xff]  ;;  %v8110_v39 = vld [vmem:[#allocation11 + $0xc88] sm:$0xff] }
 0x529   :  { %11085 = vmatprep.subr.bf16.mxu1 %v12887_v20  ;;  %v12941_v20 = vcombine.high %v8085_v10, %v8089_v11  ;;  %v12959_v0 = vcombine.high %v8102_v13, %v8106_v55  ;;  %v8114_v3 = vld [vmem:[#allocation11 + $0xca8] sm:$0xff] }
 0x52b   :  { %10922 = vmatpush1.bf16.msra.mxu0 %v12884_v26  ;;  %v8098_v26 = vld [vmem:[#allocation11 + $0xc28] sm:$0xff] }
 0x52c   :  { %11086 = vmatpush1.bf16.msra.mxu1 %v12886_v18  ;;  %10923 = vmatprep.subr.bf16.mxu0 %v12893_v27  ;;  %v12940_v18 = vcombine.low %v8085_v10, %v8089_v11  ;;  %v12942_v27 = vcombine.low %v8086_v14, %v8090_v16  ;;  %v12951_v51 = vcombine.high %v8094_v23, %v8098_v26  ;;  %v8117_v11 = vld [vmem:[#allocation11 + $0xcc0] sm:$0xff]  ;;  %v8118_v16 = vld [vmem:[#allocation11 + $0xcc8] sm:$0xff] }
 0x52d   :  { %11087 = vmatprep.subr.bf16.mxu1 %v12895_v12  ;;  %v12949_v12 = vcombine.high %v8093_v57, %v8097_v24  ;;  %v12967_v10 = vcombine.high %v8110_v39, %v8114_v3  ;;  %v8121_v14 = vld [vmem:[#allocation11 + $0xce0] sm:$0xff] }
 0x52e   :  { %v8125_v24 = vld [vmem:[#allocation11 + $0xd00] sm:$0xff] }
 0x52f   :  { %10924 = vmatpush1.bf16.msra.mxu0 %v12892_v15  ;;  %v13731_v15 = vld [vmem:[#allocation9] sm:$0xff] }
 0x530   :  { %11088 = vmatpush1.bf16.msra.mxu1 %v12894_v33  ;;  %10925 = vmatprep.subr.bf16.mxu0 %v12901_v34  ;;  %v4456_v33 = vrot.slane %v13731_v15, %v4455_v28  ;;  %v4460_v34 = vrot.slane %v13731_v15, %v4459_v30 }
 0x531   :  { %11089 = vmatprep.subr.bf16.mxu1 %v12903_v35  ;;  %v4468_v35 = vrot.slane %v13731_v15, %v4467_v29 }
 0x533   :  { %10926 = vmatpush1.bf16.msra.mxu0 %v12900_v42 }
 0x534   :  { %11090 = vmatpush1.bf16.msra.mxu1 %v12902_v36  ;;  %10927 = vmatprep.subr.bf16.mxu0 %v12909_v47 }
 0x535   :  { %11091 = vmatprep.subr.bf16.mxu1 %v12911_v43 }
 0x537   :  { %10928 = vmatpush1.bf16.msra.mxu0 %v12908_v9 }
 0x538   :  { %11092 = vmatpush1.bf16.msra.mxu1 %v12910_v52  ;;  %10929 = vmatprep.subr.bf16.mxu0 %v12917_v46  ;;  %v8101_v52 = vld [vmem:[#allocation11 + $0xc40] sm:$0xff] }
 0x539   :  { %11093 = vmatprep.subr.bf16.mxu1 %v12919_v4  ;;  %v8105_v4 = vld [vmem:[#allocation11 + $0xc60] sm:$0xff] }
 0x53b   :  { %10930 = vmatpush1.bf16.msra.mxu0 %v12916_v61  ;;  %v12950_v61 = vcombine.low %v8094_v23, %v8098_v26  ;;  %v8129_v23 = vld [vmem:[#allocation11 + $0xd20] sm:$0xff]  ;;  %v8126_v26 = vld [vmem:[#allocation11 + $0xd08] sm:$0xff] }
 0x53c   :  { %11094 = vmatpush1.bf16.msra.mxu1 %v12918_v62  ;;  %10931 = vmatprep.subr.bf16.mxu0 %v12925_v8  ;;  %v8109_v8 = vld [vmem:[#allocation11 + $0xc80] sm:$0xff] }
 0x53d   :  { %11095 = vmatprep.subr.bf16.mxu1 %v12927_v63  ;;  %v12957_v63 = vcombine.high %v8101_v52, %v8105_v4 }
 0x53f   :  { %10932 = vmatpush1.bf16.msra.mxu0 %v12924_v50 }
 0x540   :  { %11096 = vmatpush1.bf16.msra.mxu1 %v12926_v5  ;;  %10933 = vmatprep.subr.bf16.mxu0 %v12933_v48  ;;  %v12956_v5 = vcombine.low %v8101_v52, %v8105_v4  ;;  %v12958_v48 = vcombine.low %v8102_v13, %v8106_v55  ;;  %v8149_v4 = vld [vmem:[#allocation11 + $0xdc0] sm:$0xff]  ;;  %v8150_v55 = vld [vmem:[#allocation11 + $0xdc8] sm:$0xff] }
 0x541   :  { %11097 = vmatprep.subr.bf16.mxu1 %v12935_v6  ;;  %v12965_v6 = vcombine.high %v8109_v8, %v8113_v2  ;;  %v8153_v13 = vld [vmem:[#allocation11 + $0xde0] sm:$0xff] }
 0x543   :  { %10934 = vmatpush1.bf16.msra.mxu0 %v12932_v60  ;;  %v8122_v60 = vld [vmem:[#allocation11 + $0xce8] sm:$0xff] }
 0x544   :  { %11098 = vmatpush1.bf16.msra.mxu1 %v12934_v19  ;;  %10935 = vmatprep.subr.bf16.mxu0 %v12941_v20  ;;  %v12964_v19 = vcombine.low %v8109_v8, %v8113_v2  ;;  %v12966_v20 = vcombine.low %v8110_v39, %v8114_v3  ;;  %v12975_v57 = vcombine.high %v8118_v16, %v8122_v60  ;;  %v8157_v2 = vld [vmem:[#allocation11 + $0xe00] sm:$0xff]  ;;  %v8158_v3 = vld [vmem:[#allocation11 + $0xe08] sm:$0xff] }
 0x545   :  { %11099 = vmatprep.subr.bf16.mxu1 %v12943_v21  ;;  %v12973_v21 = vcombine.high %v8117_v11, %v8121_v14  ;;  %v8161_v39 = vld [vmem:[#allocation11 + $0xe20] sm:$0xff] }
 0x547   :  { %10936 = vmatpush1.bf16.msra.mxu0 %v12940_v18  ;;  %v8130_v18 = vld [vmem:[#allocation11 + $0xd28] sm:$0xff] }
 0x548   :  { %11100 = vmatpush1.bf16.msra.mxu1 %v12942_v27  ;;  %10946 = vmatprep.subr.bf16.mxu0 %v12949_v12  ;;  %v12972_v27 = vcombine.low %v8117_v11, %v8121_v14  ;;  %v12974_v12 = vcombine.low %v8118_v16, %v8122_v60  ;;  %v8165_v14 = vld [vmem:[#allocation11 + $0xe40] sm:$0xff]  ;;  %v8166_v60 = vld [vmem:[#allocation11 + $0xe48] sm:$0xff] }
 0x549   :  { %11110 = vmatprep.subr.bf16.mxu1 %v12951_v51  ;;  %v12981_v51 = vcombine.high %v8125_v24, %v8129_v23  ;;  %v8169_v16 = vld [vmem:[#allocation11 + $0xe60] sm:$0xff] }
 0x55d   :  { %v7522_v53 = vpop.f32.mrb[12].mxu0 }
 0x55e   :  { %v13080_v22 = vadd.f32 %v7522_v53, %v4456_v33  ;;  %v13742_v38 = vpop.f32.mrb[12].mxu1  ;;  %v7524_v41 = vpop.f32.mrb[13].mxu0  ;;  %v12983_v33 = vcombine.high %v8126_v26, %v8130_v18  ;;  %v8134_v53 = vld [vmem:[#allocation11 + $0xd48] sm:$0xff] }
 0x55f   :  { %v13081_v42 = vadd.f32 %v7524_v41, %v4460_v34  ;;  %v7688_v36 = vpop.f32.mrb[13].mxu1  ;;  %v7526_v47 = vpop.f32.mrb[14].mxu0  ;;  %v8133_v34 = vld [vmem:[#allocation11 + $0xd40] sm:$0xff]  ;;  %v12980_v41 = vcombine.low %v8125_v24, %v8129_v23 }
 0x560   :  { %v7697_v43 = vmax.f32 %v13080_v22, 0.0  ;;  %v13083_v40 = vadd.f32 %v7688_v36, %v4468_v35  ;;  %v7690_v1 = vpop.f32.mrb[14].mxu1  ;;  %v7527_v44 = vpop.f32.mrb[15].mxu0  ;;  %v8137_v35 = vld [vmem:[#allocation11 + $0xd60] sm:$0xff]  ;;  %v8138_v22 = vld [vmem:[#allocation11 + $0xd68] sm:$0xff] }
 0x561   :  { %v7698_v32 = vmax.f32 %v13081_v42, 0.0  ;;  %v7691_v9 = vpop.f32.mrb[15].mxu1  ;;  %v12982_v42 = vcombine.low %v8126_v26, %v8130_v18  ;;  %v12989_v36 = vcombine.high %v8133_v34, %v8137_v35  ;;  %v12991_v47 = vcombine.high %v8134_v53, %v8138_v22  ;;  %v8142_v1 = vld [vmem:[#allocation11 + $0xd88] sm:$0xff]  ;;  %v8173_v23 = vld [vmem:[#allocation11 + $0xe80] sm:$0xff] }
 0x562   :  { %v7700_v46 = vmax.f32 %v13083_v40, 0.0  ;;  %v13746_v62 = vpack.c.bf16 %v7697_v43, %v7697_v43  ;;  %v8141_v43 = vld [vmem:[#allocation11 + $0xd80] sm:$0xff]  ;;  %v8146_v44 = vld [vmem:[#allocation11 + $0xda8] sm:$0xff]  ;;  %v12990_v9 = vcombine.low %v8134_v53, %v8138_v22 }
 0x563   :  { %v13744_v59 = vpack.c.bf16 %v7698_v32, %v7698_v32  ;;  %v8145_v40 = vld [vmem:[#allocation11 + $0xda0] sm:$0xff]  ;;  %v12988_v32 = vcombine.low %v8133_v34, %v8137_v35  ;;  %v12998_v8 = vcombine.low %v8142_v1, %v8146_v44  ;;  %v8174_v18 = vld [vmem:[#allocation11 + $0xe88] sm:$0xff] }
 0x564   :  { %v13750_v50 = vpack.c.bf16 %v7700_v46, %v7700_v46  ;;  %v12997_v52 = vcombine.high %v8141_v43, %v8145_v40  ;;  %v12999_v46 = vcombine.high %v8142_v1, %v8146_v44  ;;  %v8177_v26 = vld [vmem:[#allocation11 + $0xea0] sm:$0xff]  ;;  %v8182_v22 = vld [vmem:[#allocation11 + $0xec8] sm:$0xff] }
 0x565   :  { %10937 = vmatprep.mubr.bf16.mxu0 %v13744_v59  ;;  %11101 = vmatprep.mubr.bf16.mxu1 %v13744_v59  ;;  %v8181_v35 = vld [vmem:[#allocation11 + $0xec0] sm:$0xff]  ;;  %v8190_v44 = vld [vmem:[#allocation11 + $0xf08] sm:$0xff] }
 0x566   :  { %10938 = vmatmul.mubr.bf16.vlgmr.msra.gmra.mrb[16].mxu0 %v13746_v62  ;;  %11102 = vmatmul.mubr.bf16.vlgmr.msra.gmra.mrb[16].mxu1 %v13746_v62  ;;  %v8185_v53 = vld [vmem:[#allocation11 + $0xee0] sm:$0xff] }
 0x567   :  { %10947 = vmatpush1.bf16.msra.mxu0 %v12948_v45  ;;  %11111 = vmatpush1.bf16.msra.mxu1 %v12950_v61  ;;  %v8154_v45 = vld [vmem:[#allocation11 + $0xde8] sm:$0xff]  ;;  %v12996_v61 = vcombine.low %v8141_v43, %v8145_v40  ;;  %v8189_v40 = vld [vmem:[#allocation11 + $0xf00] sm:$0xff] }
 0x568   :  { %10978 = vmatprep.mubr.bf16.mxu0 %v13750_v50  ;;  %11142 = vmatprep.mubr.bf16.mxu1 %v13750_v50  ;;  %v8193_v1 = vld [vmem:[#allocation11 + $0xf20] sm:$0xff] }
 0x569   :  { %10948 = vmatprep.subr.bf16.mxu0 %v12957_v63  ;;  %11112 = vmatprep.subr.bf16.mxu1 %v12959_v0  ;;  %v13005_v63 = vcombine.high %v8149_v4, %v8153_v13  ;;  %v13007_v0 = vcombine.high %v8150_v55, %v8154_v45 }
 0x56b   :  { %10949 = vmatpush1.bf16.msra.mxu0 %v12956_v5  ;;  %11113 = vmatpush1.bf16.msra.mxu1 %v12958_v48  ;;  %v8162_v5 = vld [vmem:[#allocation11 + $0xe28] sm:$0xff]  ;;  %v13004_v48 = vcombine.low %v8149_v4, %v8153_v13  ;;  %v8197_v13 = vld [vmem:[#allocation11 + $0xf40] sm:$0xff] }
 0x56c   :  { %10950 = vmatprep.subr.bf16.mxu0 %v12965_v6  ;;  %11114 = vmatprep.subr.bf16.mxu1 %v12967_v10  ;;  %v13006_v6 = vcombine.low %v8150_v55, %v8154_v45  ;;  %v13013_v10 = vcombine.high %v8157_v2, %v8161_v39  ;;  %v13015_v11 = vcombine.high %v8158_v3, %v8162_v5  ;;  %v8201_v55 = vld [vmem:[#allocation11 + $0xf60] sm:$0xff]  ;;  %v8198_v45 = vld [vmem:[#allocation11 + $0xf48] sm:$0xff] }
 0x56f   :  { %10951 = vmatpush1.bf16.msra.mxu0 %v12964_v19  ;;  %11115 = vmatpush1.bf16.msra.mxu1 %v12966_v20  ;;  %v8170_v19 = vld [vmem:[#allocation11 + $0xe68] sm:$0xff]  ;;  %v13012_v20 = vcombine.low %v8157_v2, %v8161_v39  ;;  %v13053_v2 = vcombine.high %v8197_v13, %v8201_v55 }
 0x570   :  { %10952 = vmatprep.subr.bf16.mxu0 %v12973_v21  ;;  %11116 = vmatprep.subr.bf16.mxu1 %v12975_v57  ;;  %v13014_v21 = vcombine.low %v8158_v3, %v8162_v5  ;;  %v13021_v57 = vcombine.high %v8165_v14, %v8169_v16  ;;  %v13023_v24 = vcombine.high %v8166_v60, %v8170_v19  ;;  %v8205_v3 = vld [vmem:[#allocation11 + $0xf80] sm:$0xff] }
 0x571   :  { %v8209_v5 = vld [vmem:[#allocation11 + $0xfa0] sm:$0xff] }
 0x573   :  { %10953 = vmatpush1.bf16.msra.mxu0 %v12972_v27  ;;  %11117 = vmatpush1.bf16.msra.mxu1 %v12974_v12  ;;  %v8178_v27 = vld [vmem:[#allocation11 + $0xea8] sm:$0xff]  ;;  %v13020_v12 = vcombine.low %v8165_v14, %v8169_v16  ;;  %v13061_v16 = vcombine.high %v8205_v3, %v8209_v5 }
 0x574   :  { %10954 = vmatprep.subr.bf16.mxu0 %v12981_v51  ;;  %11118 = vmatprep.subr.bf16.mxu1 %v12983_v33  ;;  %v13022_v51 = vcombine.low %v8166_v60, %v8170_v19  ;;  %v13029_v33 = vcombine.high %v8173_v23, %v8177_v26  ;;  %v13031_v34 = vcombine.high %v8174_v18, %v8178_v27  ;;  %v8213_v19 = vld [vmem:[#allocation11 + $0xfc0] sm:$0xff] }
 0x577   :  { %10955 = vmatpush1.bf16.msra.mxu0 %v12980_v41  ;;  %11119 = vmatpush1.bf16.msra.mxu1 %v12982_v42  ;;  %v8186_v41 = vld [vmem:[#allocation11 + $0xee8] sm:$0xff]  ;;  %v13028_v42 = vcombine.low %v8173_v23, %v8177_v26 }
 0x578   :  { %10956 = vmatprep.subr.bf16.mxu0 %v12989_v36  ;;  %11120 = vmatprep.subr.bf16.mxu1 %v12991_v47  ;;  %v13030_v36 = vcombine.low %v8174_v18, %v8178_v27  ;;  %v13037_v47 = vcombine.high %v8181_v35, %v8185_v53  ;;  %v13039_v43 = vcombine.high %v8182_v22, %v8186_v41 }
 0x57b   :  { %10957 = vmatpush1.bf16.msra.mxu0 %v12988_v32  ;;  %11121 = vmatpush1.bf16.msra.mxu1 %v12990_v9  ;;  %v8194_v32 = vld [vmem:[#allocation11 + $0xf28] sm:$0xff]  ;;  %v13036_v9 = vcombine.low %v8181_v35, %v8185_v53 }
 0x57c   :  { %10958 = vmatprep.subr.bf16.mxu0 %v12997_v52  ;;  %11122 = vmatprep.subr.bf16.mxu1 %v12999_v46  ;;  %v13038_v52 = vcombine.low %v8182_v22, %v8186_v41  ;;  %v13045_v46 = vcombine.high %v8189_v40, %v8193_v1  ;;  %v13047_v4 = vcombine.high %v8190_v44, %v8194_v32 }
 0x57f   :  { %10959 = vmatpush1.bf16.msra.mxu0 %v12996_v61  ;;  %11123 = vmatpush1.bf16.msra.mxu1 %v12998_v8  ;;  %v8202_v61 = vld [vmem:[#allocation11 + $0xf68] sm:$0xff]  ;;  %v13044_v8 = vcombine.low %v8189_v40, %v8193_v1 }
 0x580   :  { %10960 = vmatprep.subr.bf16.mxu0 %v13005_v63  ;;  %11124 = vmatprep.subr.bf16.mxu1 %v13007_v0  ;;  %v13046_v63 = vcombine.low %v8190_v44, %v8194_v32  ;;  %v4463_v0 = vsub.s32 6, %v13686_v25  ;;  %v13055_v39 = vcombine.high %v8198_v45, %v8202_v61 }
 0x582   :  { %v4464_v14 = vrot.slane %v13731_v15, %v4463_v0  ;;  %v7715_v15 = vld [vmem:[#allocation11 + $0x30] sm:$0xff] }
 0x583   :  { %10961 = vmatpush1.bf16.msra.mxu0 %v13004_v48  ;;  %11125 = vmatpush1.bf16.msra.mxu1 %v13006_v6  ;;  %v8206_v48 = vld [vmem:[#allocation11 + $0xf88] sm:$0xff] }
 0x584   :  { %10962 = vmatprep.subr.bf16.mxu0 %v13013_v10  ;;  %11126 = vmatprep.subr.bf16.mxu1 %v13015_v11  ;;  %v8210_v6 = vld [vmem:[#allocation11 + $0xfa8] sm:$0xff]  ;;  %v13052_v10 = vcombine.low %v8197_v13, %v8201_v55  ;;  %v13054_v11 = vcombine.low %v8198_v45, %v8202_v61  ;;  %v13082_v26 = vadd.f32 %v13742_v38, %v4464_v14  ;;  %v7720_v38 = vld [vmem:[#allocation11 + $0x58] sm:$0xff] }
 0x585   :  { %v13063_v60 = vcombine.high %v8206_v48, %v8210_v6  ;;  %v13062_v23 = vcombine.low %v8206_v48, %v8210_v6  ;;  %v7748_v14 = vld [vmem:[#allocation11 + $0x138] sm:$0xff] }
 0x586   :  { %v7699_v53 = vmax.f32 %v13082_v26, 0.0 }
 0x587   :  { %10963 = vmatpush1.bf16.msra.mxu0 %v13012_v20  ;;  %11127 = vmatpush1.bf16.msra.mxu1 %v13014_v21  ;;  %v8217_v20 = vld [vmem:[#allocation11 + $0xfe0] sm:$0xff]  ;;  %v8214_v21 = vld [vmem:[#allocation11 + $0xfc8] sm:$0xff] }
 0x588   :  { %10964 = vmatprep.subr.bf16.mxu0 %v13021_v57  ;;  %11128 = vmatprep.subr.bf16.mxu1 %v13023_v24  ;;  %v8218_v57 = vld [vmem:[#allocation11 + $0xfe8] sm:$0xff]  ;;  %v13060_v24 = vcombine.low %v8205_v3, %v8209_v5  ;;  %v13069_v18 = vcombine.high %v8213_v19, %v8217_v20  ;;  %v13761_v40 = vpack.c.bf16 %v7699_v53, %v7699_v53 }
 0x589   :  { %v13071_v27 = vcombine.high %v8214_v21, %v8218_v57  ;;  %v13070_v35 = vcombine.low %v8214_v21, %v8218_v57  ;;  %v7751_v21 = vld [vmem:[#allocation11 + $0x150] sm:$0xff] }
 0x58a   :  { %v7755_v57 = vld [vmem:[#allocation11 + $0x170] sm:$0xff] }
 0x58b   :  { %10965 = vmatpush1.bf16.msra.mxu0 %v13020_v12  ;;  %11129 = vmatpush1.bf16.msra.mxu1 %v13022_v51  ;;  %v7711_v12 = vld [vmem:[#allocation11 + $0x10] sm:$0xff]  ;;  %v7712_v51 = vld [vmem:[#allocation11 + $0x18] sm:$0xff] }
 0x58c   :  { %10966 = vmatprep.subr.bf16.mxu0 %v13029_v33  ;;  %11130 = vmatprep.subr.bf16.mxu1 %v13031_v34  ;;  %v7716_v33 = vld [vmem:[#allocation11 + $0x38] sm:$0xff]  ;;  %v13068_v34 = vcombine.low %v8213_v19, %v8217_v20  ;;  %v12569_v22 = vcombine.high %v7711_v12, %v7715_v15 }
 0x58d   :  { %v12571_v41 = vcombine.high %v7712_v51, %v7716_v33  ;;  %v12570_v1 = vcombine.low %v7712_v51, %v7716_v33  ;;  %v7763_v51 = vld [vmem:[#allocation11 + $0x1b0] sm:$0xff]  ;;  %v7760_v33 = vld [vmem:[#allocation11 + $0x198] sm:$0xff] }
 0x58f   :  { %10967 = vmatpush1.bf16.msra.mxu0 %v13028_v42  ;;  %11131 = vmatpush1.bf16.msra.mxu1 %v13030_v36  ;;  %v7719_v42 = vld [vmem:[#allocation11 + $0x50] sm:$0xff] }
 0x590   :  { %10968 = vmatprep.subr.bf16.mxu0 %v13037_v47  ;;  %11132 = vmatprep.subr.bf16.mxu1 %v13039_v43  ;;  %v7723_v36 = vld [vmem:[#allocation11 + $0x70] sm:$0xff]  ;;  %v7724_v47 = vld [vmem:[#allocation11 + $0x78] sm:$0xff]  ;;  %v12568_v43 = vcombine.low %v7711_v12, %v7715_v15 }
 0x591   :  { %v12577_v44 = vcombine.high %v7719_v42, %v7723_v36  ;;  %v12579_v32 = vcombine.high %v7720_v38, %v7724_v47  ;;  %v12576_v13 = vcombine.low %v7719_v42, %v7723_v36  ;;  %v12578_v55 = vcombine.low %v7720_v38, %v7724_v47  ;;  %v7759_v15 = vld [vmem:[#allocation11 + $0x190] sm:$0xff]  ;;  %v7768_v38 = vld [vmem:[#allocation11 + $0x1d8] sm:$0xff] }
 0x592   :  { %v7767_v42 = vld [vmem:[#allocation11 + $0x1d0] sm:$0xff]  ;;  %v7772_v47 = vld [vmem:[#allocation11 + $0x1f8] sm:$0xff] }
 0x593   :  { %10969 = vmatpush1.bf16.msra.mxu0 %v13036_v9  ;;  %11133 = vmatpush1.bf16.msra.mxu1 %v13038_v52  ;;  %v7727_v9 = vld [vmem:[#allocation11 + $0x90] sm:$0xff] }
 0x594   :  { %10970 = vmatprep.subr.bf16.mxu0 %v13045_v46  ;;  %11134 = vmatprep.subr.bf16.mxu1 %v13047_v4  ;;  %v7731_v52 = vld [vmem:[#allocation11 + $0xb0] sm:$0xff]  ;;  %v7728_v46 = vld [vmem:[#allocation11 + $0x98] sm:$0xff] }
 0x595   :  { %v7732_v4 = vld [vmem:[#allocation11 + $0xb8] sm:$0xff]  ;;  %v12585_v45 = vcombine.high %v7727_v9, %v7731_v52  ;;  %v12584_v3 = vcombine.low %v7727_v9, %v7731_v52  ;;  %v7771_v36 = vld [vmem:[#allocation11 + $0x1f0] sm:$0xff] }
 0x596   :  { %v12587_v61 = vcombine.high %v7728_v46, %v7732_v4  ;;  %v12586_v5 = vcombine.low %v7728_v46, %v7732_v4  ;;  %v7775_v9 = vld [vmem:[#allocation11 + $0x210] sm:$0xff]  ;;  %v7776_v46 = vld [vmem:[#allocation11 + $0x218] sm:$0xff] }
 0x597   :  { %10971 = vmatpush1.bf16.msra.mxu0 %v13044_v8  ;;  %11135 = vmatpush1.bf16.msra.mxu1 %v13046_v63  ;;  %v7735_v8 = vld [vmem:[#allocation11 + $0xd0] sm:$0xff]  ;;  %v7780_v4 = vld [vmem:[#allocation11 + $0x238] sm:$0xff] }
 0x598   :  { %10972 = vmatprep.subr.bf16.mxu0 %v13053_v2  ;;  %11136 = vmatprep.subr.bf16.mxu1 %v13055_v39  ;;  %v7739_v63 = vld [vmem:[#allocation11 + $0xf0] sm:$0xff]  ;;  %v7736_v2 = vld [vmem:[#allocation11 + $0xd8] sm:$0xff] }
 0x599   :  { %v7740_v39 = vld [vmem:[#allocation11 + $0xf8] sm:$0xff]  ;;  %v12593_v48 = vcombine.high %v7735_v8, %v7739_v63  ;;  %v7779_v52 = vld [vmem:[#allocation11 + $0x230] sm:$0xff] }
 0x59a   :  { %v12595_v6 = vcombine.high %v7736_v2, %v7740_v39 }
 0x59b   :  { %10973 = vmatpush1.bf16.msra.mxu0 %v13052_v10  ;;  %11137 = vmatpush1.bf16.msra.mxu1 %v13054_v11  ;;  %v7743_v10 = vld [vmem:[#allocation11 + $0x110] sm:$0xff] }
 0x59c   :  { %10974 = vmatprep.subr.bf16.mxu0 %v13061_v16  ;;  %11138 = vmatprep.subr.bf16.mxu1 %v13063_v60  ;;  %v7747_v11 = vld [vmem:[#allocation11 + $0x130] sm:$0xff]  ;;  %v12592_v16 = vcombine.low %v7735_v8, %v7739_v63  ;;  %v12594_v60 = vcombine.low %v7736_v2, %v7740_v39  ;;  %v7784_v2 = vld [vmem:[#allocation11 + $0x258] sm:$0xff] }
 0x59d   :  { %v12601_v19 = vcombine.high %v7743_v10, %v7747_v11  ;;  %v12600_v26 = vcombine.low %v7743_v10, %v7747_v11  ;;  %v7783_v8 = vld [vmem:[#allocation11 + $0x250] sm:$0xff]  ;;  %v7788_v39 = vld [vmem:[#allocation11 + $0x278] sm:$0xff] }
 0x59e   :  { %v7787_v63 = vld [vmem:[#allocation11 + $0x270] sm:$0xff] }
 0x59f   :  { %10975 = vmatpush1.bf16.msra.mxu0 %v13060_v24  ;;  %11139 = vmatpush1.bf16.msra.mxu1 %v13062_v23  ;;  %v7752_v24 = vld [vmem:[#allocation11 + $0x158] sm:$0xff]  ;;  %v7791_v10 = vld [vmem:[#allocation11 + $0x290] sm:$0xff] }
 0x5a0   :  { %10976 = vmatprep.subr.bf16.mxu0 %v13069_v18  ;;  %11140 = vmatprep.subr.bf16.mxu1 %v13071_v27  ;;  %v7756_v23 = vld [vmem:[#allocation11 + $0x178] sm:$0xff]  ;;  %v12609_v27 = vcombine.high %v7751_v21, %v7755_v57  ;;  %v7795_v11 = vld [vmem:[#allocation11 + $0x2b0] sm:$0xff] }
 0x5a1   :  { %v12611_v12 = vcombine.high %v7752_v24, %v7756_v23  ;;  %v12610_v53 = vcombine.low %v7752_v24, %v7756_v23  ;;  %v7800_v24 = vld [vmem:[#allocation11 + $0x2d8] sm:$0xff] }
 0x5a2   :  { %v7804_v23 = vld [vmem:[#allocation11 + $0x2f8] sm:$0xff] }
 0x5a3   :  { %10977 = vmatpush1.bf16.msra.mxu0 %v13068_v34  ;;  %11141 = vmatpush1.bf16.msra.mxu1 %v13070_v35  ;;  %v7764_v34 = vld [vmem:[#allocation11 + $0x1b8] sm:$0xff]  ;;  %v12608_v35 = vcombine.low %v7751_v21, %v7755_v57  ;;  %v7799_v21 = vld [vmem:[#allocation11 + $0x2d0] sm:$0xff] }
 0x5a4   :  { %11151 = vmatprep.subr.bf16.mxu0 %v12569_v22  ;;  %11315 = vmatprep.subr.bf16.mxu1 %v12571_v41  ;;  %v12617_v22 = vcombine.high %v7759_v15, %v7763_v51  ;;  %v12619_v41 = vcombine.high %v7760_v33, %v7764_v34  ;;  %v7803_v57 = vld [vmem:[#allocation11 + $0x2f0] sm:$0xff] }
 0x5a6   :  { %10979 = vmatmul.mubr.bf16.vlgmr.msra.gmra.mrb[16].mxu0 %v13761_v40  ;;  %11143 = vmatmul.mubr.bf16.vlgmr.msra.gmra.mrb[16].mxu1 %v13761_v40 }
 0x5a7   :  { %11152 = vmatpush1.bf16.msra.mxu0 %v12568_v43  ;;  %11183 = vmatprep.mubr.bf16.mxu0 %v13695_v31  ;;  %v12616_v43 = vcombine.low %v7759_v15, %v7763_v51  ;;  %v7807_v15 = vld [vmem:[#allocation11 + $0x310] sm:$0xff] }
 0x5a8   :  { %11316 = vmatpush1.bf16.msra.mxu1 %v12570_v1  ;;  %11347 = vmatprep.mubr.bf16.mxu1 %v13695_v31  ;;  %v7744_v31 = vld [vmem:[#allocation11 + $0x118] sm:$0xff]  ;;  %v12618_v1 = vcombine.low %v7760_v33, %v7764_v34  ;;  %v7811_v51 = vld [vmem:[#allocation11 + $0x330] sm:$0xff] }
 0x5a9   :  { %11153 = vmatprep.subr.bf16.mxu0 %v12577_v44  ;;  %11317 = vmatprep.subr.bf16.mxu1 %v12579_v32  ;;  %v12603_v20 = vcombine.high %v7744_v31, %v7748_v14  ;;  %v12602_v18 = vcombine.low %v7744_v31, %v7748_v14  ;;  %v12625_v44 = vcombine.high %v7767_v42, %v7771_v36  ;;  %v7792_v31 = vld [vmem:[#allocation11 + $0x298] sm:$0xff] }
 0x5aa   :  { %v12627_v32 = vcombine.high %v7768_v38, %v7772_v47  ;;  %v7796_v14 = vld [vmem:[#allocation11 + $0x2b8] sm:$0xff] }
 0x5ab   :  { %11154 = vmatpush1.bf16.msra.mxu0 %v12576_v13  ;;  %v12624_v13 = vcombine.low %v7767_v42, %v7771_v36  ;;  %v7808_v33 = vld [vmem:[#allocation11 + $0x318] sm:$0xff]  ;;  %v7815_v42 = vld [vmem:[#allocation11 + $0x350] sm:$0xff] }
 0x5ac   :  { %11318 = vmatpush1.bf16.msra.mxu1 %v12578_v55  ;;  %11155 = vmatprep.subr.bf16.mxu0 %v12585_v45  ;;  %v12626_v55 = vcombine.low %v7768_v38, %v7772_v47  ;;  %v12633_v45 = vcombine.high %v7775_v9, %v7779_v52  ;;  %v7812_v34 = vld [vmem:[#allocation11 + $0x338] sm:$0xff]  ;;  %v7819_v36 = vld [vmem:[#allocation11 + $0x370] sm:$0xff] }
 0x5ad   :  { %11319 = vmatprep.subr.bf16.mxu1 %v12587_v61  ;;  %v12635_v61 = vcombine.high %v7776_v46, %v7780_v4  ;;  %v7816_v38 = vld [vmem:[#allocation11 + $0x358] sm:$0xff] }
 0x5ae   :  { %v7820_v47 = vld [vmem:[#allocation11 + $0x378] sm:$0xff] }
 0x5af   :  { %11156 = vmatpush1.bf16.msra.mxu0 %v12584_v3  ;;  %v12632_v3 = vcombine.low %v7775_v9, %v7779_v52  ;;  %v7823_v9 = vld [vmem:[#allocation11 + $0x390] sm:$0xff] }
 0x5b0   :  { %11320 = vmatpush1.bf16.msra.mxu1 %v12586_v5  ;;  %11157 = vmatprep.subr.bf16.mxu0 %v12593_v48  ;;  %v12634_v5 = vcombine.low %v7776_v46, %v7780_v4  ;;  %v12641_v48 = vcombine.high %v7783_v8, %v7787_v63  ;;  %v7827_v52 = vld [vmem:[#allocation11 + $0x3b0] sm:$0xff]  ;;  %v7824_v46 = vld [vmem:[#allocation11 + $0x398] sm:$0xff] }
 0x5b1   :  { %11321 = vmatprep.subr.bf16.mxu1 %v12595_v6  ;;  %v12643_v6 = vcombine.high %v7784_v2, %v7788_v39  ;;  %v7828_v4 = vld [vmem:[#allocation11 + $0x3b8] sm:$0xff] }
 0x5b3   :  { %11158 = vmatpush1.bf16.msra.mxu0 %v12592_v16  ;;  %v12640_v16 = vcombine.low %v7783_v8, %v7787_v63  ;;  %v7831_v8 = vld [vmem:[#allocation11 + $0x3d0] sm:$0xff] }
 0x5b4   :  { %11322 = vmatpush1.bf16.msra.mxu1 %v12594_v60  ;;  %11159 = vmatprep.subr.bf16.mxu0 %v12601_v19  ;;  %v12642_v60 = vcombine.low %v7784_v2, %v7788_v39  ;;  %v12649_v19 = vcombine.high %v7791_v10, %v7795_v11  ;;  %v7835_v63 = vld [vmem:[#allocation11 + $0x3f0] sm:$0xff]  ;;  %v7832_v2 = vld [vmem:[#allocation11 + $0x3d8] sm:$0xff] }
 0x5b5   :  { %11323 = vmatprep.subr.bf16.mxu1 %v12603_v20  ;;  %v12651_v20 = vcombine.high %v7792_v31, %v7796_v14  ;;  %v7836_v39 = vld [vmem:[#allocation11 + $0x3f8] sm:$0xff] }
 0x5b7   :  { %11160 = vmatpush1.bf16.msra.mxu0 %v12600_v26  ;;  %v12648_v26 = vcombine.low %v7791_v10, %v7795_v11  ;;  %v7839_v10 = vld [vmem:[#allocation11 + $0x410] sm:$0xff] }
 0x5b8   :  { %11324 = vmatpush1.bf16.msra.mxu1 %v12602_v18  ;;  %11161 = vmatprep.subr.bf16.mxu0 %v12609_v27  ;;  %v12650_v18 = vcombine.low %v7792_v31, %v7796_v14  ;;  %v12657_v27 = vcombine.high %v7799_v21, %v7803_v57  ;;  %v7843_v11 = vld [vmem:[#allocation11 + $0x430] sm:$0xff]  ;;  %v7840_v31 = vld [vmem:[#allocation11 + $0x418] sm:$0xff] }
 0x5b9   :  { %11325 = vmatprep.subr.bf16.mxu1 %v12611_v12  ;;  %v12659_v12 = vcombine.high %v7800_v24, %v7804_v23  ;;  %v7844_v14 = vld [vmem:[#allocation11 + $0x438] sm:$0xff] }
 0x5bb   :  { %11162 = vmatpush1.bf16.msra.mxu0 %v12608_v35  ;;  %v12656_v35 = vcombine.low %v7799_v21, %v7803_v57  ;;  %v7847_v21 = vld [vmem:[#allocation11 + $0x450] sm:$0xff] }
 0x5bc   :  { %11326 = vmatpush1.bf16.msra.mxu1 %v12610_v53  ;;  %11163 = vmatprep.subr.bf16.mxu0 %v12617_v22  ;;  %v12658_v53 = vcombine.low %v7800_v24, %v7804_v23  ;;  %v12665_v22 = vcombine.high %v7807_v15, %v7811_v51  ;;  %v7851_v57 = vld [vmem:[#allocation11 + $0x470] sm:$0xff]  ;;  %v12696_v24 = vcombine.low %v7839_v10, %v7843_v11  ;;  %v7848_v23 = vld [vmem:[#allocation11 + $0x458] sm:$0xff] }
 0x5bd   :  { %11327 = vmatprep.subr.bf16.mxu1 %v12619_v41  ;;  %v12667_v41 = vcombine.high %v7808_v33, %v7812_v34 }
 0x5bf   :  { %11164 = vmatpush1.bf16.msra.mxu0 %v12616_v43  ;;  %v12664_v43 = vcombine.low %v7807_v15, %v7811_v51  ;;  %v7859_v15 = vld [vmem:[#allocation11 + $0x4b0] sm:$0xff] }
 0x5c0   :  { %11328 = vmatpush1.bf16.msra.mxu1 %v12618_v1  ;;  %11165 = vmatprep.subr.bf16.mxu0 %v12625_v44  ;;  %v12666_v1 = vcombine.low %v7808_v33, %v7812_v34  ;;  %v12673_v44 = vcombine.high %v7815_v42, %v7819_v36  ;;  %v7856_v33 = vld [vmem:[#allocation11 + $0x498] sm:$0xff] }
 0x5c1   :  { %11329 = vmatprep.subr.bf16.mxu1 %v12627_v32  ;;  %v12675_v32 = vcombine.high %v7816_v38, %v7820_v47  ;;  %v7860_v34 = vld [vmem:[#allocation11 + $0x4b8] sm:$0xff] }
 0x5c3   :  { %11166 = vmatpush1.bf16.msra.mxu0 %v12624_v13  ;;  %v12672_v13 = vcombine.low %v7815_v42, %v7819_v36  ;;  %v7863_v42 = vld [vmem:[#allocation11 + $0x4d0] sm:$0xff] }
 0x5c4   :  { %11330 = vmatpush1.bf16.msra.mxu1 %v12626_v55  ;;  %11167 = vmatprep.subr.bf16.mxu0 %v12633_v45  ;;  %v12674_v55 = vcombine.low %v7816_v38, %v7820_v47  ;;  %v12681_v45 = vcombine.high %v7823_v9, %v7827_v52  ;;  %v7867_v36 = vld [vmem:[#allocation11 + $0x4f0] sm:$0xff]  ;;  %v7864_v38 = vld [vmem:[#allocation11 + $0x4d8] sm:$0xff] }
 0x5c5   :  { %11331 = vmatprep.subr.bf16.mxu1 %v12635_v61  ;;  %v12683_v61 = vcombine.high %v7824_v46, %v7828_v4  ;;  %v7868_v47 = vld [vmem:[#allocation11 + $0x4f8] sm:$0xff] }
 0x5c7   :  { %11168 = vmatpush1.bf16.msra.mxu0 %v12632_v3  ;;  %v12680_v3 = vcombine.low %v7823_v9, %v7827_v52  ;;  %v7875_v9 = vld [vmem:[#allocation11 + $0x530] sm:$0xff]  ;;  %v7872_v52 = vld [vmem:[#allocation11 + $0x518] sm:$0xff] }
 0x5c8   :  { %11332 = vmatpush1.bf16.msra.mxu1 %v12634_v5  ;;  %11169 = vmatprep.subr.bf16.mxu0 %v12641_v48  ;;  %v12682_v5 = vcombine.low %v7824_v46, %v7828_v4  ;;  %v12689_v48 = vcombine.high %v7831_v8, %v7835_v63  ;;  %v7876_v46 = vld [vmem:[#allocation11 + $0x538] sm:$0xff]  ;;  %v12722_v4 = vcombine.low %v7864_v38, %v7868_v47 }
 0x5c9   :  { %11333 = vmatprep.subr.bf16.mxu1 %v12643_v6  ;;  %v12691_v6 = vcombine.high %v7832_v2, %v7836_v39 }
 0x5cb   :  { %11170 = vmatpush1.bf16.msra.mxu0 %v12640_v16  ;;  %v12688_v16 = vcombine.low %v7831_v8, %v7835_v63  ;;  %v7880_v8 = vld [vmem:[#allocation11 + $0x558] sm:$0xff] }
 0x5cc   :  { %11334 = vmatpush1.bf16.msra.mxu1 %v12642_v60  ;;  %11171 = vmatprep.subr.bf16.mxu0 %v12649_v19  ;;  %v12690_v60 = vcombine.low %v7832_v2, %v7836_v39  ;;  %v12697_v19 = vcombine.high %v7839_v10, %v7843_v11  ;;  %v7884_v63 = vld [vmem:[#allocation11 + $0x578] sm:$0xff]  ;;  %v12730_v39 = vcombine.low %v7872_v52, %v7876_v46 }
 0x5cd   :  { %11335 = vmatprep.subr.bf16.mxu1 %v12651_v20  ;;  %v12699_v20 = vcombine.high %v7840_v31, %v7844_v14  ;;  %v7888_v10 = vld [vmem:[#allocation11 + $0x598] sm:$0xff] }
 0x5ce   :  { %v7892_v11 = vld [vmem:[#allocation11 + $0x5b8] sm:$0xff] }
 0x5cf   :  { %11172 = vmatpush1.bf16.msra.mxu0 %v12648_v26  ;;  %v7852_v26 = vld [vmem:[#allocation11 + $0x478] sm:$0xff] }
 0x5d0   :  { %11336 = vmatpush1.bf16.msra.mxu1 %v12650_v18  ;;  %11173 = vmatprep.subr.bf16.mxu0 %v12657_v27  ;;  %v12698_v18 = vcombine.low %v7840_v31, %v7844_v14  ;;  %v12705_v27 = vcombine.high %v7847_v21, %v7851_v57  ;;  %v12707_v51 = vcombine.high %v7848_v23, %v7852_v26 }
 0x5d1   :  { %11337 = vmatprep.subr.bf16.mxu1 %v12659_v12  ;;  %v7855_v12 = vld [vmem:[#allocation11 + $0x490] sm:$0xff]  ;;  %v12738_v14 = vcombine.low %v7880_v8, %v7884_v63 }
 0x5d3   :  { %11174 = vmatpush1.bf16.msra.mxu0 %v12656_v35  ;;  %v12704_v35 = vcombine.low %v7847_v21, %v7851_v57  ;;  %v7896_v21 = vld [vmem:[#allocation11 + $0x5d8] sm:$0xff] }
 0x5d4   :  { %11338 = vmatpush1.bf16.msra.mxu1 %v12658_v53  ;;  %11175 = vmatprep.subr.bf16.mxu0 %v12665_v22  ;;  %v12706_v53 = vcombine.low %v7848_v23, %v7852_v26  ;;  %v12713_v22 = vcombine.high %v7855_v12, %v7859_v15  ;;  %v7900_v57 = vld [vmem:[#allocation11 + $0x5f8] sm:$0xff]  ;;  %v12746_v23 = vcombine.low %v7888_v10, %v7892_v11 }
 0x5d5   :  { %11339 = vmatprep.subr.bf16.mxu1 %v12667_v41  ;;  %v12715_v41 = vcombine.high %v7856_v33, %v7860_v34 }
 0x5d7   :  { %11176 = vmatpush1.bf16.msra.mxu0 %v12664_v43  ;;  %v12712_v43 = vcombine.low %v7855_v12, %v7859_v15  ;;  %v7907_v12 = vld [vmem:[#allocation11 + $0x630] sm:$0xff]  ;;  %v7904_v15 = vld [vmem:[#allocation11 + $0x618] sm:$0xff] }
 0x5d8   :  { %11340 = vmatpush1.bf16.msra.mxu1 %v12666_v1  ;;  %11177 = vmatprep.subr.bf16.mxu0 %v12673_v44  ;;  %v12721_v1 = vcombine.high %v7863_v42, %v7867_v36  ;;  %v12723_v44 = vcombine.high %v7864_v38, %v7868_v47 }
 0x5d9   :  { %11341 = vmatprep.subr.bf16.mxu1 %v12675_v32  ;;  %v7871_v32 = vld [vmem:[#allocation11 + $0x510] sm:$0xff] }
 0x5da   :  { %v12728_v2 = vcombine.low %v7871_v32, %v7875_v9 }
 0x5db   :  { %11178 = vmatpush1.bf16.msra.mxu0 %v12672_v13  ;;  %v12729_v13 = vcombine.high %v7871_v32, %v7875_v9  ;;  %v7920_v32 = vld [vmem:[#allocation11 + $0x698] sm:$0xff] }
 0x5dc   :  { %11342 = vmatpush1.bf16.msra.mxu1 %v12674_v55  ;;  %11179 = vmatprep.subr.bf16.mxu0 %v12681_v45  ;;  %v12731_v55 = vcombine.high %v7872_v52, %v7876_v46  ;;  %v7879_v45 = vld [vmem:[#allocation11 + $0x550] sm:$0xff]  ;;  %v7924_v9 = vld [vmem:[#allocation11 + $0x6b8] sm:$0xff] }
 0x5dd   :  { %11343 = vmatprep.subr.bf16.mxu1 %v12683_v61  ;;  %v7883_v61 = vld [vmem:[#allocation11 + $0x570] sm:$0xff] }
 0x5de   :  { %v12736_v31 = vcombine.low %v7879_v45, %v7883_v61 }
 0x5df   :  { %11180 = vmatpush1.bf16.msra.mxu0 %v12680_v3  ;;  %v12737_v3 = vcombine.high %v7879_v45, %v7883_v61  ;;  %v7928_v45 = vld [vmem:[#allocation11 + $0x6d8] sm:$0xff] }
 0x5e0   :  { %11344 = vmatpush1.bf16.msra.mxu1 %v12682_v5  ;;  %11181 = vmatprep.subr.bf16.mxu0 %v12689_v48  ;;  %v12739_v5 = vcombine.high %v7880_v8, %v7884_v63  ;;  %v7887_v48 = vld [vmem:[#allocation11 + $0x590] sm:$0xff]  ;;  %v7932_v61 = vld [vmem:[#allocation11 + $0x6f8] sm:$0xff]  ;;  %v12778_v63 = vcombine.low %v7920_v32, %v7924_v9 }
 0x5e1   :  { %11345 = vmatprep.subr.bf16.mxu1 %v12691_v6  ;;  %v7891_v6 = vld [vmem:[#allocation11 + $0x5b0] sm:$0xff] }
 0x5e3   :  { %11182 = vmatpush1.bf16.msra.mxu0 %v12688_v16  ;;  %v12745_v16 = vcombine.high %v7887_v48, %v7891_v6 }
 0x5e4   :  { %11346 = vmatpush1.bf16.msra.mxu1 %v12690_v60  ;;  %11192 = vmatprep.subr.bf16.mxu0 %v12697_v19  ;;  %v12747_v60 = vcombine.high %v7888_v10, %v7892_v11  ;;  %v7895_v19 = vld [vmem:[#allocation11 + $0x5d0] sm:$0xff]  ;;  %v12786_v11 = vcombine.low %v7928_v45, %v7932_v61 }
 0x5e5   :  { %11356 = vmatprep.subr.bf16.mxu1 %v12699_v20  ;;  %v7899_v20 = vld [vmem:[#allocation11 + $0x5f0] sm:$0xff] }
 0x5e6   :  { %11184 = vmatmul.mubr.bf16.vlgmr.msra.gmra.mrb[20].mxu0 %v13711_v49  ;;  %v12753_v26 = vcombine.high %v7895_v19, %v7899_v20 }
 0x5e7   :  { %11348 = vmatmul.mubr.bf16.vlgmr.msra.gmra.mrb[20].mxu1 %v13711_v49  ;;  %11193 = vmatpush1.bf16.msra.mxu0 %v12696_v24  ;;  %v12714_v49 = vcombine.low %v7856_v33, %v7860_v34  ;;  %v12744_v24 = vcombine.low %v7887_v48, %v7891_v6  ;;  %v12752_v33 = vcombine.low %v7895_v19, %v7899_v20  ;;  %v7936_v48 = vld [vmem:[#allocation11 + $0x718] sm:$0xff] }
 0x5e8   :  { %11224 = vmatprep.mubr.bf16.mxu0 %v13713_v56  ;;  %11357 = vmatpush1.bf16.msra.mxu1 %v12698_v18  ;;  %v12755_v18 = vcombine.high %v7896_v21, %v7900_v57  ;;  %v12754_v34 = vcombine.low %v7896_v21, %v7900_v57  ;;  %v7940_v6 = vld [vmem:[#allocation11 + $0x738] sm:$0xff] }
 0x5e9   :  { %11388 = vmatprep.mubr.bf16.mxu1 %v13713_v56  ;;  %11194 = vmatprep.subr.bf16.mxu0 %v12705_v27  ;;  %v12720_v56 = vcombine.low %v7863_v42, %v7867_v36  ;;  %v7903_v27 = vld [vmem:[#allocation11 + $0x610] sm:$0xff]  ;;  %v7912_v42 = vld [vmem:[#allocation11 + $0x658] sm:$0xff]  ;;  %v12794_v57 = vcombine.low %v7936_v48, %v7940_v6 }
 0x5ea   :  { %11358 = vmatprep.subr.bf16.mxu1 %v12707_v51  ;;  %v7908_v51 = vld [vmem:[#allocation11 + $0x638] sm:$0xff]  ;;  %v12760_v38 = vcombine.low %v7903_v27, %v7907_v12 }
 0x5eb   :  { %11195 = vmatpush1.bf16.msra.mxu0 %v12704_v35  ;;  %v12761_v35 = vcombine.high %v7903_v27, %v7907_v12  ;;  %v7916_v36 = vld [vmem:[#allocation11 + $0x678] sm:$0xff]  ;;  %v12762_v47 = vcombine.low %v7904_v15, %v7908_v51 }
 0x5ec   :  { %11359 = vmatpush1.bf16.msra.mxu1 %v12706_v53  ;;  %11196 = vmatprep.subr.bf16.mxu0 %v12713_v22  ;;  %v12763_v53 = vcombine.high %v7904_v15, %v7908_v51  ;;  %v7911_v22 = vld [vmem:[#allocation11 + $0x650] sm:$0xff]  ;;  %v12770_v46 = vcombine.low %v7912_v42, %v7916_v36  ;;  %v7944_v19 = vld [vmem:[#allocation11 + $0x758] sm:$0xff] }
 0x5ed   :  { %11360 = vmatprep.subr.bf16.mxu1 %v12715_v41  ;;  %v7915_v41 = vld [vmem:[#allocation11 + $0x670] sm:$0xff]  ;;  %v7948_v20 = vld [vmem:[#allocation11 + $0x778] sm:$0xff] }
 0x5ee   :  { %v12768_v52 = vcombine.low %v7911_v22, %v7915_v41  ;;  %v7952_v27 = vld [vmem:[#allocation11 + $0x798] sm:$0xff]  ;;  %v12802_v51 = vcombine.low %v7944_v19, %v7948_v20 }
 0x5ef   :  { %11197 = vmatpush1.bf16.msra.mxu0 %v12712_v43  ;;  %v12769_v43 = vcombine.high %v7911_v22, %v7915_v41  ;;  %v7956_v12 = vld [vmem:[#allocation11 + $0x7b8] sm:$0xff] }
 0x5f0   :  { %11361 = vmatpush1.bf16.msra.mxu1 %v12714_v49  ;;  %11198 = vmatprep.subr.bf16.mxu0 %v12721_v1  ;;  %v12771_v49 = vcombine.high %v7912_v42, %v7916_v36  ;;  %v7919_v1 = vld [vmem:[#allocation11 + $0x690] sm:$0xff]  ;;  %v7960_v22 = vld [vmem:[#allocation11 + $0x7d8] sm:$0xff]  ;;  %v12810_v36 = vcombine.low %v7952_v27, %v7956_v12 }
 0x5f1   :  { %11362 = vmatprep.subr.bf16.mxu1 %v12723_v44  ;;  %v7923_v44 = vld [vmem:[#allocation11 + $0x6b0] sm:$0xff]  ;;  %v7964_v41 = vld [vmem:[#allocation11 + $0x7f8] sm:$0xff] }
 0x5f2   :  { %v12776_v8 = vcombine.low %v7919_v1, %v7923_v44 }
 0x5f3   :  { %11199 = vmatpush1.bf16.msra.mxu0 %v12720_v56  ;;  %v12777_v56 = vcombine.high %v7919_v1, %v7923_v44  ;;  %v7968_v1 = vld [vmem:[#allocation11 + $0x818] sm:$0xff] }
 0x5f4   :  { %11363 = vmatpush1.bf16.msra.mxu1 %v12722_v4  ;;  %11200 = vmatprep.subr.bf16.mxu0 %v12729_v13  ;;  %v12779_v4 = vcombine.high %v7920_v32, %v7924_v9  ;;  %v7927_v13 = vld [vmem:[#allocation11 + $0x6d0] sm:$0xff]  ;;  %v7972_v44 = vld [vmem:[#allocation11 + $0x838] sm:$0xff]  ;;  %v12818_v9 = vcombine.low %v7960_v22, %v7964_v41 }
 0x5f5   :  { %11364 = vmatprep.subr.bf16.mxu1 %v12731_v55  ;;  %v7931_v55 = vld [vmem:[#allocation11 + $0x6f0] sm:$0xff] }
 0x5f6   :  { %v12784_v10 = vcombine.low %v7927_v13, %v7931_v55 }
 0x5f7   :  { %11201 = vmatpush1.bf16.msra.mxu0 %v12728_v2  ;;  %v12785_v2 = vcombine.high %v7927_v13, %v7931_v55  ;;  %v7976_v55 = vld [vmem:[#allocation11 + $0x858] sm:$0xff] }
 0x5f8   :  { %11365 = vmatpush1.bf16.msra.mxu1 %v12730_v39  ;;  %11202 = vmatprep.subr.bf16.mxu0 %v12737_v3  ;;  %v12787_v39 = vcombine.high %v7928_v45, %v7932_v61  ;;  %v7935_v3 = vld [vmem:[#allocation11 + $0x710] sm:$0xff]  ;;  %v7980_v45 = vld [vmem:[#allocation11 + $0x878] sm:$0xff]  ;;  %v12826_v61 = vcombine.low %v7968_v1, %v7972_v44 }
 0x5f9   :  { %11366 = vmatprep.subr.bf16.mxu1 %v12739_v5  ;;  %v7939_v5 = vld [vmem:[#allocation11 + $0x730] sm:$0xff] }
 0x5fa   :  { %v12792_v21 = vcombine.low %v7935_v3, %v7939_v5 }
 0x5fb   :  { %11203 = vmatpush1.bf16.msra.mxu0 %v12736_v31  ;;  %v12793_v31 = vcombine.high %v7935_v3, %v7939_v5  ;;  %v7984_v3 = vld [vmem:[#allocation11 + $0x898] sm:$0xff] }
 0x5fc   :  { %11367 = vmatpush1.bf16.msra.mxu1 %v12738_v14  ;;  %11204 = vmatprep.subr.bf16.mxu0 %v12745_v16  ;;  %v12795_v14 = vcombine.high %v7936_v48, %v7940_v6  ;;  %v7943_v16 = vld [vmem:[#allocation11 + $0x750] sm:$0xff]  ;;  %v7988_v5 = vld [vmem:[#allocation11 + $0x8b8] sm:$0xff]  ;;  %v12834_v6 = vcombine.low %v7976_v55, %v7980_v45 }
 0x5fd   :  { %11368 = vmatprep.subr.bf16.mxu1 %v12747_v60  ;;  %v7947_v60 = vld [vmem:[#allocation11 + $0x770] sm:$0xff] }
 0x5fe   :  { %v12800_v15 = vcombine.low %v7943_v16, %v7947_v60 }
 0x5ff   :  { %11205 = vmatpush1.bf16.msra.mxu0 %v12744_v24  ;;  %v12801_v24 = vcombine.high %v7943_v16, %v7947_v60  ;;  %v7992_v16 = vld [vmem:[#allocation11 + $0x8d8] sm:$0xff] }
 0x600   :  { %11369 = vmatpush1.bf16.msra.mxu1 %v12746_v23  ;;  %11206 = vmatprep.subr.bf16.mxu0 %v12753_v26  ;;  %v12803_v23 = vcombine.high %v7944_v19, %v7948_v20  ;;  %v7951_v26 = vld [vmem:[#allocation11 + $0x790] sm:$0xff]  ;;  %v7996_v60 = vld [vmem:[#allocation11 + $0x8f8] sm:$0xff] }
 0x601   :  { %11370 = vmatprep.subr.bf16.mxu1 %v12755_v18  ;;  %v7955_v18 = vld [vmem:[#allocation11 + $0x7b0] sm:$0xff] }
 0x602   :  { %v12808_v42 = vcombine.low %v7951_v26, %v7955_v18 }
 0x603   :  { %11207 = vmatpush1.bf16.msra.mxu0 %v12752_v33  ;;  %v12809_v33 = vcombine.high %v7951_v26, %v7955_v18  ;;  %v8004_v26 = vld [vmem:[#allocation11 + $0x938] sm:$0xff]  ;;  %v12850_v18 = vcombine.low %v7992_v16, %v7996_v60 }
 0x604   :  { %11371 = vmatpush1.bf16.msra.mxu1 %v12754_v34  ;;  %11208 = vmatprep.subr.bf16.mxu0 %v12761_v35  ;;  %v12811_v34 = vcombine.high %v7952_v27, %v7956_v12  ;;  %v7959_v35 = vld [vmem:[#allocation11 + $0x7d0] sm:$0xff] }
 0x605   :  { %11372 = vmatprep.subr.bf16.mxu1 %v12763_v53  ;;  %v7963_v53 = vld [vmem:[#allocation11 + $0x7f0] sm:$0xff] }
 0x606   :  { %v12816_v32 = vcombine.low %v7959_v35, %v7963_v53 }
 0x607   :  { %11209 = vmatpush1.bf16.msra.mxu0 %v12760_v38  ;;  %v12817_v38 = vcombine.high %v7959_v35, %v7963_v53 }
 0x608   :  { %11373 = vmatpush1.bf16.msra.mxu1 %v12762_v47  ;;  %11210 = vmatprep.subr.bf16.mxu0 %v12769_v43  ;;  %v12819_v47 = vcombine.high %v7960_v22, %v7964_v41  ;;  %v7967_v43 = vld [vmem:[#allocation11 + $0x810] sm:$0xff] }
 0x609   :  { %11374 = vmatprep.subr.bf16.mxu1 %v12771_v49  ;;  %v7971_v49 = vld [vmem:[#allocation11 + $0x830] sm:$0xff] }
 0x60a   :  { %v12824_v13 = vcombine.low %v7967_v43, %v7971_v49 }
 0x60b   :  { %11211 = vmatpush1.bf16.msra.mxu0 %v12768_v52  ;;  %v12825_v52 = vcombine.high %v7967_v43, %v7971_v49 }
 0x60c   :  { %11375 = vmatpush1.bf16.msra.mxu1 %v12770_v46  ;;  %11212 = vmatprep.subr.bf16.mxu0 %v12777_v56  ;;  %v12827_v46 = vcombine.high %v7968_v1, %v7972_v44  ;;  %v7975_v56 = vld [vmem:[#allocation11 + $0x850] sm:$0xff] }
 0x60d   :  { %11376 = vmatprep.subr.bf16.mxu1 %v12779_v4  ;;  %v7979_v4 = vld [vmem:[#allocation11 + $0x870] sm:$0xff] }
 0x60e   :  { %v12832_v48 = vcombine.low %v7975_v56, %v7979_v4 }
 0x60f   :  { %11213 = vmatpush1.bf16.msra.mxu0 %v12776_v8  ;;  %v12833_v8 = vcombine.high %v7975_v56, %v7979_v4 }
 0x610   :  { %11377 = vmatpush1.bf16.msra.mxu1 %v12778_v63  ;;  %11214 = vmatprep.subr.bf16.mxu0 %v12785_v2  ;;  %v7983_v63 = vld [vmem:[#allocation11 + $0x890] sm:$0xff] }
 0x611   :  { %11378 = vmatprep.subr.bf16.mxu1 %v12787_v39  ;;  %v7987_v2 = vld [vmem:[#allocation11 + $0x8b0] sm:$0xff]  ;;  %v12835_v39 = vcombine.high %v7976_v55, %v7980_v45 }
 0x612   :  { %v12840_v19 = vcombine.low %v7983_v63, %v7987_v2  ;;  %v8031_v45 = vld [vmem:[#allocation11 + $0xa10] sm:$0xff] }
 0x613   :  { %11215 = vmatpush1.bf16.msra.mxu0 %v12784_v10  ;;  %v12841_v10 = vcombine.high %v7983_v63, %v7987_v2  ;;  %v8036_v63 = vld [vmem:[#allocation11 + $0xa38] sm:$0xff] }
 0x614   :  { %11379 = vmatpush1.bf16.msra.mxu1 %v12786_v11  ;;  %11216 = vmatprep.subr.bf16.mxu0 %v12793_v31  ;;  %v12843_v11 = vcombine.high %v7984_v3, %v7988_v5  ;;  %v7991_v31 = vld [vmem:[#allocation11 + $0x8d0] sm:$0xff] }
 0x615   :  { %11380 = vmatprep.subr.bf16.mxu1 %v12795_v14  ;;  %v7995_v14 = vld [vmem:[#allocation11 + $0x8f0] sm:$0xff] }
 0x616   :  { %v12849_v20 = vcombine.high %v7991_v31, %v7995_v14 }
 0x617   :  { %11217 = vmatpush1.bf16.msra.mxu0 %v12792_v21  ;;  %v12851_v21 = vcombine.high %v7992_v16, %v7996_v60 }
 0x618   :  { %11381 = vmatpush1.bf16.msra.mxu1 %v12794_v57  ;;  %11218 = vmatprep.subr.bf16.mxu0 %v12801_v24  ;;  %v7999_v57 = vld [vmem:[#allocation11 + $0x910] sm:$0xff] }
 0x619   :  { %11382 = vmatprep.subr.bf16.mxu1 %v12803_v23  ;;  %v8003_v24 = vld [vmem:[#allocation11 + $0x930] sm:$0xff]  ;;  %v8000_v23 = vld [vmem:[#allocation11 + $0x918] sm:$0xff] }
 0x61a   :  { %v12857_v27 = vcombine.high %v7999_v57, %v8003_v24  ;;  %v12859_v12 = vcombine.high %v8000_v23, %v8004_v26  ;;  %v12856_v35 = vcombine.low %v7999_v57, %v8003_v24  ;;  %v12858_v53 = vcombine.low %v8000_v23, %v8004_v26 }
 0x61b   :  { %11219 = vmatpush1.bf16.msra.mxu0 %v12800_v15  ;;  %v8007_v15 = vld [vmem:[#allocation11 + $0x950] sm:$0xff] }
 0x61c   :  { %11383 = vmatpush1.bf16.msra.mxu1 %v12802_v51  ;;  %11220 = vmatprep.subr.bf16.mxu0 %v12809_v33  ;;  %v8011_v51 = vld [vmem:[#allocation11 + $0x970] sm:$0xff]  ;;  %v8008_v33 = vld [vmem:[#allocation11 + $0x958] sm:$0xff] }
 0x61d   :  { %11384 = vmatprep.subr.bf16.mxu1 %v12811_v34  ;;  %v8012_v34 = vld [vmem:[#allocation11 + $0x978] sm:$0xff]  ;;  %v12865_v22 = vcombine.high %v8007_v15, %v8011_v51  ;;  %v12864_v43 = vcombine.low %v8007_v15, %v8011_v51 }
 0x61e   :  { %v12867_v41 = vcombine.high %v8008_v33, %v8012_v34  ;;  %v12866_v49 = vcombine.low %v8008_v33, %v8012_v34 }
 0x61f   :  { %11221 = vmatpush1.bf16.msra.mxu0 %v12808_v42  ;;  %v8015_v42 = vld [vmem:[#allocation11 + $0x990] sm:$0xff] }
 0x620   :  { %11385 = vmatpush1.bf16.msra.mxu1 %v12810_v36  ;;  %11222 = vmatprep.subr.bf16.mxu0 %v12817_v38  ;;  %v8019_v36 = vld [vmem:[#allocation11 + $0x9b0] sm:$0xff]  ;;  %v8016_v38 = vld [vmem:[#allocation11 + $0x998] sm:$0xff] }
 0x621   :  { %11386 = vmatprep.subr.bf16.mxu1 %v12819_v47  ;;  %v8020_v47 = vld [vmem:[#allocation11 + $0x9b8] sm:$0xff]  ;;  %v12873_v1 = vcombine.high %v8015_v42, %v8019_v36  ;;  %v12872_v56 = vcombine.low %v8015_v42, %v8019_v36 }
 0x622   :  { %v12875_v44 = vcombine.high %v8016_v38, %v8020_v47  ;;  %v12874_v4 = vcombine.low %v8016_v38, %v8020_v47 }
 0x623   :  { %11223 = vmatpush1.bf16.msra.mxu0 %v12816_v32  ;;  %v8023_v32 = vld [vmem:[#allocation11 + $0x9d0] sm:$0xff] }
 0x624   :  { %11387 = vmatpush1.bf16.msra.mxu1 %v12818_v9  ;;  %11233 = vmatprep.subr.bf16.mxu0 %v12825_v52  ;;  %v8027_v9 = vld [vmem:[#allocation11 + $0x9f0] sm:$0xff]  ;;  %v8024_v52 = vld [vmem:[#allocation11 + $0x9d8] sm:$0xff] }
 0x625   :  { %11397 = vmatprep.subr.bf16.mxu1 %v12827_v46  ;;  %v8028_v46 = vld [vmem:[#allocation11 + $0x9f8] sm:$0xff]  ;;  %v12880_v2 = vcombine.low %v8023_v32, %v8027_v9 }
 0x626   :  { %11225 = vmatmul.mubr.bf16.vlgmr.msra.gmra.mrb[20].mxu0 %v13724_v54  ;;  %v12883_v55 = vcombine.high %v8024_v52, %v8028_v46 }
 0x627   :  { %11389 = vmatmul.mubr.bf16.vlgmr.msra.gmra.mrb[20].mxu1 %v13724_v54  ;;  %11234 = vmatpush1.bf16.msra.mxu0 %v12824_v13  ;;  %v12842_v54 = vcombine.low %v7984_v3, %v7988_v5  ;;  %v12881_v13 = vcombine.high %v8023_v32, %v8027_v9 }
 0x628   :  { %11265 = vmatprep.mubr.bf16.mxu0 %v13744_v59  ;;  %11398 = vmatpush1.bf16.msra.mxu1 %v12826_v61  ;;  %v8035_v61 = vld [vmem:[#allocation11 + $0xa30] sm:$0xff] }
 0x629   :  { %11429 = vmatprep.mubr.bf16.mxu1 %v13744_v59  ;;  %11235 = vmatprep.subr.bf16.mxu0 %v12833_v8  ;;  %v12848_v59 = vcombine.low %v7991_v31, %v7995_v14  ;;  %v8032_v8 = vld [vmem:[#allocation11 + $0xa18] sm:$0xff]  ;;  %v12889_v3 = vcombine.high %v8031_v45, %v8035_v61  ;;  %v12888_v31 = vcombine.low %v8031_v45, %v8035_v61 }
 0x62a   :  { %11399 = vmatprep.subr.bf16.mxu1 %v12835_v39  ;;  %v12882_v39 = vcombine.low %v8024_v52, %v8028_v46  ;;  %v12891_v5 = vcombine.high %v8032_v8, %v8036_v63  ;;  %v12890_v14 = vcombine.low %v8032_v8, %v8036_v63 }
 0x62b   :  { %11236 = vmatpush1.bf16.msra.mxu0 %v12832_v48  ;;  %v8039_v48 = vld [vmem:[#allocation11 + $0xa50] sm:$0xff] }
 0x62c   :  { %11400 = vmatpush1.bf16.msra.mxu1 %v12834_v6  ;;  %11237 = vmatprep.subr.bf16.mxu0 %v12841_v10  ;;  %v8043_v6 = vld [vmem:[#allocation11 + $0xa70] sm:$0xff]  ;;  %v8040_v10 = vld [vmem:[#allocation11 + $0xa58] sm:$0xff] }
 0x62d   :  { %11401 = vmatprep.subr.bf16.mxu1 %v12843_v11  ;;  %v8044_v11 = vld [vmem:[#allocation11 + $0xa78] sm:$0xff]  ;;  %v12897_v16 = vcombine.high %v8039_v48, %v8043_v6  ;;  %v12896_v57 = vcombine.low %v8039_v48, %v8043_v6 }
 0x62e   :  { %v12899_v60 = vcombine.high %v8040_v10, %v8044_v11  ;;  %v12898_v24 = vcombine.low %v8040_v10, %v8044_v11 }
 0x62f   :  { %11238 = vmatpush1.bf16.msra.mxu0 %v12840_v19  ;;  %v8047_v19 = vld [vmem:[#allocation11 + $0xa90] sm:$0xff] }
 0x630   :  { %11402 = vmatpush1.bf16.msra.mxu1 %v12842_v54  ;;  %11239 = vmatprep.subr.bf16.mxu0 %v12849_v20  ;;  %v8051_v54 = vld [vmem:[#allocation11 + $0xab0] sm:$0xff]  ;;  %v8048_v20 = vld [vmem:[#allocation11 + $0xa98] sm:$0xff] }
 0x631   :  { %11403 = vmatprep.subr.bf16.mxu1 %v12851_v21  ;;  %v8052_v21 = vld [vmem:[#allocation11 + $0xab8] sm:$0xff]  ;;  %v12905_v23 = vcombine.high %v8047_v19, %v8051_v54  ;;  %v12904_v15 = vcombine.low %v8047_v19, %v8051_v54 }
 0x632   :  { %v12907_v26 = vcombine.high %v8048_v20, %v8052_v21  ;;  %v12906_v51 = vcombine.low %v8048_v20, %v8052_v21 }
 0x633   :  { %11240 = vmatpush1.bf16.msra.mxu0 %v12848_v59  ;;  %v8055_v59 = vld [vmem:[#allocation11 + $0xad0] sm:$0xff] }
 0x634   :  { %11404 = vmatpush1.bf16.msra.mxu1 %v12850_v18  ;;  %11241 = vmatprep.subr.bf16.mxu0 %v12857_v27  ;;  %v8059_v18 = vld [vmem:[#allocation11 + $0xaf0] sm:$0xff]  ;;  %v8056_v27 = vld [vmem:[#allocation11 + $0xad8] sm:$0xff] }
 0x635   :  { %11405 = vmatprep.subr.bf16.mxu1 %v12859_v12  ;;  %v8060_v12 = vld [vmem:[#allocation11 + $0xaf8] sm:$0xff]  ;;  %v12913_v33 = vcombine.high %v8055_v59, %v8059_v18  ;;  %v12912_v42 = vcombine.low %v8055_v59, %v8059_v18 }
 0x636   :  { %v12915_v34 = vcombine.high %v8056_v27, %v8060_v12  ;;  %v12914_v36 = vcombine.low %v8056_v27, %v8060_v12  ;;  %v8108_v59 = vld [vmem:[#allocation11 + $0xc78] sm:$0xff]  ;;  %v8111_v12 = vld [vmem:[#allocation11 + $0xc90] sm:$0xff] }
 0x637   :  { %11242 = vmatpush1.bf16.msra.mxu0 %v12856_v35  ;;  %v8063_v35 = vld [vmem:[#allocation11 + $0xb10] sm:$0xff] }
 0x638   :  { %11406 = vmatpush1.bf16.msra.mxu1 %v12858_v53  ;;  %11243 = vmatprep.subr.bf16.mxu0 %v12865_v22  ;;  %v8067_v53 = vld [vmem:[#allocation11 + $0xb30] sm:$0xff]  ;;  %v8064_v22 = vld [vmem:[#allocation11 + $0xb18] sm:$0xff] }
 0x639   :  { %11407 = vmatprep.subr.bf16.mxu1 %v12867_v41  ;;  %v8068_v41 = vld [vmem:[#allocation11 + $0xb38] sm:$0xff]  ;;  %v12921_v38 = vcombine.high %v8063_v35, %v8067_v53  ;;  %v12920_v32 = vcombine.low %v8063_v35, %v8067_v53 }
 0x63a   :  { %v12923_v47 = vcombine.high %v8064_v22, %v8068_v41  ;;  %v12922_v9 = vcombine.low %v8064_v22, %v8068_v41 }
 0x63b   :  { %11244 = vmatpush1.bf16.msra.mxu0 %v12864_v43  ;;  %v8071_v43 = vld [vmem:[#allocation11 + $0xb50] sm:$0xff] }
 0x63c   :  { %11408 = vmatpush1.bf16.msra.mxu1 %v12866_v49  ;;  %11245 = vmatprep.subr.bf16.mxu0 %v12873_v1  ;;  %v8075_v49 = vld [vmem:[#allocation11 + $0xb70] sm:$0xff]  ;;  %v8072_v1 = vld [vmem:[#allocation11 + $0xb58] sm:$0xff] }
 0x63d   :  { %11409 = vmatprep.subr.bf16.mxu1 %v12875_v44  ;;  %v8076_v44 = vld [vmem:[#allocation11 + $0xb78] sm:$0xff]  ;;  %v12929_v52 = vcombine.high %v8071_v43, %v8075_v49  ;;  %v12928_v45 = vcombine.low %v8071_v43, %v8075_v49 }
 0x63e   :  { %v12931_v46 = vcombine.high %v8072_v1, %v8076_v44  ;;  %v12930_v61 = vcombine.low %v8072_v1, %v8076_v44  ;;  %v8127_v44 = vld [vmem:[#allocation11 + $0xd10] sm:$0xff] }
 0x63f   :  { %11246 = vmatpush1.bf16.msra.mxu0 %v12872_v56  ;;  %v8079_v56 = vld [vmem:[#allocation11 + $0xb90] sm:$0xff] }
 0x640   :  { %11410 = vmatpush1.bf16.msra.mxu1 %v12874_v4  ;;  %11247 = vmatprep.subr.bf16.mxu0 %v12881_v13  ;;  %v8083_v4 = vld [vmem:[#allocation11 + $0xbb0] sm:$0xff]  ;;  %v8080_v13 = vld [vmem:[#allocation11 + $0xb98] sm:$0xff] }
 0x641   :  { %11411 = vmatprep.subr.bf16.mxu1 %v12883_v55  ;;  %v8084_v55 = vld [vmem:[#allocation11 + $0xbb8] sm:$0xff]  ;;  %v12937_v8 = vcombine.high %v8079_v56, %v8083_v4  ;;  %v12936_v48 = vcombine.low %v8079_v56, %v8083_v4 }
 0x642   :  { %v12939_v63 = vcombine.high %v8080_v13, %v8084_v55  ;;  %v12938_v6 = vcombine.low %v8080_v13, %v8084_v55  ;;  %v8135_v13 = vld [vmem:[#allocation11 + $0xd50] sm:$0xff] }
 0x643   :  { %11248 = vmatpush1.bf16.msra.mxu0 %v12880_v2  ;;  %v8087_v2 = vld [vmem:[#allocation11 + $0xbd0] sm:$0xff] }
 0x644   :  { %11412 = vmatpush1.bf16.msra.mxu1 %v12882_v39  ;;  %11249 = vmatprep.subr.bf16.mxu0 %v12889_v3  ;;  %v8091_v39 = vld [vmem:[#allocation11 + $0xbf0] sm:$0xff]  ;;  %v8088_v3 = vld [vmem:[#allocation11 + $0xbd8] sm:$0xff] }
 0x645   :  { %11413 = vmatprep.subr.bf16.mxu1 %v12891_v5  ;;  %v8092_v5 = vld [vmem:[#allocation11 + $0xbf8] sm:$0xff]  ;;  %v12945_v10 = vcombine.high %v8087_v2, %v8091_v39  ;;  %v12944_v19 = vcombine.low %v8087_v2, %v8091_v39  ;;  %v8139_v55 = vld [vmem:[#allocation11 + $0xd70] sm:$0xff] }
 0x646   :  { %v12947_v11 = vcombine.high %v8088_v3, %v8092_v5  ;;  %v12946_v54 = vcombine.low %v8088_v3, %v8092_v5  ;;  %v12993_v2 = vcombine.high %v8135_v13, %v8139_v55  ;;  %v8143_v3 = vld [vmem:[#allocation11 + $0xd90] sm:$0xff] }
 0x647   :  { %11250 = vmatpush1.bf16.msra.mxu0 %v12888_v31  ;;  %v8095_v31 = vld [vmem:[#allocation11 + $0xc10] sm:$0xff] }
 0x648   :  { %11414 = vmatpush1.bf16.msra.mxu1 %v12890_v14  ;;  %11251 = vmatprep.subr.bf16.mxu0 %v12897_v16  ;;  %v8099_v14 = vld [vmem:[#allocation11 + $0xc30] sm:$0xff]  ;;  %v8096_v16 = vld [vmem:[#allocation11 + $0xc18] sm:$0xff] }
 0x649   :  { %11415 = vmatprep.subr.bf16.mxu1 %v12899_v60  ;;  %v8100_v60 = vld [vmem:[#allocation11 + $0xc38] sm:$0xff]  ;;  %v12953_v20 = vcombine.high %v8095_v31, %v8099_v14  ;;  %v8147_v5 = vld [vmem:[#allocation11 + $0xdb0] sm:$0xff] }
 0x64a   :  { %v12955_v21 = vcombine.high %v8096_v16, %v8100_v60  ;;  %v12954_v18 = vcombine.low %v8096_v16, %v8100_v60 }
 0x64b   :  { %11252 = vmatpush1.bf16.msra.mxu0 %v12896_v57  ;;  %v8103_v57 = vld [vmem:[#allocation11 + $0xc50] sm:$0xff] }
 0x64c   :  { %11416 = vmatpush1.bf16.msra.mxu1 %v12898_v24  ;;  %11253 = vmatprep.subr.bf16.mxu0 %v12905_v23  ;;  %v8107_v24 = vld [vmem:[#allocation11 + $0xc70] sm:$0xff]  ;;  %v12952_v23 = vcombine.low %v8095_v31, %v8099_v14  ;;  %v13001_v31 = vcombine.high %v8143_v3, %v8147_v5 }
 0x64d   :  { %11417 = vmatprep.subr.bf16.mxu1 %v12907_v26  ;;  %v8104_v26 = vld [vmem:[#allocation11 + $0xc58] sm:$0xff]  ;;  %v12961_v27 = vcombine.high %v8103_v57, %v8107_v24  ;;  %v12960_v35 = vcombine.low %v8103_v57, %v8107_v24 }
 0x64e   :  { %v12962_v53 = vcombine.low %v8104_v26, %v8108_v59  ;;  %v8152_v57 = vld [vmem:[#allocation11 + $0xdd8] sm:$0xff] }
 0x64f   :  { %11254 = vmatpush1.bf16.msra.mxu0 %v12904_v15  ;;  %v8115_v15 = vld [vmem:[#allocation11 + $0xcb0] sm:$0xff]  ;;  %v8156_v24 = vld [vmem:[#allocation11 + $0xdf8] sm:$0xff] }
 0x650   :  { %11418 = vmatpush1.bf16.msra.mxu1 %v12906_v51  ;;  %11255 = vmatprep.subr.bf16.mxu0 %v12913_v33  ;;  %v12963_v51 = vcombine.high %v8104_v26, %v8108_v59  ;;  %v8112_v33 = vld [vmem:[#allocation11 + $0xc98] sm:$0xff]  ;;  %v12969_v22 = vcombine.high %v8111_v12, %v8115_v15  ;;  %v12968_v43 = vcombine.low %v8111_v12, %v8115_v15 }
 0x651   :  { %11419 = vmatprep.subr.bf16.mxu1 %v12915_v34  ;;  %v8116_v34 = vld [vmem:[#allocation11 + $0xcb8] sm:$0xff]  ;;  %v13000_v59 = vcombine.low %v8143_v3, %v8147_v5 }
 0x652   :  { %v12971_v41 = vcombine.high %v8112_v33, %v8116_v34 }
 0x653   :  { %11256 = vmatpush1.bf16.msra.mxu0 %v12912_v42  ;;  %v8119_v42 = vld [vmem:[#allocation11 + $0xcd0] sm:$0xff] }
 0x654   :  { %11420 = vmatpush1.bf16.msra.mxu1 %v12914_v36  ;;  %11257 = vmatprep.subr.bf16.mxu0 %v12921_v38  ;;  %v8123_v36 = vld [vmem:[#allocation11 + $0xcf0] sm:$0xff]  ;;  %v8120_v38 = vld [vmem:[#allocation11 + $0xcd8] sm:$0xff] }
 0x655   :  { %11421 = vmatprep.subr.bf16.mxu1 %v12923_v47  ;;  %v8124_v47 = vld [vmem:[#allocation11 + $0xcf8] sm:$0xff]  ;;  %v12977_v49 = vcombine.high %v8119_v42, %v8123_v36 }
 0x656   :  { %v12979_v1 = vcombine.high %v8120_v38, %v8124_v47 }
 0x657   :  { %11258 = vmatpush1.bf16.msra.mxu0 %v12920_v32  ;;  %v8131_v32 = vld [vmem:[#allocation11 + $0xd30] sm:$0xff] }
 0x658   :  { %11422 = vmatpush1.bf16.msra.mxu1 %v12922_v9  ;;  %11259 = vmatprep.subr.bf16.mxu0 %v12929_v52  ;;  %v8128_v9 = vld [vmem:[#allocation11 + $0xd18] sm:$0xff]  ;;  %v12985_v56 = vcombine.high %v8127_v44, %v8131_v32 }
 0x659   :  { %11423 = vmatprep.subr.bf16.mxu1 %v12931_v46  ;;  %v8132_v52 = vld [vmem:[#allocation11 + $0xd38] sm:$0xff]  ;;  %v12978_v46 = vcombine.low %v8120_v38, %v8124_v47  ;;  %v8167_v38 = vld [vmem:[#allocation11 + $0xe50] sm:$0xff] }
 0x65a   :  { %v12987_v4 = vcombine.high %v8128_v9, %v8132_v52  ;;  %v8171_v47 = vld [vmem:[#allocation11 + $0xe70] sm:$0xff] }
 0x65b   :  { %11260 = vmatpush1.bf16.msra.mxu0 %v12928_v45  ;;  %v8136_v45 = vld [vmem:[#allocation11 + $0xd58] sm:$0xff] }
 0x65c   :  { %11424 = vmatpush1.bf16.msra.mxu1 %v12930_v61  ;;  %11261 = vmatprep.subr.bf16.mxu0 %v12937_v8  ;;  %v8140_v61 = vld [vmem:[#allocation11 + $0xd78] sm:$0xff]  ;;  %v12984_v8 = vcombine.low %v8127_v44, %v8131_v32  ;;  %v13025_v44 = vcombine.high %v8167_v38, %v8171_v47 }
 0x65d   :  { %11425 = vmatprep.subr.bf16.mxu1 %v12939_v63  ;;  %v12986_v63 = vcombine.low %v8128_v9, %v8132_v52  ;;  %v12995_v39 = vcombine.high %v8136_v45, %v8140_v61  ;;  %v8175_v9 = vld [vmem:[#allocation11 + $0xe90] sm:$0xff] }
 0x65e   :  { %v8179_v52 = vld [vmem:[#allocation11 + $0xeb0] sm:$0xff] }
 0x65f   :  { %11262 = vmatpush1.bf16.msra.mxu0 %v12936_v48  ;;  %v8144_v48 = vld [vmem:[#allocation11 + $0xd98] sm:$0xff] }
 0x660   :  { %11426 = vmatpush1.bf16.msra.mxu1 %v12938_v6  ;;  %11263 = vmatprep.subr.bf16.mxu0 %v12945_v10  ;;  %v8148_v6 = vld [vmem:[#allocation11 + $0xdb8] sm:$0xff]  ;;  %v12992_v10 = vcombine.low %v8135_v13, %v8139_v55  ;;  %v13033_v13 = vcombine.high %v8175_v9, %v8179_v52 }
 0x661   :  { %11427 = vmatprep.subr.bf16.mxu1 %v12947_v11  ;;  %v12994_v11 = vcombine.low %v8136_v45, %v8140_v61  ;;  %v13003_v60 = vcombine.high %v8144_v48, %v8148_v6  ;;  %v13002_v12 = vcombine.low %v8144_v48, %v8148_v6  ;;  %v8183_v45 = vld [vmem:[#allocation11 + $0xed0] sm:$0xff] }
 0x662   :  { %v8187_v61 = vld [vmem:[#allocation11 + $0xef0] sm:$0xff] }
 0x663   :  { %11264 = vmatpush1.bf16.msra.mxu0 %v12944_v19  ;;  %v8151_v19 = vld [vmem:[#allocation11 + $0xdd0] sm:$0xff]  ;;  %v13041_v3 = vcombine.high %v8183_v45, %v8187_v61 }
 0x664   :  { %11428 = vmatpush1.bf16.msra.mxu1 %v12946_v54  ;;  %11274 = vmatprep.subr.bf16.mxu0 %v12953_v20  ;;  %v8155_v54 = vld [vmem:[#allocation11 + $0xdf0] sm:$0xff] }
 0x665   :  { %11438 = vmatprep.subr.bf16.mxu1 %v12955_v21  ;;  %v13009_v15 = vcombine.high %v8151_v19, %v8155_v54  ;;  %v8191_v48 = vld [vmem:[#allocation11 + $0xf10] sm:$0xff] }
 0x666   :  { %11266 = vmatmul.mubr.bf16.vlgmr.msra.gmra.mrb[20].mxu0 %v13746_v62  ;;  %v8195_v6 = vld [vmem:[#allocation11 + $0xf30] sm:$0xff] }
 0x667   :  { %11430 = vmatmul.mubr.bf16.vlgmr.msra.gmra.mrb[20].mxu1 %v13746_v62  ;;  %11275 = vmatpush1.bf16.msra.mxu0 %v12952_v23  ;;  %v12970_v62 = vcombine.low %v8112_v33, %v8116_v34  ;;  %v8159_v33 = vld [vmem:[#allocation11 + $0xe10] sm:$0xff] }
 0x668   :  { %11306 = vmatprep.mubr.bf16.mxu0 %v13750_v50  ;;  %11439 = vmatpush1.bf16.msra.mxu1 %v12954_v18  ;;  %v8163_v34 = vld [vmem:[#allocation11 + $0xe30] sm:$0xff] }
 0x669   :  { %11470 = vmatprep.mubr.bf16.mxu1 %v13750_v50  ;;  %11276 = vmatprep.subr.bf16.mxu0 %v12961_v27  ;;  %v12976_v50 = vcombine.low %v8119_v42, %v8123_v36  ;;  %v13017_v42 = vcombine.high %v8159_v33, %v8163_v34 }
 0x66a   :  { %11440 = vmatprep.subr.bf16.mxu1 %v12963_v51  ;;  %v13011_v51 = vcombine.high %v8152_v57, %v8156_v24 }
 0x66b   :  { %11277 = vmatpush1.bf16.msra.mxu0 %v12960_v35  ;;  %v8160_v35 = vld [vmem:[#allocation11 + $0xe18] sm:$0xff] }
 0x66c   :  { %11441 = vmatpush1.bf16.msra.mxu1 %v12962_v53  ;;  %11278 = vmatprep.subr.bf16.mxu0 %v12969_v22  ;;  %v8164_v53 = vld [vmem:[#allocation11 + $0xe38] sm:$0xff]  ;;  %v13008_v22 = vcombine.low %v8151_v19, %v8155_v54  ;;  %v13049_v19 = vcombine.high %v8191_v48, %v8195_v6 }
 0x66d   :  { %11442 = vmatprep.subr.bf16.mxu1 %v12971_v41  ;;  %v13010_v41 = vcombine.low %v8152_v57, %v8156_v24  ;;  %v13019_v36 = vcombine.high %v8160_v35, %v8164_v53  ;;  %v8199_v57 = vld [vmem:[#allocation11 + $0xf50] sm:$0xff] }
 0x66e   :  { %v8203_v24 = vld [vmem:[#allocation11 + $0xf70] sm:$0xff] }
 0x66f   :  { %11279 = vmatpush1.bf16.msra.mxu0 %v12968_v43  ;;  %v8168_v43 = vld [vmem:[#allocation11 + $0xe58] sm:$0xff] }
 0x670   :  { %11443 = vmatpush1.bf16.msra.mxu1 %v12970_v62  ;;  %11280 = vmatprep.subr.bf16.mxu0 %v12977_v49  ;;  %v8172_v62 = vld [vmem:[#allocation11 + $0xe78] sm:$0xff]  ;;  %v13016_v49 = vcombine.low %v8159_v33, %v8163_v34 }
 0x671   :  { %11444 = vmatprep.subr.bf16.mxu1 %v12979_v1  ;;  %v13018_v1 = vcombine.low %v8160_v35, %v8164_v53  ;;  %v13027_v32 = vcombine.high %v8168_v43, %v8172_v62  ;;  %v8208_v33 = vld [vmem:[#allocation11 + $0xf98] sm:$0xff]  ;;  %v13056_v35 = vcombine.low %v8199_v57, %v8203_v24 }
 0x672   :  { %v8212_v34 = vld [vmem:[#allocation11 + $0xfb8] sm:$0xff] }
 0x673   :  { %11281 = vmatpush1.bf16.msra.mxu0 %v12976_v50  ;;  %v8176_v50 = vld [vmem:[#allocation11 + $0xe98] sm:$0xff] }
 0x674   :  { %11445 = vmatpush1.bf16.msra.mxu1 %v12978_v46  ;;  %11282 = vmatprep.subr.bf16.mxu0 %v12985_v56  ;;  %v8180_v46 = vld [vmem:[#allocation11 + $0xeb8] sm:$0xff]  ;;  %v13024_v56 = vcombine.low %v8167_v38, %v8171_v47 }
 0x675   :  { %11446 = vmatprep.subr.bf16.mxu1 %v12987_v4  ;;  %v13026_v4 = vcombine.low %v8168_v43, %v8172_v62  ;;  %v13035_v55 = vcombine.high %v8176_v50, %v8180_v46  ;;  %v8216_v38 = vld [vmem:[#allocation11 + $0xfd8] sm:$0xff]  ;;  %v13066_v62 = vcombine.low %v8208_v33, %v8212_v34 }
 0x676   :  { %v8220_v47 = vld [vmem:[#allocation11 + $0xff8] sm:$0xff] }
 0x677   :  { %11283 = vmatpush1.bf16.msra.mxu0 %v12984_v8  ;;  %v8184_v8 = vld [vmem:[#allocation11 + $0xed8] sm:$0xff] }
 0x678   :  { %11447 = vmatpush1.bf16.msra.mxu1 %v12986_v63  ;;  %11284 = vmatprep.subr.bf16.mxu0 %v12993_v2  ;;  %v8188_v63 = vld [vmem:[#allocation11 + $0xef8] sm:$0xff]  ;;  %v13032_v2 = vcombine.low %v8175_v9, %v8179_v52  ;;  %v8221_v9 = vld [vmem:[#allocation12] sm:$0xff] }
 0x679   :  { %v13779_v14 = vpop.f32.mrb[16].mxu0  ;;  %v13781_v16 = vpop.f32.mrb[16].mxu1  ;;  %11448 = vmatprep.subr.bf16.mxu1 %v12995_v39  ;;  %v13034_v39 = vcombine.low %v8176_v50, %v8180_v46  ;;  %v13043_v5 = vcombine.high %v8184_v8, %v8188_v63  ;;  %v8226_v52 = vrot.slane %v8221_v9, %v4439_v7  ;;  %v8230_v50 = vrot.slane %v8221_v9, %v4443_v58 }
 0x67a   :  { %v13783_v20 = vpop.f32.mrb[17].mxu0  ;;  %v13785_v21 = vpop.f32.mrb[17].mxu1  ;;  %v8242_v58 = vrot.slane %v8221_v9, %v4455_v28 }
 0x67b   :  { %v10984_v23 = vpop.f32.mrb[18].mxu0  ;;  %v11148_v26 = vpop.f32.mrb[18].mxu1  ;;  %11285 = vmatpush1.bf16.msra.mxu0 %v12992_v10  ;;  %v8192_v10 = vld [vmem:[#allocation11 + $0xf18] sm:$0xff]  ;;  %v13084_v46 = vadd.f32 %v13779_v14, %v8226_v52  ;;  %v8246_v14 = vrot.slane %v8221_v9, %v4459_v30 }
 0x67c   :  { %11449 = vmatpush1.bf16.msra.mxu1 %v12994_v11  ;;  %v10985_v18 = vpop.f32.mrb[19].mxu0  ;;  %v11149_v27 = vpop.f32.mrb[19].mxu1  ;;  %11286 = vmatprep.subr.bf16.mxu0 %v13001_v31  ;;  %v8196_v11 = vld [vmem:[#allocation11 + $0xf38] sm:$0xff]  ;;  %v13040_v31 = vcombine.low %v8183_v45, %v8187_v61 }
 0x67d   :  { %11450 = vmatprep.subr.bf16.mxu1 %v13003_v60  ;;  %v13042_v60 = vcombine.low %v8184_v8, %v8188_v63  ;;  %v13051_v54 = vcombine.high %v8192_v10, %v8196_v11  ;;  %v8200_v23 = vld [vmem:[#allocation11 + $0xf58] sm:$0xff]  ;;  %v13050_v18 = vcombine.low %v8192_v10, %v8196_v11  ;;  %v13057_v27 = vcombine.high %v8199_v57, %v8203_v24 }
 0x67e   :  { %v8204_v26 = vld [vmem:[#allocation11 + $0xf78] sm:$0xff] }
 0x67f   :  { %11287 = vmatpush1.bf16.msra.mxu0 %v13000_v59  ;;  %v13048_v59 = vcombine.low %v8191_v48, %v8195_v6  ;;  %v13058_v53 = vcombine.low %v8200_v23, %v8204_v26 }
 0x680   :  { %11451 = vmatpush1.bf16.msra.mxu1 %v13002_v12  ;;  %11288 = vmatprep.subr.bf16.mxu0 %v13009_v15  ;;  %v13059_v12 = vcombine.high %v8200_v23, %v8204_v26  ;;  %v8207_v15 = vld [vmem:[#allocation11 + $0xf90] sm:$0xff] }
 0x681   :  { %11452 = vmatprep.subr.bf16.mxu1 %v13011_v51  ;;  %v8211_v51 = vld [vmem:[#allocation11 + $0xfb0] sm:$0xff] }
 0x682   :  { %v13064_v43 = vcombine.low %v8207_v15, %v8211_v51 }
 0x683   :  { %11289 = vmatpush1.bf16.msra.mxu0 %v13008_v22  ;;  %v13065_v22 = vcombine.high %v8207_v15, %v8211_v51 }
 0x684   :  { %11453 = vmatpush1.bf16.msra.mxu1 %v13010_v41  ;;  %11290 = vmatprep.subr.bf16.mxu0 %v13017_v42  ;;  %v13067_v41 = vcombine.high %v8208_v33, %v8212_v34  ;;  %v8215_v42 = vld [vmem:[#allocation11 + $0xfd0] sm:$0xff] }
 0x685   :  { %11454 = vmatprep.subr.bf16.mxu1 %v13019_v36  ;;  %v8219_v36 = vld [vmem:[#allocation11 + $0xff0] sm:$0xff] }
 0x687   :  { %11291 = vmatpush1.bf16.msra.mxu0 %v13016_v49  ;;  %v13073_v49 = vcombine.high %v8215_v42, %v8219_v36 }
 0x688   :  { %11455 = vmatpush1.bf16.msra.mxu1 %v13018_v1  ;;  %11292 = vmatprep.subr.bf16.mxu0 %v13025_v44  ;;  %v13075_v1 = vcombine.high %v8216_v38, %v8220_v47  ;;  %v13072_v44 = vcombine.low %v8215_v42, %v8219_v36 }
 0x689   :  { %11456 = vmatprep.subr.bf16.mxu1 %v13027_v32  ;;  %v13074_v32 = vcombine.low %v8216_v38, %v8220_v47 }
 0x68b   :  { %11293 = vmatpush1.bf16.msra.mxu0 %v13024_v56  ;;  %v13085_v56 = vadd.f32 %v13783_v20, %v8230_v50 }
 0x68c   :  { %11457 = vmatpush1.bf16.msra.mxu1 %v13026_v4  ;;  %11294 = vmatprep.subr.bf16.mxu0 %v13033_v13  ;;  %v8234_v4 = vrot.slane %v8221_v9, %v4447_v37  ;;  %v11479_v13 = vmul.f32 %v13084_v46, %v13084_v46  ;;  %v8250_v37 = vrot.slane %v8221_v9, %v4463_v0 }
 0x68d   :  { %11458 = vmatprep.subr.bf16.mxu1 %v13035_v55  ;;  %v11480_v55 = vmul.f32 %v13085_v56, %v13085_v56 }
 0x68e   :  { %v13086_v45 = vadd.f32 %v13781_v16, %v8234_v4 }
 0x68f   :  { %11295 = vmatpush1.bf16.msra.mxu0 %v13032_v2  ;;  %v11487_v61 = vadd.f32 %v11480_v55, %v11479_v13 }
 0x690   :  { %11459 = vmatpush1.bf16.msra.mxu1 %v13034_v39  ;;  %11296 = vmatprep.subr.bf16.mxu0 %v13041_v3  ;;  %v11481_v8 = vmul.f32 %v13086_v45, %v13086_v45 }
 0x691   :  { %11460 = vmatprep.subr.bf16.mxu1 %v13043_v5 }
 0x692   :  { %v11488_v20 = vadd.f32 %v11487_v61, %v11481_v8 }
 0x693   :  { %11297 = vmatpush1.bf16.msra.mxu0 %v13040_v31 }
 0x694   :  { %11461 = vmatpush1.bf16.msra.mxu1 %v13042_v60  ;;  %11298 = vmatprep.subr.bf16.mxu0 %v13049_v19 }
 0x695   :  { %11462 = vmatprep.subr.bf16.mxu1 %v13051_v54 }
 0x697   :  { %11299 = vmatpush1.bf16.msra.mxu0 %v13048_v59 }
 0x698   :  { %11463 = vmatpush1.bf16.msra.mxu1 %v13050_v18  ;;  %11300 = vmatprep.subr.bf16.mxu0 %v13057_v27 }
 0x699   :  { %11464 = vmatprep.subr.bf16.mxu1 %v13059_v12 }
 0x69b   :  { %11301 = vmatpush1.bf16.msra.mxu0 %v13056_v35 }
 0x69c   :  { %11465 = vmatpush1.bf16.msra.mxu1 %v13058_v53  ;;  %11302 = vmatprep.subr.bf16.mxu0 %v13065_v22 }
 0x69d   :  { %11466 = vmatprep.subr.bf16.mxu1 %v13067_v41 }
 0x69f   :  { %11303 = vmatpush1.bf16.msra.mxu0 %v13064_v43 }
 0x6a0   :  { %11467 = vmatpush1.bf16.msra.mxu1 %v13066_v62  ;;  %11304 = vmatprep.subr.bf16.mxu0 %v13073_v49 }
 0x6a1   :  { %11468 = vmatprep.subr.bf16.mxu1 %v13075_v1 }
 0x6a3   :  { %11305 = vmatpush1.bf16.msra.mxu0 %v13072_v44 }
 0x6a4   :  { %11469 = vmatpush1.bf16.msra.mxu1 %v13074_v32 }
 0x6a6   :  { %11307 = vmatmul.mubr.bf16.vlgmr.msra.gmra.mrb[20].mxu0 %v13761_v40 }
 0x6a7   :  { %11471 = vmatmul.mubr.bf16.vlgmr.msra.gmra.mrb[20].mxu1 %v13761_v40  ;;  %v8238_v40 = vrot.slane %v8221_v9, %v4451_v17  ;;  %v8254_v17 = vrot.slane %v8221_v9, %v4467_v29 }
 0x6a9   :  { %v13087_v7 = vadd.f32 %v13785_v21, %v8238_v40 }
 0x6ab   :  { %v11482_v2 = vmul.f32 %v13087_v7, %v13087_v7 }
 0x6ad   :  { %v11489_v6 = vadd.f32 %v11488_v20, %v11482_v2 }
 0x779   :  { %v11308_v63 = vpop.f32.mrb[20].mxu0 }
 0x77a   :  { %v13088_v16 = vadd.f32 %v11308_v63, %v8242_v58  ;;  %v11472_v39 = vpop.f32.mrb[20].mxu1  ;;  %v11310_v3 = vpop.f32.mrb[21].mxu0 }
 0x77b   :  { %v13089_v5 = vadd.f32 %v11310_v3, %v8246_v14  ;;  %v11474_v21 = vpop.f32.mrb[21].mxu1  ;;  %v11312_v48 = vpop.f32.mrb[22].mxu0  ;;  %v13090_v10 = vadd.f32 %v11472_v39, %v8250_v37 }
 0x77c   :  { %v11483_v28 = vmul.f32 %v13088_v16, %v13088_v16  ;;  %v11476_v11 = vpop.f32.mrb[22].mxu1  ;;  %v11313_v30 = vpop.f32.mrb[23].mxu0  ;;  %v13091_v0 = vadd.f32 %v11474_v21, %v8254_v17 }
 0x77d   :  { %v11484_v31 = vmul.f32 %v13089_v5, %v13089_v5  ;;  %v11477_v60 = vpop.f32.mrb[23].mxu1  ;;  %v11485_v54 = vmul.f32 %v13090_v10, %v13090_v10 }
 0x77e   :  { %v11490_v19 = vadd.f32 %v11489_v6, %v11483_v28  ;;  %v11486_v24 = vmul.f32 %v13091_v0, %v13091_v0 }
 0x780   :  { %v11491_v57 = vadd.f32 %v11490_v19, %v11484_v31 }
 0x782   :  { %v11492_v23 = vadd.f32 %v11491_v57, %v11485_v54 }
 0x784   :  { %v11493_v26 = vadd.f32 %v11492_v23, %v11486_v24 }
 0x786   :  { %11494 = vadd.xlane.f32.xlu0 %v11493_v26 }
 0x813   :  { %v11495_v25 = vpop.xlane.xlu0 %11494 }
 0x814   :  { %v11496_v29 = vmax.f32 %v11495_v25, 1e-24 }
 0x816   :  { %13253 = vrsqrt.f32 %v11496_v29 }
 0x820   :  { %v13254_v59 = vpop.eup %13253 }
 0x821   :  { %v11498_v18 = vmul.f32 %v13254_v59, %v13084_v46  ;;  %v11499_v27 = vmul.f32 %v13254_v59, %v13085_v56  ;;  %v11500_v12 = vmul.f32 %v13254_v59, %v13086_v45  ;;  %v11501_v15 = vmul.f32 %v13254_v59, %v13087_v7 }
 0x822   :  { %v11502_v51 = vmul.f32 %v13254_v59, %v13088_v16  ;;  %v11503_v33 = vmul.f32 %v13254_v59, %v13089_v5  ;;  %v11504_v34 = vmul.f32 %v13254_v59, %v13090_v10  ;;  %v11505_v35 = vmul.f32 %v13254_v59, %v13091_v0 }
 0x823   :  { %11506 = vst [vmem:[#allocation14] sm:$0xff] %v11498_v18  ;;  %11507 = vst [vmem:[#allocation14 + $0x8] sm:$0xff] %v11499_v27 }
 0x824   :  { %11508 = vst [vmem:[#allocation14 + $0x10] sm:$0xff] %v11500_v12  ;;  %11509 = vst [vmem:[#allocation14 + $0x18] sm:$0xff] %v11501_v15 }
 0x825   :  { %11510 = vst [vmem:[#allocation14 + $0x20] sm:$0xff] %v11502_v51  ;;  %11511 = vst [vmem:[#allocation14 + $0x28] sm:$0xff] %v11503_v33 }
 0x826   :  { %11512 = vst [vmem:[#allocation14 + $0x30] sm:$0xff] %v11504_v34  ;;  %11513 = vst [vmem:[#allocation14 + $0x38] sm:$0xff] %v11505_v35 }
 0x827   :  { %13399 = shalt.err (!%p13396_p10)
}
 0x828   :  { %s13400_s0 = scalar_lea.hbm %s13827_s6, 1024 }
 0x829   :  { %p13401_p11 = scmp.ne.s32.totalorder %s13827_s6, %s13400_s0  ;;  %p13404_p12 = scmp.lt.u32.totalorder %s13400_s0, %s13827_s6 }
 0x82b   :  { %p13406_p13 = pnand %p13404_p12, %p13401_p11 }
 0x82d   :  { %13409 = shalt.err (!%p13406_p13)
}
 0x82e   :  { %11523 = dma.vmem_to_hbm [thread:$0]  %s11521_s8, 1024, %s13827_s6, [#allocation5]  }
 0x82f   :  { %13418 = dma.done.wait [#allocation5], 1024  }
 0x830   :  { %13419 = vsyncadd [#allocation5], 4294966272 }
 0x831   :  { %11527 = vsyncpa [#allocation4], 1 }
 0x832   :  { %11528 = vsyncpa [#allocation7], 1 }
 0x833   :  { %11529 = vsyncpa [#allocation10], 1 }
 0x834   :  { %11530 = vsyncpa [#allocation13], 1 }
 0x835   :  { %11531 = vsyncpa [#allocation5], 1 }

</bundles_post_ra>
